<compile_context>
chip_gen: v6e
topology: v6e:2x2x1
jax: 0.10.0
libtpu: 0.0.40
codegen_flags: <defaults>
</compile_context>

<pallas_src>
import jax
import jax.numpy as jnp
from jax.experimental import pallas as pl
from jax.experimental.pallas import tpu as pltpu

# ---------------------------------------------------------------------------
# Static problem sizes (LeNet on 3x32x32, batch 2)
# ---------------------------------------------------------------------------
BATCH = 2
LANES = 128

CONV1_HW = 28                                  # conv1 output spatial
POOL1_HW = 14                                  # pool1 output spatial
HALF_ROWS = BATCH * CONV1_HW * POOL1_HW + 8    # 792 rows per w-parity half (+8 pad)
Y1_ROWS = 2 * HALF_ROWS                        # 1584 im2col / conv1 rows
WM1_ROWS = HALF_ROWS                           # 792 (b, h, w//2) w-max rows

P1_ROWS = BATCH * POOL1_HW * POOL1_HW          # 392 packed pool1 rows
P1_LANES = 48                                  # lane = 8*j + c (5 taps x 8ch), padded

CONV2_ROWS = 336                               # >= last valid conv2 row (331)+1, mult of 8
WM2_ROWS = CONV2_ROWS // 2                     # 168

POOL2_HW = 5
MPAD = 8                                       # batch rows padded 2 -> 8
P2_ROWS = 25 * MPAD                            # 200 (rows = b*25 + hw)
P2_LANES = 16


# ---------------------------------------------------------------------------
# The fused kernel
# ---------------------------------------------------------------------------
def _lenet_kernel(x_ref, w1_ref, b1_ref, w2_ref, b2_ref,
                  wf1_ref, bf1_ref, wf2_ref, bf2_ref, wf3_ref, bf3_ref,
                  o_ref,
                  y1_s, wm1_s, p1_s, y2_s, wm2_s, p2_s):
    f32 = jnp.float32
    bf16 = jnp.bfloat16

    # ---- conv1: ONE im2col matmul (+bias, relu), done in two row chunks -----
    for h in range(2):
        rows = pl.ds(h * HALF_ROWS, HALF_ROWS)
        y = jnp.dot(x_ref[rows, :], w1_ref[...], preferred_element_type=f32)
        y1_s[rows, :] = jnp.maximum(y + b1_ref[...], 0.0)

    # ---- pool1 w-direction max: halves are (w even | w odd) -> contiguous ---
    wm1_s[...] = jnp.maximum(y1_s[pl.ds(0, WM1_ROWS), :],
                             y1_s[pl.ds(WM1_ROWS, WM1_ROWS), :])

    # ---- pool1 h-max fused with decimating repack + horizontal-tap packing --
    # p1 row (b, h, w), lane 8*j + c = pool1 output channel c at (b, h, w+j).
    for b in range(BATCH):
        for ph in range(POOL1_HW):
            base = b * (CONV1_HW * POOL1_HW) + (2 * ph) * POOL1_HW
            pe = jnp.maximum(wm1_s[pl.ds(base, 18), :],
                             wm1_s[pl.ds(base + POOL1_HW, 18), :])
            packed = pe[0:POOL1_HW, :]
            for j in range(1, 5):
                # y1 lanes >= 6 are exactly 0, so rolled taps never collide.
                packed = packed + pltpu.roll(pe[j:j + POOL1_HW, :], 8 * j, axis=1)
            p1_s[pl.ds(b * POOL1_HW * POOL1_HW + ph * POOL1_HW, POOL1_HW), :] = \
                packed[:, :P1_LANES]

    # ---- conv2: 5 vertical-tap matmuls over the lane-packed contraction -----
    acc = None
    for i in range(5):
        lhs = p1_s[pl.ds(i * POOL1_HW, CONV2_ROWS), :].astype(bf16)
        d = jnp.dot(lhs, w2_ref[i], preferred_element_type=f32)
        acc = d if acc is None else acc + d
    y2_s[...] = jnp.maximum(acc + b2_ref[...], 0.0)

    # ---- pool2 fused with decimating repack ----------------------------------
    wm2_s[...] = jnp.maximum(y2_s[pl.ds(0, WM2_ROWS, 2), :],
                             y2_s[pl.ds(1, WM2_ROWS, 2), :])
    p2_s[...] = jnp.zeros((P2_ROWS, P2_LANES), f32)   # padded batch rows stay 0
    for b in range(BATCH):
        for ph in range(POOL2_HW):
            base = b * 98 + (2 * ph) * 7
            pooled = jnp.maximum(wm2_s[pl.ds(base, POOL2_HW), :],
                                 wm2_s[pl.ds(base + 7, POOL2_HW), :])
            p2_s[pl.ds(b * 25 + ph * POOL2_HW, POOL2_HW), :] = pooled[:, :P2_LANES]

    # ---- fc1 (400->120): 25 per-position (8,16)x(16,128) matmuls -------------
    acc = None
    for hw in range(25):
        lhs = p2_s[pl.ds(hw, MPAD, 25), :].astype(bf16)
        d = jnp.dot(lhs, wf1_ref[hw], preferred_element_type=f32)
        acc = d if acc is None else acc + d
    h1 = jnp.maximum(acc + bf1_ref[...], 0.0)

    # ---- fc2 (120->84) + relu, fc3 (84->10) -----------------------------------
    h2 = jnp.maximum(
        jnp.dot(h1.astype(bf16), wf2_ref[...], preferred_element_type=f32)
        + bf2_ref[...], 0.0)
    out = jnp.dot(h2.astype(bf16), wf3_ref[...], preferred_element_type=f32) \
        + bf3_ref[...]
    o_ref[...] = out.astype(o_ref.dtype)


# ---------------------------------------------------------------------------
# One-time parameter repack (outside the jitted forward)
# ---------------------------------------------------------------------------
def prepare_params(p):
    f32, bf16 = jnp.float32, jnp.bfloat16

    # conv1 -> single im2col weight: row f = (i*5+j)*3 + c, col = out channel.
    w1 = jnp.transpose(p["conv1_w"], (2, 3, 1, 0)).reshape(75, 6)
    w1p = jnp.zeros((LANES, LANES), f32).at[:75, :6].set(w1).astype(bf16)

    # conv2 -> 5 vertical-tap weights over the lane-packed (j, c) contraction:
    # row = 8*j + c (c padded 6 -> 8), col = out channel (16).
    w2 = jnp.transpose(p["conv2_w"], (2, 3, 1, 0))           # (i, j, c, o)
    w2 = jnp.pad(w2, ((0, 0), (0, 0), (0, 2), (0, 0)))       # c -> 8
    w2 = w2.reshape(5, 40, 16)
    w2p = jnp.zeros((5, P1_LANES, LANES), f32).at[:, :40, :16].set(w2).astype(bf16)

    # fc1: PyTorch flatten order is c*25 + h*5 + w -> wf1[hw][c, n].
    wf1 = jnp.transpose(p["fc1_w"].reshape(120, 16, 25), (2, 1, 0))   # (25,16,120)
    wf1p = jnp.zeros((25, P2_LANES, LANES), f32).at[:, :, :120].set(wf1).astype(bf16)

    def pad_mat(w):                       # torch (N, K) -> (128, 128) [k, n] bf16
        z = jnp.zeros((LANES, LANES), f32)
        return z.at[:w.shape[1], :w.shape[0]].set(w.T).astype(bf16)

    def pad_bias(b):                      # (N,) -> (1, 128) f32
        return jnp.zeros((1, LANES), f32).at[0, :b.shape[0]].set(b)

    return dict(
        w1=w1p, b1=pad_bias(p["conv1_b"]),
        w2=w2p, b2=pad_bias(p["conv2_b"]),
        wf1=wf1p, bf1=pad_bias(p["fc1_b"]),
        wf2=pad_mat(p["fc2_w"]), bf2=pad_bias(p["fc2_b"]),
        wf3=pad_mat(p["fc3_w"]), bf3=pad_bias(p["fc3_b"]),
    )


def _prep_input(x):
    # NCHW -> conv1 im2col, rows ordered (w-parity, b, h, w//2) so the pool1
    # horizontal max is contiguous in-kernel; features f = (i*5+j)*3 + c.
    b = x.shape[0]
    pats = [x[:, :, i:i + CONV1_HW, j:j + CONV1_HW]
            for i in range(5) for j in range(5)]
    p = jnp.stack(pats, axis=-1)                       # (B, 3, 28, 28, 25)
    p = jnp.transpose(p, (0, 2, 3, 4, 1))              # (B, 28, 28, 25, 3)
    p = p.reshape(b, CONV1_HW, POOL1_HW, 2, 75)        # w -> (w//2, parity)
    p = jnp.transpose(p, (3, 0, 1, 2, 4)).reshape(2, b * CONV1_HW * POOL1_HW, 75)
    out = jnp.zeros((2, HALF_ROWS, LANES), jnp.bfloat16)
    out = out.at[:, :b * CONV1_HW * POOL1_HW, :75].set(p.astype(jnp.bfloat16))
    return out.reshape(Y1_ROWS, LANES)


# ---------------------------------------------------------------------------
# Forward pass
# ---------------------------------------------------------------------------
def _fused_forward(kp, x):
    xk = _prep_input(x)
    inputs = (xk, kp["w1"], kp["b1"], kp["w2"], kp["b2"],
              kp["wf1"], kp["bf1"], kp["wf2"], kp["bf2"],
              kp["wf3"], kp["bf3"])

    flops = 2 * (Y1_ROWS * LANES * LANES
                 + 5 * CONV2_ROWS * P1_LANES * LANES
                 + 25 * MPAD * P2_LANES * LANES
                 + 2 * MPAD * LANES * LANES)
    bytes_accessed = sum(int(a.size) * a.dtype.itemsize for a in inputs) \
        + MPAD * LANES * 4

    out = pl.pallas_call(
        _lenet_kernel,
        out_shape=jax.ShapeDtypeStruct((MPAD, LANES), jnp.float32),
        in_specs=[pl.BlockSpec(memory_space=pltpu.MemorySpace.VMEM)] * len(inputs),
        out_specs=pl.BlockSpec(memory_space=pltpu.MemorySpace.VMEM),
        scratch_shapes=[
            pltpu.VMEM((Y1_ROWS, LANES), jnp.float32),      # y1: conv1 + relu
            pltpu.VMEM((WM1_ROWS, LANES), jnp.float32),     # wm1: pool1 w-max
            pltpu.VMEM((P1_ROWS, P1_LANES), jnp.float32),   # p1: packed pool1
            pltpu.VMEM((CONV2_ROWS, LANES), jnp.float32),   # y2: conv2 + relu
            pltpu.VMEM((WM2_ROWS, LANES), jnp.float32),     # wm2: pool2 w-max
            pltpu.VMEM((P2_ROWS, P2_LANES), jnp.float32),   # p2: pooled 5x5x16
        ],
        cost_estimate=pl.CostEstimate(flops=flops, transcendentals=0,
                                      bytes_accessed=bytes_accessed),
    )(*inputs)
    return out[:x.shape[0], :10]


net_forward = jax.jit(_fused_forward)


# ---------------------------------------------------------------------------
# Deterministic synthetic parameters (PyTorch layouts)
# ---------------------------------------------------------------------------
def init_params(key):
    ks = jax.random.split(key, 10)
    s = 0.1
    return {
        "conv1_w": s * jax.random.normal(ks[0], (6, 3, 5, 5), jnp.float32),
        "conv1_b": s * jax.random.normal(ks[1], (6,), jnp.float32),
        "conv2_w": s * jax.random.normal(ks[2], (16, 6, 5, 5), jnp.float32),
        "conv2_b": s * jax.random.normal(ks[3], (16,), jnp.float32),
        "fc1_w": s * jax.random.normal(ks[4], (120, 400), jnp.float32),
        "fc1_b": s * jax.random.normal(ks[5], (120,), jnp.float32),
        "fc2_w": s * jax.random.normal(ks[6], (84, 120), jnp.float32),
        "fc2_b": s * jax.random.normal(ks[7], (84,), jnp.float32),
        "fc3_w": s * jax.random.normal(ks[8], (10, 84), jnp.float32),
        "fc3_b": s * jax.random.normal(ks[9], (10,), jnp.float32),
    }


if __name__ == "__main__":
    key = jax.random.PRNGKey(0)
    pkey, xkey = jax.random.split(key)
    params = init_params(pkey)
    kparams = prepare_params(params)            # one-time repack, outside jit
    # Net's fc1 (16*5*5 inputs) implies a 3x32x32 spatial input.
    x = jax.random.normal(xkey, (BATCH, 3, 32, 32), jnp.float32)
    out = net_forward(kparams, x)
    out = jax.block_until_ready(out)
    assert out.shape == (BATCH, 10) and out.dtype == jnp.float32
    assert bool(jnp.all(jnp.isfinite(out)))
    print("KERNEL_OK")
</pallas_src>

<mosaic_0001>
module attributes {stable_mosaic.version = 11 : i64} {
  func.func @_lenet_kernel(%arg0: memref<1584x128xbf16, #tpu.memory_space<vmem>>, %arg1: memref<128x128xbf16, #tpu.memory_space<vmem>>, %arg2: memref<1x128xf32, #tpu.memory_space<vmem>>, %arg3: memref<5x48x128xbf16, #tpu.memory_space<vmem>>, %arg4: memref<1x128xf32, #tpu.memory_space<vmem>>, %arg5: memref<25x16x128xbf16, #tpu.memory_space<vmem>>, %arg6: memref<1x128xf32, #tpu.memory_space<vmem>>, %arg7: memref<128x128xbf16, #tpu.memory_space<vmem>>, %arg8: memref<1x128xf32, #tpu.memory_space<vmem>>, %arg9: memref<128x128xbf16, #tpu.memory_space<vmem>>, %arg10: memref<1x128xf32, #tpu.memory_space<vmem>>, %arg11: memref<8x128xf32, #tpu.memory_space<vmem>>, %arg12: memref<1584x128xf32, #tpu.memory_space<vmem>>, %arg13: memref<792x128xf32, #tpu.memory_space<vmem>>, %arg14: memref<392x48xf32, #tpu.memory_space<vmem>>, %arg15: memref<336x128xf32, #tpu.memory_space<vmem>>, %arg16: memref<168x128xf32, #tpu.memory_space<vmem>>, %arg17: memref<200x16xf32, #tpu.memory_space<vmem>>) attributes {dimension_semantics = [], scalar_prefetch = 0 : i64, scratch_operands = 6 : i64, tpu.core_type = #tpu.core_type<tc>} {
    %c0 = arith.constant 0 : index
    %c0_0 = arith.constant 0 : index
    %0 = vector.load %arg0[%c0, %c0_0] : memref<1584x128xbf16, #tpu.memory_space<vmem>>, vector<792x128xbf16>
    %c0_1 = arith.constant 0 : index
    %c0_2 = arith.constant 0 : index
    %1 = vector.load %arg1[%c0_1, %c0_2] : memref<128x128xbf16, #tpu.memory_space<vmem>>, vector<128x128xbf16>
    %cst = arith.constant dense<0.000000e+00> : vector<792x128xf32>
    %2 = tpu.matmul %0, %1, %cst {dimension_numbers = #tpu.dot_dimension_numbers<[1], [0], [0], [1], [0, 0, 1, 1], [], []>} : vector<792x128xbf16>, vector<128x128xbf16>, vector<792x128xf32> -> vector<792x128xf32>
    %c0_3 = arith.constant 0 : index
    %c0_4 = arith.constant 0 : index
    %3 = vector.load %arg2[%c0_3, %c0_4] : memref<1x128xf32, #tpu.memory_space<vmem>>, vector<1x128xf32>
    %4 = vector.broadcast %3 : vector<1x128xf32> to vector<792x128xf32>
    %5 = arith.addf %2, %4 : vector<792x128xf32>
    %cst_5 = arith.constant 0.000000e+00 : f32
    %6 = vector.broadcast %cst_5 : f32 to vector<792x128xf32>
    %7 = arith.maximumf %5, %6 : vector<792x128xf32>
    %c0_6 = arith.constant 0 : index
    %c0_7 = arith.constant 0 : index
    %8 = vector.load %arg12[%c0_6, %c0_7] : memref<1584x128xf32, #tpu.memory_space<vmem>>, vector<792x128xf32>
    tpu.vector_store %arg12[%c0_6, %c0_7], %7 {strides = array<i32>} : memref<1584x128xf32, #tpu.memory_space<vmem>>, vector<792x128xf32>,
    %c792 = arith.constant 792 : index
    %c0_8 = arith.constant 0 : index
    %9 = vector.load %arg0[%c792, %c0_8] : memref<1584x128xbf16, #tpu.memory_space<vmem>>, vector<792x128xbf16>
    %c0_9 = arith.constant 0 : index
    %c0_10 = arith.constant 0 : index
    %10 = vector.load %arg1[%c0_9, %c0_10] : memref<128x128xbf16, #tpu.memory_space<vmem>>, vector<128x128xbf16>
    %cst_11 = arith.constant dense<0.000000e+00> : vector<792x128xf32>
    %11 = tpu.matmul %9, %10, %cst_11 {dimension_numbers = #tpu.dot_dimension_numbers<[1], [0], [0], [1], [0, 0, 1, 1], [], []>} : vector<792x128xbf16>, vector<128x128xbf16>, vector<792x128xf32> -> vector<792x128xf32>
    %c0_12 = arith.constant 0 : index
    %c0_13 = arith.constant 0 : index
    %12 = vector.load %arg2[%c0_12, %c0_13] : memref<1x128xf32, #tpu.memory_space<vmem>>, vector<1x128xf32>
    %13 = vector.broadcast %12 : vector<1x128xf32> to vector<792x128xf32>
    %14 = arith.addf %11, %13 : vector<792x128xf32>
    %cst_14 = arith.constant 0.000000e+00 : f32
    %15 = vector.broadcast %cst_14 : f32 to vector<792x128xf32>
    %16 = arith.maximumf %14, %15 : vector<792x128xf32>
    %c792_15 = arith.constant 792 : index
    %c0_16 = arith.constant 0 : index
    %17 = vector.load %arg12[%c792_15, %c0_16] : memref<1584x128xf32, #tpu.memory_space<vmem>>, vector<792x128xf32>
    tpu.vector_store %arg12[%c792_15, %c0_16], %16 {strides = array<i32>} : memref<1584x128xf32, #tpu.memory_space<vmem>>, vector<792x128xf32>,
    %c0_17 = arith.constant 0 : index
    %c0_18 = arith.constant 0 : index
    %18 = vector.load %arg12[%c0_17, %c0_18] : memref<1584x128xf32, #tpu.memory_space<vmem>>, vector<792x128xf32>
    %c792_19 = arith.constant 792 : index
    %c0_20 = arith.constant 0 : index
    %19 = vector.load %arg12[%c792_19, %c0_20] : memref<1584x128xf32, #tpu.memory_space<vmem>>, vector<792x128xf32>
    %20 = arith.maximumf %18, %19 : vector<792x128xf32>
    %c0_21 = arith.constant 0 : index
    %c0_22 = arith.constant 0 : index
    %21 = vector.load %arg13[%c0_21, %c0_22] : memref<792x128xf32, #tpu.memory_space<vmem>>, vector<792x128xf32>
    tpu.vector_store %arg13[%c0_21, %c0_22], %20 {strides = array<i32>} : memref<792x128xf32, #tpu.memory_space<vmem>>, vector<792x128xf32>,
    %c0_23 = arith.constant 0 : index
    %c0_24 = arith.constant 0 : index
    %22 = vector.load %arg13[%c0_23, %c0_24] : memref<792x128xf32, #tpu.memory_space<vmem>>, vector<18x128xf32>
    %c14 = arith.constant 14 : index
    %c0_25 = arith.constant 0 : index
    %23 = vector.load %arg13[%c14, %c0_25] : memref<792x128xf32, #tpu.memory_space<vmem>>, vector<18x128xf32>
    %24 = arith.maximumf %22, %23 : vector<18x128xf32>
    %25 = vector.extract_strided_slice %24 {offsets = [0, 0], sizes = [14, 128], strides = [1, 1]} : vector<18x128xf32> to vector<14x128xf32>
    %26 = vector.extract_strided_slice %24 {offsets = [1, 0], sizes = [14, 128], strides = [1, 1]} : vector<18x128xf32> to vector<14x128xf32>
    %c8_i32 = arith.constant 8 : i32
    %27 = tpu.dynamic_rotate %26 by %c8_i32 dim 1 : vector<14x128xf32>, i32 -> vector<14x128xf32>
    %28 = arith.addf %25, %27 : vector<14x128xf32>
    %29 = vector.extract_strided_slice %24 {offsets = [2, 0], sizes = [14, 128], strides = [1, 1]} : vector<18x128xf32> to vector<14x128xf32>
    %c16_i32 = arith.constant 16 : i32
    %30 = tpu.dynamic_rotate %29 by %c16_i32 dim 1 : vector<14x128xf32>, i32 -> vector<14x128xf32>
    %31 = arith.addf %28, %30 : vector<14x128xf32>
    %32 = vector.extract_strided_slice %24 {offsets = [3, 0], sizes = [14, 128], strides = [1, 1]} : vector<18x128xf32> to vector<14x128xf32>
    %c24_i32 = arith.constant 24 : i32
    %33 = tpu.dynamic_rotate %32 by %c24_i32 dim 1 : vector<14x128xf32>, i32 -> vector<14x128xf32>
    %34 = arith.addf %31, %33 : vector<14x128xf32>
    %35 = vector.extract_strided_slice %24 {offsets = [4, 0], sizes = [14, 128], strides = [1, 1]} : vector<18x128xf32> to vector<14x128xf32>
    %c32_i32 = arith.constant 32 : i32
    %36 = tpu.dynamic_rotate %35 by %c32_i32 dim 1 : vector<14x128xf32>, i32 -> vector<14x128xf32>
    %37 = arith.addf %34, %36 : vector<14x128xf32>
    %38 = vector.extract_strided_slice %37 {offsets = [0, 0], sizes = [14, 48], strides = [1, 1]} : vector<14x128xf32> to vector<14x48xf32>
    %c0_26 = arith.constant 0 : index
    %c0_27 = arith.constant 0 : index
    %39 = vector.load %arg14[%c0_26, %c0_27] : memref<392x48xf32, #tpu.memory_space<vmem>>, vector<14x48xf32>
    tpu.vector_store %arg14[%c0_26, %c0_27], %38 {strides = array<i32>} : memref<392x48xf32, #tpu.memory_space<vmem>>, vector<14x48xf32>,
    %c28 = arith.constant 28 : index
    %c0_28 = arith.constant 0 : index
    %40 = vector.load %arg13[%c28, %c0_28] : memref<792x128xf32, #tpu.memory_space<vmem>>, vector<18x128xf32>
    %c42 = arith.constant 42 : index
    %c0_29 = arith.constant 0 : index
    %41 = vector.load %arg13[%c42, %c0_29] : memref<792x128xf32, #tpu.memory_space<vmem>>, vector<18x128xf32>
    %42 = arith.maximumf %40, %41 : vector<18x128xf32>
    %43 = vector.extract_strided_slice %42 {offsets = [0, 0], sizes = [14, 128], strides = [1, 1]} : vector<18x128xf32> to vector<14x128xf32>
    %44 = vector.extract_strided_slice %42 {offsets = [1, 0], sizes = [14, 128], strides = [1, 1]} : vector<18x128xf32> to vector<14x128xf32>
    %c8_i32_30 = arith.constant 8 : i32
    %45 = tpu.dynamic_rotate %44 by %c8_i32_30 dim 1 : vector<14x128xf32>, i32 -> vector<14x128xf32>
    %46 = arith.addf %43, %45 : vector<14x128xf32>
    %47 = vector.extract_strided_slice %42 {offsets = [2, 0], sizes = [14, 128], strides = [1, 1]} : vector<18x128xf32> to vector<14x128xf32>
    %c16_i32_31 = arith.constant 16 : i32
    %48 = tpu.dynamic_rotate %47 by %c16_i32_31 dim 1 : vector<14x128xf32>, i32 -> vector<14x128xf32>
    %49 = arith.addf %46, %48 : vector<14x128xf32>
    %50 = vector.extract_strided_slice %42 {offsets = [3, 0], sizes = [14, 128], strides = [1, 1]} : vector<18x128xf32> to vector<14x128xf32>
    %c24_i32_32 = arith.constant 24 : i32
    %51 = tpu.dynamic_rotate %50 by %c24_i32_32 dim 1 : vector<14x128xf32>, i32 -> vector<14x128xf32>
    %52 = arith.addf %49, %51 : vector<14x128xf32>
    %53 = vector.extract_strided_slice %42 {offsets = [4, 0], sizes = [14, 128], strides = [1, 1]} : vector<18x128xf32> to vector<14x128xf32>
    %c32_i32_33 = arith.constant 32 : i32
    %54 = tpu.dynamic_rotate %53 by %c32_i32_33 dim 1 : vector<14x128xf32>, i32 -> vector<14x128xf32>
    %55 = arith.addf %52, %54 : vector<14x128xf32>
    %56 = vector.extract_strided_slice %55 {offsets = [0, 0], sizes = [14, 48], strides = [1, 1]} : vector<14x128xf32> to vector<14x48xf32>
    %c14_34 = arith.constant 14 : index
    %c0_35 = arith.constant 0 : index
    %57 = vector.load %arg14[%c14_34, %c0_35] : memref<392x48xf32, #tpu.memory_space<vmem>>, vector<14x48xf32>
    tpu.vector_store %arg14[%c14_34, %c0_35], %56 {strides = array<i32>} : memref<392x48xf32, #tpu.memory_space<vmem>>, vector<14x48xf32>,
    %c56 = arith.constant 56 : index
    %c0_36 = arith.constant 0 : index
    %58 = vector.load %arg13[%c56, %c0_36] : memref<792x128xf32, #tpu.memory_space<vmem>>, vector<18x128xf32>
    %c70 = arith.constant 70 : index
    %c0_37 = arith.constant 0 : index
    %59 = vector.load %arg13[%c70, %c0_37] : memref<792x128xf32, #tpu.memory_space<vmem>>, vector<18x128xf32>
    %60 = arith.maximumf %58, %59 : vector<18x128xf32>
    %61 = vector.extract_strided_slice %60 {offsets = [0, 0], sizes = [14, 128], strides = [1, 1]} : vector<18x128xf32> to vector<14x128xf32>
    %62 = vector.extract_strided_slice %60 {offsets = [1, 0], sizes = [14, 128], strides = [1, 1]} : vector<18x128xf32> to vector<14x128xf32>
    %c8_i32_38 = arith.constant 8 : i32
    %63 = tpu.dynamic_rotate %62 by %c8_i32_38 dim 1 : vector<14x128xf32>, i32 -> vector<14x128xf32>
    %64 = arith.addf %61, %63 : vector<14x128xf32>
    %65 = vector.extract_strided_slice %60 {offsets = [2, 0], sizes = [14, 128], strides = [1, 1]} : vector<18x128xf32> to vector<14x128xf32>
    %c16_i32_39 = arith.constant 16 : i32
    %66 = tpu.dynamic_rotate %65 by %c16_i32_39 dim 1 : vector<14x128xf32>, i32 -> vector<14x128xf32>
    %67 = arith.addf %64, %66 : vector<14x128xf32>
    %68 = vector.extract_strided_slice %60 {offsets = [3, 0], sizes = [14, 128], strides = [1, 1]} : vector<18x128xf32> to vector<14x128xf32>
    %c24_i32_40 = arith.constant 24 : i32
    %69 = tpu.dynamic_rotate %68 by %c24_i32_40 dim 1 : vector<14x128xf32>, i32 -> vector<14x128xf32>
    %70 = arith.addf %67, %69 : vector<14x128xf32>
    %71 = vector.extract_strided_slice %60 {offsets = [4, 0], sizes = [14, 128], strides = [1, 1]} : vector<18x128xf32> to vector<14x128xf32>
    %c32_i32_41 = arith.constant 32 : i32
    %72 = tpu.dynamic_rotate %71 by %c32_i32_41 dim 1 : vector<14x128xf32>, i32 -> vector<14x128xf32>
    %73 = arith.addf %70, %72 : vector<14x128xf32>
    %74 = vector.extract_strided_slice %73 {offsets = [0, 0], sizes = [14, 48], strides = [1, 1]} : vector<14x128xf32> to vector<14x48xf32>
    %c28_42 = arith.constant 28 : index
    %c0_43 = arith.constant 0 : index
    %75 = vector.load %arg14[%c28_42, %c0_43] : memref<392x48xf32, #tpu.memory_space<vmem>>, vector<14x48xf32>
    tpu.vector_store %arg14[%c28_42, %c0_43], %74 {strides = array<i32>} : memref<392x48xf32, #tpu.memory_space<vmem>>, vector<14x48xf32>,
    %c84 = arith.constant 84 : index
    %c0_44 = arith.constant 0 : index
    %76 = vector.load %arg13[%c84, %c0_44] : memref<792x128xf32, #tpu.memory_space<vmem>>, vector<18x128xf32>
    %c98 = arith.constant 98 : index
    %c0_45 = arith.constant 0 : index
    %77 = vector.load %arg13[%c98, %c0_45] : memref<792x128xf32, #tpu.memory_space<vmem>>, vector<18x128xf32>
    %78 = arith.maximumf %76, %77 : vector<18x128xf32>
    %79 = vector.extract_strided_slice %78 {offsets = [0, 0], sizes = [14, 128], strides = [1, 1]} : vector<18x128xf32> to vector<14x128xf32>
    %80 = vector.extract_strided_slice %78 {offsets = [1, 0], sizes = [14, 128], strides = [1, 1]} : vector<18x128xf32> to vector<14x128xf32>
    %c8_i32_46 = arith.constant 8 : i32
    %81 = tpu.dynamic_rotate %80 by %c8_i32_46 dim 1 : vector<14x128xf32>, i32 -> vector<14x128xf32>
    %82 = arith.addf %79, %81 : vector<14x128xf32>
    %83 = vector.extract_strided_slice %78 {offsets = [2, 0], sizes = [14, 128], strides = [1, 1]} : vector<18x128xf32> to vector<14x128xf32>
    %c16_i32_47 = arith.constant 16 : i32
    %84 = tpu.dynamic_rotate %83 by %c16_i32_47 dim 1 : vector<14x128xf32>, i32 -> vector<14x128xf32>
    %85 = arith.addf %82, %84 : vector<14x128xf32>
    %86 = vector.extract_strided_slice %78 {offsets = [3, 0], sizes = [14, 128], strides = [1, 1]} : vector<18x128xf32> to vector<14x128xf32>
    %c24_i32_48 = arith.constant 24 : i32
    %87 = tpu.dynamic_rotate %86 by %c24_i32_48 dim 1 : vector<14x128xf32>, i32 -> vector<14x128xf32>
    %88 = arith.addf %85, %87 : vector<14x128xf32>
    %89 = vector.extract_strided_slice %78 {offsets = [4, 0], sizes = [14, 128], strides = [1, 1]} : vector<18x128xf32> to vector<14x128xf32>
    %c32_i32_49 = arith.constant 32 : i32
    %90 = tpu.dynamic_rotate %89 by %c32_i32_49 dim 1 : vector<14x128xf32>, i32 -> vector<14x128xf32>
    %91 = arith.addf %88, %90 : vector<14x128xf32>
    %92 = vector.extract_strided_slice %91 {offsets = [0, 0], sizes = [14, 48], strides = [1, 1]} : vector<14x128xf32> to vector<14x48xf32>
    %c42_50 = arith.constant 42 : index
    %c0_51 = arith.constant 0 : index
    %93 = vector.load %arg14[%c42_50, %c0_51] : memref<392x48xf32, #tpu.memory_space<vmem>>, vector<14x48xf32>
    tpu.vector_store %arg14[%c42_50, %c0_51], %92 {strides = array<i32>} : memref<392x48xf32, #tpu.memory_space<vmem>>, vector<14x48xf32>,
    %c112 = arith.constant 112 : index
    %c0_52 = arith.constant 0 : index
    %94 = vector.load %arg13[%c112, %c0_52] : memref<792x128xf32, #tpu.memory_space<vmem>>, vector<18x128xf32>
    %c126 = arith.constant 126 : index
    %c0_53 = arith.constant 0 : index
    %95 = vector.load %arg13[%c126, %c0_53] : memref<792x128xf32, #tpu.memory_space<vmem>>, vector<18x128xf32>
    %96 = arith.maximumf %94, %95 : vector<18x128xf32>
    %97 = vector.extract_strided_slice %96 {offsets = [0, 0], sizes = [14, 128], strides = [1, 1]} : vector<18x128xf32> to vector<14x128xf32>
    %98 = vector.extract_strided_slice %96 {offsets = [1, 0], sizes = [14, 128], strides = [1, 1]} : vector<18x128xf32> to vector<14x128xf32>
    %c8_i32_54 = arith.constant 8 : i32
    %99 = tpu.dynamic_rotate %98 by %c8_i32_54 dim 1 : vector<14x128xf32>, i32 -> vector<14x128xf32>
    %100 = arith.addf %97, %99 : vector<14x128xf32>
    %101 = vector.extract_strided_slice %96 {offsets = [2, 0], sizes = [14, 128], strides = [1, 1]} : vector<18x128xf32> to vector<14x128xf32>
    %c16_i32_55 = arith.constant 16 : i32
    %102 = tpu.dynamic_rotate %101 by %c16_i32_55 dim 1 : vector<14x128xf32>, i32 -> vector<14x128xf32>
    %103 = arith.addf %100, %102 : vector<14x128xf32>
    %104 = vector.extract_strided_slice %96 {offsets = [3, 0], sizes = [14, 128], strides = [1, 1]} : vector<18x128xf32> to vector<14x128xf32>
    %c24_i32_56 = arith.constant 24 : i32
    %105 = tpu.dynamic_rotate %104 by %c24_i32_56 dim 1 : vector<14x128xf32>, i32 -> vector<14x128xf32>
    %106 = arith.addf %103, %105 : vector<14x128xf32>
    %107 = vector.extract_strided_slice %96 {offsets = [4, 0], sizes = [14, 128], strides = [1, 1]} : vector<18x128xf32> to vector<14x128xf32>
    %c32_i32_57 = arith.constant 32 : i32
    %108 = tpu.dynamic_rotate %107 by %c32_i32_57 dim 1 : vector<14x128xf32>, i32 -> vector<14x128xf32>
    %109 = arith.addf %106, %108 : vector<14x128xf32>
    %110 = vector.extract_strided_slice %109 {offsets = [0, 0], sizes = [14, 48], strides = [1, 1]} : vector<14x128xf32> to vector<14x48xf32>
    %c56_58 = arith.constant 56 : index
    %c0_59 = arith.constant 0 : index
    %111 = vector.load %arg14[%c56_58, %c0_59] : memref<392x48xf32, #tpu.memory_space<vmem>>, vector<14x48xf32>
    tpu.vector_store %arg14[%c56_58, %c0_59], %110 {strides = array<i32>} : memref<392x48xf32, #tpu.memory_space<vmem>>, vector<14x48xf32>,
    %c140 = arith.constant 140 : index
    %c0_60 = arith.constant 0 : index
    %112 = vector.load %arg13[%c140, %c0_60] : memref<792x128xf32, #tpu.memory_space<vmem>>, vector<18x128xf32>
    %c154 = arith.constant 154 : index
    %c0_61 = arith.constant 0 : index
    %113 = vector.load %arg13[%c154, %c0_61] : memref<792x128xf32, #tpu.memory_space<vmem>>, vector<18x128xf32>
    %114 = arith.maximumf %112, %113 : vector<18x128xf32>
    %115 = vector.extract_strided_slice %114 {offsets = [0, 0], sizes = [14, 128], strides = [1, 1]} : vector<18x128xf32> to vector<14x128xf32>
    %116 = vector.extract_strided_slice %114 {offsets = [1, 0], sizes = [14, 128], strides = [1, 1]} : vector<18x128xf32> to vector<14x128xf32>
    %c8_i32_62 = arith.constant 8 : i32
    %117 = tpu.dynamic_rotate %116 by %c8_i32_62 dim 1 : vector<14x128xf32>, i32 -> vector<14x128xf32>
    %118 = arith.addf %115, %117 : vector<14x128xf32>
    %119 = vector.extract_strided_slice %114 {offsets = [2, 0], sizes = [14, 128], strides = [1, 1]} : vector<18x128xf32> to vector<14x128xf32>
    %c16_i32_63 = arith.constant 16 : i32
    %120 = tpu.dynamic_rotate %119 by %c16_i32_63 dim 1 : vector<14x128xf32>, i32 -> vector<14x128xf32>
    %121 = arith.addf %118, %120 : vector<14x128xf32>
    %122 = vector.extract_strided_slice %114 {offsets = [3, 0], sizes = [14, 128], strides = [1, 1]} : vector<18x128xf32> to vector<14x128xf32>
    %c24_i32_64 = arith.constant 24 : i32
    %123 = tpu.dynamic_rotate %122 by %c24_i32_64 dim 1 : vector<14x128xf32>, i32 -> vector<14x128xf32>
    %124 = arith.addf %121, %123 : vector<14x128xf32>
    %125 = vector.extract_strided_slice %114 {offsets = [4, 0], sizes = [14, 128], strides = [1, 1]} : vector<18x128xf32> to vector<14x128xf32>
    %c32_i32_65 = arith.constant 32 : i32
    %126 = tpu.dynamic_rotate %125 by %c32_i32_65 dim 1 : vector<14x128xf32>, i32 -> vector<14x128xf32>
    %127 = arith.addf %124, %126 : vector<14x128xf32>
    %128 = vector.extract_strided_slice %127 {offsets = [0, 0], sizes = [14, 48], strides = [1, 1]} : vector<14x128xf32> to vector<14x48xf32>
    %c70_66 = arith.constant 70 : index
    %c0_67 = arith.constant 0 : index
    %129 = vector.load %arg14[%c70_66, %c0_67] : memref<392x48xf32, #tpu.memory_space<vmem>>, vector<14x48xf32>
    tpu.vector_store %arg14[%c70_66, %c0_67], %128 {strides = array<i32>} : memref<392x48xf32, #tpu.memory_space<vmem>>, vector<14x48xf32>,
    %c168 = arith.constant 168 : index
    %c0_68 = arith.constant 0 : index
    %130 = vector.load %arg13[%c168, %c0_68] : memref<792x128xf32, #tpu.memory_space<vmem>>, vector<18x128xf32>
    %c182 = arith.constant 182 : index
    %c0_69 = arith.constant 0 : index
    %131 = vector.load %arg13[%c182, %c0_69] : memref<792x128xf32, #tpu.memory_space<vmem>>, vector<18x128xf32>
    %132 = arith.maximumf %130, %131 : vector<18x128xf32>
    %133 = vector.extract_strided_slice %132 {offsets = [0, 0], sizes = [14, 128], strides = [1, 1]} : vector<18x128xf32> to vector<14x128xf32>
    %134 = vector.extract_strided_slice %132 {offsets = [1, 0], sizes = [14, 128], strides = [1, 1]} : vector<18x128xf32> to vector<14x128xf32>
    %c8_i32_70 = arith.constant 8 : i32
    %135 = tpu.dynamic_rotate %134 by %c8_i32_70 dim 1 : vector<14x128xf32>, i32 -> vector<14x128xf32>
    %136 = arith.addf %133, %135 : vector<14x128xf32>
    %137 = vector.extract_strided_slice %132 {offsets = [2, 0], sizes = [14, 128], strides = [1, 1]} : vector<18x128xf32> to vector<14x128xf32>
    %c16_i32_71 = arith.constant 16 : i32
    %138 = tpu.dynamic_rotate %137 by %c16_i32_71 dim 1 : vector<14x128xf32>, i32 -> vector<14x128xf32>
    %139 = arith.addf %136, %138 : vector<14x128xf32>
    %140 = vector.extract_strided_slice %132 {offsets = [3, 0], sizes = [14, 128], strides = [1, 1]} : vector<18x128xf32> to vector<14x128xf32>
    %c24_i32_72 = arith.constant 24 : i32
    %141 = tpu.dynamic_rotate %140 by %c24_i32_72 dim 1 : vector<14x128xf32>, i32 -> vector<14x128xf32>
    %142 = arith.addf %139, %141 : vector<14x128xf32>
    %143 = vector.extract_strided_slice %132 {offsets = [4, 0], sizes = [14, 128], strides = [1, 1]} : vector<18x128xf32> to vector<14x128xf32>
    %c32_i32_73 = arith.constant 32 : i32
    %144 = tpu.dynamic_rotate %143 by %c32_i32_73 dim 1 : vector<14x128xf32>, i32 -> vector<14x128xf32>
    %145 = arith.addf %142, %144 : vector<14x128xf32>
    %146 = vector.extract_strided_slice %145 {offsets = [0, 0], sizes = [14, 48], strides = [1, 1]} : vector<14x128xf32> to vector<14x48xf32>
    %c84_74 = arith.constant 84 : index
    %c0_75 = arith.constant 0 : index
    %147 = vector.load %arg14[%c84_74, %c0_75] : memref<392x48xf32, #tpu.memory_space<vmem>>, vector<14x48xf32>
    tpu.vector_store %arg14[%c84_74, %c0_75], %146 {strides = array<i32>} : memref<392x48xf32, #tpu.memory_space<vmem>>, vector<14x48xf32>,
    %c196 = arith.constant 196 : index
    %c0_76 = arith.constant 0 : index
    %148 = vector.load %arg13[%c196, %c0_76] : memref<792x128xf32, #tpu.memory_space<vmem>>, vector<18x128xf32>
    %c210 = arith.constant 210 : index
    %c0_77 = arith.constant 0 : index
    %149 = vector.load %arg13[%c210, %c0_77] : memref<792x128xf32, #tpu.memory_space<vmem>>, vector<18x128xf32>
    %150 = arith.maximumf %148, %149 : vector<18x128xf32>
    %151 = vector.extract_strided_slice %150 {offsets = [0, 0], sizes = [14, 128], strides = [1, 1]} : vector<18x128xf32> to vector<14x128xf32>
    %152 = vector.extract_strided_slice %150 {offsets = [1, 0], sizes = [14, 128], strides = [1, 1]} : vector<18x128xf32> to vector<14x128xf32>
    %c8_i32_78 = arith.constant 8 : i32
    %153 = tpu.dynamic_rotate %152 by %c8_i32_78 dim 1 : vector<14x128xf32>, i32 -> vector<14x128xf32>
    %154 = arith.addf %151, %153 : vector<14x128xf32>
    %155 = vector.extract_strided_slice %150 {offsets = [2, 0], sizes = [14, 128], strides = [1, 1]} : vector<18x128xf32> to vector<14x128xf32>
    %c16_i32_79 = arith.constant 16 : i32
    %156 = tpu.dynamic_rotate %155 by %c16_i32_79 dim 1 : vector<14x128xf32>, i32 -> vector<14x128xf32>
    %157 = arith.addf %154, %156 : vector<14x128xf32>
    %158 = vector.extract_strided_slice %150 {offsets = [3, 0], sizes = [14, 128], strides = [1, 1]} : vector<18x128xf32> to vector<14x128xf32>
    %c24_i32_80 = arith.constant 24 : i32
    %159 = tpu.dynamic_rotate %158 by %c24_i32_80 dim 1 : vector<14x128xf32>, i32 -> vector<14x128xf32>
    %160 = arith.addf %157, %159 : vector<14x128xf32>
    %161 = vector.extract_strided_slice %150 {offsets = [4, 0], sizes = [14, 128], strides = [1, 1]} : vector<18x128xf32> to vector<14x128xf32>
    %c32_i32_81 = arith.constant 32 : i32
    %162 = tpu.dynamic_rotate %161 by %c32_i32_81 dim 1 : vector<14x128xf32>, i32 -> vector<14x128xf32>
    %163 = arith.addf %160, %162 : vector<14x128xf32>
    %164 = vector.extract_strided_slice %163 {offsets = [0, 0], sizes = [14, 48], strides = [1, 1]} : vector<14x128xf32> to vector<14x48xf32>
    %c98_82 = arith.constant 98 : index
    %c0_83 = arith.constant 0 : index
    %165 = vector.load %arg14[%c98_82, %c0_83] : memref<392x48xf32, #tpu.memory_space<vmem>>, vector<14x48xf32>
    tpu.vector_store %arg14[%c98_82, %c0_83], %164 {strides = array<i32>} : memref<392x48xf32, #tpu.memory_space<vmem>>, vector<14x48xf32>,
    %c224 = arith.constant 224 : index
    %c0_84 = arith.constant 0 : index
    %166 = vector.load %arg13[%c224, %c0_84] : memref<792x128xf32, #tpu.memory_space<vmem>>, vector<18x128xf32>
    %c238 = arith.constant 238 : index
    %c0_85 = arith.constant 0 : index
    %167 = vector.load %arg13[%c238, %c0_85] : memref<792x128xf32, #tpu.memory_space<vmem>>, vector<18x128xf32>
    %168 = arith.maximumf %166, %167 : vector<18x128xf32>
    %169 = vector.extract_strided_slice %168 {offsets = [0, 0], sizes = [14, 128], strides = [1, 1]} : vector<18x128xf32> to vector<14x128xf32>
    %170 = vector.extract_strided_slice %168 {offsets = [1, 0], sizes = [14, 128], strides = [1, 1]} : vector<18x128xf32> to vector<14x128xf32>
    %c8_i32_86 = arith.constant 8 : i32
    %171 = tpu.dynamic_rotate %170 by %c8_i32_86 dim 1 : vector<14x128xf32>, i32 -> vector<14x128xf32>
    %172 = arith.addf %169, %171 : vector<14x128xf32>
    %173 = vector.extract_strided_slice %168 {offsets = [2, 0], sizes = [14, 128], strides = [1, 1]} : vector<18x128xf32> to vector<14x128xf32>
    %c16_i32_87 = arith.constant 16 : i32
    %174 = tpu.dynamic_rotate %173 by %c16_i32_87 dim 1 : vector<14x128xf32>, i32 -> vector<14x128xf32>
    %175 = arith.addf %172, %174 : vector<14x128xf32>
    %176 = vector.extract_strided_slice %168 {offsets = [3, 0], sizes = [14, 128], strides = [1, 1]} : vector<18x128xf32> to vector<14x128xf32>
    %c24_i32_88 = arith.constant 24 : i32
    %177 = tpu.dynamic_rotate %176 by %c24_i32_88 dim 1 : vector<14x128xf32>, i32 -> vector<14x128xf32>
    %178 = arith.addf %175, %177 : vector<14x128xf32>
    %179 = vector.extract_strided_slice %168 {offsets = [4, 0], sizes = [14, 128], strides = [1, 1]} : vector<18x128xf32> to vector<14x128xf32>
    %c32_i32_89 = arith.constant 32 : i32
    %180 = tpu.dynamic_rotate %179 by %c32_i32_89 dim 1 : vector<14x128xf32>, i32 -> vector<14x128xf32>
    %181 = arith.addf %178, %180 : vector<14x128xf32>
    %182 = vector.extract_strided_slice %181 {offsets = [0, 0], sizes = [14, 48], strides = [1, 1]} : vector<14x128xf32> to vector<14x48xf32>
    %c112_90 = arith.constant 112 : index
    %c0_91 = arith.constant 0 : index
    %183 = vector.load %arg14[%c112_90, %c0_91] : memref<392x48xf32, #tpu.memory_space<vmem>>, vector<14x48xf32>
    tpu.vector_store %arg14[%c112_90, %c0_91], %182 {strides = array<i32>} : memref<392x48xf32, #tpu.memory_space<vmem>>, vector<14x48xf32>,
    %c252 = arith.constant 252 : index
    %c0_92 = arith.constant 0 : index
    %184 = vector.load %arg13[%c252, %c0_92] : memref<792x128xf32, #tpu.memory_space<vmem>>, vector<18x128xf32>
    %c266 = arith.constant 266 : index
    %c0_93 = arith.constant 0 : index
    %185 = vector.load %arg13[%c266, %c0_93] : memref<792x128xf32, #tpu.memory_space<vmem>>, vector<18x128xf32>
    %186 = arith.maximumf %184, %185 : vector<18x128xf32>
    %187 = vector.extract_strided_slice %186 {offsets = [0, 0], sizes = [14, 128], strides = [1, 1]} : vector<18x128xf32> to vector<14x128xf32>
    %188 = vector.extract_strided_slice %186 {offsets = [1, 0], sizes = [14, 128], strides = [1, 1]} : vector<18x128xf32> to vector<14x128xf32>
    %c8_i32_94 = arith.constant 8 : i32
    %189 = tpu.dynamic_rotate %188 by %c8_i32_94 dim 1 : vector<14x128xf32>, i32 -> vector<14x128xf32>
    %190 = arith.addf %187, %189 : vector<14x128xf32>
    %191 = vector.extract_strided_slice %186 {offsets = [2, 0], sizes = [14, 128], strides = [1, 1]} : vector<18x128xf32> to vector<14x128xf32>
    %c16_i32_95 = arith.constant 16 : i32
    %192 = tpu.dynamic_rotate %191 by %c16_i32_95 dim 1 : vector<14x128xf32>, i32 -> vector<14x128xf32>
    %193 = arith.addf %190, %192 : vector<14x128xf32>
    %194 = vector.extract_strided_slice %186 {offsets = [3, 0], sizes = [14, 128], strides = [1, 1]} : vector<18x128xf32> to vector<14x128xf32>
    %c24_i32_96 = arith.constant 24 : i32
    %195 = tpu.dynamic_rotate %194 by %c24_i32_96 dim 1 : vector<14x128xf32>, i32 -> vector<14x128xf32>
    %196 = arith.addf %193, %195 : vector<14x128xf32>
    %197 = vector.extract_strided_slice %186 {offsets = [4, 0], sizes = [14, 128], strides = [1, 1]} : vector<18x128xf32> to vector<14x128xf32>
    %c32_i32_97 = arith.constant 32 : i32
    %198 = tpu.dynamic_rotate %197 by %c32_i32_97 dim 1 : vector<14x128xf32>, i32 -> vector<14x128xf32>
    %199 = arith.addf %196, %198 : vector<14x128xf32>
    %200 = vector.extract_strided_slice %199 {offsets = [0, 0], sizes = [14, 48], strides = [1, 1]} : vector<14x128xf32> to vector<14x48xf32>
    %c126_98 = arith.constant 126 : index
    %c0_99 = arith.constant 0 : index
    %201 = vector.load %arg14[%c126_98, %c0_99] : memref<392x48xf32, #tpu.memory_space<vmem>>, vector<14x48xf32>
    tpu.vector_store %arg14[%c126_98, %c0_99], %200 {strides = array<i32>} : memref<392x48xf32, #tpu.memory_space<vmem>>, vector<14x48xf32>,
    %c280 = arith.constant 280 : index
    %c0_100 = arith.constant 0 : index
    %202 = vector.load %arg13[%c280, %c0_100] : memref<792x128xf32, #tpu.memory_space<vmem>>, vector<18x128xf32>
    %c294 = arith.constant 294 : index
    %c0_101 = arith.constant 0 : index
    %203 = vector.load %arg13[%c294, %c0_101] : memref<792x128xf32, #tpu.memory_space<vmem>>, vector<18x128xf32>
    %204 = arith.maximumf %202, %203 : vector<18x128xf32>
    %205 = vector.extract_strided_slice %204 {offsets = [0, 0], sizes = [14, 128], strides = [1, 1]} : vector<18x128xf32> to vector<14x128xf32>
    %206 = vector.extract_strided_slice %204 {offsets = [1, 0], sizes = [14, 128], strides = [1, 1]} : vector<18x128xf32> to vector<14x128xf32>
    %c8_i32_102 = arith.constant 8 : i32
    %207 = tpu.dynamic_rotate %206 by %c8_i32_102 dim 1 : vector<14x128xf32>, i32 -> vector<14x128xf32>
    %208 = arith.addf %205, %207 : vector<14x128xf32>
    %209 = vector.extract_strided_slice %204 {offsets = [2, 0], sizes = [14, 128], strides = [1, 1]} : vector<18x128xf32> to vector<14x128xf32>
    %c16_i32_103 = arith.constant 16 : i32
    %210 = tpu.dynamic_rotate %209 by %c16_i32_103 dim 1 : vector<14x128xf32>, i32 -> vector<14x128xf32>
    %211 = arith.addf %208, %210 : vector<14x128xf32>
    %212 = vector.extract_strided_slice %204 {offsets = [3, 0], sizes = [14, 128], strides = [1, 1]} : vector<18x128xf32> to vector<14x128xf32>
    %c24_i32_104 = arith.constant 24 : i32
    %213 = tpu.dynamic_rotate %212 by %c24_i32_104 dim 1 : vector<14x128xf32>, i32 -> vector<14x128xf32>
    %214 = arith.addf %211, %213 : vector<14x128xf32>
    %215 = vector.extract_strided_slice %204 {offsets = [4, 0], sizes = [14, 128], strides = [1, 1]} : vector<18x128xf32> to vector<14x128xf32>
    %c32_i32_105 = arith.constant 32 : i32
    %216 = tpu.dynamic_rotate %215 by %c32_i32_105 dim 1 : vector<14x128xf32>, i32 -> vector<14x128xf32>
    %217 = arith.addf %214, %216 : vector<14x128xf32>
    %218 = vector.extract_strided_slice %217 {offsets = [0, 0], sizes = [14, 48], strides = [1, 1]} : vector<14x128xf32> to vector<14x48xf32>
    %c140_106 = arith.constant 140 : index
    %c0_107 = arith.constant 0 : index
    %219 = vector.load %arg14[%c140_106, %c0_107] : memref<392x48xf32, #tpu.memory_space<vmem>>, vector<14x48xf32>
    tpu.vector_store %arg14[%c140_106, %c0_107], %218 {strides = array<i32>} : memref<392x48xf32, #tpu.memory_space<vmem>>, vector<14x48xf32>,
    %c308 = arith.constant 308 : index
    %c0_108 = arith.constant 0 : index
    %220 = vector.load %arg13[%c308, %c0_108] : memref<792x128xf32, #tpu.memory_space<vmem>>, vector<18x128xf32>
    %c322 = arith.constant 322 : index
    %c0_109 = arith.constant 0 : index
    %221 = vector.load %arg13[%c322, %c0_109] : memref<792x128xf32, #tpu.memory_space<vmem>>, vector<18x128xf32>
    %222 = arith.maximumf %220, %221 : vector<18x128xf32>
    %223 = vector.extract_strided_slice %222 {offsets = [0, 0], sizes = [14, 128], strides = [1, 1]} : vector<18x128xf32> to vector<14x128xf32>
    %224 = vector.extract_strided_slice %222 {offsets = [1, 0], sizes = [14, 128], strides = [1, 1]} : vector<18x128xf32> to vector<14x128xf32>
    %c8_i32_110 = arith.constant 8 : i32
    %225 = tpu.dynamic_rotate %224 by %c8_i32_110 dim 1 : vector<14x128xf32>, i32 -> vector<14x128xf32>
    %226 = arith.addf %223, %225 : vector<14x128xf32>
    %227 = vector.extract_strided_slice %222 {offsets = [2, 0], sizes = [14, 128], strides = [1, 1]} : vector<18x128xf32> to vector<14x128xf32>
    %c16_i32_111 = arith.constant 16 : i32
    %228 = tpu.dynamic_rotate %227 by %c16_i32_111 dim 1 : vector<14x128xf32>, i32 -> vector<14x128xf32>
    %229 = arith.addf %226, %228 : vector<14x128xf32>
    %230 = vector.extract_strided_slice %222 {offsets = [3, 0], sizes = [14, 128], strides = [1, 1]} : vector<18x128xf32> to vector<14x128xf32>
    %c24_i32_112 = arith.constant 24 : i32
    %231 = tpu.dynamic_rotate %230 by %c24_i32_112 dim 1 : vector<14x128xf32>, i32 -> vector<14x128xf32>
    %232 = arith.addf %229, %231 : vector<14x128xf32>
    %233 = vector.extract_strided_slice %222 {offsets = [4, 0], sizes = [14, 128], strides = [1, 1]} : vector<18x128xf32> to vector<14x128xf32>
    %c32_i32_113 = arith.constant 32 : i32
    %234 = tpu.dynamic_rotate %233 by %c32_i32_113 dim 1 : vector<14x128xf32>, i32 -> vector<14x128xf32>
    %235 = arith.addf %232, %234 : vector<14x128xf32>
    %236 = vector.extract_strided_slice %235 {offsets = [0, 0], sizes = [14, 48], strides = [1, 1]} : vector<14x128xf32> to vector<14x48xf32>
    %c154_114 = arith.constant 154 : index
    %c0_115 = arith.constant 0 : index
    %237 = vector.load %arg14[%c154_114, %c0_115] : memref<392x48xf32, #tpu.memory_space<vmem>>, vector<14x48xf32>
    tpu.vector_store %arg14[%c154_114, %c0_115], %236 {strides = array<i32>} : memref<392x48xf32, #tpu.memory_space<vmem>>, vector<14x48xf32>,
    %c336 = arith.constant 336 : index
    %c0_116 = arith.constant 0 : index
    %238 = vector.load %arg13[%c336, %c0_116] : memref<792x128xf32, #tpu.memory_space<vmem>>, vector<18x128xf32>
    %c350 = arith.constant 350 : index
    %c0_117 = arith.constant 0 : index
    %239 = vector.load %arg13[%c350, %c0_117] : memref<792x128xf32, #tpu.memory_space<vmem>>, vector<18x128xf32>
    %240 = arith.maximumf %238, %239 : vector<18x128xf32>
    %241 = vector.extract_strided_slice %240 {offsets = [0, 0], sizes = [14, 128], strides = [1, 1]} : vector<18x128xf32> to vector<14x128xf32>
    %242 = vector.extract_strided_slice %240 {offsets = [1, 0], sizes = [14, 128], strides = [1, 1]} : vector<18x128xf32> to vector<14x128xf32>
    %c8_i32_118 = arith.constant 8 : i32
    %243 = tpu.dynamic_rotate %242 by %c8_i32_118 dim 1 : vector<14x128xf32>, i32 -> vector<14x128xf32>
    %244 = arith.addf %241, %243 : vector<14x128xf32>
    %245 = vector.extract_strided_slice %240 {offsets = [2, 0], sizes = [14, 128], strides = [1, 1]} : vector<18x128xf32> to vector<14x128xf32>
    %c16_i32_119 = arith.constant 16 : i32
    %246 = tpu.dynamic_rotate %245 by %c16_i32_119 dim 1 : vector<14x128xf32>, i32 -> vector<14x128xf32>
    %247 = arith.addf %244, %246 : vector<14x128xf32>
    %248 = vector.extract_strided_slice %240 {offsets = [3, 0], sizes = [14, 128], strides = [1, 1]} : vector<18x128xf32> to vector<14x128xf32>
    %c24_i32_120 = arith.constant 24 : i32
    %249 = tpu.dynamic_rotate %248 by %c24_i32_120 dim 1 : vector<14x128xf32>, i32 -> vector<14x128xf32>
    %250 = arith.addf %247, %249 : vector<14x128xf32>
    %251 = vector.extract_strided_slice %240 {offsets = [4, 0], sizes = [14, 128], strides = [1, 1]} : vector<18x128xf32> to vector<14x128xf32>
    %c32_i32_121 = arith.constant 32 : i32
    %252 = tpu.dynamic_rotate %251 by %c32_i32_121 dim 1 : vector<14x128xf32>, i32 -> vector<14x128xf32>
    %253 = arith.addf %250, %252 : vector<14x128xf32>
    %254 = vector.extract_strided_slice %253 {offsets = [0, 0], sizes = [14, 48], strides = [1, 1]} : vector<14x128xf32> to vector<14x48xf32>
    %c168_122 = arith.constant 168 : index
    %c0_123 = arith.constant 0 : index
    %255 = vector.load %arg14[%c168_122, %c0_123] : memref<392x48xf32, #tpu.memory_space<vmem>>, vector<14x48xf32>
    tpu.vector_store %arg14[%c168_122, %c0_123], %254 {strides = array<i32>} : memref<392x48xf32, #tpu.memory_space<vmem>>, vector<14x48xf32>,
    %c364 = arith.constant 364 : index
    %c0_124 = arith.constant 0 : index
    %256 = vector.load %arg13[%c364, %c0_124] : memref<792x128xf32, #tpu.memory_space<vmem>>, vector<18x128xf32>
    %c378 = arith.constant 378 : index
    %c0_125 = arith.constant 0 : index
    %257 = vector.load %arg13[%c378, %c0_125] : memref<792x128xf32, #tpu.memory_space<vmem>>, vector<18x128xf32>
    %258 = arith.maximumf %256, %257 : vector<18x128xf32>
    %259 = vector.extract_strided_slice %258 {offsets = [0, 0], sizes = [14, 128], strides = [1, 1]} : vector<18x128xf32> to vector<14x128xf32>
    %260 = vector.extract_strided_slice %258 {offsets = [1, 0], sizes = [14, 128], strides = [1, 1]} : vector<18x128xf32> to vector<14x128xf32>
    %c8_i32_126 = arith.constant 8 : i32
    %261 = tpu.dynamic_rotate %260 by %c8_i32_126 dim 1 : vector<14x128xf32>, i32 -> vector<14x128xf32>
    %262 = arith.addf %259, %261 : vector<14x128xf32>
    %263 = vector.extract_strided_slice %258 {offsets = [2, 0], sizes = [14, 128], strides = [1, 1]} : vector<18x128xf32> to vector<14x128xf32>
    %c16_i32_127 = arith.constant 16 : i32
    %264 = tpu.dynamic_rotate %263 by %c16_i32_127 dim 1 : vector<14x128xf32>, i32 -> vector<14x128xf32>
    %265 = arith.addf %262, %264 : vector<14x128xf32>
    %266 = vector.extract_strided_slice %258 {offsets = [3, 0], sizes = [14, 128], strides = [1, 1]} : vector<18x128xf32> to vector<14x128xf32>
    %c24_i32_128 = arith.constant 24 : i32
    %267 = tpu.dynamic_rotate %266 by %c24_i32_128 dim 1 : vector<14x128xf32>, i32 -> vector<14x128xf32>
    %268 = arith.addf %265, %267 : vector<14x128xf32>
    %269 = vector.extract_strided_slice %258 {offsets = [4, 0], sizes = [14, 128], strides = [1, 1]} : vector<18x128xf32> to vector<14x128xf32>
    %c32_i32_129 = arith.constant 32 : i32
    %270 = tpu.dynamic_rotate %269 by %c32_i32_129 dim 1 : vector<14x128xf32>, i32 -> vector<14x128xf32>
    %271 = arith.addf %268, %270 : vector<14x128xf32>
    %272 = vector.extract_strided_slice %271 {offsets = [0, 0], sizes = [14, 48], strides = [1, 1]} : vector<14x128xf32> to vector<14x48xf32>
    %c182_130 = arith.constant 182 : index
    %c0_131 = arith.constant 0 : index
    %273 = vector.load %arg14[%c182_130, %c0_131] : memref<392x48xf32, #tpu.memory_space<vmem>>, vector<14x48xf32>
    tpu.vector_store %arg14[%c182_130, %c0_131], %272 {strides = array<i32>} : memref<392x48xf32, #tpu.memory_space<vmem>>, vector<14x48xf32>,
    %c392 = arith.constant 392 : index
    %c0_132 = arith.constant 0 : index
    %274 = vector.load %arg13[%c392, %c0_132] : memref<792x128xf32, #tpu.memory_space<vmem>>, vector<18x128xf32>
    %c406 = arith.constant 406 : index
    %c0_133 = arith.constant 0 : index
    %275 = vector.load %arg13[%c406, %c0_133] : memref<792x128xf32, #tpu.memory_space<vmem>>, vector<18x128xf32>
    %276 = arith.maximumf %274, %275 : vector<18x128xf32>
    %277 = vector.extract_strided_slice %276 {offsets = [0, 0], sizes = [14, 128], strides = [1, 1]} : vector<18x128xf32> to vector<14x128xf32>
    %278 = vector.extract_strided_slice %276 {offsets = [1, 0], sizes = [14, 128], strides = [1, 1]} : vector<18x128xf32> to vector<14x128xf32>
    %c8_i32_134 = arith.constant 8 : i32
    %279 = tpu.dynamic_rotate %278 by %c8_i32_134 dim 1 : vector<14x128xf32>, i32 -> vector<14x128xf32>
    %280 = arith.addf %277, %279 : vector<14x128xf32>
    %281 = vector.extract_strided_slice %276 {offsets = [2, 0], sizes = [14, 128], strides = [1, 1]} : vector<18x128xf32> to vector<14x128xf32>
    %c16_i32_135 = arith.constant 16 : i32
    %282 = tpu.dynamic_rotate %281 by %c16_i32_135 dim 1 : vector<14x128xf32>, i32 -> vector<14x128xf32>
    %283 = arith.addf %280, %282 : vector<14x128xf32>
    %284 = vector.extract_strided_slice %276 {offsets = [3, 0], sizes = [14, 128], strides = [1, 1]} : vector<18x128xf32> to vector<14x128xf32>
    %c24_i32_136 = arith.constant 24 : i32
    %285 = tpu.dynamic_rotate %284 by %c24_i32_136 dim 1 : vector<14x128xf32>, i32 -> vector<14x128xf32>
    %286 = arith.addf %283, %285 : vector<14x128xf32>
    %287 = vector.extract_strided_slice %276 {offsets = [4, 0], sizes = [14, 128], strides = [1, 1]} : vector<18x128xf32> to vector<14x128xf32>
    %c32_i32_137 = arith.constant 32 : i32
    %288 = tpu.dynamic_rotate %287 by %c32_i32_137 dim 1 : vector<14x128xf32>, i32 -> vector<14x128xf32>
    %289 = arith.addf %286, %288 : vector<14x128xf32>
    %290 = vector.extract_strided_slice %289 {offsets = [0, 0], sizes = [14, 48], strides = [1, 1]} : vector<14x128xf32> to vector<14x48xf32>
    %c196_138 = arith.constant 196 : index
    %c0_139 = arith.constant 0 : index
    %291 = vector.load %arg14[%c196_138, %c0_139] : memref<392x48xf32, #tpu.memory_space<vmem>>, vector<14x48xf32>
    tpu.vector_store %arg14[%c196_138, %c0_139], %290 {strides = array<i32>} : memref<392x48xf32, #tpu.memory_space<vmem>>, vector<14x48xf32>,
    %c420 = arith.constant 420 : index
    %c0_140 = arith.constant 0 : index
    %292 = vector.load %arg13[%c420, %c0_140] : memref<792x128xf32, #tpu.memory_space<vmem>>, vector<18x128xf32>
    %c434 = arith.constant 434 : index
    %c0_141 = arith.constant 0 : index
    %293 = vector.load %arg13[%c434, %c0_141] : memref<792x128xf32, #tpu.memory_space<vmem>>, vector<18x128xf32>
    %294 = arith.maximumf %292, %293 : vector<18x128xf32>
    %295 = vector.extract_strided_slice %294 {offsets = [0, 0], sizes = [14, 128], strides = [1, 1]} : vector<18x128xf32> to vector<14x128xf32>
    %296 = vector.extract_strided_slice %294 {offsets = [1, 0], sizes = [14, 128], strides = [1, 1]} : vector<18x128xf32> to vector<14x128xf32>
    %c8_i32_142 = arith.constant 8 : i32
    %297 = tpu.dynamic_rotate %296 by %c8_i32_142 dim 1 : vector<14x128xf32>, i32 -> vector<14x128xf32>
    %298 = arith.addf %295, %297 : vector<14x128xf32>
    %299 = vector.extract_strided_slice %294 {offsets = [2, 0], sizes = [14, 128], strides = [1, 1]} : vector<18x128xf32> to vector<14x128xf32>
    %c16_i32_143 = arith.constant 16 : i32
    %300 = tpu.dynamic_rotate %299 by %c16_i32_143 dim 1 : vector<14x128xf32>, i32 -> vector<14x128xf32>
    %301 = arith.addf %298, %300 : vector<14x128xf32>
    %302 = vector.extract_strided_slice %294 {offsets = [3, 0], sizes = [14, 128], strides = [1, 1]} : vector<18x128xf32> to vector<14x128xf32>
    %c24_i32_144 = arith.constant 24 : i32
    %303 = tpu.dynamic_rotate %302 by %c24_i32_144 dim 1 : vector<14x128xf32>, i32 -> vector<14x128xf32>
    %304 = arith.addf %301, %303 : vector<14x128xf32>
    %305 = vector.extract_strided_slice %294 {offsets = [4, 0], sizes = [14, 128], strides = [1, 1]} : vector<18x128xf32> to vector<14x128xf32>
    %c32_i32_145 = arith.constant 32 : i32
    %306 = tpu.dynamic_rotate %305 by %c32_i32_145 dim 1 : vector<14x128xf32>, i32 -> vector<14x128xf32>
    %307 = arith.addf %304, %306 : vector<14x128xf32>
    %308 = vector.extract_strided_slice %307 {offsets = [0, 0], sizes = [14, 48], strides = [1, 1]} : vector<14x128xf32> to vector<14x48xf32>
    %c210_146 = arith.constant 210 : index
    %c0_147 = arith.constant 0 : index
    %309 = vector.load %arg14[%c210_146, %c0_147] : memref<392x48xf32, #tpu.memory_space<vmem>>, vector<14x48xf32>
    tpu.vector_store %arg14[%c210_146, %c0_147], %308 {strides = array<i32>} : memref<392x48xf32, #tpu.memory_space<vmem>>, vector<14x48xf32>,
    %c448 = arith.constant 448 : index
    %c0_148 = arith.constant 0 : index
    %310 = vector.load %arg13[%c448, %c0_148] : memref<792x128xf32, #tpu.memory_space<vmem>>, vector<18x128xf32>
    %c462 = arith.constant 462 : index
    %c0_149 = arith.constant 0 : index
    %311 = vector.load %arg13[%c462, %c0_149] : memref<792x128xf32, #tpu.memory_space<vmem>>, vector<18x128xf32>
    %312 = arith.maximumf %310, %311 : vector<18x128xf32>
    %313 = vector.extract_strided_slice %312 {offsets = [0, 0], sizes = [14, 128], strides = [1, 1]} : vector<18x128xf32> to vector<14x128xf32>
    %314 = vector.extract_strided_slice %312 {offsets = [1, 0], sizes = [14, 128], strides = [1, 1]} : vector<18x128xf32> to vector<14x128xf32>
    %c8_i32_150 = arith.constant 8 : i32
    %315 = tpu.dynamic_rotate %314 by %c8_i32_150 dim 1 : vector<14x128xf32>, i32 -> vector<14x128xf32>
    %316 = arith.addf %313, %315 : vector<14x128xf32>
    %317 = vector.extract_strided_slice %312 {offsets = [2, 0], sizes = [14, 128], strides = [1, 1]} : vector<18x128xf32> to vector<14x128xf32>
    %c16_i32_151 = arith.constant 16 : i32
    %318 = tpu.dynamic_rotate %317 by %c16_i32_151 dim 1 : vector<14x128xf32>, i32 -> vector<14x128xf32>
    %319 = arith.addf %316, %318 : vector<14x128xf32>
    %320 = vector.extract_strided_slice %312 {offsets = [3, 0], sizes = [14, 128], strides = [1, 1]} : vector<18x128xf32> to vector<14x128xf32>
    %c24_i32_152 = arith.constant 24 : i32
    %321 = tpu.dynamic_rotate %320 by %c24_i32_152 dim 1 : vector<14x128xf32>, i32 -> vector<14x128xf32>
    %322 = arith.addf %319, %321 : vector<14x128xf32>
    %323 = vector.extract_strided_slice %312 {offsets = [4, 0], sizes = [14, 128], strides = [1, 1]} : vector<18x128xf32> to vector<14x128xf32>
    %c32_i32_153 = arith.constant 32 : i32
    %324 = tpu.dynamic_rotate %323 by %c32_i32_153 dim 1 : vector<14x128xf32>, i32 -> vector<14x128xf32>
    %325 = arith.addf %322, %324 : vector<14x128xf32>
    %326 = vector.extract_strided_slice %325 {offsets = [0, 0], sizes = [14, 48], strides = [1, 1]} : vector<14x128xf32> to vector<14x48xf32>
    %c224_154 = arith.constant 224 : index
    %c0_155 = arith.constant 0 : index
    %327 = vector.load %arg14[%c224_154, %c0_155] : memref<392x48xf32, #tpu.memory_space<vmem>>, vector<14x48xf32>
    tpu.vector_store %arg14[%c224_154, %c0_155], %326 {strides = array<i32>} : memref<392x48xf32, #tpu.memory_space<vmem>>, vector<14x48xf32>,
    %c476 = arith.constant 476 : index
    %c0_156 = arith.constant 0 : index
    %328 = vector.load %arg13[%c476, %c0_156] : memref<792x128xf32, #tpu.memory_space<vmem>>, vector<18x128xf32>
    %c490 = arith.constant 490 : index
    %c0_157 = arith.constant 0 : index
    %329 = vector.load %arg13[%c490, %c0_157] : memref<792x128xf32, #tpu.memory_space<vmem>>, vector<18x128xf32>
    %330 = arith.maximumf %328, %329 : vector<18x128xf32>
    %331 = vector.extract_strided_slice %330 {offsets = [0, 0], sizes = [14, 128], strides = [1, 1]} : vector<18x128xf32> to vector<14x128xf32>
    %332 = vector.extract_strided_slice %330 {offsets = [1, 0], sizes = [14, 128], strides = [1, 1]} : vector<18x128xf32> to vector<14x128xf32>
    %c8_i32_158 = arith.constant 8 : i32
    %333 = tpu.dynamic_rotate %332 by %c8_i32_158 dim 1 : vector<14x128xf32>, i32 -> vector<14x128xf32>
    %334 = arith.addf %331, %333 : vector<14x128xf32>
    %335 = vector.extract_strided_slice %330 {offsets = [2, 0], sizes = [14, 128], strides = [1, 1]} : vector<18x128xf32> to vector<14x128xf32>
    %c16_i32_159 = arith.constant 16 : i32
    %336 = tpu.dynamic_rotate %335 by %c16_i32_159 dim 1 : vector<14x128xf32>, i32 -> vector<14x128xf32>
    %337 = arith.addf %334, %336 : vector<14x128xf32>
    %338 = vector.extract_strided_slice %330 {offsets = [3, 0], sizes = [14, 128], strides = [1, 1]} : vector<18x128xf32> to vector<14x128xf32>
    %c24_i32_160 = arith.constant 24 : i32
    %339 = tpu.dynamic_rotate %338 by %c24_i32_160 dim 1 : vector<14x128xf32>, i32 -> vector<14x128xf32>
    %340 = arith.addf %337, %339 : vector<14x128xf32>
    %341 = vector.extract_strided_slice %330 {offsets = [4, 0], sizes = [14, 128], strides = [1, 1]} : vector<18x128xf32> to vector<14x128xf32>
    %c32_i32_161 = arith.constant 32 : i32
    %342 = tpu.dynamic_rotate %341 by %c32_i32_161 dim 1 : vector<14x128xf32>, i32 -> vector<14x128xf32>
    %343 = arith.addf %340, %342 : vector<14x128xf32>
    %344 = vector.extract_strided_slice %343 {offsets = [0, 0], sizes = [14, 48], strides = [1, 1]} : vector<14x128xf32> to vector<14x48xf32>
    %c238_162 = arith.constant 238 : index
    %c0_163 = arith.constant 0 : index
    %345 = vector.load %arg14[%c238_162, %c0_163] : memref<392x48xf32, #tpu.memory_space<vmem>>, vector<14x48xf32>
    tpu.vector_store %arg14[%c238_162, %c0_163], %344 {strides = array<i32>} : memref<392x48xf32, #tpu.memory_space<vmem>>, vector<14x48xf32>,
    %c504 = arith.constant 504 : index
    %c0_164 = arith.constant 0 : index
    %346 = vector.load %arg13[%c504, %c0_164] : memref<792x128xf32, #tpu.memory_space<vmem>>, vector<18x128xf32>
    %c518 = arith.constant 518 : index
    %c0_165 = arith.constant 0 : index
    %347 = vector.load %arg13[%c518, %c0_165] : memref<792x128xf32, #tpu.memory_space<vmem>>, vector<18x128xf32>
    %348 = arith.maximumf %346, %347 : vector<18x128xf32>
    %349 = vector.extract_strided_slice %348 {offsets = [0, 0], sizes = [14, 128], strides = [1, 1]} : vector<18x128xf32> to vector<14x128xf32>
    %350 = vector.extract_strided_slice %348 {offsets = [1, 0], sizes = [14, 128], strides = [1, 1]} : vector<18x128xf32> to vector<14x128xf32>
    %c8_i32_166 = arith.constant 8 : i32
    %351 = tpu.dynamic_rotate %350 by %c8_i32_166 dim 1 : vector<14x128xf32>, i32 -> vector<14x128xf32>
    %352 = arith.addf %349, %351 : vector<14x128xf32>
    %353 = vector.extract_strided_slice %348 {offsets = [2, 0], sizes = [14, 128], strides = [1, 1]} : vector<18x128xf32> to vector<14x128xf32>
    %c16_i32_167 = arith.constant 16 : i32
    %354 = tpu.dynamic_rotate %353 by %c16_i32_167 dim 1 : vector<14x128xf32>, i32 -> vector<14x128xf32>
    %355 = arith.addf %352, %354 : vector<14x128xf32>
    %356 = vector.extract_strided_slice %348 {offsets = [3, 0], sizes = [14, 128], strides = [1, 1]} : vector<18x128xf32> to vector<14x128xf32>
    %c24_i32_168 = arith.constant 24 : i32
    %357 = tpu.dynamic_rotate %356 by %c24_i32_168 dim 1 : vector<14x128xf32>, i32 -> vector<14x128xf32>
    %358 = arith.addf %355, %357 : vector<14x128xf32>
    %359 = vector.extract_strided_slice %348 {offsets = [4, 0], sizes = [14, 128], strides = [1, 1]} : vector<18x128xf32> to vector<14x128xf32>
    %c32_i32_169 = arith.constant 32 : i32
    %360 = tpu.dynamic_rotate %359 by %c32_i32_169 dim 1 : vector<14x128xf32>, i32 -> vector<14x128xf32>
    %361 = arith.addf %358, %360 : vector<14x128xf32>
    %362 = vector.extract_strided_slice %361 {offsets = [0, 0], sizes = [14, 48], strides = [1, 1]} : vector<14x128xf32> to vector<14x48xf32>
    %c252_170 = arith.constant 252 : index
    %c0_171 = arith.constant 0 : index
    %363 = vector.load %arg14[%c252_170, %c0_171] : memref<392x48xf32, #tpu.memory_space<vmem>>, vector<14x48xf32>
    tpu.vector_store %arg14[%c252_170, %c0_171], %362 {strides = array<i32>} : memref<392x48xf32, #tpu.memory_space<vmem>>, vector<14x48xf32>,
    %c532 = arith.constant 532 : index
    %c0_172 = arith.constant 0 : index
    %364 = vector.load %arg13[%c532, %c0_172] : memref<792x128xf32, #tpu.memory_space<vmem>>, vector<18x128xf32>
    %c546 = arith.constant 546 : index
    %c0_173 = arith.constant 0 : index
    %365 = vector.load %arg13[%c546, %c0_173] : memref<792x128xf32, #tpu.memory_space<vmem>>, vector<18x128xf32>
    %366 = arith.maximumf %364, %365 : vector<18x128xf32>
    %367 = vector.extract_strided_slice %366 {offsets = [0, 0], sizes = [14, 128], strides = [1, 1]} : vector<18x128xf32> to vector<14x128xf32>
    %368 = vector.extract_strided_slice %366 {offsets = [1, 0], sizes = [14, 128], strides = [1, 1]} : vector<18x128xf32> to vector<14x128xf32>
    %c8_i32_174 = arith.constant 8 : i32
    %369 = tpu.dynamic_rotate %368 by %c8_i32_174 dim 1 : vector<14x128xf32>, i32 -> vector<14x128xf32>
    %370 = arith.addf %367, %369 : vector<14x128xf32>
    %371 = vector.extract_strided_slice %366 {offsets = [2, 0], sizes = [14, 128], strides = [1, 1]} : vector<18x128xf32> to vector<14x128xf32>
    %c16_i32_175 = arith.constant 16 : i32
    %372 = tpu.dynamic_rotate %371 by %c16_i32_175 dim 1 : vector<14x128xf32>, i32 -> vector<14x128xf32>
    %373 = arith.addf %370, %372 : vector<14x128xf32>
    %374 = vector.extract_strided_slice %366 {offsets = [3, 0], sizes = [14, 128], strides = [1, 1]} : vector<18x128xf32> to vector<14x128xf32>
    %c24_i32_176 = arith.constant 24 : i32
    %375 = tpu.dynamic_rotate %374 by %c24_i32_176 dim 1 : vector<14x128xf32>, i32 -> vector<14x128xf32>
    %376 = arith.addf %373, %375 : vector<14x128xf32>
    %377 = vector.extract_strided_slice %366 {offsets = [4, 0], sizes = [14, 128], strides = [1, 1]} : vector<18x128xf32> to vector<14x128xf32>
    %c32_i32_177 = arith.constant 32 : i32
    %378 = tpu.dynamic_rotate %377 by %c32_i32_177 dim 1 : vector<14x128xf32>, i32 -> vector<14x128xf32>
    %379 = arith.addf %376, %378 : vector<14x128xf32>
    %380 = vector.extract_strided_slice %379 {offsets = [0, 0], sizes = [14, 48], strides = [1, 1]} : vector<14x128xf32> to vector<14x48xf32>
    %c266_178 = arith.constant 266 : index
    %c0_179 = arith.constant 0 : index
    %381 = vector.load %arg14[%c266_178, %c0_179] : memref<392x48xf32, #tpu.memory_space<vmem>>, vector<14x48xf32>
    tpu.vector_store %arg14[%c266_178, %c0_179], %380 {strides = array<i32>} : memref<392x48xf32, #tpu.memory_space<vmem>>, vector<14x48xf32>,
    %c560 = arith.constant 560 : index
    %c0_180 = arith.constant 0 : index
    %382 = vector.load %arg13[%c560, %c0_180] : memref<792x128xf32, #tpu.memory_space<vmem>>, vector<18x128xf32>
    %c574 = arith.constant 574 : index
    %c0_181 = arith.constant 0 : index
    %383 = vector.load %arg13[%c574, %c0_181] : memref<792x128xf32, #tpu.memory_space<vmem>>, vector<18x128xf32>
    %384 = arith.maximumf %382, %383 : vector<18x128xf32>
    %385 = vector.extract_strided_slice %384 {offsets = [0, 0], sizes = [14, 128], strides = [1, 1]} : vector<18x128xf32> to vector<14x128xf32>
    %386 = vector.extract_strided_slice %384 {offsets = [1, 0], sizes = [14, 128], strides = [1, 1]} : vector<18x128xf32> to vector<14x128xf32>
    %c8_i32_182 = arith.constant 8 : i32
    %387 = tpu.dynamic_rotate %386 by %c8_i32_182 dim 1 : vector<14x128xf32>, i32 -> vector<14x128xf32>
    %388 = arith.addf %385, %387 : vector<14x128xf32>
    %389 = vector.extract_strided_slice %384 {offsets = [2, 0], sizes = [14, 128], strides = [1, 1]} : vector<18x128xf32> to vector<14x128xf32>
    %c16_i32_183 = arith.constant 16 : i32
    %390 = tpu.dynamic_rotate %389 by %c16_i32_183 dim 1 : vector<14x128xf32>, i32 -> vector<14x128xf32>
    %391 = arith.addf %388, %390 : vector<14x128xf32>
    %392 = vector.extract_strided_slice %384 {offsets = [3, 0], sizes = [14, 128], strides = [1, 1]} : vector<18x128xf32> to vector<14x128xf32>
    %c24_i32_184 = arith.constant 24 : i32
    %393 = tpu.dynamic_rotate %392 by %c24_i32_184 dim 1 : vector<14x128xf32>, i32 -> vector<14x128xf32>
    %394 = arith.addf %391, %393 : vector<14x128xf32>
    %395 = vector.extract_strided_slice %384 {offsets = [4, 0], sizes = [14, 128], strides = [1, 1]} : vector<18x128xf32> to vector<14x128xf32>
    %c32_i32_185 = arith.constant 32 : i32
    %396 = tpu.dynamic_rotate %395 by %c32_i32_185 dim 1 : vector<14x128xf32>, i32 -> vector<14x128xf32>
    %397 = arith.addf %394, %396 : vector<14x128xf32>
    %398 = vector.extract_strided_slice %397 {offsets = [0, 0], sizes = [14, 48], strides = [1, 1]} : vector<14x128xf32> to vector<14x48xf32>
    %c280_186 = arith.constant 280 : index
    %c0_187 = arith.constant 0 : index
    %399 = vector.load %arg14[%c280_186, %c0_187] : memref<392x48xf32, #tpu.memory_space<vmem>>, vector<14x48xf32>
    tpu.vector_store %arg14[%c280_186, %c0_187], %398 {strides = array<i32>} : memref<392x48xf32, #tpu.memory_space<vmem>>, vector<14x48xf32>,
    %c588 = arith.constant 588 : index
    %c0_188 = arith.constant 0 : index
    %400 = vector.load %arg13[%c588, %c0_188] : memref<792x128xf32, #tpu.memory_space<vmem>>, vector<18x128xf32>
    %c602 = arith.constant 602 : index
    %c0_189 = arith.constant 0 : index
    %401 = vector.load %arg13[%c602, %c0_189] : memref<792x128xf32, #tpu.memory_space<vmem>>, vector<18x128xf32>
    %402 = arith.maximumf %400, %401 : vector<18x128xf32>
    %403 = vector.extract_strided_slice %402 {offsets = [0, 0], sizes = [14, 128], strides = [1, 1]} : vector<18x128xf32> to vector<14x128xf32>
    %404 = vector.extract_strided_slice %402 {offsets = [1, 0], sizes = [14, 128], strides = [1, 1]} : vector<18x128xf32> to vector<14x128xf32>
    %c8_i32_190 = arith.constant 8 : i32
    %405 = tpu.dynamic_rotate %404 by %c8_i32_190 dim 1 : vector<14x128xf32>, i32 -> vector<14x128xf32>
    %406 = arith.addf %403, %405 : vector<14x128xf32>
    %407 = vector.extract_strided_slice %402 {offsets = [2, 0], sizes = [14, 128], strides = [1, 1]} : vector<18x128xf32> to vector<14x128xf32>
    %c16_i32_191 = arith.constant 16 : i32
    %408 = tpu.dynamic_rotate %407 by %c16_i32_191 dim 1 : vector<14x128xf32>, i32 -> vector<14x128xf32>
    %409 = arith.addf %406, %408 : vector<14x128xf32>
    %410 = vector.extract_strided_slice %402 {offsets = [3, 0], sizes = [14, 128], strides = [1, 1]} : vector<18x128xf32> to vector<14x128xf32>
    %c24_i32_192 = arith.constant 24 : i32
    %411 = tpu.dynamic_rotate %410 by %c24_i32_192 dim 1 : vector<14x128xf32>, i32 -> vector<14x128xf32>
    %412 = arith.addf %409, %411 : vector<14x128xf32>
    %413 = vector.extract_strided_slice %402 {offsets = [4, 0], sizes = [14, 128], strides = [1, 1]} : vector<18x128xf32> to vector<14x128xf32>
    %c32_i32_193 = arith.constant 32 : i32
    %414 = tpu.dynamic_rotate %413 by %c32_i32_193 dim 1 : vector<14x128xf32>, i32 -> vector<14x128xf32>
    %415 = arith.addf %412, %414 : vector<14x128xf32>
    %416 = vector.extract_strided_slice %415 {offsets = [0, 0], sizes = [14, 48], strides = [1, 1]} : vector<14x128xf32> to vector<14x48xf32>
    %c294_194 = arith.constant 294 : index
    %c0_195 = arith.constant 0 : index
    %417 = vector.load %arg14[%c294_194, %c0_195] : memref<392x48xf32, #tpu.memory_space<vmem>>, vector<14x48xf32>
    tpu.vector_store %arg14[%c294_194, %c0_195], %416 {strides = array<i32>} : memref<392x48xf32, #tpu.memory_space<vmem>>, vector<14x48xf32>,
    %c616 = arith.constant 616 : index
    %c0_196 = arith.constant 0 : index
    %418 = vector.load %arg13[%c616, %c0_196] : memref<792x128xf32, #tpu.memory_space<vmem>>, vector<18x128xf32>
    %c630 = arith.constant 630 : index
    %c0_197 = arith.constant 0 : index
    %419 = vector.load %arg13[%c630, %c0_197] : memref<792x128xf32, #tpu.memory_space<vmem>>, vector<18x128xf32>
    %420 = arith.maximumf %418, %419 : vector<18x128xf32>
    %421 = vector.extract_strided_slice %420 {offsets = [0, 0], sizes = [14, 128], strides = [1, 1]} : vector<18x128xf32> to vector<14x128xf32>
    %422 = vector.extract_strided_slice %420 {offsets = [1, 0], sizes = [14, 128], strides = [1, 1]} : vector<18x128xf32> to vector<14x128xf32>
    %c8_i32_198 = arith.constant 8 : i32
    %423 = tpu.dynamic_rotate %422 by %c8_i32_198 dim 1 : vector<14x128xf32>, i32 -> vector<14x128xf32>
    %424 = arith.addf %421, %423 : vector<14x128xf32>
    %425 = vector.extract_strided_slice %420 {offsets = [2, 0], sizes = [14, 128], strides = [1, 1]} : vector<18x128xf32> to vector<14x128xf32>
    %c16_i32_199 = arith.constant 16 : i32
    %426 = tpu.dynamic_rotate %425 by %c16_i32_199 dim 1 : vector<14x128xf32>, i32 -> vector<14x128xf32>
    %427 = arith.addf %424, %426 : vector<14x128xf32>
    %428 = vector.extract_strided_slice %420 {offsets = [3, 0], sizes = [14, 128], strides = [1, 1]} : vector<18x128xf32> to vector<14x128xf32>
    %c24_i32_200 = arith.constant 24 : i32
    %429 = tpu.dynamic_rotate %428 by %c24_i32_200 dim 1 : vector<14x128xf32>, i32 -> vector<14x128xf32>
    %430 = arith.addf %427, %429 : vector<14x128xf32>
    %431 = vector.extract_strided_slice %420 {offsets = [4, 0], sizes = [14, 128], strides = [1, 1]} : vector<18x128xf32> to vector<14x128xf32>
    %c32_i32_201 = arith.constant 32 : i32
    %432 = tpu.dynamic_rotate %431 by %c32_i32_201 dim 1 : vector<14x128xf32>, i32 -> vector<14x128xf32>
    %433 = arith.addf %430, %432 : vector<14x128xf32>
    %434 = vector.extract_strided_slice %433 {offsets = [0, 0], sizes = [14, 48], strides = [1, 1]} : vector<14x128xf32> to vector<14x48xf32>
    %c308_202 = arith.constant 308 : index
    %c0_203 = arith.constant 0 : index
    %435 = vector.load %arg14[%c308_202, %c0_203] : memref<392x48xf32, #tpu.memory_space<vmem>>, vector<14x48xf32>
    tpu.vector_store %arg14[%c308_202, %c0_203], %434 {strides = array<i32>} : memref<392x48xf32, #tpu.memory_space<vmem>>, vector<14x48xf32>,
    %c644 = arith.constant 644 : index
    %c0_204 = arith.constant 0 : index
    %436 = vector.load %arg13[%c644, %c0_204] : memref<792x128xf32, #tpu.memory_space<vmem>>, vector<18x128xf32>
    %c658 = arith.constant 658 : index
    %c0_205 = arith.constant 0 : index
    %437 = vector.load %arg13[%c658, %c0_205] : memref<792x128xf32, #tpu.memory_space<vmem>>, vector<18x128xf32>
    %438 = arith.maximumf %436, %437 : vector<18x128xf32>
    %439 = vector.extract_strided_slice %438 {offsets = [0, 0], sizes = [14, 128], strides = [1, 1]} : vector<18x128xf32> to vector<14x128xf32>
    %440 = vector.extract_strided_slice %438 {offsets = [1, 0], sizes = [14, 128], strides = [1, 1]} : vector<18x128xf32> to vector<14x128xf32>
    %c8_i32_206 = arith.constant 8 : i32
    %441 = tpu.dynamic_rotate %440 by %c8_i32_206 dim 1 : vector<14x128xf32>, i32 -> vector<14x128xf32>
    %442 = arith.addf %439, %441 : vector<14x128xf32>
    %443 = vector.extract_strided_slice %438 {offsets = [2, 0], sizes = [14, 128], strides = [1, 1]} : vector<18x128xf32> to vector<14x128xf32>
    %c16_i32_207 = arith.constant 16 : i32
    %444 = tpu.dynamic_rotate %443 by %c16_i32_207 dim 1 : vector<14x128xf32>, i32 -> vector<14x128xf32>
    %445 = arith.addf %442, %444 : vector<14x128xf32>
    %446 = vector.extract_strided_slice %438 {offsets = [3, 0], sizes = [14, 128], strides = [1, 1]} : vector<18x128xf32> to vector<14x128xf32>
    %c24_i32_208 = arith.constant 24 : i32
    %447 = tpu.dynamic_rotate %446 by %c24_i32_208 dim 1 : vector<14x128xf32>, i32 -> vector<14x128xf32>
    %448 = arith.addf %445, %447 : vector<14x128xf32>
    %449 = vector.extract_strided_slice %438 {offsets = [4, 0], sizes = [14, 128], strides = [1, 1]} : vector<18x128xf32> to vector<14x128xf32>
    %c32_i32_209 = arith.constant 32 : i32
    %450 = tpu.dynamic_rotate %449 by %c32_i32_209 dim 1 : vector<14x128xf32>, i32 -> vector<14x128xf32>
    %451 = arith.addf %448, %450 : vector<14x128xf32>
    %452 = vector.extract_strided_slice %451 {offsets = [0, 0], sizes = [14, 48], strides = [1, 1]} : vector<14x128xf32> to vector<14x48xf32>
    %c322_210 = arith.constant 322 : index
    %c0_211 = arith.constant 0 : index
    %453 = vector.load %arg14[%c322_210, %c0_211] : memref<392x48xf32, #tpu.memory_space<vmem>>, vector<14x48xf32>
    tpu.vector_store %arg14[%c322_210, %c0_211], %452 {strides = array<i32>} : memref<392x48xf32, #tpu.memory_space<vmem>>, vector<14x48xf32>,
    %c672 = arith.constant 672 : index
    %c0_212 = arith.constant 0 : index
    %454 = vector.load %arg13[%c672, %c0_212] : memref<792x128xf32, #tpu.memory_space<vmem>>, vector<18x128xf32>
    %c686 = arith.constant 686 : index
    %c0_213 = arith.constant 0 : index
    %455 = vector.load %arg13[%c686, %c0_213] : memref<792x128xf32, #tpu.memory_space<vmem>>, vector<18x128xf32>
    %456 = arith.maximumf %454, %455 : vector<18x128xf32>
    %457 = vector.extract_strided_slice %456 {offsets = [0, 0], sizes = [14, 128], strides = [1, 1]} : vector<18x128xf32> to vector<14x128xf32>
    %458 = vector.extract_strided_slice %456 {offsets = [1, 0], sizes = [14, 128], strides = [1, 1]} : vector<18x128xf32> to vector<14x128xf32>
    %c8_i32_214 = arith.constant 8 : i32
    %459 = tpu.dynamic_rotate %458 by %c8_i32_214 dim 1 : vector<14x128xf32>, i32 -> vector<14x128xf32>
    %460 = arith.addf %457, %459 : vector<14x128xf32>
    %461 = vector.extract_strided_slice %456 {offsets = [2, 0], sizes = [14, 128], strides = [1, 1]} : vector<18x128xf32> to vector<14x128xf32>
    %c16_i32_215 = arith.constant 16 : i32
    %462 = tpu.dynamic_rotate %461 by %c16_i32_215 dim 1 : vector<14x128xf32>, i32 -> vector<14x128xf32>
    %463 = arith.addf %460, %462 : vector<14x128xf32>
    %464 = vector.extract_strided_slice %456 {offsets = [3, 0], sizes = [14, 128], strides = [1, 1]} : vector<18x128xf32> to vector<14x128xf32>
    %c24_i32_216 = arith.constant 24 : i32
    %465 = tpu.dynamic_rotate %464 by %c24_i32_216 dim 1 : vector<14x128xf32>, i32 -> vector<14x128xf32>
    %466 = arith.addf %463, %465 : vector<14x128xf32>
    %467 = vector.extract_strided_slice %456 {offsets = [4, 0], sizes = [14, 128], strides = [1, 1]} : vector<18x128xf32> to vector<14x128xf32>
    %c32_i32_217 = arith.constant 32 : i32
    %468 = tpu.dynamic_rotate %467 by %c32_i32_217 dim 1 : vector<14x128xf32>, i32 -> vector<14x128xf32>
    %469 = arith.addf %466, %468 : vector<14x128xf32>
    %470 = vector.extract_strided_slice %469 {offsets = [0, 0], sizes = [14, 48], strides = [1, 1]} : vector<14x128xf32> to vector<14x48xf32>
    %c336_218 = arith.constant 336 : index
    %c0_219 = arith.constant 0 : index
    %471 = vector.load %arg14[%c336_218, %c0_219] : memref<392x48xf32, #tpu.memory_space<vmem>>, vector<14x48xf32>
    tpu.vector_store %arg14[%c336_218, %c0_219], %470 {strides = array<i32>} : memref<392x48xf32, #tpu.memory_space<vmem>>, vector<14x48xf32>,
    %c700 = arith.constant 700 : index
    %c0_220 = arith.constant 0 : index
    %472 = vector.load %arg13[%c700, %c0_220] : memref<792x128xf32, #tpu.memory_space<vmem>>, vector<18x128xf32>
    %c714 = arith.constant 714 : index
    %c0_221 = arith.constant 0 : index
    %473 = vector.load %arg13[%c714, %c0_221] : memref<792x128xf32, #tpu.memory_space<vmem>>, vector<18x128xf32>
    %474 = arith.maximumf %472, %473 : vector<18x128xf32>
    %475 = vector.extract_strided_slice %474 {offsets = [0, 0], sizes = [14, 128], strides = [1, 1]} : vector<18x128xf32> to vector<14x128xf32>
    %476 = vector.extract_strided_slice %474 {offsets = [1, 0], sizes = [14, 128], strides = [1, 1]} : vector<18x128xf32> to vector<14x128xf32>
    %c8_i32_222 = arith.constant 8 : i32
    %477 = tpu.dynamic_rotate %476 by %c8_i32_222 dim 1 : vector<14x128xf32>, i32 -> vector<14x128xf32>
    %478 = arith.addf %475, %477 : vector<14x128xf32>
    %479 = vector.extract_strided_slice %474 {offsets = [2, 0], sizes = [14, 128], strides = [1, 1]} : vector<18x128xf32> to vector<14x128xf32>
    %c16_i32_223 = arith.constant 16 : i32
    %480 = tpu.dynamic_rotate %479 by %c16_i32_223 dim 1 : vector<14x128xf32>, i32 -> vector<14x128xf32>
    %481 = arith.addf %478, %480 : vector<14x128xf32>
    %482 = vector.extract_strided_slice %474 {offsets = [3, 0], sizes = [14, 128], strides = [1, 1]} : vector<18x128xf32> to vector<14x128xf32>
    %c24_i32_224 = arith.constant 24 : i32
    %483 = tpu.dynamic_rotate %482 by %c24_i32_224 dim 1 : vector<14x128xf32>, i32 -> vector<14x128xf32>
    %484 = arith.addf %481, %483 : vector<14x128xf32>
    %485 = vector.extract_strided_slice %474 {offsets = [4, 0], sizes = [14, 128], strides = [1, 1]} : vector<18x128xf32> to vector<14x128xf32>
    %c32_i32_225 = arith.constant 32 : i32
    %486 = tpu.dynamic_rotate %485 by %c32_i32_225 dim 1 : vector<14x128xf32>, i32 -> vector<14x128xf32>
    %487 = arith.addf %484, %486 : vector<14x128xf32>
    %488 = vector.extract_strided_slice %487 {offsets = [0, 0], sizes = [14, 48], strides = [1, 1]} : vector<14x128xf32> to vector<14x48xf32>
    %c350_226 = arith.constant 350 : index
    %c0_227 = arith.constant 0 : index
    %489 = vector.load %arg14[%c350_226, %c0_227] : memref<392x48xf32, #tpu.memory_space<vmem>>, vector<14x48xf32>
    tpu.vector_store %arg14[%c350_226, %c0_227], %488 {strides = array<i32>} : memref<392x48xf32, #tpu.memory_space<vmem>>, vector<14x48xf32>,
    %c728 = arith.constant 728 : index
    %c0_228 = arith.constant 0 : index
    %490 = vector.load %arg13[%c728, %c0_228] : memref<792x128xf32, #tpu.memory_space<vmem>>, vector<18x128xf32>
    %c742 = arith.constant 742 : index
    %c0_229 = arith.constant 0 : index
    %491 = vector.load %arg13[%c742, %c0_229] : memref<792x128xf32, #tpu.memory_space<vmem>>, vector<18x128xf32>
    %492 = arith.maximumf %490, %491 : vector<18x128xf32>
    %493 = vector.extract_strided_slice %492 {offsets = [0, 0], sizes = [14, 128], strides = [1, 1]} : vector<18x128xf32> to vector<14x128xf32>
    %494 = vector.extract_strided_slice %492 {offsets = [1, 0], sizes = [14, 128], strides = [1, 1]} : vector<18x128xf32> to vector<14x128xf32>
    %c8_i32_230 = arith.constant 8 : i32
    %495 = tpu.dynamic_rotate %494 by %c8_i32_230 dim 1 : vector<14x128xf32>, i32 -> vector<14x128xf32>
    %496 = arith.addf %493, %495 : vector<14x128xf32>
    %497 = vector.extract_strided_slice %492 {offsets = [2, 0], sizes = [14, 128], strides = [1, 1]} : vector<18x128xf32> to vector<14x128xf32>
    %c16_i32_231 = arith.constant 16 : i32
    %498 = tpu.dynamic_rotate %497 by %c16_i32_231 dim 1 : vector<14x128xf32>, i32 -> vector<14x128xf32>
    %499 = arith.addf %496, %498 : vector<14x128xf32>
    %500 = vector.extract_strided_slice %492 {offsets = [3, 0], sizes = [14, 128], strides = [1, 1]} : vector<18x128xf32> to vector<14x128xf32>
    %c24_i32_232 = arith.constant 24 : i32
    %501 = tpu.dynamic_rotate %500 by %c24_i32_232 dim 1 : vector<14x128xf32>, i32 -> vector<14x128xf32>
    %502 = arith.addf %499, %501 : vector<14x128xf32>
    %503 = vector.extract_strided_slice %492 {offsets = [4, 0], sizes = [14, 128], strides = [1, 1]} : vector<18x128xf32> to vector<14x128xf32>
    %c32_i32_233 = arith.constant 32 : i32
    %504 = tpu.dynamic_rotate %503 by %c32_i32_233 dim 1 : vector<14x128xf32>, i32 -> vector<14x128xf32>
    %505 = arith.addf %502, %504 : vector<14x128xf32>
    %506 = vector.extract_strided_slice %505 {offsets = [0, 0], sizes = [14, 48], strides = [1, 1]} : vector<14x128xf32> to vector<14x48xf32>
    %c364_234 = arith.constant 364 : index
    %c0_235 = arith.constant 0 : index
    %507 = vector.load %arg14[%c364_234, %c0_235] : memref<392x48xf32, #tpu.memory_space<vmem>>, vector<14x48xf32>
    tpu.vector_store %arg14[%c364_234, %c0_235], %506 {strides = array<i32>} : memref<392x48xf32, #tpu.memory_space<vmem>>, vector<14x48xf32>,
    %c756 = arith.constant 756 : index
    %c0_236 = arith.constant 0 : index
    %508 = vector.load %arg13[%c756, %c0_236] : memref<792x128xf32, #tpu.memory_space<vmem>>, vector<18x128xf32>
    %c770 = arith.constant 770 : index
    %c0_237 = arith.constant 0 : index
    %509 = vector.load %arg13[%c770, %c0_237] : memref<792x128xf32, #tpu.memory_space<vmem>>, vector<18x128xf32>
    %510 = arith.maximumf %508, %509 : vector<18x128xf32>
    %511 = vector.extract_strided_slice %510 {offsets = [0, 0], sizes = [14, 128], strides = [1, 1]} : vector<18x128xf32> to vector<14x128xf32>
    %512 = vector.extract_strided_slice %510 {offsets = [1, 0], sizes = [14, 128], strides = [1, 1]} : vector<18x128xf32> to vector<14x128xf32>
    %c8_i32_238 = arith.constant 8 : i32
    %513 = tpu.dynamic_rotate %512 by %c8_i32_238 dim 1 : vector<14x128xf32>, i32 -> vector<14x128xf32>
    %514 = arith.addf %511, %513 : vector<14x128xf32>
    %515 = vector.extract_strided_slice %510 {offsets = [2, 0], sizes = [14, 128], strides = [1, 1]} : vector<18x128xf32> to vector<14x128xf32>
    %c16_i32_239 = arith.constant 16 : i32
    %516 = tpu.dynamic_rotate %515 by %c16_i32_239 dim 1 : vector<14x128xf32>, i32 -> vector<14x128xf32>
    %517 = arith.addf %514, %516 : vector<14x128xf32>
    %518 = vector.extract_strided_slice %510 {offsets = [3, 0], sizes = [14, 128], strides = [1, 1]} : vector<18x128xf32> to vector<14x128xf32>
    %c24_i32_240 = arith.constant 24 : i32
    %519 = tpu.dynamic_rotate %518 by %c24_i32_240 dim 1 : vector<14x128xf32>, i32 -> vector<14x128xf32>
    %520 = arith.addf %517, %519 : vector<14x128xf32>
    %521 = vector.extract_strided_slice %510 {offsets = [4, 0], sizes = [14, 128], strides = [1, 1]} : vector<18x128xf32> to vector<14x128xf32>
    %c32_i32_241 = arith.constant 32 : i32
    %522 = tpu.dynamic_rotate %521 by %c32_i32_241 dim 1 : vector<14x128xf32>, i32 -> vector<14x128xf32>
    %523 = arith.addf %520, %522 : vector<14x128xf32>
    %524 = vector.extract_strided_slice %523 {offsets = [0, 0], sizes = [14, 48], strides = [1, 1]} : vector<14x128xf32> to vector<14x48xf32>
    %c378_242 = arith.constant 378 : index
    %c0_243 = arith.constant 0 : index
    %525 = vector.load %arg14[%c378_242, %c0_243] : memref<392x48xf32, #tpu.memory_space<vmem>>, vector<14x48xf32>
    tpu.vector_store %arg14[%c378_242, %c0_243], %524 {strides = array<i32>} : memref<392x48xf32, #tpu.memory_space<vmem>>, vector<14x48xf32>,
    %c0_244 = arith.constant 0 : index
    %c0_245 = arith.constant 0 : index
    %526 = vector.load %arg14[%c0_244, %c0_245] : memref<392x48xf32, #tpu.memory_space<vmem>>, vector<336x48xf32>
    %527 = arith.truncf %526 : vector<336x48xf32> to vector<336x48xbf16>
    %c0_246 = arith.constant 0 : index
    %c0_247 = arith.constant 0 : index
    %c0_248 = arith.constant 0 : index
    %528 = vector.load %arg3[%c0_246, %c0_247, %c0_248] : memref<5x48x128xbf16, #tpu.memory_space<vmem>>, vector<1x48x128xbf16>
    %529 = vector.shape_cast %528 : vector<1x48x128xbf16> to vector<48x128xbf16>
    %cst_249 = arith.constant dense<0.000000e+00> : vector<336x128xf32>
    %530 = tpu.matmul %527, %529, %cst_249 {dimension_numbers = #tpu.dot_dimension_numbers<[1], [0], [0], [1], [0, 0, 1, 1], [], []>} : vector<336x48xbf16>, vector<48x128xbf16>, vector<336x128xf32> -> vector<336x128xf32>
    %c14_250 = arith.constant 14 : index
    %c0_251 = arith.constant 0 : index
    %531 = vector.load %arg14[%c14_250, %c0_251] : memref<392x48xf32, #tpu.memory_space<vmem>>, vector<336x48xf32>
    %532 = arith.truncf %531 : vector<336x48xf32> to vector<336x48xbf16>
    %c1 = arith.constant 1 : index
    %c0_252 = arith.constant 0 : index
    %c0_253 = arith.constant 0 : index
    %533 = vector.load %arg3[%c1, %c0_252, %c0_253] : memref<5x48x128xbf16, #tpu.memory_space<vmem>>, vector<1x48x128xbf16>
    %534 = vector.shape_cast %533 : vector<1x48x128xbf16> to vector<48x128xbf16>
    %cst_254 = arith.constant dense<0.000000e+00> : vector<336x128xf32>
    %535 = tpu.matmul %532, %534, %cst_254 {dimension_numbers = #tpu.dot_dimension_numbers<[1], [0], [0], [1], [0, 0, 1, 1], [], []>} : vector<336x48xbf16>, vector<48x128xbf16>, vector<336x128xf32> -> vector<336x128xf32>
    %536 = arith.addf %530, %535 : vector<336x128xf32>
    %c28_255 = arith.constant 28 : index
    %c0_256 = arith.constant 0 : index
    %537 = vector.load %arg14[%c28_255, %c0_256] : memref<392x48xf32, #tpu.memory_space<vmem>>, vector<336x48xf32>
    %538 = arith.truncf %537 : vector<336x48xf32> to vector<336x48xbf16>
    %c2 = arith.constant 2 : index
    %c0_257 = arith.constant 0 : index
    %c0_258 = arith.constant 0 : index
    %539 = vector.load %arg3[%c2, %c0_257, %c0_258] : memref<5x48x128xbf16, #tpu.memory_space<vmem>>, vector<1x48x128xbf16>
    %540 = vector.shape_cast %539 : vector<1x48x128xbf16> to vector<48x128xbf16>
    %cst_259 = arith.constant dense<0.000000e+00> : vector<336x128xf32>
    %541 = tpu.matmul %538, %540, %cst_259 {dimension_numbers = #tpu.dot_dimension_numbers<[1], [0], [0], [1], [0, 0, 1, 1], [], []>} : vector<336x48xbf16>, vector<48x128xbf16>, vector<336x128xf32> -> vector<336x128xf32>
    %542 = arith.addf %536, %541 : vector<336x128xf32>
    %c42_260 = arith.constant 42 : index
    %c0_261 = arith.constant 0 : index
    %543 = vector.load %arg14[%c42_260, %c0_261] : memref<392x48xf32, #tpu.memory_space<vmem>>, vector<336x48xf32>
    %544 = arith.truncf %543 : vector<336x48xf32> to vector<336x48xbf16>
    %c3 = arith.constant 3 : index
    %c0_262 = arith.constant 0 : index
    %c0_263 = arith.constant 0 : index
    %545 = vector.load %arg3[%c3, %c0_262, %c0_263] : memref<5x48x128xbf16, #tpu.memory_space<vmem>>, vector<1x48x128xbf16>
    %546 = vector.shape_cast %545 : vector<1x48x128xbf16> to vector<48x128xbf16>
    %cst_264 = arith.constant dense<0.000000e+00> : vector<336x128xf32>
    %547 = tpu.matmul %544, %546, %cst_264 {dimension_numbers = #tpu.dot_dimension_numbers<[1], [0], [0], [1], [0, 0, 1, 1], [], []>} : vector<336x48xbf16>, vector<48x128xbf16>, vector<336x128xf32> -> vector<336x128xf32>
    %548 = arith.addf %542, %547 : vector<336x128xf32>
    %c56_265 = arith.constant 56 : index
    %c0_266 = arith.constant 0 : index
    %549 = vector.load %arg14[%c56_265, %c0_266] : memref<392x48xf32, #tpu.memory_space<vmem>>, vector<336x48xf32>
    %550 = arith.truncf %549 : vector<336x48xf32> to vector<336x48xbf16>
    %c4 = arith.constant 4 : index
    %c0_267 = arith.constant 0 : index
    %c0_268 = arith.constant 0 : index
    %551 = vector.load %arg3[%c4, %c0_267, %c0_268] : memref<5x48x128xbf16, #tpu.memory_space<vmem>>, vector<1x48x128xbf16>
    %552 = vector.shape_cast %551 : vector<1x48x128xbf16> to vector<48x128xbf16>
    %cst_269 = arith.constant dense<0.000000e+00> : vector<336x128xf32>
    %553 = tpu.matmul %550, %552, %cst_269 {dimension_numbers = #tpu.dot_dimension_numbers<[1], [0], [0], [1], [0, 0, 1, 1], [], []>} : vector<336x48xbf16>, vector<48x128xbf16>, vector<336x128xf32> -> vector<336x128xf32>
    %554 = arith.addf %548, %553 : vector<336x128xf32>
    %c0_270 = arith.constant 0 : index
    %c0_271 = arith.constant 0 : index
    %555 = vector.load %arg4[%c0_270, %c0_271] : memref<1x128xf32, #tpu.memory_space<vmem>>, vector<1x128xf32>
    %556 = vector.broadcast %555 : vector<1x128xf32> to vector<336x128xf32>
    %557 = arith.addf %554, %556 : vector<336x128xf32>
    %cst_272 = arith.constant 0.000000e+00 : f32
    %558 = vector.broadcast %cst_272 : f32 to vector<336x128xf32>
    %559 = arith.maximumf %557, %558 : vector<336x128xf32>
    %c0_273 = arith.constant 0 : index
    %c0_274 = arith.constant 0 : index
    %560 = vector.load %arg15[%c0_273, %c0_274] : memref<336x128xf32, #tpu.memory_space<vmem>>, vector<336x128xf32>
    tpu.vector_store %arg15[%c0_273, %c0_274], %559 {strides = array<i32>} : memref<336x128xf32, #tpu.memory_space<vmem>>, vector<336x128xf32>,
    %c0_275 = arith.constant 0 : index
    %c0_276 = arith.constant 0 : index
    %561 = tpu.strided_load %arg15[%c0_275, %c0_276] {strides = array<i32: 2, 1>} : memref<336x128xf32, #tpu.memory_space<vmem>>, vector<168x128xf32>
    %c1_277 = arith.constant 1 : index
    %c0_278 = arith.constant 0 : index
    %562 = tpu.strided_load %arg15[%c1_277, %c0_278] {strides = array<i32: 2, 1>} : memref<336x128xf32, #tpu.memory_space<vmem>>, vector<168x128xf32>
    %563 = arith.maximumf %561, %562 : vector<168x128xf32>
    %c0_279 = arith.constant 0 : index
    %c0_280 = arith.constant 0 : index
    %564 = vector.load %arg16[%c0_279, %c0_280] : memref<168x128xf32, #tpu.memory_space<vmem>>, vector<168x128xf32>
    tpu.vector_store %arg16[%c0_279, %c0_280], %563 {strides = array<i32>} : memref<168x128xf32, #tpu.memory_space<vmem>>, vector<168x128xf32>,
    %cst_281 = arith.constant 0.000000e+00 : f32
    %565 = vector.broadcast %cst_281 : f32 to vector<200x16xf32>
    %c0_282 = arith.constant 0 : index
    %c0_283 = arith.constant 0 : index
    %566 = vector.load %arg17[%c0_282, %c0_283] : memref<200x16xf32, #tpu.memory_space<vmem>>, vector<200x16xf32>
    tpu.vector_store %arg17[%c0_282, %c0_283], %565 {strides = array<i32>} : memref<200x16xf32, #tpu.memory_space<vmem>>, vector<200x16xf32>,
    %c0_284 = arith.constant 0 : index
    %c0_285 = arith.constant 0 : index
    %567 = vector.load %arg16[%c0_284, %c0_285] : memref<168x128xf32, #tpu.memory_space<vmem>>, vector<5x128xf32>
    %c7 = arith.constant 7 : index
    %c0_286 = arith.constant 0 : index
    %568 = vector.load %arg16[%c7, %c0_286] : memref<168x128xf32, #tpu.memory_space<vmem>>, vector<5x128xf32>
    %569 = arith.maximumf %567, %568 : vector<5x128xf32>
    %570 = vector.extract_strided_slice %569 {offsets = [0, 0], sizes = [5, 16], strides = [1, 1]} : vector<5x128xf32> to vector<5x16xf32>
    %c0_287 = arith.constant 0 : index
    %c0_288 = arith.constant 0 : index
    %571 = vector.load %arg17[%c0_287, %c0_288] : memref<200x16xf32, #tpu.memory_space<vmem>>, vector<5x16xf32>
    tpu.vector_store %arg17[%c0_287, %c0_288], %570 {strides = array<i32>} : memref<200x16xf32, #tpu.memory_space<vmem>>, vector<5x16xf32>,
    %c14_289 = arith.constant 14 : index
    %c0_290 = arith.constant 0 : index
    %572 = vector.load %arg16[%c14_289, %c0_290] : memref<168x128xf32, #tpu.memory_space<vmem>>, vector<5x128xf32>
    %c21 = arith.constant 21 : index
    %c0_291 = arith.constant 0 : index
    %573 = vector.load %arg16[%c21, %c0_291] : memref<168x128xf32, #tpu.memory_space<vmem>>, vector<5x128xf32>
    %574 = arith.maximumf %572, %573 : vector<5x128xf32>
    %575 = vector.extract_strided_slice %574 {offsets = [0, 0], sizes = [5, 16], strides = [1, 1]} : vector<5x128xf32> to vector<5x16xf32>
    %c5 = arith.constant 5 : index
    %c0_292 = arith.constant 0 : index
    %576 = vector.load %arg17[%c5, %c0_292] : memref<200x16xf32, #tpu.memory_space<vmem>>, vector<5x16xf32>
    tpu.vector_store %arg17[%c5, %c0_292], %575 {strides = array<i32>} : memref<200x16xf32, #tpu.memory_space<vmem>>, vector<5x16xf32>,
    %c28_293 = arith.constant 28 : index
    %c0_294 = arith.constant 0 : index
    %577 = vector.load %arg16[%c28_293, %c0_294] : memref<168x128xf32, #tpu.memory_space<vmem>>, vector<5x128xf32>
    %c35 = arith.constant 35 : index
    %c0_295 = arith.constant 0 : index
    %578 = vector.load %arg16[%c35, %c0_295] : memref<168x128xf32, #tpu.memory_space<vmem>>, vector<5x128xf32>
    %579 = arith.maximumf %577, %578 : vector<5x128xf32>
    %580 = vector.extract_strided_slice %579 {offsets = [0, 0], sizes = [5, 16], strides = [1, 1]} : vector<5x128xf32> to vector<5x16xf32>
    %c10 = arith.constant 10 : index
    %c0_296 = arith.constant 0 : index
    %581 = vector.load %arg17[%c10, %c0_296] : memref<200x16xf32, #tpu.memory_space<vmem>>, vector<5x16xf32>
    tpu.vector_store %arg17[%c10, %c0_296], %580 {strides = array<i32>} : memref<200x16xf32, #tpu.memory_space<vmem>>, vector<5x16xf32>,
    %c42_297 = arith.constant 42 : index
    %c0_298 = arith.constant 0 : index
    %582 = vector.load %arg16[%c42_297, %c0_298] : memref<168x128xf32, #tpu.memory_space<vmem>>, vector<5x128xf32>
    %c49 = arith.constant 49 : index
    %c0_299 = arith.constant 0 : index
    %583 = vector.load %arg16[%c49, %c0_299] : memref<168x128xf32, #tpu.memory_space<vmem>>, vector<5x128xf32>
    %584 = arith.maximumf %582, %583 : vector<5x128xf32>
    %585 = vector.extract_strided_slice %584 {offsets = [0, 0], sizes = [5, 16], strides = [1, 1]} : vector<5x128xf32> to vector<5x16xf32>
    %c15 = arith.constant 15 : index
    %c0_300 = arith.constant 0 : index
    %586 = vector.load %arg17[%c15, %c0_300] : memref<200x16xf32, #tpu.memory_space<vmem>>, vector<5x16xf32>
    tpu.vector_store %arg17[%c15, %c0_300], %585 {strides = array<i32>} : memref<200x16xf32, #tpu.memory_space<vmem>>, vector<5x16xf32>,
    %c56_301 = arith.constant 56 : index
    %c0_302 = arith.constant 0 : index
    %587 = vector.load %arg16[%c56_301, %c0_302] : memref<168x128xf32, #tpu.memory_space<vmem>>, vector<5x128xf32>
    %c63 = arith.constant 63 : index
    %c0_303 = arith.constant 0 : index
    %588 = vector.load %arg16[%c63, %c0_303] : memref<168x128xf32, #tpu.memory_space<vmem>>, vector<5x128xf32>
    %589 = arith.maximumf %587, %588 : vector<5x128xf32>
    %590 = vector.extract_strided_slice %589 {offsets = [0, 0], sizes = [5, 16], strides = [1, 1]} : vector<5x128xf32> to vector<5x16xf32>
    %c20 = arith.constant 20 : index
    %c0_304 = arith.constant 0 : index
    %591 = vector.load %arg17[%c20, %c0_304] : memref<200x16xf32, #tpu.memory_space<vmem>>, vector<5x16xf32>
    tpu.vector_store %arg17[%c20, %c0_304], %590 {strides = array<i32>} : memref<200x16xf32, #tpu.memory_space<vmem>>, vector<5x16xf32>,
    %c98_305 = arith.constant 98 : index
    %c0_306 = arith.constant 0 : index
    %592 = vector.load %arg16[%c98_305, %c0_306] : memref<168x128xf32, #tpu.memory_space<vmem>>, vector<5x128xf32>
    %c105 = arith.constant 105 : index
    %c0_307 = arith.constant 0 : index
    %593 = vector.load %arg16[%c105, %c0_307] : memref<168x128xf32, #tpu.memory_space<vmem>>, vector<5x128xf32>
    %594 = arith.maximumf %592, %593 : vector<5x128xf32>
    %595 = vector.extract_strided_slice %594 {offsets = [0, 0], sizes = [5, 16], strides = [1, 1]} : vector<5x128xf32> to vector<5x16xf32>
    %c25 = arith.constant 25 : index
    %c0_308 = arith.constant 0 : index
    %596 = vector.load %arg17[%c25, %c0_308] : memref<200x16xf32, #tpu.memory_space<vmem>>, vector<5x16xf32>
    tpu.vector_store %arg17[%c25, %c0_308], %595 {strides = array<i32>} : memref<200x16xf32, #tpu.memory_space<vmem>>, vector<5x16xf32>,
    %c112_309 = arith.constant 112 : index
    %c0_310 = arith.constant 0 : index
    %597 = vector.load %arg16[%c112_309, %c0_310] : memref<168x128xf32, #tpu.memory_space<vmem>>, vector<5x128xf32>
    %c119 = arith.constant 119 : index
    %c0_311 = arith.constant 0 : index
    %598 = vector.load %arg16[%c119, %c0_311] : memref<168x128xf32, #tpu.memory_space<vmem>>, vector<5x128xf32>
    %599 = arith.maximumf %597, %598 : vector<5x128xf32>
    %600 = vector.extract_strided_slice %599 {offsets = [0, 0], sizes = [5, 16], strides = [1, 1]} : vector<5x128xf32> to vector<5x16xf32>
    %c30 = arith.constant 30 : index
    %c0_312 = arith.constant 0 : index
    %601 = vector.load %arg17[%c30, %c0_312] : memref<200x16xf32, #tpu.memory_space<vmem>>, vector<5x16xf32>
    tpu.vector_store %arg17[%c30, %c0_312], %600 {strides = array<i32>} : memref<200x16xf32, #tpu.memory_space<vmem>>, vector<5x16xf32>,
    %c126_313 = arith.constant 126 : index
    %c0_314 = arith.constant 0 : index
    %602 = vector.load %arg16[%c126_313, %c0_314] : memref<168x128xf32, #tpu.memory_space<vmem>>, vector<5x128xf32>
    %c133 = arith.constant 133 : index
    %c0_315 = arith.constant 0 : index
    %603 = vector.load %arg16[%c133, %c0_315] : memref<168x128xf32, #tpu.memory_space<vmem>>, vector<5x128xf32>
    %604 = arith.maximumf %602, %603 : vector<5x128xf32>
    %605 = vector.extract_strided_slice %604 {offsets = [0, 0], sizes = [5, 16], strides = [1, 1]} : vector<5x128xf32> to vector<5x16xf32>
    %c35_316 = arith.constant 35 : index
    %c0_317 = arith.constant 0 : index
    %606 = vector.load %arg17[%c35_316, %c0_317] : memref<200x16xf32, #tpu.memory_space<vmem>>, vector<5x16xf32>
    tpu.vector_store %arg17[%c35_316, %c0_317], %605 {strides = array<i32>} : memref<200x16xf32, #tpu.memory_space<vmem>>, vector<5x16xf32>,
    %c140_318 = arith.constant 140 : index
    %c0_319 = arith.constant 0 : index
    %607 = vector.load %arg16[%c140_318, %c0_319] : memref<168x128xf32, #tpu.memory_space<vmem>>, vector<5x128xf32>
    %c147 = arith.constant 147 : index
    %c0_320 = arith.constant 0 : index
    %608 = vector.load %arg16[%c147, %c0_320] : memref<168x128xf32, #tpu.memory_space<vmem>>, vector<5x128xf32>
    %609 = arith.maximumf %607, %608 : vector<5x128xf32>
    %610 = vector.extract_strided_slice %609 {offsets = [0, 0], sizes = [5, 16], strides = [1, 1]} : vector<5x128xf32> to vector<5x16xf32>
    %c40 = arith.constant 40 : index
    %c0_321 = arith.constant 0 : index
    %611 = vector.load %arg17[%c40, %c0_321] : memref<200x16xf32, #tpu.memory_space<vmem>>, vector<5x16xf32>
    tpu.vector_store %arg17[%c40, %c0_321], %610 {strides = array<i32>} : memref<200x16xf32, #tpu.memory_space<vmem>>, vector<5x16xf32>,
    %c154_322 = arith.constant 154 : index
    %c0_323 = arith.constant 0 : index
    %612 = vector.load %arg16[%c154_322, %c0_323] : memref<168x128xf32, #tpu.memory_space<vmem>>, vector<5x128xf32>
    %c161 = arith.constant 161 : index
    %c0_324 = arith.constant 0 : index
    %613 = vector.load %arg16[%c161, %c0_324] : memref<168x128xf32, #tpu.memory_space<vmem>>, vector<5x128xf32>
    %614 = arith.maximumf %612, %613 : vector<5x128xf32>
    %615 = vector.extract_strided_slice %614 {offsets = [0, 0], sizes = [5, 16], strides = [1, 1]} : vector<5x128xf32> to vector<5x16xf32>
    %c45 = arith.constant 45 : index
    %c0_325 = arith.constant 0 : index
    %616 = vector.load %arg17[%c45, %c0_325] : memref<200x16xf32, #tpu.memory_space<vmem>>, vector<5x16xf32>
    tpu.vector_store %arg17[%c45, %c0_325], %615 {strides = array<i32>} : memref<200x16xf32, #tpu.memory_space<vmem>>, vector<5x16xf32>,
    %c0_326 = arith.constant 0 : index
    %c0_327 = arith.constant 0 : index
    %617 = tpu.strided_load %arg17[%c0_326, %c0_327] {strides = array<i32: 25, 1>} : memref<200x16xf32, #tpu.memory_space<vmem>>, vector<8x16xf32>
    %618 = arith.truncf %617 : vector<8x16xf32> to vector<8x16xbf16>
    %c0_328 = arith.constant 0 : index
    %c0_329 = arith.constant 0 : index
    %c0_330 = arith.constant 0 : index
    %619 = vector.load %arg5[%c0_328, %c0_329, %c0_330] : memref<25x16x128xbf16, #tpu.memory_space<vmem>>, vector<1x16x128xbf16>
    %620 = vector.shape_cast %619 : vector<1x16x128xbf16> to vector<16x128xbf16>
    %cst_331 = arith.constant dense<0.000000e+00> : vector<8x128xf32>
    %621 = tpu.matmul %618, %620, %cst_331 {dimension_numbers = #tpu.dot_dimension_numbers<[1], [0], [0], [1], [0, 0, 1, 1], [], []>} : vector<8x16xbf16>, vector<16x128xbf16>, vector<8x128xf32> -> vector<8x128xf32>
    %c1_332 = arith.constant 1 : index
    %c0_333 = arith.constant 0 : index
    %622 = tpu.strided_load %arg17[%c1_332, %c0_333] {strides = array<i32: 25, 1>} : memref<200x16xf32, #tpu.memory_space<vmem>>, vector<8x16xf32>
    %623 = arith.truncf %622 : vector<8x16xf32> to vector<8x16xbf16>
    %c1_334 = arith.constant 1 : index
    %c0_335 = arith.constant 0 : index
    %c0_336 = arith.constant 0 : index
    %624 = vector.load %arg5[%c1_334, %c0_335, %c0_336] : memref<25x16x128xbf16, #tpu.memory_space<vmem>>, vector<1x16x128xbf16>
    %625 = vector.shape_cast %624 : vector<1x16x128xbf16> to vector<16x128xbf16>
    %cst_337 = arith.constant dense<0.000000e+00> : vector<8x128xf32>
    %626 = tpu.matmul %623, %625, %cst_337 {dimension_numbers = #tpu.dot_dimension_numbers<[1], [0], [0], [1], [0, 0, 1, 1], [], []>} : vector<8x16xbf16>, vector<16x128xbf16>, vector<8x128xf32> -> vector<8x128xf32>
    %627 = arith.addf %621, %626 : vector<8x128xf32>
    %c2_338 = arith.constant 2 : index
    %c0_339 = arith.constant 0 : index
    %628 = tpu.strided_load %arg17[%c2_338, %c0_339] {strides = array<i32: 25, 1>} : memref<200x16xf32, #tpu.memory_space<vmem>>, vector<8x16xf32>
    %629 = arith.truncf %628 : vector<8x16xf32> to vector<8x16xbf16>
    %c2_340 = arith.constant 2 : index
    %c0_341 = arith.constant 0 : index
    %c0_342 = arith.constant 0 : index
    %630 = vector.load %arg5[%c2_340, %c0_341, %c0_342] : memref<25x16x128xbf16, #tpu.memory_space<vmem>>, vector<1x16x128xbf16>
    %631 = vector.shape_cast %630 : vector<1x16x128xbf16> to vector<16x128xbf16>
    %cst_343 = arith.constant dense<0.000000e+00> : vector<8x128xf32>
    %632 = tpu.matmul %629, %631, %cst_343 {dimension_numbers = #tpu.dot_dimension_numbers<[1], [0], [0], [1], [0, 0, 1, 1], [], []>} : vector<8x16xbf16>, vector<16x128xbf16>, vector<8x128xf32> -> vector<8x128xf32>
    %633 = arith.addf %627, %632 : vector<8x128xf32>
    %c3_344 = arith.constant 3 : index
    %c0_345 = arith.constant 0 : index
    %634 = tpu.strided_load %arg17[%c3_344, %c0_345] {strides = array<i32: 25, 1>} : memref<200x16xf32, #tpu.memory_space<vmem>>, vector<8x16xf32>
    %635 = arith.truncf %634 : vector<8x16xf32> to vector<8x16xbf16>
    %c3_346 = arith.constant 3 : index
    %c0_347 = arith.constant 0 : index
    %c0_348 = arith.constant 0 : index
    %636 = vector.load %arg5[%c3_346, %c0_347, %c0_348] : memref<25x16x128xbf16, #tpu.memory_space<vmem>>, vector<1x16x128xbf16>
    %637 = vector.shape_cast %636 : vector<1x16x128xbf16> to vector<16x128xbf16>
    %cst_349 = arith.constant dense<0.000000e+00> : vector<8x128xf32>
    %638 = tpu.matmul %635, %637, %cst_349 {dimension_numbers = #tpu.dot_dimension_numbers<[1], [0], [0], [1], [0, 0, 1, 1], [], []>} : vector<8x16xbf16>, vector<16x128xbf16>, vector<8x128xf32> -> vector<8x128xf32>
    %639 = arith.addf %633, %638 : vector<8x128xf32>
    %c4_350 = arith.constant 4 : index
    %c0_351 = arith.constant 0 : index
    %640 = tpu.strided_load %arg17[%c4_350, %c0_351] {strides = array<i32: 25, 1>} : memref<200x16xf32, #tpu.memory_space<vmem>>, vector<8x16xf32>
    %641 = arith.truncf %640 : vector<8x16xf32> to vector<8x16xbf16>
    %c4_352 = arith.constant 4 : index
    %c0_353 = arith.constant 0 : index
    %c0_354 = arith.constant 0 : index
    %642 = vector.load %arg5[%c4_352, %c0_353, %c0_354] : memref<25x16x128xbf16, #tpu.memory_space<vmem>>, vector<1x16x128xbf16>
    %643 = vector.shape_cast %642 : vector<1x16x128xbf16> to vector<16x128xbf16>
    %cst_355 = arith.constant dense<0.000000e+00> : vector<8x128xf32>
    %644 = tpu.matmul %641, %643, %cst_355 {dimension_numbers = #tpu.dot_dimension_numbers<[1], [0], [0], [1], [0, 0, 1, 1], [], []>} : vector<8x16xbf16>, vector<16x128xbf16>, vector<8x128xf32> -> vector<8x128xf32>
    %645 = arith.addf %639, %644 : vector<8x128xf32>
    %c5_356 = arith.constant 5 : index
    %c0_357 = arith.constant 0 : index
    %646 = tpu.strided_load %arg17[%c5_356, %c0_357] {strides = array<i32: 25, 1>} : memref<200x16xf32, #tpu.memory_space<vmem>>, vector<8x16xf32>
    %647 = arith.truncf %646 : vector<8x16xf32> to vector<8x16xbf16>
    %c5_358 = arith.constant 5 : index
    %c0_359 = arith.constant 0 : index
    %c0_360 = arith.constant 0 : index
    %648 = vector.load %arg5[%c5_358, %c0_359, %c0_360] : memref<25x16x128xbf16, #tpu.memory_space<vmem>>, vector<1x16x128xbf16>
    %649 = vector.shape_cast %648 : vector<1x16x128xbf16> to vector<16x128xbf16>
    %cst_361 = arith.constant dense<0.000000e+00> : vector<8x128xf32>
    %650 = tpu.matmul %647, %649, %cst_361 {dimension_numbers = #tpu.dot_dimension_numbers<[1], [0], [0], [1], [0, 0, 1, 1], [], []>} : vector<8x16xbf16>, vector<16x128xbf16>, vector<8x128xf32> -> vector<8x128xf32>
    %651 = arith.addf %645, %650 : vector<8x128xf32>
    %c6 = arith.constant 6 : index
    %c0_362 = arith.constant 0 : index
    %652 = tpu.strided_load %arg17[%c6, %c0_362] {strides = array<i32: 25, 1>} : memref<200x16xf32, #tpu.memory_space<vmem>>, vector<8x16xf32>
    %653 = arith.truncf %652 : vector<8x16xf32> to vector<8x16xbf16>
    %c6_363 = arith.constant 6 : index
    %c0_364 = arith.constant 0 : index
    %c0_365 = arith.constant 0 : index
    %654 = vector.load %arg5[%c6_363, %c0_364, %c0_365] : memref<25x16x128xbf16, #tpu.memory_space<vmem>>, vector<1x16x128xbf16>
    %655 = vector.shape_cast %654 : vector<1x16x128xbf16> to vector<16x128xbf16>
    %cst_366 = arith.constant dense<0.000000e+00> : vector<8x128xf32>
    %656 = tpu.matmul %653, %655, %cst_366 {dimension_numbers = #tpu.dot_dimension_numbers<[1], [0], [0], [1], [0, 0, 1, 1], [], []>} : vector<8x16xbf16>, vector<16x128xbf16>, vector<8x128xf32> -> vector<8x128xf32>
    %657 = arith.addf %651, %656 : vector<8x128xf32>
    %c7_367 = arith.constant 7 : index
    %c0_368 = arith.constant 0 : index
    %658 = tpu.strided_load %arg17[%c7_367, %c0_368] {strides = array<i32: 25, 1>} : memref<200x16xf32, #tpu.memory_space<vmem>>, vector<8x16xf32>
    %659 = arith.truncf %658 : vector<8x16xf32> to vector<8x16xbf16>
    %c7_369 = arith.constant 7 : index
    %c0_370 = arith.constant 0 : index
    %c0_371 = arith.constant 0 : index
    %660 = vector.load %arg5[%c7_369, %c0_370, %c0_371] : memref<25x16x128xbf16, #tpu.memory_space<vmem>>, vector<1x16x128xbf16>
    %661 = vector.shape_cast %660 : vector<1x16x128xbf16> to vector<16x128xbf16>
    %cst_372 = arith.constant dense<0.000000e+00> : vector<8x128xf32>
    %662 = tpu.matmul %659, %661, %cst_372 {dimension_numbers = #tpu.dot_dimension_numbers<[1], [0], [0], [1], [0, 0, 1, 1], [], []>} : vector<8x16xbf16>, vector<16x128xbf16>, vector<8x128xf32> -> vector<8x128xf32>
    %663 = arith.addf %657, %662 : vector<8x128xf32>
    %c8 = arith.constant 8 : index
    %c0_373 = arith.constant 0 : index
    %664 = tpu.strided_load %arg17[%c8, %c0_373] {strides = array<i32: 25, 1>} : memref<200x16xf32, #tpu.memory_space<vmem>>, vector<8x16xf32>
    %665 = arith.truncf %664 : vector<8x16xf32> to vector<8x16xbf16>
    %c8_374 = arith.constant 8 : index
    %c0_375 = arith.constant 0 : index
    %c0_376 = arith.constant 0 : index
    %666 = vector.load %arg5[%c8_374, %c0_375, %c0_376] : memref<25x16x128xbf16, #tpu.memory_space<vmem>>, vector<1x16x128xbf16>
    %667 = vector.shape_cast %666 : vector<1x16x128xbf16> to vector<16x128xbf16>
    %cst_377 = arith.constant dense<0.000000e+00> : vector<8x128xf32>
    %668 = tpu.matmul %665, %667, %cst_377 {dimension_numbers = #tpu.dot_dimension_numbers<[1], [0], [0], [1], [0, 0, 1, 1], [], []>} : vector<8x16xbf16>, vector<16x128xbf16>, vector<8x128xf32> -> vector<8x128xf32>
    %669 = arith.addf %663, %668 : vector<8x128xf32>
    %c9 = arith.constant 9 : index
    %c0_378 = arith.constant 0 : index
    %670 = tpu.strided_load %arg17[%c9, %c0_378] {strides = array<i32: 25, 1>} : memref<200x16xf32, #tpu.memory_space<vmem>>, vector<8x16xf32>
    %671 = arith.truncf %670 : vector<8x16xf32> to vector<8x16xbf16>
    %c9_379 = arith.constant 9 : index
    %c0_380 = arith.constant 0 : index
    %c0_381 = arith.constant 0 : index
    %672 = vector.load %arg5[%c9_379, %c0_380, %c0_381] : memref<25x16x128xbf16, #tpu.memory_space<vmem>>, vector<1x16x128xbf16>
    %673 = vector.shape_cast %672 : vector<1x16x128xbf16> to vector<16x128xbf16>
    %cst_382 = arith.constant dense<0.000000e+00> : vector<8x128xf32>
    %674 = tpu.matmul %671, %673, %cst_382 {dimension_numbers = #tpu.dot_dimension_numbers<[1], [0], [0], [1], [0, 0, 1, 1], [], []>} : vector<8x16xbf16>, vector<16x128xbf16>, vector<8x128xf32> -> vector<8x128xf32>
    %675 = arith.addf %669, %674 : vector<8x128xf32>
    %c10_383 = arith.constant 10 : index
    %c0_384 = arith.constant 0 : index
    %676 = tpu.strided_load %arg17[%c10_383, %c0_384] {strides = array<i32: 25, 1>} : memref<200x16xf32, #tpu.memory_space<vmem>>, vector<8x16xf32>
    %677 = arith.truncf %676 : vector<8x16xf32> to vector<8x16xbf16>
    %c10_385 = arith.constant 10 : index
    %c0_386 = arith.constant 0 : index
    %c0_387 = arith.constant 0 : index
    %678 = vector.load %arg5[%c10_385, %c0_386, %c0_387] : memref<25x16x128xbf16, #tpu.memory_space<vmem>>, vector<1x16x128xbf16>
    %679 = vector.shape_cast %678 : vector<1x16x128xbf16> to vector<16x128xbf16>
    %cst_388 = arith.constant dense<0.000000e+00> : vector<8x128xf32>
    %680 = tpu.matmul %677, %679, %cst_388 {dimension_numbers = #tpu.dot_dimension_numbers<[1], [0], [0], [1], [0, 0, 1, 1], [], []>} : vector<8x16xbf16>, vector<16x128xbf16>, vector<8x128xf32> -> vector<8x128xf32>
    %681 = arith.addf %675, %680 : vector<8x128xf32>
    %c11 = arith.constant 11 : index
    %c0_389 = arith.constant 0 : index
    %682 = tpu.strided_load %arg17[%c11, %c0_389] {strides = array<i32: 25, 1>} : memref<200x16xf32, #tpu.memory_space<vmem>>, vector<8x16xf32>
    %683 = arith.truncf %682 : vector<8x16xf32> to vector<8x16xbf16>
    %c11_390 = arith.constant 11 : index
    %c0_391 = arith.constant 0 : index
    %c0_392 = arith.constant 0 : index
    %684 = vector.load %arg5[%c11_390, %c0_391, %c0_392] : memref<25x16x128xbf16, #tpu.memory_space<vmem>>, vector<1x16x128xbf16>
    %685 = vector.shape_cast %684 : vector<1x16x128xbf16> to vector<16x128xbf16>
    %cst_393 = arith.constant dense<0.000000e+00> : vector<8x128xf32>
    %686 = tpu.matmul %683, %685, %cst_393 {dimension_numbers = #tpu.dot_dimension_numbers<[1], [0], [0], [1], [0, 0, 1, 1], [], []>} : vector<8x16xbf16>, vector<16x128xbf16>, vector<8x128xf32> -> vector<8x128xf32>
    %687 = arith.addf %681, %686 : vector<8x128xf32>
    %c12 = arith.constant 12 : index
    %c0_394 = arith.constant 0 : index
    %688 = tpu.strided_load %arg17[%c12, %c0_394] {strides = array<i32: 25, 1>} : memref<200x16xf32, #tpu.memory_space<vmem>>, vector<8x16xf32>
    %689 = arith.truncf %688 : vector<8x16xf32> to vector<8x16xbf16>
    %c12_395 = arith.constant 12 : index
    %c0_396 = arith.constant 0 : index
    %c0_397 = arith.constant 0 : index
    %690 = vector.load %arg5[%c12_395, %c0_396, %c0_397] : memref<25x16x128xbf16, #tpu.memory_space<vmem>>, vector<1x16x128xbf16>
    %691 = vector.shape_cast %690 : vector<1x16x128xbf16> to vector<16x128xbf16>
    %cst_398 = arith.constant dense<0.000000e+00> : vector<8x128xf32>
    %692 = tpu.matmul %689, %691, %cst_398 {dimension_numbers = #tpu.dot_dimension_numbers<[1], [0], [0], [1], [0, 0, 1, 1], [], []>} : vector<8x16xbf16>, vector<16x128xbf16>, vector<8x128xf32> -> vector<8x128xf32>
    %693 = arith.addf %687, %692 : vector<8x128xf32>
    %c13 = arith.constant 13 : index
    %c0_399 = arith.constant 0 : index
    %694 = tpu.strided_load %arg17[%c13, %c0_399] {strides = array<i32: 25, 1>} : memref<200x16xf32, #tpu.memory_space<vmem>>, vector<8x16xf32>
    %695 = arith.truncf %694 : vector<8x16xf32> to vector<8x16xbf16>
    %c13_400 = arith.constant 13 : index
    %c0_401 = arith.constant 0 : index
    %c0_402 = arith.constant 0 : index
    %696 = vector.load %arg5[%c13_400, %c0_401, %c0_402] : memref<25x16x128xbf16, #tpu.memory_space<vmem>>, vector<1x16x128xbf16>
    %697 = vector.shape_cast %696 : vector<1x16x128xbf16> to vector<16x128xbf16>
    %cst_403 = arith.constant dense<0.000000e+00> : vector<8x128xf32>
    %698 = tpu.matmul %695, %697, %cst_403 {dimension_numbers = #tpu.dot_dimension_numbers<[1], [0], [0], [1], [0, 0, 1, 1], [], []>} : vector<8x16xbf16>, vector<16x128xbf16>, vector<8x128xf32> -> vector<8x128xf32>
    %699 = arith.addf %693, %698 : vector<8x128xf32>
    %c14_404 = arith.constant 14 : index
    %c0_405 = arith.constant 0 : index
    %700 = tpu.strided_load %arg17[%c14_404, %c0_405] {strides = array<i32: 25, 1>} : memref<200x16xf32, #tpu.memory_space<vmem>>, vector<8x16xf32>
    %701 = arith.truncf %700 : vector<8x16xf32> to vector<8x16xbf16>
    %c14_406 = arith.constant 14 : index
    %c0_407 = arith.constant 0 : index
    %c0_408 = arith.constant 0 : index
    %702 = vector.load %arg5[%c14_406, %c0_407, %c0_408] : memref<25x16x128xbf16, #tpu.memory_space<vmem>>, vector<1x16x128xbf16>
    %703 = vector.shape_cast %702 : vector<1x16x128xbf16> to vector<16x128xbf16>
    %cst_409 = arith.constant dense<0.000000e+00> : vector<8x128xf32>
    %704 = tpu.matmul %701, %703, %cst_409 {dimension_numbers = #tpu.dot_dimension_numbers<[1], [0], [0], [1], [0, 0, 1, 1], [], []>} : vector<8x16xbf16>, vector<16x128xbf16>, vector<8x128xf32> -> vector<8x128xf32>
    %705 = arith.addf %699, %704 : vector<8x128xf32>
    %c15_410 = arith.constant 15 : index
    %c0_411 = arith.constant 0 : index
    %706 = tpu.strided_load %arg17[%c15_410, %c0_411] {strides = array<i32: 25, 1>} : memref<200x16xf32, #tpu.memory_space<vmem>>, vector<8x16xf32>
    %707 = arith.truncf %706 : vector<8x16xf32> to vector<8x16xbf16>
    %c15_412 = arith.constant 15 : index
    %c0_413 = arith.constant 0 : index
    %c0_414 = arith.constant 0 : index
    %708 = vector.load %arg5[%c15_412, %c0_413, %c0_414] : memref<25x16x128xbf16, #tpu.memory_space<vmem>>, vector<1x16x128xbf16>
    %709 = vector.shape_cast %708 : vector<1x16x128xbf16> to vector<16x128xbf16>
    %cst_415 = arith.constant dense<0.000000e+00> : vector<8x128xf32>
    %710 = tpu.matmul %707, %709, %cst_415 {dimension_numbers = #tpu.dot_dimension_numbers<[1], [0], [0], [1], [0, 0, 1, 1], [], []>} : vector<8x16xbf16>, vector<16x128xbf16>, vector<8x128xf32> -> vector<8x128xf32>
    %711 = arith.addf %705, %710 : vector<8x128xf32>
    %c16 = arith.constant 16 : index
    %c0_416 = arith.constant 0 : index
    %712 = tpu.strided_load %arg17[%c16, %c0_416] {strides = array<i32: 25, 1>} : memref<200x16xf32, #tpu.memory_space<vmem>>, vector<8x16xf32>
    %713 = arith.truncf %712 : vector<8x16xf32> to vector<8x16xbf16>
    %c16_417 = arith.constant 16 : index
    %c0_418 = arith.constant 0 : index
    %c0_419 = arith.constant 0 : index
    %714 = vector.load %arg5[%c16_417, %c0_418, %c0_419] : memref<25x16x128xbf16, #tpu.memory_space<vmem>>, vector<1x16x128xbf16>
    %715 = vector.shape_cast %714 : vector<1x16x128xbf16> to vector<16x128xbf16>
    %cst_420 = arith.constant dense<0.000000e+00> : vector<8x128xf32>
    %716 = tpu.matmul %713, %715, %cst_420 {dimension_numbers = #tpu.dot_dimension_numbers<[1], [0], [0], [1], [0, 0, 1, 1], [], []>} : vector<8x16xbf16>, vector<16x128xbf16>, vector<8x128xf32> -> vector<8x128xf32>
    %717 = arith.addf %711, %716 : vector<8x128xf32>
    %c17 = arith.constant 17 : index
    %c0_421 = arith.constant 0 : index
    %718 = tpu.strided_load %arg17[%c17, %c0_421] {strides = array<i32: 25, 1>} : memref<200x16xf32, #tpu.memory_space<vmem>>, vector<8x16xf32>
    %719 = arith.truncf %718 : vector<8x16xf32> to vector<8x16xbf16>
    %c17_422 = arith.constant 17 : index
    %c0_423 = arith.constant 0 : index
    %c0_424 = arith.constant 0 : index
    %720 = vector.load %arg5[%c17_422, %c0_423, %c0_424] : memref<25x16x128xbf16, #tpu.memory_space<vmem>>, vector<1x16x128xbf16>
    %721 = vector.shape_cast %720 : vector<1x16x128xbf16> to vector<16x128xbf16>
    %cst_425 = arith.constant dense<0.000000e+00> : vector<8x128xf32>
    %722 = tpu.matmul %719, %721, %cst_425 {dimension_numbers = #tpu.dot_dimension_numbers<[1], [0], [0], [1], [0, 0, 1, 1], [], []>} : vector<8x16xbf16>, vector<16x128xbf16>, vector<8x128xf32> -> vector<8x128xf32>
    %723 = arith.addf %717, %722 : vector<8x128xf32>
    %c18 = arith.constant 18 : index
    %c0_426 = arith.constant 0 : index
    %724 = tpu.strided_load %arg17[%c18, %c0_426] {strides = array<i32: 25, 1>} : memref<200x16xf32, #tpu.memory_space<vmem>>, vector<8x16xf32>
    %725 = arith.truncf %724 : vector<8x16xf32> to vector<8x16xbf16>
    %c18_427 = arith.constant 18 : index
    %c0_428 = arith.constant 0 : index
    %c0_429 = arith.constant 0 : index
    %726 = vector.load %arg5[%c18_427, %c0_428, %c0_429] : memref<25x16x128xbf16, #tpu.memory_space<vmem>>, vector<1x16x128xbf16>
    %727 = vector.shape_cast %726 : vector<1x16x128xbf16> to vector<16x128xbf16>
    %cst_430 = arith.constant dense<0.000000e+00> : vector<8x128xf32>
    %728 = tpu.matmul %725, %727, %cst_430 {dimension_numbers = #tpu.dot_dimension_numbers<[1], [0], [0], [1], [0, 0, 1, 1], [], []>} : vector<8x16xbf16>, vector<16x128xbf16>, vector<8x128xf32> -> vector<8x128xf32>
    %729 = arith.addf %723, %728 : vector<8x128xf32>
    %c19 = arith.constant 19 : index
    %c0_431 = arith.constant 0 : index
    %730 = tpu.strided_load %arg17[%c19, %c0_431] {strides = array<i32: 25, 1>} : memref<200x16xf32, #tpu.memory_space<vmem>>, vector<8x16xf32>
    %731 = arith.truncf %730 : vector<8x16xf32> to vector<8x16xbf16>
    %c19_432 = arith.constant 19 : index
    %c0_433 = arith.constant 0 : index
    %c0_434 = arith.constant 0 : index
    %732 = vector.load %arg5[%c19_432, %c0_433, %c0_434] : memref<25x16x128xbf16, #tpu.memory_space<vmem>>, vector<1x16x128xbf16>
    %733 = vector.shape_cast %732 : vector<1x16x128xbf16> to vector<16x128xbf16>
    %cst_435 = arith.constant dense<0.000000e+00> : vector<8x128xf32>
    %734 = tpu.matmul %731, %733, %cst_435 {dimension_numbers = #tpu.dot_dimension_numbers<[1], [0], [0], [1], [0, 0, 1, 1], [], []>} : vector<8x16xbf16>, vector<16x128xbf16>, vector<8x128xf32> -> vector<8x128xf32>
    %735 = arith.addf %729, %734 : vector<8x128xf32>
    %c20_436 = arith.constant 20 : index
    %c0_437 = arith.constant 0 : index
    %736 = tpu.strided_load %arg17[%c20_436, %c0_437] {strides = array<i32: 25, 1>} : memref<200x16xf32, #tpu.memory_space<vmem>>, vector<8x16xf32>
    %737 = arith.truncf %736 : vector<8x16xf32> to vector<8x16xbf16>
    %c20_438 = arith.constant 20 : index
    %c0_439 = arith.constant 0 : index
    %c0_440 = arith.constant 0 : index
    %738 = vector.load %arg5[%c20_438, %c0_439, %c0_440] : memref<25x16x128xbf16, #tpu.memory_space<vmem>>, vector<1x16x128xbf16>
    %739 = vector.shape_cast %738 : vector<1x16x128xbf16> to vector<16x128xbf16>
    %cst_441 = arith.constant dense<0.000000e+00> : vector<8x128xf32>
    %740 = tpu.matmul %737, %739, %cst_441 {dimension_numbers = #tpu.dot_dimension_numbers<[1], [0], [0], [1], [0, 0, 1, 1], [], []>} : vector<8x16xbf16>, vector<16x128xbf16>, vector<8x128xf32> -> vector<8x128xf32>
    %741 = arith.addf %735, %740 : vector<8x128xf32>
    %c21_442 = arith.constant 21 : index
    %c0_443 = arith.constant 0 : index
    %742 = tpu.strided_load %arg17[%c21_442, %c0_443] {strides = array<i32: 25, 1>} : memref<200x16xf32, #tpu.memory_space<vmem>>, vector<8x16xf32>
    %743 = arith.truncf %742 : vector<8x16xf32> to vector<8x16xbf16>
    %c21_444 = arith.constant 21 : index
    %c0_445 = arith.constant 0 : index
    %c0_446 = arith.constant 0 : index
    %744 = vector.load %arg5[%c21_444, %c0_445, %c0_446] : memref<25x16x128xbf16, #tpu.memory_space<vmem>>, vector<1x16x128xbf16>
    %745 = vector.shape_cast %744 : vector<1x16x128xbf16> to vector<16x128xbf16>
    %cst_447 = arith.constant dense<0.000000e+00> : vector<8x128xf32>
    %746 = tpu.matmul %743, %745, %cst_447 {dimension_numbers = #tpu.dot_dimension_numbers<[1], [0], [0], [1], [0, 0, 1, 1], [], []>} : vector<8x16xbf16>, vector<16x128xbf16>, vector<8x128xf32> -> vector<8x128xf32>
    %747 = arith.addf %741, %746 : vector<8x128xf32>
    %c22 = arith.constant 22 : index
    %c0_448 = arith.constant 0 : index
    %748 = tpu.strided_load %arg17[%c22, %c0_448] {strides = array<i32: 25, 1>} : memref<200x16xf32, #tpu.memory_space<vmem>>, vector<8x16xf32>
    %749 = arith.truncf %748 : vector<8x16xf32> to vector<8x16xbf16>
    %c22_449 = arith.constant 22 : index
    %c0_450 = arith.constant 0 : index
    %c0_451 = arith.constant 0 : index
    %750 = vector.load %arg5[%c22_449, %c0_450, %c0_451] : memref<25x16x128xbf16, #tpu.memory_space<vmem>>, vector<1x16x128xbf16>
    %751 = vector.shape_cast %750 : vector<1x16x128xbf16> to vector<16x128xbf16>
    %cst_452 = arith.constant dense<0.000000e+00> : vector<8x128xf32>
    %752 = tpu.matmul %749, %751, %cst_452 {dimension_numbers = #tpu.dot_dimension_numbers<[1], [0], [0], [1], [0, 0, 1, 1], [], []>} : vector<8x16xbf16>, vector<16x128xbf16>, vector<8x128xf32> -> vector<8x128xf32>
    %753 = arith.addf %747, %752 : vector<8x128xf32>
    %c23 = arith.constant 23 : index
    %c0_453 = arith.constant 0 : index
    %754 = tpu.strided_load %arg17[%c23, %c0_453] {strides = array<i32: 25, 1>} : memref<200x16xf32, #tpu.memory_space<vmem>>, vector<8x16xf32>
    %755 = arith.truncf %754 : vector<8x16xf32> to vector<8x16xbf16>
    %c23_454 = arith.constant 23 : index
    %c0_455 = arith.constant 0 : index
    %c0_456 = arith.constant 0 : index
    %756 = vector.load %arg5[%c23_454, %c0_455, %c0_456] : memref<25x16x128xbf16, #tpu.memory_space<vmem>>, vector<1x16x128xbf16>
    %757 = vector.shape_cast %756 : vector<1x16x128xbf16> to vector<16x128xbf16>
    %cst_457 = arith.constant dense<0.000000e+00> : vector<8x128xf32>
    %758 = tpu.matmul %755, %757, %cst_457 {dimension_numbers = #tpu.dot_dimension_numbers<[1], [0], [0], [1], [0, 0, 1, 1], [], []>} : vector<8x16xbf16>, vector<16x128xbf16>, vector<8x128xf32> -> vector<8x128xf32>
    %759 = arith.addf %753, %758 : vector<8x128xf32>
    %c24 = arith.constant 24 : index
    %c0_458 = arith.constant 0 : index
    %760 = tpu.strided_load %arg17[%c24, %c0_458] {strides = array<i32: 25, 1>} : memref<200x16xf32, #tpu.memory_space<vmem>>, vector<8x16xf32>
    %761 = arith.truncf %760 : vector<8x16xf32> to vector<8x16xbf16>
    %c24_459 = arith.constant 24 : index
    %c0_460 = arith.constant 0 : index
    %c0_461 = arith.constant 0 : index
    %762 = vector.load %arg5[%c24_459, %c0_460, %c0_461] : memref<25x16x128xbf16, #tpu.memory_space<vmem>>, vector<1x16x128xbf16>
    %763 = vector.shape_cast %762 : vector<1x16x128xbf16> to vector<16x128xbf16>
    %cst_462 = arith.constant dense<0.000000e+00> : vector<8x128xf32>
    %764 = tpu.matmul %761, %763, %cst_462 {dimension_numbers = #tpu.dot_dimension_numbers<[1], [0], [0], [1], [0, 0, 1, 1], [], []>} : vector<8x16xbf16>, vector<16x128xbf16>, vector<8x128xf32> -> vector<8x128xf32>
    %765 = arith.addf %759, %764 : vector<8x128xf32>
    %c0_463 = arith.constant 0 : index
    %c0_464 = arith.constant 0 : index
    %766 = vector.load %arg6[%c0_463, %c0_464] : memref<1x128xf32, #tpu.memory_space<vmem>>, vector<1x128xf32>
    %767 = vector.broadcast %766 : vector<1x128xf32> to vector<8x128xf32>
    %768 = arith.addf %765, %767 : vector<8x128xf32>
    %cst_465 = arith.constant 0.000000e+00 : f32
    %769 = vector.broadcast %cst_465 : f32 to vector<8x128xf32>
    %770 = arith.maximumf %768, %769 : vector<8x128xf32>
    %771 = arith.truncf %770 : vector<8x128xf32> to vector<8x128xbf16>
    %c0_466 = arith.constant 0 : index
    %c0_467 = arith.constant 0 : index
    %772 = vector.load %arg7[%c0_466, %c0_467] : memref<128x128xbf16, #tpu.memory_space<vmem>>, vector<128x128xbf16>
    %cst_468 = arith.constant dense<0.000000e+00> : vector<8x128xf32>
    %773 = tpu.matmul %771, %772, %cst_468 {dimension_numbers = #tpu.dot_dimension_numbers<[1], [0], [0], [1], [0, 0, 1, 1], [], []>} : vector<8x128xbf16>, vector<128x128xbf16>, vector<8x128xf32> -> vector<8x128xf32>
    %c0_469 = arith.constant 0 : index
    %c0_470 = arith.constant 0 : index
    %774 = vector.load %arg8[%c0_469, %c0_470] : memref<1x128xf32, #tpu.memory_space<vmem>>, vector<1x128xf32>
    %775 = vector.broadcast %774 : vector<1x128xf32> to vector<8x128xf32>
    %776 = arith.addf %773, %775 : vector<8x128xf32>
    %cst_471 = arith.constant 0.000000e+00 : f32
    %777 = vector.broadcast %cst_471 : f32 to vector<8x128xf32>
    %778 = arith.maximumf %776, %777 : vector<8x128xf32>
    %779 = arith.truncf %778 : vector<8x128xf32> to vector<8x128xbf16>
    %c0_472 = arith.constant 0 : index
    %c0_473 = arith.constant 0 : index
    %780 = vector.load %arg9[%c0_472, %c0_473] : memref<128x128xbf16, #tpu.memory_space<vmem>>, vector<128x128xbf16>
    %cst_474 = arith.constant dense<0.000000e+00> : vector<8x128xf32>
    %781 = tpu.matmul %779, %780, %cst_474 {dimension_numbers = #tpu.dot_dimension_numbers<[1], [0], [0], [1], [0, 0, 1, 1], [], []>} : vector<8x128xbf16>, vector<128x128xbf16>, vector<8x128xf32> -> vector<8x128xf32>
    %c0_475 = arith.constant 0 : index
    %c0_476 = arith.constant 0 : index
    %782 = vector.load %arg10[%c0_475, %c0_476] : memref<1x128xf32, #tpu.memory_space<vmem>>, vector<1x128xf32>
    %783 = vector.broadcast %782 : vector<1x128xf32> to vector<8x128xf32>
    %784 = arith.addf %781, %783 : vector<8x128xf32>
    %c0_477 = arith.constant 0 : index
    %c0_478 = arith.constant 0 : index
    %785 = vector.load %arg11[%c0_477, %c0_478] : memref<8x128xf32, #tpu.memory_space<vmem>>, vector<8x128xf32>
    tpu.vector_store %arg11[%c0_477, %c0_478], %784 {strides = array<i32>} : memref<8x128xf32, #tpu.memory_space<vmem>>, vector<8x128xf32>,
    return
  }
}

</mosaic_0001>

<bundles_post_ra>
// kernel: _fused_forward.1
= control target key start
LH: loop header
LB: loop body
LE: loop exit
PB: predicated region body
PF: predicated region fallthrough
CT: control target
= control target key end

     0   :  { %vm2642_vm0 = vcmask 1046528   ;;  %s9982_s21 = smov 8   ;;  %vm2654_vm1 = vcmask 1045504   ;;  %s9983_s23 = smov 16   ;;  %vm2667_vm2 = vcmask 1044480   ;;  %vm2681_vm3 = vcmask 1043456   ;;  %s13141_s1 = inlined_call_operand.vmem [shape: bf16[128,128], index: 1, kind: input, shape index: {}]   ;;  %s13142_s0 = inlined_call_operand.vmem [shape: bf16[1584,128], index: 0, kind: input, shape index: {}]   ;;  %s13143_s2 = inlined_call_operand.vmem [shape: f32[1,128], index: 2, kind: input, shape index: {}]   ;;  %s13144_s3 = inlined_call_operand.vmem [shape: bf16[5,48,128], index: 3, kind: input, shape index: {}]   ;;  %s13145_s5 = inlined_call_operand.vmem [shape: bf16[25,16,128], index: 5, kind: input, shape index: {}]   ;;  %s13146_s4 = inlined_call_operand.vmem [shape: f32[1,128], index: 4, kind: input, shape index: {}]   ;;  %s13147_s7 = inlined_call_operand.vmem [shape: bf16[128,128], index: 7, kind: input, shape index: {}]   ;;  %s13148_s9 = inlined_call_operand.vmem [shape: bf16[128,128], index: 9, kind: input, shape index: {}]   ;;  %s13149_s6 = inlined_call_operand.vmem [shape: f32[1,128], index: 6, kind: input, shape index: {}]   ;;  %s13150_s8 = inlined_call_operand.vmem [shape: f32[1,128], index: 8, kind: input, shape index: {}]   ;;  %s13151_s10 = inlined_call_operand.vmem [shape: f32[1,128], index: 10, kind: input, shape index: {}]   ;;  %s13152_s11 = inlined_call_operand.vmem [shape: f32[8,128], index: 11, kind: output, shape index: {}]  }
   0x1   :  { %v9780_v0 = vld [vmem:[%s13141_s1 + $0x38] sm:$0xff]   ;;  %v9782_v2 = vld [vmem:[%s13141_s1 + $0x30] sm:$0xff]   ;;  %v9784_v4 = vld [vmem:[%s13141_s1 + $0x28] sm:$0xff]   ;;  %s9984_s30 = smov 24   ;;  %s9985_s20 = smov 32   ;;  %vm9987_vm4 = vmmov 0  }
   0x2   :  { %v9781_v1 = vld [vmem:[%s13141_s1 + $0x38] sm:$0xff]   ;;  %8902 = vmatprep.subr.bf16.mxu0 %v9780_v0  ;;  %v9783_v3 = vld [vmem:[%s13141_s1 + $0x30] sm:$0xff]   ;;  %v9785_v5 = vld [vmem:[%s13141_s1 + $0x28] sm:$0xff]   ;;  %vm2695_vm5 = vcmask 392192   ;;  %vm2697_vm6 = vcmask 390144   ;;  %vm6516_vm7 = vcmask 130048  }
   0x3   :  { %9018 = vmatprep.subr.bf16.mxu1 %v9781_v1  ;;  %8903 = vmatpush3.bf16.msra.mxu0 %v9780_v0  ;;  %v9786_v6 = vld [vmem:[%s13141_s1 + $0x20] sm:$0xff]   ;;  %v9788_v8 = vld [vmem:[%s13141_s1 + $0x18] sm:$0xff]   ;;  %v9790_v10 = vld [vmem:[%s13141_s1 + $0x10] sm:$0xff]   ;;  %vm6545_vm8 = vcmask 126976  }
   0x4   :  { %9019 = vmatpush3.bf16.msra.mxu1 %v9781_v1  ;;  %8904 = vmatprep.subr.bf16.mxu0 %v9782_v2  ;;  %v9787_v7 = vld [vmem:[%s13141_s1 + $0x20] sm:$0xff]   ;;  %v9789_v9 = vld [vmem:[%s13141_s1 + $0x18] sm:$0xff]   ;;  %v9791_v11 = vld [vmem:[%s13141_s1 + $0x10] sm:$0xff]  }
   0x5   :  { %9020 = vmatprep.subr.bf16.mxu1 %v9783_v3  ;;  %v9796_v12 = vld [vmem:[%s13142_s0] sm:$0xff]   ;;  %v9797_v13 = vld [vmem:[%s13142_s0 + $0x18c] sm:$0xff]   ;;  %v9799_v19 = vld [vmem:[%s13142_s0 + $0x194] sm:$0xff]  }
   0x6   :  { %8918 = vmatprep.mubr.bf16.mxu0 %v9796_v12  ;;  %9034 = vmatprep.mubr.bf16.mxu1 %v9797_v13  ;;  %v9792_v14 = vld [vmem:[%s13141_s1 + $0x8] sm:$0xff]   ;;  %v9794_v16 = vld [vmem:[%s13141_s1] sm:$0xff]   ;;  %v9800_v20 = vld [vmem:[%s13142_s0 + $0x10] sm:$0xff]  }
   0x7   :  { %8905 = vmatpush3.bf16.msra.mxu0 %v9782_v2  ;;  %v9793_v15 = vld [vmem:[%s13141_s1 + $0x8] sm:$0xff]   ;;  %v9795_v17 = vld [vmem:[%s13141_s1] sm:$0xff]   ;;  %v9802_v22 = vld [vmem:[%s13142_s0 + $0x18] sm:$0xff]  }
   0x8   :  { %9021 = vmatpush3.bf16.msra.mxu1 %v9783_v3  ;;  %8906 = vmatprep.subr.bf16.mxu0 %v9784_v4  ;;  %v9798_v18 = vld [vmem:[%s13142_s0 + $0x8] sm:$0xff]   ;;  %v9801_v21 = vld [vmem:[%s13142_s0 + $0x19c] sm:$0xff]   ;;  %v9807_v27 = vld [vmem:[%s13142_s0 + $0x1b4] sm:$0xff]  }
   0x9   :  { %9022 = vmatprep.subr.bf16.mxu1 %v9785_v5  ;;  %v9803_v23 = vld [vmem:[%s13142_s0 + $0x1a4] sm:$0xff]   ;;  %v9805_v25 = vld [vmem:[%s13142_s0 + $0x1ac] sm:$0xff]   ;;  %v9809_v29 = vld [vmem:[%s13142_s0 + $0x1bc] sm:$0xff]  }
   0xa   :  { %v9804_v24 = vld [vmem:[%s13142_s0 + $0x20] sm:$0xff]   ;;  %v9806_v26 = vld [vmem:[%s13142_s0 + $0x28] sm:$0xff]   ;;  %v9808_v28 = vld [vmem:[%s13142_s0 + $0x30] sm:$0xff]  }
   0xb   :  { %8907 = vmatpush3.bf16.msra.mxu0 %v9784_v4  ;;  %v9810_v30 = vld [vmem:[%s13142_s0 + $0x38] sm:$0xff]   ;;  %v9811_v31 = vld [vmem:[%s13142_s0 + $0x1c4] sm:$0xff]   ;;  %v9813_v33 = vld [vmem:[%s13142_s0 + $0x1cc] sm:$0xff]  }
   0xc   :  { %9023 = vmatpush3.bf16.msra.mxu1 %v9785_v5  ;;  %8908 = vmatprep.subr.bf16.mxu0 %v9786_v6  ;;  %v9812_v32 = vld [vmem:[%s13142_s0 + $0x40] sm:$0xff]   ;;  %v9814_v34 = vld [vmem:[%s13142_s0 + $0x48] sm:$0xff]   ;;  %v9815_v35 = vld [vmem:[%s13142_s0 + $0x1d4] sm:$0xff]  }
   0xd   :  { %9024 = vmatprep.subr.bf16.mxu1 %v9787_v7  ;;  %v9816_v36 = vld [vmem:[%s13142_s0 + $0x50] sm:$0xff]   ;;  %v9817_v37 = vld [vmem:[%s13142_s0 + $0x1dc] sm:$0xff]   ;;  %v9819_v39 = vld [vmem:[%s13142_s0 + $0x1e4] sm:$0xff]  }
   0xe   :  { %v9818_v38 = vld [vmem:[%s13142_s0 + $0x58] sm:$0xff]   ;;  %v9820_v40 = vld [vmem:[%s13142_s0 + $0x60] sm:$0xff]   ;;  %v9821_v41 = vld [vmem:[%s13142_s0 + $0x1ec] sm:$0xff]  }
   0xf   :  { %8909 = vmatpush3.bf16.msra.mxu0 %v9786_v6  ;;  %v9822_v42 = vld [vmem:[%s13142_s0 + $0x68] sm:$0xff]   ;;  %v9823_v43 = vld [vmem:[%s13142_s0 + $0x1f4] sm:$0xff]   ;;  %v9825_v45 = vld [vmem:[%s13142_s0 + $0x1fc] sm:$0xff]  }
  0x10   :  { %9025 = vmatpush3.bf16.msra.mxu1 %v9787_v7  ;;  %8910 = vmatprep.subr.bf16.mxu0 %v9788_v8  ;;  %v9824_v44 = vld [vmem:[%s13142_s0 + $0x70] sm:$0xff]   ;;  %v9826_v46 = vld [vmem:[%s13142_s0 + $0x78] sm:$0xff]   ;;  %v9827_v47 = vld [vmem:[%s13142_s0 + $0x204] sm:$0xff]  }
  0x11   :  { %9026 = vmatprep.subr.bf16.mxu1 %v9789_v9  ;;  %v9828_v48 = vld [vmem:[%s13142_s0 + $0x80] sm:$0xff]   ;;  %v9829_v49 = vld [vmem:[%s13142_s0 + $0x20c] sm:$0xff]   ;;  %v9831_v51 = vld [vmem:[%s13142_s0 + $0x214] sm:$0xff]  }
  0x12   :  { %v9830_v50 = vld [vmem:[%s13142_s0 + $0x88] sm:$0xff]   ;;  %v9832_v52 = vld [vmem:[%s13142_s0 + $0x90] sm:$0xff]   ;;  %v9833_v53 = vld [vmem:[%s13142_s0 + $0x21c] sm:$0xff]  }
  0x13   :  { %8911 = vmatpush3.bf16.msra.mxu0 %v9788_v8  ;;  %v9834_v54 = vld [vmem:[%s13142_s0 + $0x98] sm:$0xff]   ;;  %v9835_v55 = vld [vmem:[%s13142_s0 + $0x224] sm:$0xff]   ;;  %v9837_v57 = vld [vmem:[%s13142_s0 + $0x22c] sm:$0xff]  }
  0x14   :  { %9027 = vmatpush3.bf16.msra.mxu1 %v9789_v9  ;;  %8912 = vmatprep.subr.bf16.mxu0 %v9790_v10  ;;  %v9836_v56 = vld [vmem:[%s13142_s0 + $0xa0] sm:$0xff]   ;;  %v9838_v58 = vld [vmem:[%s13142_s0 + $0xa8] sm:$0xff]   ;;  %v9839_v59 = vld [vmem:[%s13142_s0 + $0x234] sm:$0xff]  }
  0x15   :  { %9028 = vmatprep.subr.bf16.mxu1 %v9791_v11  ;;  %v9840_v60 = vld [vmem:[%s13142_s0 + $0xb0] sm:$0xff]   ;;  %v9841_v61 = vld [vmem:[%s13142_s0 + $0x23c] sm:$0xff]   ;;  %v9843_v63 = vld [vmem:[%s13142_s0 + $0x244] sm:$0xff]  }
  0x16   :  { %v9842_v62 = vld [vmem:[%s13142_s0 + $0xb8] sm:$0xff]   ;;  %v9844_v0 = vld [vmem:[%s13142_s0 + $0xc0] sm:$0xff]   ;;  %v9845_v1 = vld [vmem:[%s13142_s0 + $0x24c] sm:$0xff]  }
  0x17   :  { %8913 = vmatpush3.bf16.msra.mxu0 %v9790_v10  ;;  %v9846_v2 = vld [vmem:[%s13142_s0 + $0xc8] sm:$0xff]   ;;  %v9847_v3 = vld [vmem:[%s13142_s0 + $0x254] sm:$0xff]   ;;  %v9849_v5 = vld [vmem:[%s13142_s0 + $0x25c] sm:$0xff]  }
  0x18   :  { %9029 = vmatpush3.bf16.msra.mxu1 %v9791_v11  ;;  %8914 = vmatprep.subr.bf16.mxu0 %v9792_v14  ;;  %v9848_v4 = vld [vmem:[%s13142_s0 + $0xd0] sm:$0xff]   ;;  %v9850_v6 = vld [vmem:[%s13142_s0 + $0xd8] sm:$0xff]   ;;  %v9851_v7 = vld [vmem:[%s13142_s0 + $0x264] sm:$0xff]  }
  0x19   :  { %9030 = vmatprep.subr.bf16.mxu1 %v9793_v15  ;;  %v9852_v8 = vld [vmem:[%s13142_s0 + $0xe0] sm:$0xff]   ;;  %v9853_v9 = vld [vmem:[%s13142_s0 + $0x26c] sm:$0xff]   ;;  %v9855_v11 = vld [vmem:[%s13142_s0 + $0x274] sm:$0xff]  }
  0x1a   :  { %v9854_v10 = vld [vmem:[%s13142_s0 + $0xe8] sm:$0xff]   ;;  %v9856_v12 = vld [vmem:[%s13142_s0 + $0xf0] sm:$0xff]   ;;  %v9857_v13 = vld [vmem:[%s13142_s0 + $0x27c] sm:$0xff]  }
  0x1b   :  { %8915 = vmatpush3.bf16.msra.mxu0 %v9792_v14  ;;  %v9858_v14 = vld [vmem:[%s13142_s0 + $0xf8] sm:$0xff]  }
  0x1c   :  { %9031 = vmatpush3.bf16.msra.mxu1 %v9793_v15  ;;  %8916 = vmatprep.subr.bf16.mxu0 %v9794_v16  ;;  %v9859_v15 = vld [vmem:[%s13142_s0 + $0x284] sm:$0xff]  }
  0x1d   :  { %9032 = vmatprep.subr.bf16.mxu1 %v9795_v17 }
  0x1f   :  { %8917 = vmatpush3.bf16.msra.mxu0 %v9794_v16  ;;  %v9860_v16 = vld [vmem:[%s13142_s0 + $0x100] sm:$0xff]  }
  0x20   :  { %9033 = vmatpush3.bf16.msra.mxu1 %v9795_v17  ;;  %v9861_v17 = vld [vmem:[%s13142_s0 + $0x28c] sm:$0xff]  }
  0x22   :  { %8919 = vmatmul.mubr.bf16.vlgmr.msra.gmra.mxu0 %v9798_v18  ;;  %v9862_v18 = vld [vmem:[%s13142_s0 + $0x108] sm:$0xff]  }
  0x23   :  { %9035 = vmatmul.mubr.bf16.vlgmr.msra.gmra.mxu1 %v9799_v19  ;;  %8922 = vmatprep.mubr.bf16.mxu0 %v9800_v20  ;;  %v9863_v19 = vld [vmem:[%s13142_s0 + $0x294] sm:$0xff]  }
  0x24   :  { %9038 = vmatprep.mubr.bf16.mxu1 %v9801_v21  ;;  %v9864_v20 = vld [vmem:[%s13142_s0 + $0x110] sm:$0xff]   ;;  %v9865_v21 = vld [vmem:[%s13142_s0 + $0x29c] sm:$0xff]  }
  0x2a   :  { %8923 = vmatmul.mubr.bf16.gmra.mxu0 %v9802_v22  ;;  %v9866_v22 = vld [vmem:[%s13142_s0 + $0x118] sm:$0xff]  }
  0x2b   :  { %9039 = vmatmul.mubr.bf16.gmra.mxu1 %v9803_v23  ;;  %8926 = vmatprep.mubr.bf16.mxu0 %v9804_v24  ;;  %v9867_v23 = vld [vmem:[%s13142_s0 + $0x2a4] sm:$0xff]  }
  0x2c   :  { %9042 = vmatprep.mubr.bf16.mxu1 %v9805_v25  ;;  %v9868_v24 = vld [vmem:[%s13142_s0 + $0x120] sm:$0xff]   ;;  %v9869_v25 = vld [vmem:[%s13142_s0 + $0x2ac] sm:$0xff]  }
  0x32   :  { %8927 = vmatmul.mubr.bf16.gmra.mxu0 %v9806_v26  ;;  %v9870_v26 = vld [vmem:[%s13142_s0 + $0x128] sm:$0xff]  }
  0x33   :  { %9043 = vmatmul.mubr.bf16.gmra.mxu1 %v9807_v27  ;;  %8930 = vmatprep.mubr.bf16.mxu0 %v9808_v28  ;;  %v9871_v27 = vld [vmem:[%s13142_s0 + $0x2b4] sm:$0xff]  }
  0x34   :  { %9046 = vmatprep.mubr.bf16.mxu1 %v9809_v29  ;;  %v9872_v28 = vld [vmem:[%s13142_s0 + $0x130] sm:$0xff]   ;;  %v9873_v29 = vld [vmem:[%s13142_s0 + $0x2bc] sm:$0xff]  }
  0x3a   :  { %8931 = vmatmul.mubr.bf16.gmra.mxu0 %v9810_v30  ;;  %v9874_v30 = vld [vmem:[%s13142_s0 + $0x138] sm:$0xff]  }
  0x3b   :  { %9047 = vmatmul.mubr.bf16.gmra.mxu1 %v9811_v31  ;;  %8934 = vmatprep.mubr.bf16.mxu0 %v9812_v32  ;;  %v9875_v31 = vld [vmem:[%s13142_s0 + $0x2c4] sm:$0xff]  }
  0x3c   :  { %9050 = vmatprep.mubr.bf16.mxu1 %v9813_v33  ;;  %v9876_v32 = vld [vmem:[%s13142_s0 + $0x140] sm:$0xff]   ;;  %v9877_v33 = vld [vmem:[%s13142_s0 + $0x2cc] sm:$0xff]  }
  0x42   :  { %8935 = vmatmul.mubr.bf16.gmra.mxu0 %v9814_v34  ;;  %v10345_v34 = vld [vmem:[%s13143_s2] ss:$0 sm:$0xff] }
  0x43   :  { %9051 = vmatmul.mubr.bf16.gmra.mxu1 %v9815_v35  ;;  %8938 = vmatprep.mubr.bf16.mxu0 %v9816_v36  ;;  %v9878_v36 = vld [vmem:[%s13142_s0 + $0x148] sm:$0xff]  }
  0x44   :  { %9054 = vmatprep.mubr.bf16.mxu1 %v9817_v37  ;;  %v9879_v37 = vld [vmem:[%s13142_s0 + $0x2d4] sm:$0xff]  }
  0x4a   :  { %8939 = vmatmul.mubr.bf16.gmra.mxu0 %v9818_v38 }
  0x4b   :  { %9055 = vmatmul.mubr.bf16.gmra.mxu1 %v9819_v39  ;;  %8942 = vmatprep.mubr.bf16.mxu0 %v9820_v40 }
  0x4c   :  { %9058 = vmatprep.mubr.bf16.mxu1 %v9821_v41 }
  0x52   :  { %8943 = vmatmul.mubr.bf16.gmra.mxu0 %v9822_v42 }
  0x53   :  { %9059 = vmatmul.mubr.bf16.gmra.mxu1 %v9823_v43  ;;  %8946 = vmatprep.mubr.bf16.mxu0 %v9824_v44 }
  0x54   :  { %9062 = vmatprep.mubr.bf16.mxu1 %v9825_v45 }
  0x5a   :  { %8947 = vmatmul.mubr.bf16.gmra.mxu0 %v9826_v46 }
  0x5b   :  { %9063 = vmatmul.mubr.bf16.gmra.mxu1 %v9827_v47  ;;  %8950 = vmatprep.mubr.bf16.mxu0 %v9828_v48 }
  0x5c   :  { %9066 = vmatprep.mubr.bf16.mxu1 %v9829_v49 }
  0x62   :  { %8951 = vmatmul.mubr.bf16.gmra.mxu0 %v9830_v50 }
  0x63   :  { %9067 = vmatmul.mubr.bf16.gmra.mxu1 %v9831_v51  ;;  %8954 = vmatprep.mubr.bf16.mxu0 %v9832_v52 }
  0x64   :  { %9070 = vmatprep.mubr.bf16.mxu1 %v9833_v53 }
  0x6a   :  { %8955 = vmatmul.mubr.bf16.gmra.mxu0 %v9834_v54 }
  0x6b   :  { %9071 = vmatmul.mubr.bf16.gmra.mxu1 %v9835_v55  ;;  %8958 = vmatprep.mubr.bf16.mxu0 %v9836_v56 }
  0x6c   :  { %9074 = vmatprep.mubr.bf16.mxu1 %v9837_v57 }
  0x72   :  { %8959 = vmatmul.mubr.bf16.gmra.mxu0 %v9838_v58 }
  0x73   :  { %9075 = vmatmul.mubr.bf16.gmra.mxu1 %v9839_v59  ;;  %8962 = vmatprep.mubr.bf16.mxu0 %v9840_v60 }
  0x74   :  { %9078 = vmatprep.mubr.bf16.mxu1 %v9841_v61 }
  0x7a   :  { %8963 = vmatmul.mubr.bf16.gmra.mxu0 %v9842_v62 }
  0x7b   :  { %9079 = vmatmul.mubr.bf16.gmra.mxu1 %v9843_v63  ;;  %8966 = vmatprep.mubr.bf16.mxu0 %v9844_v0 }
  0x7c   :  { %9082 = vmatprep.mubr.bf16.mxu1 %v9845_v1 }
  0x82   :  { %8967 = vmatmul.mubr.bf16.gmra.mxu0 %v9846_v2 }
  0x83   :  { %9083 = vmatmul.mubr.bf16.gmra.mxu1 %v9847_v3  ;;  %8970 = vmatprep.mubr.bf16.mxu0 %v9848_v4 }
  0x84   :  { %9086 = vmatprep.mubr.bf16.mxu1 %v9849_v5 }
  0x8a   :  { %8971 = vmatmul.mubr.bf16.gmra.mxu0 %v9850_v6 }
  0x8b   :  { %9087 = vmatmul.mubr.bf16.gmra.mxu1 %v9851_v7  ;;  %8974 = vmatprep.mubr.bf16.mxu0 %v9852_v8 }
  0x8c   :  { %9090 = vmatprep.mubr.bf16.mxu1 %v9853_v9 }
  0x92   :  { %8975 = vmatmul.mubr.bf16.gmra.mxu0 %v9854_v10 }
  0x93   :  { %9091 = vmatmul.mubr.bf16.gmra.mxu1 %v9855_v11  ;;  %8978 = vmatprep.mubr.bf16.mxu0 %v9856_v12 }
  0x94   :  { %9094 = vmatprep.mubr.bf16.mxu1 %v9857_v13 }
  0x9a   :  { %8979 = vmatmul.mubr.bf16.gmra.mxu0 %v9858_v14 }
  0x9b   :  { %9095 = vmatmul.mubr.bf16.gmra.mxu1 %v9859_v15  ;;  %8982 = vmatprep.mubr.bf16.mxu0 %v9860_v16 }
  0x9c   :  { %9098 = vmatprep.mubr.bf16.mxu1 %v9861_v17 }
  0xa2   :  { %8983 = vmatmul.mubr.bf16.gmra.mxu0 %v9862_v18 }
  0xa3   :  { %9099 = vmatmul.mubr.bf16.gmra.mxu1 %v9863_v19  ;;  %8986 = vmatprep.mubr.bf16.mxu0 %v9864_v20 }
  0xa4   :  { %9102 = vmatprep.mubr.bf16.mxu1 %v9865_v21 }
  0xaa   :  { %8987 = vmatmul.mubr.bf16.gmra.mxu0 %v9866_v22 }
  0xab   :  { %9103 = vmatmul.mubr.bf16.gmra.mxu1 %v9867_v23  ;;  %8990 = vmatprep.mubr.bf16.mxu0 %v9868_v24 }
  0xac   :  { %9106 = vmatprep.mubr.bf16.mxu1 %v9869_v25 }
  0xb2   :  { %8991 = vmatmul.mubr.bf16.gmra.mxu0 %v9870_v26 }
  0xb3   :  { %9107 = vmatmul.mubr.bf16.gmra.mxu1 %v9871_v27  ;;  %8994 = vmatprep.mubr.bf16.mxu0 %v9872_v28 }
  0xb4   :  { %9110 = vmatprep.mubr.bf16.mxu1 %v9873_v29 }
  0xba   :  { %8995 = vmatmul.mubr.bf16.gmra.mxu0 %v9874_v30 }
  0xbb   :  { %9111 = vmatmul.mubr.bf16.gmra.mxu1 %v9875_v31  ;;  %8998 = vmatprep.mubr.bf16.mxu0 %v9876_v32 }
  0xbc   :  { %9114 = vmatprep.mubr.bf16.mxu1 %v9877_v33 }
  0xc2   :  { %8999 = vmatmul.mubr.bf16.gmra.mxu0 %v9878_v36 }
  0xc3   :  { %9115 = vmatmul.mubr.bf16.gmra.mxu1 %v9879_v37 }
  0xe2   :  { %v8920_v35 = vpop.f32.mrf.mxu0 }
  0xe3   :  { %v550_v38 = vadd.f32 %v8920_v35, %v10345_v34  ;;  %v9036_v39 = vpop.f32.mrf.mxu1 }
  0xe4   :  { %v1648_v40 = vadd.f32 %v9036_v39, %v10345_v34  ;;  %v541_v41 = vpop.f32.mrf.mxu0 }
  0xe5   :  { %v941_v42 = vmax.f32 %v550_v38, 0.0  ;;  %v542_v43 = vadd.f32 %v10345_v34, %v541_v41  ;;  %v1639_v44 = vpop.f32.mrf.mxu1 }
  0xe6   :  { %v2039_v45 = vmax.f32 %v1648_v40, 0.0  ;;  %v1640_v46 = vadd.f32 %v10345_v34, %v1639_v44  ;;  %v8921_v47 = vpop.f32.mrf.mxu0 }
  0xe7   :  { %v939_v48 = vmax.f32 %v542_v43, 0.0  ;;  %v553_v49 = vadd.f32 %v8921_v47, %v10345_v34  ;;  %v9037_v50 = vpop.f32.mrf.mxu1 }
  0xe8   :  { %v2435_v51 = vmax.f32 %v941_v42, %v2039_v45  ;;  %v2037_v52 = vmax.f32 %v1640_v46, 0.0  ;;  %v1651_v53 = vadd.f32 %v9037_v50, %v10345_v34  ;;  %v544_v54 = vpop.f32.mrf.mxu0 }
  0xe9   :  { %v942_v55 = vmax.f32 %v553_v49, 0.0  ;;  %v545_v56 = vadd.f32 %v10345_v34, %v544_v54  ;;  %v1642_v57 = vpop.f32.mrf.mxu1 }
  0xea   :  { %2534 = vst [vmem:[#allocation3 + $0x10] sm:$0xff] %v2435_v51  ;;  %v10360_v58 = vmax.f32 %v939_v48, %v2037_v52  ;;  %v2040_v59 = vmax.f32 %v1651_v53, 0.0  ;;  %v1643_v60 = vadd.f32 %v10345_v34, %v1642_v57  ;;  %v8924_v61 = vpop.f32.mrf.mxu0 }
  0xeb   :  { %v940_v62 = vmax.f32 %v545_v56, 0.0  ;;  %v566_v63 = vadd.f32 %v8924_v61, %v10345_v34  ;;  %v9040_v0 = vpop.f32.mrf.mxu1 }
  0xec   :  { %v2436_v1 = vmax.f32 %v942_v55, %v2040_v59  ;;  %v2038_v2 = vmax.f32 %v1643_v60, 0.0  ;;  %v1664_v3 = vadd.f32 %v9040_v0, %v10345_v34  ;;  %v557_v4 = vpop.f32.mrf.mxu0 }
  0xed   :  { %v945_v5 = vmax.f32 %v566_v63, 0.0  ;;  %v558_v6 = vadd.f32 %v10345_v34, %v557_v4  ;;  %v1655_v7 = vpop.f32.mrf.mxu1 }
  0xee   :  { %2535 = vst [vmem:[#allocation3 + $0x18] sm:$0xff] %v2436_v1  ;;  %v2434_v8 = vmax.f32 %v940_v62, %v2038_v2  ;;  %v2043_v9 = vmax.f32 %v1664_v3, 0.0  ;;  %v1656_v10 = vadd.f32 %v10345_v34, %v1655_v7  ;;  %v8925_v11 = vpop.f32.mrf.mxu0 }
  0xef   :  { %v943_v12 = vmax.f32 %v558_v6, 0.0  ;;  %v569_v13 = vadd.f32 %v8925_v11, %v10345_v34  ;;  %v9041_v14 = vpop.f32.mrf.mxu1 }
  0xf0   :  { %2533 = vst [vmem:[#allocation3 + $0x8] sm:$0xff] %v2434_v8  ;;  %v2439_v15 = vmax.f32 %v945_v5, %v2043_v9  ;;  %v2041_v16 = vmax.f32 %v1656_v10, 0.0  ;;  %v1667_v17 = vadd.f32 %v9041_v14, %v10345_v34  ;;  %v560_v18 = vpop.f32.mrf.mxu0  ;;  %v9880_v10 = vld [vmem:[%s13142_s0 + $0x150] sm:$0xff]  }
  0xf1   :  { %v946_v19 = vmax.f32 %v569_v13, 0.0  ;;  %v561_v20 = vadd.f32 %v10345_v34, %v560_v18  ;;  %v1658_v21 = vpop.f32.mrf.mxu1  ;;  %9002 = vmatprep.mubr.bf16.mxu0 %v9880_v10 }
  0xf2   :  { %2538 = vst [vmem:[#allocation3 + $0x30] sm:$0xff] %v2439_v15  ;;  %v2437_v22 = vmax.f32 %v943_v12, %v2041_v16  ;;  %v2044_v23 = vmax.f32 %v1667_v17, 0.0  ;;  %v1659_v24 = vadd.f32 %v10345_v34, %v1658_v21  ;;  %v8928_v25 = vpop.f32.mrf.mxu0  ;;  %v9881_v16 = vld [vmem:[%s13142_s0 + $0x2dc] sm:$0xff]  }
  0xf3   :  { %v944_v26 = vmax.f32 %v561_v20, 0.0  ;;  %v582_v27 = vadd.f32 %v8928_v25, %v10345_v34  ;;  %v9044_v28 = vpop.f32.mrf.mxu1  ;;  %v9882_v17 = vld [vmem:[%s13142_s0 + $0x158] sm:$0xff]   ;;  %9118 = vmatprep.mubr.bf16.mxu1 %v9881_v16 }
  0xf4   :  { %2536 = vst [vmem:[#allocation3 + $0x20] sm:$0xff] %v2437_v22  ;;  %v10372_v29 = vmax.f32 %v946_v19, %v2044_v23  ;;  %v2042_v30 = vmax.f32 %v1659_v24, 0.0  ;;  %v1680_v31 = vadd.f32 %v9044_v28, %v10345_v34  ;;  %v573_v32 = vpop.f32.mrf.mxu0  ;;  %9003 = vmatmul.mubr.bf16.gmra.mxu0 %v9882_v17 }
  0xf5   :  { %v949_v33 = vmax.f32 %v582_v27, 0.0  ;;  %v574_v35 = vadd.f32 %v10345_v34, %v573_v32  ;;  %v1671_v36 = vpop.f32.mrf.mxu1  ;;  %v2635_v37 = vld [vmem:[#allocation3 + $0x16] sm:$0xff] }
  0xf6   :  { %2539 = vst [vmem:[#allocation3 + $0x38] sm:$0xff] %v10372_v29  ;;  %v2438_v38 = vmax.f32 %v944_v26, %v2042_v30  ;;  %v2047_v39 = vmax.f32 %v1680_v31, 0.0  ;;  %v1672_v40 = vadd.f32 %v10345_v34, %v1671_v36  ;;  %v8929_v41 = vpop.f32.mrf.mxu0  ;;  %v10378_v42 = vmax.f32 %v2434_v8, %v2635_v37 }
  0xf7   :  { %v947_v43 = vmax.f32 %v574_v35, 0.0  ;;  %v585_v44 = vadd.f32 %v8929_v41, %v10345_v34  ;;  %v9045_v45 = vpop.f32.mrf.mxu1  ;;  %v2634_v46 = vld [vmem:[#allocation3 + $0xe] sm:$0xff] }
  0xf8   :  { %2537 = vst [vmem:[#allocation3 + $0x28] sm:$0xff] %v2438_v38  ;;  %v2443_v47 = vmax.f32 %v949_v33, %v2047_v39  ;;  %v2045_v48 = vmax.f32 %v1672_v40, 0.0  ;;  %v1683_v49 = vadd.f32 %v9045_v45, %v10345_v34  ;;  %v576_v50 = vpop.f32.mrf.mxu0  ;;  %v2644_v51 = vrot.slane %v10378_v42, 1  ;;  %v9883_v33 = vld [vmem:[%s13142_s0 + $0x2e4] sm:$0xff]  }
  0xf9   :  { %v950_v52 = vmax.f32 %v585_v44, 0.0  ;;  %v577_v53 = vadd.f32 %v10345_v34, %v576_v50  ;;  %v1674_v54 = vpop.f32.mrf.mxu1  ;;  %v10385_v55 = vmax.f32 %v10360_v58, %v2634_v46  ;;  %v2656_v5 = vrot.slane %v10378_v42, 2  ;;  %9119 = vmatmul.mubr.bf16.gmra.mxu1 %v9883_v33 }
  0xfa   :  { %2542 = vst [vmem:[#allocation3 + $0x50] sm:$0xff] %v2443_v47  ;;  %v10387_v56 = vmax.f32 %v947_v43, %v2045_v48  ;;  %v2048_v57 = vmax.f32 %v1683_v49, 0.0  ;;  %v1675_v59 = vadd.f32 %v10345_v34, %v1674_v54  ;;  %v8932_v60 = vpop.f32.mrf.mxu0  ;;  %2650 = vrot.lane.b32.xlu1 %v2644_v51, %s9982_s21 }
  0xfb   :  { %v948_v61 = vmax.f32 %v577_v53, 0.0  ;;  %v598_v62 = vadd.f32 %v8932_v60, %v10345_v34  ;;  %v9048_v63 = vpop.f32.mrf.mxu1  ;;  %v2643_v0 = vrot.slane %v10385_v55, 1  ;;  %v2655_v58 = vrot.slane %v10385_v55, 2  ;;  %v2699_v15 = vld [vmem:[#allocation3 + $0x1c] sm:$0xff] }
  0xfc   :  { %2540 = vst [vmem:[#allocation3 + $0x40] sm:$0xff] %v10387_v56  ;;  %v2444_v1 = vmax.f32 %v950_v52, %v2048_v57  ;;  %v2046_v2 = vmax.f32 %v1675_v59, 0.0  ;;  %v1696_v3 = vadd.f32 %v9048_v63, %v10345_v34  ;;  %v589_v4 = vpop.f32.mrf.mxu0 }
  0xfd   :  { %v953_v6 = vmax.f32 %v598_v62, 0.0  ;;  %v590_v7 = vadd.f32 %v10345_v34, %v589_v4  ;;  %v1687_v8 = vpop.f32.mrf.mxu1  ;;  %v2645_v9 = vsel %vm2642_vm0, %v2643_v0, %v2644_v51  ;;  %v2657_v21 = vsel %vm2654_vm1, %v2655_v58, %v2656_v5  ;;  %v2703_v30 = vld [vmem:[#allocation3 + $0x32] sm:$0xff]  ;;  %v2704_v32 = vld [vmem:[#allocation3 + $0x3a] sm:$0x3] }
  0xfe   :  { %2543 = vst [vmem:[#allocation3 + $0x58] sm:$0xff] %v2444_v1  ;;  %v2442_v11 = vmax.f32 %v948_v61, %v2046_v2  ;;  %v2051_v12 = vmax.f32 %v1696_v3, 0.0  ;;  %v1688_v13 = vadd.f32 %v10345_v34, %v1687_v8  ;;  %2648 = vrot.lane.b32.xlu0 %v2645_v9, %s9982_s21  ;;  %v8933_v14 = vpop.f32.mrf.mxu0  ;;  %2662 = vrot.lane.b32.xlu1 %v2656_v5, %s9983_s23 }
  0xff   :  { %v951_v18 = vmax.f32 %v590_v7, 0.0  ;;  %v601_v19 = vadd.f32 %v8933_v14, %v10345_v34  ;;  %v9049_v20 = vpop.f32.mrf.mxu1  ;;  %v2700_v22 = vld [vmem:[#allocation3 + $0x24] sm:$0xff]  ;;  %v2701_v24 = vld [vmem:[#allocation3 + $0x2c] sm:$0x3] }
 0x100   :  { %v2702_v23 = vld [vmem:[#allocation3 + $0x2a] sm:$0xff]  ;;  %2541 = vst [vmem:[#allocation3 + $0x48] sm:$0xff] %v2442_v11  ;;  %v10413_v25 = vmax.f32 %v953_v6, %v2051_v12  ;;  %v2049_v26 = vmax.f32 %v1688_v13, 0.0  ;;  %v1699_v27 = vadd.f32 %v9049_v20, %v10345_v34  ;;  %v592_v28 = vpop.f32.mrf.mxu0  ;;  %v10422_v38 = vmax.f32 %v2700_v22, %v2703_v30 }
 0x101   :  { %v10416_v31 = vmax.f32 %v2699_v15, %v2702_v23  ;;  %v954_v35 = vmax.f32 %v601_v19, 0.0  ;;  %v593_v36 = vadd.f32 %v10345_v34, %v592_v28  ;;  %v1690_v37 = vpop.f32.mrf.mxu1  ;;  %v10424_v39 = vmax.f32 %v2701_v24, %v2704_v32  ;;  %v9884_v32 = vld [vmem:[%s13142_s0 + $0x160] sm:$0xff]  }
 0x102   :  { %2546 = vst [vmem:[#allocation3 + $0x70] sm:$0xff] %v10413_v25  ;;  %v2445_v40 = vmax.f32 %v951_v18, %v2049_v26  ;;  %v2052_v41 = vmax.f32 %v1699_v27, 0.0  ;;  %v1691_v43 = vadd.f32 %v10345_v34, %v1690_v37  ;;  %2660 = vrot.lane.b32.xlu0 %v2657_v21, %s9983_s23  ;;  %v8936_v44 = vpop.f32.mrf.mxu0  ;;  %v2722_v49 = vrot.slane %v10422_v38, 2  ;;  %9006 = vmatprep.mubr.bf16.mxu0 %v9884_v32 }
 0x103   :  { %v2721_v45 = vrot.slane %v10416_v31, 2  ;;  %v952_v46 = vmax.f32 %v593_v36, 0.0  ;;  %v614_v47 = vadd.f32 %v8936_v44, %v10345_v34  ;;  %v9052_v48 = vpop.f32.mrf.mxu1  ;;  %v2711_v50 = vrot.slane %v10422_v38, 1 }
 0x104   :  { %2544 = vst [vmem:[#allocation3 + $0x60] sm:$0xff] %v2445_v40  ;;  %v10433_v51 = vmax.f32 %v954_v35, %v2052_v41  ;;  %v2050_v52 = vmax.f32 %v1691_v43, 0.0  ;;  %v1712_v53 = vadd.f32 %v9052_v48, %v10345_v34  ;;  %v605_v54 = vpop.f32.mrf.mxu0  ;;  %v2734_v57 = vrot.slane %v10422_v38, 3  ;;  %v9885_v41 = vld [vmem:[%s13142_s0 + $0x2ec] sm:$0xff]   ;;  %v9887_v43 = vld [vmem:[%s13142_s0 + $0x2f4] sm:$0xff]  }
 0x105   :  { %v957_v59 = vmax.f32 %v614_v47, 0.0  ;;  %v606_v60 = vadd.f32 %v10345_v34, %v605_v54  ;;  %v1703_v61 = vpop.f32.mrf.mxu1  ;;  %v2723_v62 = vsel %vm2654_vm1, %v2721_v45, %v2722_v49  ;;  %v2736_v63 = vrot.slane %v10424_v39, 3  ;;  %9122 = vmatprep.mubr.bf16.mxu1 %v9885_v41 }
 0x106   :  { %2547 = vst [vmem:[#allocation3 + $0x78] sm:$0xff] %v10433_v51  ;;  %v2446_v0 = vmax.f32 %v952_v46, %v2050_v52  ;;  %v2055_v58 = vmax.f32 %v1712_v53, 0.0  ;;  %v1704_v1 = vadd.f32 %v10345_v34, %v1703_v61  ;;  %2726 = vrot.lane.b32.xlu1 %v2723_v62, %s9983_s23  ;;  %2717 = vrot.lane.b32.xlu0 %v2711_v50, %s9982_s21  ;;  %v8937_v2 = vpop.f32.mrf.mxu0  ;;  %v2746_v3 = vrot.slane %v10416_v31, 4 }
 0x107   :  { %v955_v4 = vmax.f32 %v606_v60, 0.0  ;;  %v617_v5 = vadd.f32 %v8937_v2, %v10345_v34  ;;  %v9053_v6 = vpop.f32.mrf.mxu1  ;;  %v2747_v7 = vrot.slane %v10422_v38, 4  ;;  %v2764_v8 = vld [vmem:[#allocation3 + $0x46] sm:$0xff]  ;;  %v2737_v13 = vsel %vm2667_vm2, %v2734_v57, %v2736_v63  ;;  %v2765_v14 = vld [vmem:[#allocation3 + $0x4e] sm:$0xff]  ;;  %9123 = vmatmul.mubr.bf16.gmra.mxu1 %v9887_v43 }
 0x108   :  { %2545 = vst [vmem:[#allocation3 + $0x68] sm:$0xff] %v2446_v0  ;;  %v2451_v9 = vmax.f32 %v957_v59, %v2055_v58  ;;  %v2053_v10 = vmax.f32 %v1704_v1, 0.0  ;;  %v1715_v11 = vadd.f32 %v9053_v6, %v10345_v34  ;;  %v608_v12 = vpop.f32.mrf.mxu0  ;;  %v2710_v18 = vrot.slane %v10416_v31, 1 }
 0x109   :  { %v958_v15 = vmax.f32 %v617_v5, 0.0  ;;  %v609_v16 = vadd.f32 %v10345_v34, %v608_v12  ;;  %v1706_v17 = vpop.f32.mrf.mxu1  ;;  %v10456_v19 = vmax.f32 %v10372_v29, %v2764_v8  ;;  %v2748_v24 = vsel %vm2681_vm3, %v2746_v3, %v2747_v7 }
 0x10a   :  { %2550 = vst [vmem:[#allocation3 + $0x90] sm:$0xff] %v2451_v9  ;;  %v2449_v20 = vmax.f32 %v955_v4, %v2053_v10  ;;  %v2056_v21 = vmax.f32 %v1715_v11, 0.0  ;;  %v1707_v22 = vadd.f32 %v10345_v34, %v1706_v17  ;;  %2742 = vrot.lane.b32.xlu1 %v2737_v13, %s9984_s30  ;;  %2728 = vrot.lane.b32.xlu0 %v2722_v49, %s9983_s23  ;;  %v8940_v23 = vpop.f32.mrf.mxu0  ;;  %v2733_v40 = vrot.slane %v10416_v31, 3  ;;  %v9888_v9 = vld [vmem:[%s13142_s0 + $0x170] sm:$0xff]  }
 0x10b   :  { %v956_v26 = vmax.f32 %v609_v16, 0.0  ;;  %v630_v27 = vadd.f32 %v8940_v23, %v10345_v34  ;;  %v9056_v29 = vpop.f32.mrf.mxu1  ;;  %v10466_v28 = vmax.f32 %v10387_v56, %v2765_v14  ;;  %v2772_v30 = vrot.slane %v10456_v19, 1  ;;  %v9886_v56 = vld [vmem:[%s13142_s0 + $0x168] sm:$0xff]   ;;  %v2823_v16 = vld [vmem:[#allocation3 + $0x54] sm:$0xff]  ;;  %v2824_v23 = vld [vmem:[#allocation3 + $0x5c] sm:$0xff] }
 0x10c   :  { %2548 = vst [vmem:[#allocation3 + $0x80] sm:$0xff] %v2449_v20  ;;  %v2452_v33 = vmax.f32 %v958_v15, %v2056_v21  ;;  %v2054_v35 = vmax.f32 %v1707_v22, 0.0  ;;  %v1728_v36 = vadd.f32 %v9056_v29, %v10345_v34  ;;  %v621_v37 = vpop.f32.mrf.mxu0  ;;  %v2712_v45 = vsel %vm2642_vm0, %v2710_v18, %v2711_v50  ;;  %9007 = vmatmul.mubr.bf16.gmra.mxu0 %v9886_v56  ;;  %v9889_v18 = vld [vmem:[%s13142_s0 + $0x178] sm:$0xff]  }
 0x10d   :  { %v961_v44 = vmax.f32 %v630_v27, 0.0  ;;  %v622_v46 = vadd.f32 %v10345_v34, %v621_v37  ;;  %v1719_v47 = vpop.f32.mrf.mxu1  ;;  %v2773_v48 = vrot.slane %v10466_v28, 1  ;;  %v2735_v61 = vsel %vm2667_vm2, %v2733_v40, %v2734_v57  ;;  %9010 = vmatprep.mubr.bf16.mxu0 %v9888_v9 }
 0x10e   :  { %2551 = vst [vmem:[#allocation3 + $0x98] sm:$0xff] %v2452_v33  ;;  %v2450_v49 = vmax.f32 %v956_v26, %v2054_v35  ;;  %v2059_v52 = vmax.f32 %v1728_v36, 0.0  ;;  %2753 = vrot.lane.b32.xlu1 %v2748_v24, %s9985_s20  ;;  %2715 = vrot.lane.b32.xlu0 %v2712_v45, %s9982_s21  ;;  %v1720_v53 = vadd.f32 %v10345_v34, %v1719_v47  ;;  %v8941_v54 = vpop.f32.mrf.mxu0  ;;  %v2783_v62 = vrot.slane %v10456_v19, 2  ;;  %v2763_v45 = vld [vmem:[#allocation3 + $0x48] sm:$0x3] }
 0x10f   :  { %v959_v59 = vmax.f32 %v622_v46, 0.0  ;;  %v633_v50 = vadd.f32 %v8941_v54, %v10345_v34  ;;  %v9057_v60 = vpop.f32.mrf.mxu1  ;;  %v2774_v1 = vsel %vm2642_vm0, %v2772_v30, %v2773_v48  ;;  %v2784_v5 = vrot.slane %v10466_v28, 2  ;;  %v2826_v8 = vld [vmem:[#allocation3 + $0x62] sm:$0xff]  ;;  %v2827_v13 = vld [vmem:[#allocation3 + $0x6a] sm:$0xff] }
 0x110   :  { %2549 = vst [vmem:[#allocation3 + $0x88] sm:$0xff] %v2450_v49  ;;  %v10496_v63 = vmax.f32 %v961_v44, %v2059_v52  ;;  %v2057_v0 = vmax.f32 %v1720_v53, 0.0  ;;  %v1731_v58 = vadd.f32 %v9057_v60, %v10345_v34  ;;  %v624_v2 = vpop.f32.mrf.mxu0  ;;  %v2749_v6 = vrot.slane %v10424_v39, 4 }
 0x111   :  { %v962_v3 = vmax.f32 %v633_v50, 0.0  ;;  %v625_v4 = vadd.f32 %v10345_v34, %v624_v2  ;;  %v1722_v57 = vpop.f32.mrf.mxu1  ;;  %v2808_v39 = vrot.slane %v10456_v19, 4  ;;  %v2809_v22 = vrot.slane %v10466_v28, 4 }
 0x112   :  { %2554 = vst [vmem:[#allocation3 + $0xb0] sm:$0xff] %v10496_v63  ;;  %v2453_v10 = vmax.f32 %v959_v59, %v2057_v0  ;;  %v2060_v11 = vmax.f32 %v1731_v58, 0.0  ;;  %2777 = vrot.lane.b32.xlu1 %v2774_v1, %s9982_s21  ;;  %2740 = vrot.lane.b32.xlu0 %v2735_v61, %s9984_s30  ;;  %v1723_v12 = vadd.f32 %v10345_v34, %v1722_v57  ;;  %v8944_v14 = vpop.f32.mrf.mxu0  ;;  %v9891_v59 = vld [vmem:[%s13142_s0 + $0x180] sm:$0xff]   ;;  %v2795_v60 = vrot.slane %v10456_v19, 3  ;;  %v2766_v0 = vld [vmem:[#allocation3 + $0x56] sm:$0x3] }
 0x113   :  { %v960_v15 = vmax.f32 %v625_v4, 0.0  ;;  %v9060_v17 = vpop.f32.mrf.mxu1  ;;  %v10517_v24 = vmax.f32 %v2823_v16, %v2826_v8  ;;  %v2785_v27 = vsel %vm2654_vm1, %v2783_v62, %v2784_v5  ;;  %v2750_v29 = vsel %vm2681_vm3, %v2747_v7, %v2749_v6  ;;  %v9892_v1 = vld [vmem:[%s13142_s0 + $0x188] ss:$0 sps:$4 sm:$0xff]  }
 0x114   :  { %2552 = vst [vmem:[#allocation3 + $0xa0] sm:$0xff] %v2453_v10  ;;  %v2456_v20 = vmax.f32 %v962_v3, %v2060_v11  ;;  %v2058_v21 = vmax.f32 %v1723_v12, 0.0  ;;  %v637_v26 = vpop.f32.mrf.mxu0  ;;  %v10525_v30 = vmax.f32 %v2824_v23, %v2827_v13  ;;  %v646_v35 = vadd.f32 %v8944_v14, %v10345_v34  ;;  %9011 = vmatmul.mubr.bf16.gmra.mxu0 %v9889_v18 }
 0x115   :  { %v1735_v32 = vpop.f32.mrf.mxu1  ;;  %v1744_v37 = vadd.f32 %v9060_v17, %v10345_v34  ;;  %v638_v40 = vadd.f32 %v10345_v34, %v637_v26  ;;  %v2810_v56 = vsel %vm2681_vm3, %v2808_v39, %v2809_v22  ;;  %v2834_v43 = vrot.slane %v10517_v24, 1  ;;  %9014 = vmatprep.mubr.bf16.mxu0 %v9891_v59 }
 0x116   :  { %2555 = vst [vmem:[#allocation3 + $0xb8] sm:$0xff] %v2456_v20  ;;  %v10527_v33 = vmax.f32 %v960_v15, %v2058_v21  ;;  %2788 = vrot.lane.b32.xlu1 %v2785_v27, %s9983_s23  ;;  %2755 = vrot.lane.b32.xlu0 %v2750_v29, %s9985_s20  ;;  %v8945_v36 = vpop.f32.mrf.mxu0  ;;  %v1736_v41 = vadd.f32 %v10345_v34, %v1735_v32  ;;  %v965_v44 = vmax.f32 %v646_v35, 0.0  ;;  %v2835_v47 = vrot.slane %v10525_v30, 1  ;;  %v2888_v29 = vld [vmem:[#allocation3 + $0x7e] sm:$0xff] }
 0x117   :  { %v9061_v7 = vpop.f32.mrf.mxu1  ;;  %v2063_v49 = vmax.f32 %v1744_v37, 0.0  ;;  %v963_v52 = vmax.f32 %v638_v40, 0.0  ;;  %v2845_v2 = vrot.slane %v10517_v24, 2  ;;  %v2796_v3 = vrot.slane %v10466_v28, 3  ;;  %v2889_v13 = vld [vmem:[#allocation3 + $0x86] sm:$0xff] }
 0x118   :  { %2553 = vst [vmem:[#allocation3 + $0xa8] sm:$0xff] %v10527_v33  ;;  %v640_v46 = vpop.f32.mrf.mxu0  ;;  %v2061_v53 = vmax.f32 %v1736_v41, 0.0  ;;  %v10554_v4 = vmax.f32 %v2763_v45, %v2766_v0  ;;  %v2846_v6 = vrot.slane %v10525_v30, 2  ;;  %v2857_v8 = vrot.slane %v10517_v24, 3 }
 0x119   :  { %v1738_v54 = vpop.f32.mrf.mxu1  ;;  %v2459_v61 = vmax.f32 %v965_v44, %v2063_v49  ;;  %v2858_v9 = vrot.slane %v10525_v30, 3  ;;  %v2870_v12 = vrot.slane %v10517_v24, 4  ;;  %v649_v14 = vadd.f32 %v8945_v36, %v10345_v34 }
 0x11a   :  { %2815 = vrot.lane.b32.xlu1 %v2810_v56, %s9985_s20  ;;  %2779 = vrot.lane.b32.xlu0 %v2773_v48, %s9982_s21  ;;  %v8948_v50 = vpop.f32.mrf.mxu0  ;;  %v2457_v62 = vmax.f32 %v963_v52, %v2061_v53  ;;  %v2836_v48 = vsel %vm2642_vm0, %v2834_v43, %v2835_v47  ;;  %v2797_v39 = vsel %vm2667_vm2, %v2795_v60, %v2796_v3  ;;  %v2798_v16 = vrot.slane %v10554_v4, 3 }
 0x11b   :  { %v9064_v58 = vpop.f32.mrf.mxu1  ;;  %2558 = vst [vmem:[#allocation3 + $0xd0] sm:$0xff] %v2459_v61  ;;  %v2871_v17 = vrot.slane %v10525_v30, 4  ;;  %v1747_v18 = vadd.f32 %v9061_v7, %v10345_v34  ;;  %v2859_v21 = vsel %vm2667_vm2, %v2857_v8, %v2858_v9  ;;  %v2811_v23 = vrot.slane %v10554_v4, 4 }
 0x11c   :  { %v653_v57 = vpop.f32.mrf.mxu0  ;;  %2556 = vst [vmem:[#allocation3 + $0xc0] sm:$0xff] %v2457_v62  ;;  %9015 = vmatmul.mubr.bf16.gmra.mxu0 %v9892_v1  ;;  %v966_v26 = vmax.f32 %v649_v14, 0.0  ;;  %v10582_v32 = vmax.f32 %v10433_v51, %v2889_v13  ;;  %v641_v36 = vadd.f32 %v10345_v34, %v640_v46  ;;  %v1739_v37 = vadd.f32 %v10345_v34, %v1738_v54  ;;  %v2828_v1 = vld [vmem:[#allocation3 + $0x72] sm:$0x3] }
 0x11d   :  { %v1751_v10 = vpop.f32.mrf.mxu1  ;;  %v2064_v35 = vmax.f32 %v1747_v18, 0.0  ;;  %v662_v41 = vadd.f32 %v8948_v50, %v10345_v34  ;;  %v1760_v7 = vadd.f32 %v9064_v58, %v10345_v34  ;;  %v654_v56 = vadd.f32 %v10345_v34, %v653_v57 }
 0x11e   :  { %2839 = vrot.lane.b32.xlu1 %v2836_v48, %s9982_s21  ;;  %2790 = vrot.lane.b32.xlu0 %v2784_v5, %s9983_s23  ;;  %v8949_v11 = vpop.f32.mrf.mxu0  ;;  %v2847_v5 = vsel %vm2654_vm1, %v2845_v2, %v2846_v6  ;;  %v1752_v43 = vadd.f32 %v10345_v34, %v1751_v10  ;;  %v2799_v45 = vsel %vm2667_vm2, %v2796_v3, %v2798_v16  ;;  %v964_v51 = vmax.f32 %v641_v36, 0.0 }
 0x11f   :  { %v9065_v15 = vpop.f32.mrf.mxu1  ;;  %v2460_v49 = vmax.f32 %v966_v26, %v2064_v35  ;;  %v2062_v52 = vmax.f32 %v1739_v37, 0.0  ;;  %v969_v59 = vmax.f32 %v662_v41, 0.0  ;;  %v2067_v46 = vmax.f32 %v1760_v7, 0.0 }
 0x120   :  { %v656_v20 = vpop.f32.mrf.mxu0  ;;  %v967_v60 = vmax.f32 %v654_v56, 0.0  ;;  %v2065_v54 = vmax.f32 %v1752_v43, 0.0  ;;  %v10594_v50 = vmax.f32 %v10413_v25, %v2888_v29  ;;  %v665_v0 = vadd.f32 %v8949_v11, %v10345_v34  ;;  %v2825_v25 = vld [vmem:[#allocation3 + $0x64] sm:$0x3] }
 0x121   :  { %v1754_v27 = vpop.f32.mrf.mxu1  ;;  %2559 = vst [vmem:[#allocation3 + $0xd8] sm:$0xff] %v2460_v49  ;;  %v2458_v62 = vmax.f32 %v964_v51, %v2062_v52  ;;  %v2463_v2 = vmax.f32 %v969_v59, %v2067_v46  ;;  %v1763_v4 = vadd.f32 %v9065_v15, %v10345_v34  ;;  %v2872_v48 = vsel %vm2681_vm3, %v2870_v12, %v2871_v17 }
 0x122   :  { %2850 = vrot.lane.b32.xlu1 %v2847_v5, %s9983_s23  ;;  %2802 = vrot.lane.b32.xlu0 %v2797_v39, %s9984_s30  ;;  %v8952_v40 = vpop.f32.mrf.mxu0  ;;  %v10597_v3 = vmax.f32 %v967_v60, %v2065_v54  ;;  %v2897_v8 = vrot.slane %v10582_v32, 1  ;;  %v970_v10 = vmax.f32 %v665_v0, 0.0  ;;  %v657_v13 = vadd.f32 %v10345_v34, %v656_v20 }
 0x123   :  { %v9068_v44 = vpop.f32.mrf.mxu1  ;;  %2557 = vst [vmem:[#allocation3 + $0xc8] sm:$0xff] %v2458_v62  ;;  %v2812_v14 = vsel %vm2681_vm3, %v2809_v22, %v2811_v23  ;;  %2562 = vst [vmem:[#allocation3 + $0xf0] sm:$0xff] %v2463_v2  ;;  %v2068_v15 = vmax.f32 %v1763_v4, 0.0  ;;  %v1755_v39 = vadd.f32 %v10345_v34, %v1754_v27  ;;  %v678_v12 = vadd.f32 %v8952_v40, %v10345_v34 }
 0x124   :  { %v669_v53 = vpop.f32.mrf.mxu0  ;;  %2560 = vst [vmem:[#allocation3 + $0xe0] sm:$0xff] %v10597_v3  ;;  %v2896_v18 = vrot.slane %v10594_v50, 1  ;;  %v968_v20 = vmax.f32 %v657_v13, 0.0  ;;  %v1776_v5 = vadd.f32 %v9068_v44, %v10345_v34  ;;  %v2908_v35 = vrot.slane %v10582_v32, 2  ;;  %v2948_v13 = vld [vmem:[#allocation3 + $0x94] sm:$0xff] }
 0x125   :  { %v1767_v61 = vpop.f32.mrf.mxu1  ;;  %v2464_v22 = vmax.f32 %v970_v10, %v2068_v15  ;;  %v2066_v23 = vmax.f32 %v1755_v39, 0.0  ;;  %v973_v26 = vmax.f32 %v678_v12, 0.0  ;;  %v10623_v36 = vmax.f32 %v2825_v25, %v2828_v1 }
 0x126   :  { %2864 = vrot.lane.b32.xlu1 %v2859_v21, %s9984_s30  ;;  %2804 = vrot.lane.b32.xlu0 %v2799_v45, %s9984_s30  ;;  %v8953_v58 = vpop.f32.mrf.mxu0  ;;  %v2898_v27 = vsel %vm2642_vm0, %v2896_v18, %v2897_v8  ;;  %v2071_v37 = vmax.f32 %v1776_v5, 0.0  ;;  %v670_v7 = vadd.f32 %v10345_v34, %v669_v53  ;;  %v1768_v56 = vadd.f32 %v10345_v34, %v1767_v61  ;;  %v2947_v5 = vld [vmem:[#allocation3 + $0x8c] sm:$0xff] }
 0x127   :  { %v9069_v57 = vpop.f32.mrf.mxu1  ;;  %2563 = vst [vmem:[#allocation3 + $0xf8] sm:$0xff] %v2464_v22  ;;  %v10627_v41 = vmax.f32 %v968_v20, %v2066_v23  ;;  %v681_v43 = vadd.f32 %v8953_v58, %v10345_v34  ;;  %v2907_v45 = vrot.slane %v10594_v50, 2  ;;  %v2920_v54 = vrot.slane %v10582_v32, 3  ;;  %v2950_v22 = vld [vmem:[#allocation3 + $0x9a] sm:$0xff] }
 0x128   :  { %v672_v11 = vpop.f32.mrf.mxu0  ;;  %v2467_v49 = vmax.f32 %v973_v26, %v2071_v37  ;;  %v971_v52 = vmax.f32 %v670_v7, 0.0  ;;  %v2069_v53 = vmax.f32 %v1768_v56, 0.0  ;;  %v1779_v46 = vadd.f32 %v9069_v57, %v10345_v34  ;;  %v2887_v7 = vld [vmem:[#allocation3 + $0x80] sm:$0x3]  ;;  %v2890_v56 = vld [vmem:[#allocation3 + $0x8e] sm:$0x3] }
 0x129   :  { %v1770_v16 = vpop.f32.mrf.mxu1  ;;  %2561 = vst [vmem:[#allocation3 + $0xe8] sm:$0xff] %v10627_v41  ;;  %v974_v59 = vmax.f32 %v681_v43, 0.0  ;;  %v673_v61 = vadd.f32 %v10345_v34, %v672_v11  ;;  %v2909_v0 = vsel %vm2654_vm1, %v2907_v45, %v2908_v35  ;;  %v2860_v58 = vrot.slane %v10623_v36, 3  ;;  %v2951_v11 = vld [vmem:[#allocation3 + $0xa2] sm:$0xff] }
 0x12a   :  { %2877 = vrot.lane.b32.xlu1 %v2872_v48, %s9985_s20  ;;  %2817 = vrot.lane.b32.xlu0 %v2812_v14, %s9985_s20  ;;  %v10615_v21 = vpop.f32.mrf.mxu0  ;;  %2566 = vst [vmem:[#allocation3 + $0x110] sm:$0xff] %v2467_v49  ;;  %v2465_v1 = vmax.f32 %v971_v52, %v2069_v53  ;;  %v2072_v2 = vmax.f32 %v1779_v46, 0.0  ;;  %v2919_v10 = vrot.slane %v10594_v50, 3  ;;  %v2933_v18 = vrot.slane %v10582_v32, 4 }
 0x12b   :  { %v10617_v29 = vpop.f32.mrf.mxu1  ;;  %v972_v57 = vmax.f32 %v673_v61, 0.0  ;;  %v2873_v20 = vrot.slane %v10623_v36, 4  ;;  %v10680_v26 = vmax.f32 %v2948_v13, %v2951_v11  ;;  %v10687_v36 = vmax.f32 %v2947_v5, %v2950_v22 }
 0x12c   :  { %v10625_v40 = vpop.f32.mrf.mxu0  ;;  %2564 = vst [vmem:[#allocation3 + $0x100] sm:$0xff] %v2465_v1  ;;  %v10661_v14 = vmax.f32 %v974_v59, %v2072_v2  ;;  %v694_v43 = vadd.f32 %v10615_v21, %v10345_v34  ;;  %v1792_v45 = vadd.f32 %v10617_v29, %v10345_v34  ;;  %v10704_v59 = vld [vmem:[%s13143_s2] ss:$0 sm:$0xff] }
 0x12d   :  { %v10632_v44 = vpop.f32.mrf.mxu1  ;;  %v2874_v53 = vsel %vm2681_vm3, %v2871_v17, %v2873_v20  ;;  %v686_v21 = vadd.f32 %v10704_v59, %v10625_v40  ;;  %v2969_v5 = vrot.slane %v10687_v36, 2 }
 0x12e   :  { %2901 = vrot.lane.b32.xlu1 %v2898_v27, %s9982_s21  ;;  %2841 = vrot.lane.b32.xlu0 %v2835_v47, %s9982_s21  ;;  %v10639_v51 = vpop.f32.mrf.mxu0  ;;  %v1771_v47 = vadd.f32 %v10345_v34, %v1770_v16  ;;  %v2861_v16 = vsel %vm2667_vm2, %v2858_v9, %v2860_v58  ;;  %2567 = vst [vmem:[#allocation3 + $0x118] sm:$0xff] %v10661_v14  ;;  %v2932_v9 = vrot.slane %v10594_v50, 4  ;;  %v2970_v34 = vrot.slane %v10680_v26, 2 }
 0x12f   :  { %v10643_v60 = vpop.f32.mrf.mxu1  ;;  %v977_v29 = vmax.f32 %v694_v43, 0.0  ;;  %v2075_v61 = vmax.f32 %v1792_v45, 0.0  ;;  %v1784_v17 = vadd.f32 %v10704_v59, %v10632_v44  ;;  %v10718_v58 = vmax.f32 %v2887_v7, %v2890_v56 }
 0x130   :  { %v10648_v62 = vpop.f32.mrf.mxu0  ;;  %v2070_v48 = vmax.f32 %v1771_v47, 0.0  ;;  %v2934_v52 = vsel %vm2681_vm3, %v2932_v9, %v2933_v18  ;;  %v975_v40 = vmax.f32 %v686_v21, 0.0  ;;  %v697_v1 = vadd.f32 %v10704_v59, %v10639_v51 }
 0x131   :  { %v1786_v4 = vpop.f32.mrf.mxu1  ;;  %v1795_v13 = vadd.f32 %v10704_v59, %v10643_v60  ;;  %v2922_v7 = vrot.slane %v10718_v58, 3  ;;  %v2982_v45 = vrot.slane %v10680_v26, 3 }
 0x132   :  { %2912 = vrot.lane.b32.xlu1 %v2909_v0, %s9983_s23  ;;  %2852 = vrot.lane.b32.xlu0 %v2846_v6, %s9983_s23  ;;  %v10658_v25 = vpop.f32.mrf.mxu0  ;;  %v2466_v39 = vmax.f32 %v972_v57, %v2070_v48  ;;  %v2921_v6 = vsel %vm2667_vm2, %v2919_v10, %v2920_v54  ;;  %v2959_v0 = vrot.slane %v10680_v26, 1  ;;  %v2958_v57 = vrot.slane %v10687_v36, 1 }
 0x133   :  { %v10663_v15 = vpop.f32.mrf.mxu1  ;;  %v2471_v48 = vmax.f32 %v977_v29, %v2075_v61  ;;  %v2073_v10 = vmax.f32 %v1784_v17, 0.0  ;;  %v978_v11 = vmax.f32 %v697_v1, 0.0  ;;  %v2076_v60 = vmax.f32 %v1795_v13, 0.0 }
 0x134   :  { %v10665_v12 = vpop.f32.mrf.mxu0  ;;  %2565 = vst [vmem:[#allocation3 + $0x108] sm:$0xff] %v2466_v39  ;;  %v689_v39 = vadd.f32 %v10704_v59, %v10648_v62  ;;  %v1808_v21 = vadd.f32 %v10704_v59, %v10663_v15  ;;  %v2971_v17 = vsel %vm2654_vm1, %v2969_v5, %v2970_v34  ;;  %v9895_v15 = vld [vmem:[%s13142_s0 + $0x2fc] sm:$0xff]  }
 0x135   :  { %v10676_v23 = vpop.f32.mrf.mxu1  ;;  %2570 = vst [vmem:[#allocation3 + $0x130] sm:$0xff] %v2471_v48  ;;  %v10738_v51 = vmax.f32 %v975_v40, %v2073_v10  ;;  %v2472_v56 = vmax.f32 %v978_v11, %v2076_v60  ;;  %v2923_v11 = vsel %vm2667_vm2, %v2920_v54, %v2922_v7  ;;  %9126 = vmatprep.mubr.bf16.mxu1 %v9895_v15 }
 0x136   :  { %2926 = vrot.lane.b32.xlu1 %v2921_v6, %s9984_s30  ;;  %2866 = vrot.lane.b32.xlu0 %v2861_v16, %s9984_s30  ;;  %v10682_v27 = vpop.f32.mrf.mxu0  ;;  %v1787_v6 = vadd.f32 %v10704_v59, %v1786_v4  ;;  %v976_v22 = vmax.f32 %v689_v39, 0.0  ;;  %v2960_v4 = vsel %vm2642_vm0, %v2958_v57, %v2959_v0  ;;  %v2079_v1 = vmax.f32 %v1808_v21, 0.0  ;;  %v9896_v57 = vld [vmem:[%s13142_s0 + $0x304] sm:$0xff]  }
 0x137   :  { %v10685_v37 = vpop.f32.mrf.mxu1  ;;  %2568 = vst [vmem:[#allocation3 + $0x120] sm:$0xff] %v10738_v51  ;;  %2571 = vst [vmem:[#allocation3 + $0x138] sm:$0xff] %v2472_v56  ;;  %v1800_v48 = vadd.f32 %v10704_v59, %v10676_v23  ;;  %9127 = vmatmul.mubr.bf16.gmra.mxu1 %v9896_v57 }
 0x138   :  { %v10693_v49 = vpop.f32.mrf.mxu0  ;;  %v2074_v62 = vmax.f32 %v1787_v6, 0.0  ;;  %v1811_v10 = vadd.f32 %v10704_v59, %v10685_v37  ;;  %v2949_v6 = vld [vmem:[#allocation3 + $0x9c] sm:$0x3] }
 0x139   :  { %v10708_v46 = vpop.f32.mrf.mxu1  ;;  %v2077_v5 = vmax.f32 %v1800_v48, 0.0  ;;  %v705_v7 = vadd.f32 %v10704_v59, %v10693_v49 }
 0x13a   :  { %2939 = vrot.lane.b32.xlu1 %v2934_v52, %s9985_s20  ;;  %2879 = vrot.lane.b32.xlu0 %v2874_v53, %s9985_s20  ;;  %v10715_v47 = vpop.f32.mrf.mxu0  ;;  %v2470_v52 = vmax.f32 %v976_v22, %v2074_v62  ;;  %v710_v53 = vadd.f32 %v10704_v59, %v10658_v25  ;;  %v2080_v54 = vmax.f32 %v1811_v10, 0.0 }
 0x13b   :  { %v10722_v2 = vpop.f32.mrf.mxu1  ;;  %v726_v21 = vadd.f32 %v10704_v59, %v10715_v47  ;;  %v980_v15 = vmax.f32 %v705_v7, 0.0 }
 0x13c   :  { %v10727_v44 = vpop.f32.mrf.mxu0  ;;  %2569 = vst [vmem:[#allocation3 + $0x128] sm:$0xff] %v2470_v52  ;;  %v981_v40 = vmax.f32 %v710_v53, 0.0 }
 0x13d   :  { %v10732_v16 = vpop.f32.mrf.mxu1  ;;  %v985_v47 = vmax.f32 %v726_v21, 0.0 }
 0x13e   :  { %2976 = vrot.lane.b32.xlu1 %v2970_v34, %s9983_s23  ;;  %2903 = vrot.lane.b32.xlu0 %v2897_v8, %s9982_s21  ;;  %v10740_v20 = vpop.f32.mrf.mxu0  ;;  %v2981_v8 = vrot.slane %v10687_v36, 3  ;;  %v713_v34 = vadd.f32 %v10704_v59, %v10682_v27  ;;  %v2475_v23 = vmax.f32 %v981_v40, %v2079_v1  ;;  %v2952_v27 = vld [vmem:[#allocation3 + $0xaa] sm:$0x3] }
 0x13f   :  { %v10743_v9 = vpop.f32.mrf.mxu1  ;;  %v2955_v1 = vmax.f32 %v2949_v6, %v2952_v27  ;;  %v729_v6 = vadd.f32 %v10704_v59, %v10740_v20 }
 0x140   :  { %v10751_v43 = vpop.f32.mrf.mxu0  ;;  %v2983_v39 = vsel %vm2667_vm2, %v2981_v8, %v2982_v45  ;;  %v982_v22 = vmax.f32 %v713_v34, 0.0  ;;  %2574 = vst [vmem:[#allocation3 + $0x150] sm:$0xff] %v2475_v23  ;;  %v1803_v8 = vadd.f32 %v10704_v59, %v10708_v46  ;;  %v718_v34 = vadd.f32 %v10704_v59, %v10727_v44  ;;  %v3012_v44 = vld [vmem:[#allocation3 + $0xb6] sm:$0xff] }
 0x141   :  { %v10758_v29 = vpop.f32.mrf.mxu1  ;;  %v1827_v23 = vadd.f32 %v10704_v59, %v10743_v9  ;;  %v986_v20 = vmax.f32 %v729_v6, 0.0 }
 0x142   :  { %2963 = vrot.lane.b32.xlu1 %v2960_v4, %s9982_s21  ;;  %2914 = vrot.lane.b32.xlu0 %v2908_v35, %s9983_s23  ;;  %v10764_v61 = vpop.f32.mrf.mxu0  ;;  %v702_v35 = vadd.f32 %v10704_v59, %v10665_v12  ;;  %v2935_v12 = vrot.slane %v10718_v58, 4  ;;  %v2994_v4 = vrot.slane %v10687_v36, 4  ;;  %v2995_v58 = vrot.slane %v10680_v26, 4 }
 0x143   :  { %v10767_v25 = vpop.f32.mrf.mxu1  ;;  %v2476_v53 = vmax.f32 %v982_v22, %v2080_v54  ;;  %v2078_v46 = vmax.f32 %v1803_v8, 0.0  ;;  %v983_v22 = vmax.f32 %v718_v34, 0.0 }
 0x144   :  { %v10783_v13 = vpop.f32.mrf.mxu0  ;;  %v979_v37 = vmax.f32 %v702_v35, 0.0  ;;  %v2936_v49 = vsel %vm2681_vm3, %v2933_v18, %v2935_v12  ;;  %v1816_v18 = vadd.f32 %v10704_v59, %v10732_v16 }
 0x145   :  { %v10792_v60 = vpop.f32.mrf.mxu1  ;;  %2575 = vst [vmem:[#allocation3 + $0x158] sm:$0xff] %v2476_v53  ;;  %v2474_v48 = vmax.f32 %v980_v15, %v2078_v46  ;;  %v1819_v53 = vadd.f32 %v10704_v59, %v10758_v29  ;;  %v3011_v15 = vld [vmem:[#allocation3 + $0xb8] sm:$0x3]  ;;  %v742_v29 = vadd.f32 %v10704_v59, %v10764_v61 }
 0x146   :  { %2974 = vrot.lane.b32.xlu1 %v2971_v17, %s9983_s23  ;;  %2928 = vrot.lane.b32.xlu0 %v2923_v11, %s9984_s30  ;;  %v10796_v62 = vpop.f32.mrf.mxu0  ;;  %v2473_v52 = vmax.f32 %v979_v37, %v2077_v5  ;;  %v1824_v17 = vadd.f32 %v10704_v59, %v10722_v2  ;;  %v2996_v11 = vsel %vm2681_vm3, %v2994_v4, %v2995_v58  ;;  %v2997_v37 = vrot.slane %v2955_v1, 4 }
 0x147   :  { %v10804_v56 = vpop.f32.mrf.mxu1  ;;  %v2984_v5 = vrot.slane %v2955_v1, 3  ;;  %2573 = vst [vmem:[#allocation3 + $0x148] sm:$0xff] %v2474_v48  ;;  %v2081_v16 = vmax.f32 %v1816_v18, 0.0  ;;  %v2084_v4 = vmax.f32 %v1827_v23, 0.0  ;;  %v2082_v46 = vmax.f32 %v1819_v53, 0.0 }
 0x148   :  { %v10810_v40 = vpop.f32.mrf.mxu0  ;;  %2572 = vst [vmem:[#allocation3 + $0x140] sm:$0xff] %v2473_v52  ;;  %v2083_v57 = vmax.f32 %v1824_v17, 0.0  ;;  %v721_v52 = vadd.f32 %v10704_v59, %v10751_v43  ;;  %v10852_v17 = vmax.f32 %v10527_v33, %v3012_v44  ;;  %v2998_v1 = vsel %vm2681_vm3, %v2995_v58, %v2997_v37  ;;  %v3014_v33 = vld [vmem:[#allocation3 + $0xc6] sm:$0x3] }
 0x149   :  { %v10815_v35 = vpop.f32.mrf.mxu1  ;;  %v2477_v8 = vmax.f32 %v983_v22, %v2081_v16  ;;  %v1840_v58 = vadd.f32 %v10704_v59, %v10767_v25  ;;  %v734_v18 = vadd.f32 %v10704_v59, %v10783_v13  ;;  %v1832_v61 = vadd.f32 %v10704_v59, %v10792_v60 }
 0x14a   :  { %2988 = vrot.lane.b32.xlu1 %v2983_v39, %s9984_s30  ;;  %2941 = vrot.lane.b32.xlu0 %v2936_v49, %s9985_s20  ;;  %v10819_v2 = vpop.f32.mrf.mxu0  ;;  %v3013_v39 = vld [vmem:[#allocation3 + $0xbe] sm:$0xff]  ;;  %v2479_v12 = vmax.f32 %v985_v47, %v2083_v57  ;;  %v984_v43 = vmax.f32 %v721_v52, 0.0  ;;  %v9898_v57 = vld [vmem:[%s13142_s0 + $0x314] ss:$0 sps:$4 sm:$0xff]   ;;  %v989_v6 = vmax.f32 %v742_v29, 0.0  ;;  %v3031_v37 = vrot.slane %v10852_v17, 2 }
 0x14b   :  { %v10825_v10 = vpop.f32.mrf.mxu1  ;;  %v10843_v7 = vmax.f32 %v10496_v63, %v3013_v39  ;;  %v2985_v63 = vsel %vm2667_vm2, %v2982_v45, %v2984_v5  ;;  %2576 = vst [vmem:[#allocation3 + $0x160] sm:$0xff] %v2477_v8  ;;  %v9897_v45 = vld [vmem:[%s13142_s0 + $0x30c] sm:$0xff]   ;;  %v2087_v23 = vmax.f32 %v1840_v58, 0.0  ;;  %v3017_v5 = vmax.f32 %v3011_v15, %v3014_v33  ;;  %v3075_v58 = vld [vmem:[#allocation3 + $0xda] sm:$0xff] }
 0x14c   :  { %v10832_v27 = vpop.f32.mrf.mxu0  ;;  %2578 = vst [vmem:[#allocation3 + $0x170] sm:$0xff] %v2479_v12  ;;  %v2478_v34 = vmax.f32 %v984_v43, %v2082_v46  ;;  %v3020_v12 = vrot.slane %v10852_v17, 1  ;;  %9130 = vmatprep.mubr.bf16.mxu1 %v9897_v45  ;;  %v987_v44 = vmax.f32 %v734_v18, 0.0  ;;  %v2085_v13 = vmax.f32 %v1832_v61, 0.0  ;;  %v3074_v43 = vld [vmem:[#allocation3 + $0xd2] sm:$0xff] }
 0x14d   :  { %v10834_v54 = vpop.f32.mrf.mxu1  ;;  %v3032_v48 = vrot.slane %v10843_v7, 2  ;;  %v3021_v39 = vrot.slane %v10843_v7, 1  ;;  %9131 = vmatmul.mubr.bf16.gmra.mxu1 %v9898_v57  ;;  %v2483_v60 = vmax.f32 %v989_v6, %v2087_v23  ;;  %v3043_v22 = vrot.slane %v10852_v17, 3 }
 0x14e   :  { %3001 = vrot.lane.b32.xlu1 %v2996_v11, %s9985_s20  ;;  %2965 = vrot.lane.b32.xlu0 %v2959_v0, %s9982_s21  ;;  %v10840_v9 = vpop.f32.mrf.mxu0  ;;  %v2480_v0 = vmax.f32 %v986_v20, %v2084_v4  ;;  %2577 = vst [vmem:[#allocation3 + $0x168] sm:$0xff] %v2478_v34  ;;  %v2481_v16 = vmax.f32 %v987_v44, %v2085_v13  ;;  %v3044_v53 = vrot.slane %v10843_v7, 3  ;;  %v3046_v15 = vrot.slane %v3017_v5, 3 }
 0x14f   :  { %v10849_v21 = vpop.f32.mrf.mxu1  ;;  %v745_v20 = vadd.f32 %v10704_v59, %v10796_v62  ;;  %v3022_v52 = vsel %vm2642_vm0, %v3020_v12, %v3021_v39  ;;  %2582 = vst [vmem:[#allocation3 + $0x190] sm:$0xff] %v2483_v60  ;;  %v1835_v46 = vadd.f32 %v10704_v59, %v10815_v35  ;;  %v3056_v34 = vrot.slane %v10852_v17, 4  ;;  %v9890_v35 = vld [vmem:[%s13144_s3 + $0x28] sm:$0xff]  }
 0x150   :  { %v10854_v49 = vpop.f32.mrf.mxu0  ;;  %2579 = vst [vmem:[#allocation3 + $0x178] sm:$0xff] %v2480_v0  ;;  %v1843_v0 = vadd.f32 %v10704_v59, %v10804_v56  ;;  %2580 = vst [vmem:[#allocation3 + $0x180] sm:$0xff] %v2481_v16  ;;  %v3072_v56 = vld [vmem:[#allocation3 + $0xcc] sm:$0xff]  ;;  %v3045_v61 = vsel %vm2667_vm2, %v3043_v22, %v3044_v53  ;;  %v3047_v6 = vsel %vm2667_vm2, %v3044_v53, %v3046_v15  ;;  %v13153_v13 = vmov 0.0   ;;  %v9893_v22 = vld [vmem:[%s13144_s3 + $0x20] sm:$0xff]  }
 0x151   :  { %v10860_v47 = vpop.f32.mrf.mxu1  ;;  %v990_v62 = vmax.f32 %v745_v20, 0.0  ;;  %v2086_v18 = vmax.f32 %v1835_v46, 0.0  ;;  %v10917_v23 = vmax.f32 %v3072_v56, %v3075_v58  ;;  %9134 = vmatprep.subr.bf16.mxu0 %v13153_v13  ;;  %9140 = vmatprep.mubr.msk.bf16.mxu0 %vm9987_vm4, %v13153_v13  ;;  %v3076_v53 = vld [vmem:[#allocation3 + $0xe2] sm:$0x3] }
 0x152   :  { %3003 = vrot.lane.b32.xlu1 %v2998_v1, %s9985_s20  ;;  %2990 = vrot.lane.b32.xlu0 %v2985_v63, %s9984_s30  ;;  %v10879_v11 = vpop.f32.mrf.mxu0  ;;  %v737_v1 = vadd.f32 %v10704_v59, %v10810_v40  ;;  %v3033_v63 = vsel %vm2654_vm1, %v3031_v37, %v3032_v48  ;;  %v3071_v40 = vld [vmem:[#allocation3 + $0xc4] sm:$0xff]  ;;  %v2088_v45 = vmax.f32 %v1843_v0, 0.0  ;;  %v758_v0 = vadd.f32 %v10704_v59, %v10819_v2 }
 0x153   :  { %v10881_v25 = vpop.f32.mrf.mxu1  ;;  %v10919_v37 = vmax.f32 %v3071_v40, %v3074_v43  ;;  %9135 = vmatpush3.bf16.msra.mxu0 %v9890_v35  ;;  %9224 = vmatprep.subr.bf16.mxu1 %v13153_v13  ;;  %v750_v43 = vadd.f32 %v10704_v59, %v10832_v27  ;;  %v9894_v27 = vld [vmem:[%s13144_s3 + $0x18] sm:$0xff]  }
 0x154   :  { %v10891_v4 = vpop.f32.mrf.mxu0  ;;  %v988_v57 = vmax.f32 %v737_v1, 0.0  ;;  %v2484_v12 = vmax.f32 %v990_v62, %v2088_v45  ;;  %9136 = vmatprep.subr.bf16.mxu0 %v13153_v13  ;;  %v1856_v1 = vadd.f32 %v10704_v59, %v10825_v10  ;;  %v1848_v62 = vadd.f32 %v10704_v59, %v10834_v54  ;;  %9230 = vmatprep.mubr.msk.bf16.mxu1 %vm9987_vm4, %v13153_v13 }
 0x155   :  { %v10893_v8 = vpop.f32.mrf.mxu1  ;;  %v3082_v15 = vrot.slane %v10919_v37, 1  ;;  %v993_v2 = vmax.f32 %v758_v0, 0.0  ;;  %v991_v54 = vmax.f32 %v750_v43, 0.0 }
 0x156   :  { %3038 = vrot.lane.b32.xlu1 %v3032_v48, %s9983_s23  ;;  %3027 = vrot.lane.b32.xlu0 %v3021_v39, %s9982_s21  ;;  %v10904_v33 = vpop.f32.mrf.mxu0  ;;  %v3057_v48 = vrot.slane %v10843_v7, 4  ;;  %v3059_v39 = vrot.slane %v3017_v5, 4  ;;  %v2482_v44 = vmax.f32 %v988_v57, %v2086_v18  ;;  %2583 = vst [vmem:[#allocation3 + $0x198] sm:$0xff] %v2484_v12  ;;  %v2091_v10 = vmax.f32 %v1856_v1, 0.0 }
 0x157   :  { %v10906_v29 = vpop.f32.mrf.mxu1  ;;  %9137 = vmatpush3.bf16.msra.mxu0 %v9893_v22  ;;  %v2089_v40 = vmax.f32 %v1848_v62, 0.0  ;;  %v3106_v12 = vrot.slane %v10917_v23, 3  ;;  %v3119_v1 = vrot.slane %v10917_v23, 4 }
 0x158   :  { %v10922_v60 = vpop.f32.mrf.mxu0  ;;  %v3058_v5 = vsel %vm2681_vm3, %v3056_v34, %v3057_v48  ;;  %2581 = vst [vmem:[#allocation3 + $0x188] sm:$0xff] %v2482_v44  ;;  %v3060_v20 = vsel %vm2681_vm3, %v3057_v48, %v3059_v39  ;;  %9138 = vmatprep.subr.bf16.mxu0 %v13153_v13  ;;  %v2487_v45 = vmax.f32 %v993_v2, %v2091_v10  ;;  %v3094_v48 = vrot.slane %v10917_v23, 2  ;;  %v3137_v39 = vld [vmem:[#allocation3 + $0xf6] sm:$0xff] }
 0x159   :  { %v10924_v16 = vpop.f32.mrf.mxu1  ;;  %v3093_v34 = vrot.slane %v10919_v37, 2  ;;  %v2485_v18 = vmax.f32 %v991_v54, %v2089_v40  ;;  %v3105_v44 = vrot.slane %v10919_v37, 3  ;;  %v1859_v2 = vadd.f32 %v10704_v59, %v10849_v21 }
 0x15a   :  { %3025 = vrot.lane.b32.xlu1 %v3022_v52, %s9982_s21  ;;  %3036 = vrot.lane.b32.xlu0 %v3033_v63, %s9983_s23  ;;  %v3073_v52 = vld [vmem:[#allocation3 + $0xd4] sm:$0x3]  ;;  %v3083_v63 = vrot.slane %v10917_v23, 1  ;;  %v10947_v46 = vpop.f32.mrf.mxu0  ;;  %2586 = vst [vmem:[#allocation3 + $0x1b0] sm:$0xff] %v2487_v45  ;;  %v753_v10 = vadd.f32 %v10704_v59, %v10854_v49  ;;  %v774_v54 = vadd.f32 %v10704_v59, %v10879_v11 }
 0x15b   :  { %v10949_v56 = vpop.f32.mrf.mxu1  ;;  %v10955_v58 = vmax.f32 %v3073_v52, %v3076_v53  ;;  %9139 = vmatpush3.bf16.msra.mxu0 %v9894_v27  ;;  %2584 = vst [vmem:[#allocation3 + $0x1a0] sm:$0xff] %v2485_v18  ;;  %v3095_v22 = vsel %vm2654_vm1, %v3093_v34, %v3094_v48  ;;  %v761_v52 = vadd.f32 %v10704_v59, %v10840_v9  ;;  %v3118_v9 = vrot.slane %v10919_v37, 4 }
 0x15c   :  { %v3084_v57 = vsel %vm2642_vm0, %v3082_v15, %v3083_v63  ;;  %v10964_v35 = vpop.f32.mrf.mxu0  ;;  %9314 = vmatprep.subr.bf16.mxu0 %v13153_v13  ;;  %v1851_v27 = vadd.f32 %v10704_v59, %v10860_v47  ;;  %v766_v40 = vadd.f32 %v10704_v59, %v10891_v4  ;;  %v992_v11 = vmax.f32 %v753_v10, 0.0 }
 0x15d   :  { %v3121_v43 = vrot.slane %v10955_v58, 4  ;;  %v994_v62 = vmax.f32 %v761_v52, 0.0  ;;  %v997_v34 = vmax.f32 %v774_v54, 0.0  ;;  %v1864_v4 = vadd.f32 %v10704_v59, %v10893_v8 }
 0x15e   :  { %3050 = vrot.lane.b32.xlu1 %v3045_v61, %s9984_s30  ;;  %3052 = vrot.lane.b32.xlu0 %v3047_v6, %s9984_s30  ;;  %v10966_v61 = vpop.f32.mrf.mxu1  ;;  %v3108_v6 = vrot.slane %v10955_v58, 3  ;;  %v10980_v53 = vpop.f32.mrf.mxu0  ;;  %v1872_v58 = vadd.f32 %v10704_v59, %v10881_v25  ;;  %v995_v18 = vmax.f32 %v766_v40, 0.0  ;;  %v3120_v52 = vsel %vm2681_vm3, %v3118_v9, %v3119_v1 }
 0x15f   :  { %v2093_v10 = vmax.f32 %v1864_v4, 0.0  ;;  %v1867_v54 = vadd.f32 %v10704_v59, %v10924_v16  ;;  %v790_v4 = vadd.f32 %v10704_v59, %v10947_v46  ;;  %v1880_v46 = vadd.f32 %v10704_v59, %v10966_v61 }
 0x160   :  { %v10982_v0 = vpop.f32.mrf.mxu1  ;;  %v3109_v15 = vsel %vm2667_vm2, %v3106_v12, %v3108_v6  ;;  %v11007_v45 = vpop.f32.mrf.mxu0  ;;  %v2095_v25 = vmax.f32 %v1872_v58, 0.0 }
 0x161   :  { %v2489_v9 = vmax.f32 %v995_v18, %v2093_v10  ;;  %v782_v10 = vadd.f32 %v10704_v59, %v10964_v35  ;;  %v3199_v35 = vld [vmem:[#allocation3 + $0x112] sm:$0xff] }
 0x162   :  { %3065 = vrot.lane.b32.xlu1 %v3060_v20, %s9985_s20  ;;  %3063 = vrot.lane.b32.xlu0 %v3058_v5, %s9985_s20  ;;  %v3136_v5 = vld [vmem:[#allocation3 + $0xee] sm:$0xff]  ;;  %v10976_v20 = vmax.f32 %v10627_v41, %v3137_v39  ;;  %v3107_v41 = vsel %vm2667_vm2, %v3105_v44, %v3106_v12  ;;  %v11009_v21 = vpop.f32.mrf.mxu1  ;;  %v11018_v39 = vpop.f32.mrf.mxu0 }
 0x163   :  { %2588 = vst [vmem:[#allocation3 + $0x1c0] sm:$0xff] %v2489_v9  ;;  %v793_v9 = vadd.f32 %v10704_v59, %v10980_v53  ;;  %v999_v61 = vmax.f32 %v782_v10, 0.0  ;;  %v785_v53 = vadd.f32 %v10704_v59, %v11007_v45  ;;  %v3197_v45 = vld [vmem:[#allocation3 + $0x10c] sm:$0x3] }
 0x164   :  { %v11020_v12 = vpop.f32.mrf.mxu1  ;;  %v3156_v8 = vrot.slane %v10976_v20, 2  ;;  %v11038_v58 = vpop.f32.mrf.mxu0 }
 0x166   :  { %3089 = vrot.lane.b32.xlu1 %v3083_v63, %s9982_s21  ;;  %3087 = vrot.lane.b32.xlu0 %v3084_v57, %s9982_s21  ;;  %v10988_v63 = vmax.f32 %v10597_v3, %v3136_v5  ;;  %v3145_v3 = vrot.slane %v10976_v20, 1  ;;  %v2092_v57 = vmax.f32 %v1859_v2, 0.0  ;;  %v2491_v2 = vmax.f32 %v997_v34, %v2095_v25  ;;  %v11040_v40 = vpop.f32.mrf.mxu1 }
 0x167   :  { %v3168_v34 = vrot.slane %v10976_v20, 3  ;;  %v2094_v25 = vmax.f32 %v1867_v54, 0.0  ;;  %v3198_v54 = vld [vmem:[#allocation3 + $0x10a] sm:$0xff] }
 0x168   :  { %v3144_v47 = vrot.slane %v10988_v63, 1  ;;  %v2488_v44 = vmax.f32 %v994_v62, %v2092_v57  ;;  %v777_v62 = vadd.f32 %v10704_v59, %v10904_v33  ;;  %2590 = vst [vmem:[#allocation3 + $0x1d0] sm:$0xff] %v2491_v2  ;;  %v1001_v2 = vmax.f32 %v790_v4, 0.0 }
 0x16a   :  { %3100 = vrot.lane.b32.xlu1 %v3094_v48, %s9983_s23  ;;  %3098 = vrot.lane.b32.xlu0 %v3095_v22, %s9983_s23  ;;  %v2090_v48 = vmax.f32 %v1851_v27, 0.0  ;;  %v3122_v22 = vsel %vm2681_vm3, %v3119_v1, %v3121_v43  ;;  %2587 = vst [vmem:[#allocation3 + $0x1b8] sm:$0xff] %v2488_v44  ;;  %v1875_v43 = vadd.f32 %v10704_v59, %v10906_v29  ;;  %v3155_v29 = vrot.slane %v10988_v63, 2 }
 0x16b   :  { %v3146_v1 = vsel %vm2642_vm0, %v3144_v47, %v3145_v3  ;;  %v769_v27 = vadd.f32 %v10704_v59, %v10922_v60  ;;  %v998_v47 = vmax.f32 %v777_v62, 0.0  ;;  %v3167_v60 = vrot.slane %v10988_v63, 3 }
 0x16c   :  { %v11013_v49 = vpop.permute.xlu1 %2650  ;;  %v2486_v5 = vmax.f32 %v992_v11, %v2090_v48  ;;  %v2096_v48 = vmax.f32 %v1875_v43, 0.0  ;;  %v1888_v44 = vadd.f32 %v10704_v59, %v10949_v56  ;;  %v3157_v62 = vsel %vm2654_vm1, %v3155_v29, %v3156_v8 }
 0x16d   :  { %v996_v16 = vmax.f32 %v769_v27, 0.0  ;;  %v3169_v43 = vsel %vm2667_vm2, %v3167_v60, %v3168_v34  ;;  %v3196_v27 = vld [vmem:[#allocation3 + $0x104] sm:$0xff]  ;;  %v1891_v29 = vadd.f32 %v10704_v59, %v10982_v0  ;;  %v3181_v60 = vrot.slane %v10976_v20, 4 }
 0x16e   :  { %3114 = vrot.lane.b32.xlu1 %v3109_v15, %s9984_s30  ;;  %3112 = vrot.lane.b32.xlu0 %v3107_v41, %s9984_s30  ;;  %v3135_v15 = vld [vmem:[#allocation3 + $0xf0] sm:$0x3]  ;;  %v3138_v41 = vld [vmem:[#allocation3 + $0xfe] sm:$0x3]  ;;  %2585 = vst [vmem:[#allocation3 + $0x1a8] sm:$0xff] %v2486_v5  ;;  %v2492_v18 = vmax.f32 %v998_v47, %v2096_v48  ;;  %v2097_v48 = vmax.f32 %v1880_v46, 0.0  ;;  %v1883_v0 = vadd.f32 %v10704_v59, %v11009_v21 }
 0x16f   :  { %v11047_v11 = vmax.f32 %v3135_v15, %v3138_v41  ;;  %v2490_v5 = vmax.f32 %v996_v16, %v2094_v25  ;;  %v1002_v25 = vmax.f32 %v793_v9, 0.0  ;;  %v11088_v10 = vmax.f32 %v3196_v27, %v3199_v35 }
 0x170   :  { %v11022_v6 = vpop.permute.xlu0 %2648  ;;  %v11042_v57 = vpop.permute.xlu1 %2662  ;;  %2591 = vst [vmem:[#allocation3 + $0x1d8] sm:$0xff] %v2492_v18  ;;  %v1000_v9 = vmax.f32 %v785_v53, 0.0  ;;  %v2098_v21 = vmax.f32 %v1883_v0, 0.0 }
 0x171   :  { %v3170_v56 = vrot.slane %v11047_v11, 3  ;;  %2589 = vst [vmem:[#allocation3 + $0x1c8] sm:$0xff] %v2490_v5  ;;  %v3183_v16 = vrot.slane %v11047_v11, 4  ;;  %v3180_v5 = vrot.slane %v10988_v63, 4 }
 0x172   :  { %3127 = vrot.lane.b32.xlu1 %v3122_v22, %s9985_s20  ;;  %3125 = vrot.lane.b32.xlu0 %v3120_v52, %s9985_s20  ;;  %v11057_v22 = vpop.f32.mrf.mxu0  ;;  %v11059_v52 = vpop.f32.mrf.mxu1  ;;  %v2494_v35 = vmax.f32 %v1000_v9, %v2098_v21  ;;  %v3261_v9 = vld [vmem:[#allocation3 + $0x12e] sm:$0xff] }
 0x173   :  { %v3171_v11 = vsel %vm2667_vm2, %v3168_v34, %v3170_v56  ;;  %v3184_v56 = vsel %vm2681_vm3, %v3181_v60, %v3183_v16 }
 0x174   :  { %v11044_v33 = vpop.permute.xlu0 %2660  ;;  %v11082_v18 = vpop.f32.mrf.mxu1  ;;  %2593 = vst [vmem:[#allocation3 + $0x1e8] sm:$0xff] %v2494_v35 }
 0x175   :  { %13155 = vst [vmem:[#allocation8_spill] sm:$0xff] %v11044_v33 }
 0x176   :  { %3151 = vrot.lane.b32.xlu1 %v3145_v3, %s9982_s21  ;;  %3149 = vrot.lane.b32.xlu0 %v3146_v1, %s9982_s21  ;;  %v2099_v3 = vmax.f32 %v1888_v44, 0.0  ;;  %v3195_v1 = vld [vmem:[#allocation3 + $0xfc] sm:$0xff]  ;;  %v11094_v33 = vpop.f32.mrf.mxu1 }
 0x177   :  { %v11090_v46 = vmax.f32 %v3195_v1, %v3198_v54  ;;  %v3182_v1 = vsel %vm2681_vm3, %v3180_v5, %v3181_v60  ;;  %v3207_v60 = vrot.slane %v11088_v10, 1 }
 0x178   :  { %v11061_v15 = vpop.permute.xlu1 %2726  ;;  %v2718_v41 = vpop.permute.xlu0 %2717  ;;  %v2495_v47 = vmax.f32 %v1001_v2, %v2099_v3  ;;  %v2493_v2 = vmax.f32 %v999_v61, %v2097_v48  ;;  %v2100_v3 = vmax.f32 %v1891_v29, 0.0  ;;  %v3218_v29 = vrot.slane %v11088_v10, 2 }
 0x179   :  { %v2720_v54 = vadd.f32 %v2718_v41, %v10422_v38  ;;  %v11108_v53 = vpop.f32.mrf.mxu1  ;;  %v3206_v16 = vrot.slane %v11090_v46, 1  ;;  %v3260_v41 = vld [vmem:[#allocation3 + $0x126] sm:$0xff] }
 0x17a   :  { %3162 = vrot.lane.b32.xlu1 %v3156_v8, %s9983_s23  ;;  %3160 = vrot.lane.b32.xlu0 %v3157_v62, %s9983_s23  ;;  %v11080_v8 = vpop.f32.mrf.mxu0  ;;  %2594 = vst [vmem:[#allocation3 + $0x1f0] sm:$0xff] %v2495_v47  ;;  %v3200_v62 = vld [vmem:[#allocation3 + $0x11a] sm:$0x3]  ;;  %2592 = vst [vmem:[#allocation3 + $0x1e0] sm:$0xff] %v2493_v2  ;;  %v2496_v47 = vmax.f32 %v1002_v25, %v2100_v3  ;;  %v3230_v3 = vrot.slane %v11088_v10, 3 }
 0x17b   :  { %v11100_v27 = vmax.f32 %v3197_v45, %v3200_v62  ;;  %v3229_v62 = vrot.slane %v11090_v46, 3  ;;  %v3208_v21 = vsel %vm2642_vm0, %v3206_v16, %v3207_v60  ;;  %v809_v16 = vadd.f32 %v10704_v59, %v11057_v22 }
 0x17c   :  { %v2743_v4 = vpop.permute.xlu1 %2742  ;;  %v2729_v44 = vpop.permute.xlu0 %2728  ;;  %2595 = vst [vmem:[#allocation3 + $0x1f8] sm:$0xff] %v2496_v47 }
 0x17d   :  { %v11092_v13 = vpop.f32.mrf.mxu0  ;;  %v2731_v38 = vadd.f32 %v2729_v44, %v2720_v54  ;;  %v3232_v0 = vrot.slane %v11100_v27, 3  ;;  %v806_v44 = vadd.f32 %v10704_v59, %v11018_v39  ;;  %v11125_v47 = vpop.f32.mrf.mxu1 }
 0x17e   :  { %3176 = vrot.lane.b32.xlu1 %v3171_v11, %s9984_s30  ;;  %3174 = vrot.lane.b32.xlu0 %v3169_v43, %s9984_s30  ;;  %v3217_v43 = vrot.slane %v11090_v46, 2 }
 0x17f   :  { %v11106_v25 = vpop.f32.mrf.mxu0  ;;  %v2745_v39 = vadd.f32 %v2743_v4, %v2731_v38  ;;  %v1005_v54 = vmax.f32 %v806_v44, 0.0  ;;  %v3233_v4 = vsel %vm2667_vm2, %v3230_v3, %v3232_v0  ;;  %v1006_v0 = vmax.f32 %v809_v16, 0.0 }
 0x180   :  { %v2754_v61 = vpop.permute.xlu1 %2753  ;;  %v2716_v34 = vpop.permute.xlu0 %2715  ;;  %v3219_v45 = vsel %vm2654_vm1, %v3217_v43, %v3218_v29 }
 0x181   :  { %v2719_v48 = vadd.f32 %v2716_v34, %v10416_v31  ;;  %v3242_v34 = vrot.slane %v11090_v46, 4 }
 0x182   :  { %3189 = vrot.lane.b32.xlu1 %v3184_v56, %s9985_s20  ;;  %3187 = vrot.lane.b32.xlu0 %v3182_v1, %s9985_s20  ;;  %v11132_v56 = vmax.f32 %v10661_v14, %v3260_v41  ;;  %v1904_v1 = vadd.f32 %v10704_v59, %v11020_v12  ;;  %v1896_v14 = vadd.f32 %v10704_v59, %v11040_v40  ;;  %v11152_v41 = vpop.f32.mrf.mxu1  ;;  %v3245_v40 = vrot.slane %v11100_v27, 4 }
 0x183   :  { %v2730_v31 = vadd.f32 %v11061_v15, %v2719_v48  ;;  %v11123_v15 = vpop.f32.mrf.mxu0  ;;  %v798_v48 = vadd.f32 %v10704_v59, %v11038_v58  ;;  %v3231_v58 = vsel %vm2667_vm2, %v3229_v62, %v3230_v3  ;;  %v1907_v3 = vadd.f32 %v10704_v59, %v11059_v52 }
 0x184   :  { %v11115_v5 = vpop.permute.xlu1 %2777  ;;  %v2741_v2 = vpop.permute.xlu0 %2740  ;;  %v3279_v44 = vrot.slane %v11132_v56, 2 }
 0x185   :  { %v2744_v11 = vadd.f32 %v2741_v2, %v2730_v31  ;;  %v11150_v38 = vpop.f32.mrf.mxu0  ;;  %v2101_v2 = vmax.f32 %v1896_v14, 0.0  ;;  %v11173_v14 = vpop.f32.mrf.mxu1 }
 0x186   :  { %3213 = vrot.lane.b32.xlu1 %v3207_v60, %s9982_s21  ;;  %3224 = vrot.lane.b32.xlu0 %v3218_v29, %s9983_s23  ;;  %v11141_v29 = vmax.f32 %v10738_v51, %v3261_v9  ;;  %v2103_v60 = vmax.f32 %v1904_v1, 0.0  ;;  %v3243_v51 = vrot.slane %v11088_v10, 4  ;;  %v3319_v1 = vld [vmem:[#allocation3 + $0x134] sm:$0xff] }
 0x187   :  { %v2757_v35 = vadd.f32 %v2754_v61, %v2744_v11  ;;  %v1003_v61 = vmax.f32 %v798_v48, 0.0  ;;  %v801_v11 = vadd.f32 %v10704_v59, %v11080_v8  ;;  %v3323_v8 = vld [vmem:[#allocation3 + $0x14a] sm:$0xff]  ;;  %v2104_v48 = vmax.f32 %v1907_v3, 0.0 }
 0x188   :  { %v11138_v43 = vpop.permute.xlu1 %2788  ;;  %v2756_v31 = vpop.permute.xlu0 %2755  ;;  %v2499_v22 = vmax.f32 %v1005_v54, %v2103_v60  ;;  %v3280_v27 = vrot.slane %v11141_v29, 2  ;;  %v3305_v52 = vrot.slane %v11141_v29, 4  ;;  %v3322_v54 = vld [vmem:[#allocation3 + $0x142] sm:$0xff]  ;;  %v3244_v16 = vsel %vm2681_vm3, %v3242_v34, %v3243_v51 }
 0x189   :  { %2759 = vst.msk [vmem:[#allocation4 + $0xe] sm:$0xff] %vm2695_vm5, %v2757_v35  ;;  %v2758_v12 = vadd.f32 %v2756_v31, %v2745_v39  ;;  %v3320_v35 = vld [vmem:[#allocation3 + $0x13c] sm:$0xff]  ;;  %v2497_v39 = vmax.f32 %v1003_v61, %v2101_v2  ;;  %v1004_v31 = vmax.f32 %v801_v11, 0.0  ;;  %v11171_v60 = vpop.f32.mrf.mxu0  ;;  %v2500_v61 = vmax.f32 %v1006_v0, %v2104_v48  ;;  %v1927_v48 = vpop.f32.mrf.mxu1 }
 0x18a   :  { %3222 = vrot.lane.b32.xlu1 %v3219_v45, %s9983_s23  ;;  %3211 = vrot.lane.b32.xlu0 %v3208_v21, %s9982_s21  ;;  %v1899_v45 = vadd.f32 %v10704_v59, %v11082_v18  ;;  %v3304_v21 = vrot.slane %v11132_v56, 4  ;;  %2598 = vst [vmem:[#allocation3 + $0x210] sm:$0xff] %v2499_v22  ;;  %v822_v2 = vadd.f32 %v10704_v59, %v11092_v13 }
 0x18b   :  { %2760 = vst.msk [vmem:[#allocation4 + $0x16] sm:$0x3f] %vm2697_vm6, %v2758_v12  ;;  %v3246_v12 = vsel %vm2681_vm3, %v3243_v51, %v3245_v40  ;;  %2596 = vst [vmem:[#allocation3 + $0x200] sm:$0xff] %v2497_v39  ;;  %v1920_v3 = vadd.f32 %v10704_v59, %v11094_v33  ;;  %v11187_v34 = vmax.f32 %v3319_v1, %v3322_v54  ;;  %v829_v39 = vpop.f32.mrf.mxu0  ;;  %v3291_v1 = vrot.slane %v11132_v56, 3 }
 0x18c   :  { %v11165_v62 = vpop.permute.xlu1 %2815  ;;  %v2780_v9 = vpop.permute.xlu0 %2779  ;;  %v2102_v18 = vmax.f32 %v1899_v45, 0.0  ;;  %v11189_v51 = vmax.f32 %v3320_v35, %v3323_v8  ;;  %v2781_v40 = vadd.f32 %v11115_v5, %v10456_v19  ;;  %v3306_v13 = vsel %vm2681_vm3, %v3304_v21, %v3305_v52  ;;  %2599 = vst [vmem:[#allocation3 + $0x218] sm:$0xff] %v2500_v61 }
 0x18d   :  { %v1009_v33 = vmax.f32 %v822_v2, 0.0  ;;  %v2107_v0 = vmax.f32 %v1920_v3, 0.0  ;;  %v814_v19 = vadd.f32 %v10704_v59, %v11106_v25  ;;  %v1912_v5 = vadd.f32 %v10704_v59, %v11108_v53  ;;  %v8993_v3 = vpop.f32.mrf.mxu0 }
 0x18e   :  { %3238 = vrot.lane.b32.xlu1 %v3233_v4, %s9984_s30  ;;  %3236 = vrot.lane.b32.xlu0 %v3231_v58, %s9984_s30  ;;  %v2498_v22 = vmax.f32 %v1004_v31, %v2102_v18  ;;  %v3281_v4 = vsel %vm2654_vm1, %v3279_v44, %v3280_v27  ;;  %v3269_v58 = vrot.slane %v11141_v29, 1  ;;  %v3268_v44 = vrot.slane %v11132_v56, 1 }
 0x18f   :  { %v2792_v21 = vadd.f32 %v11138_v43, %v2781_v40  ;;  %v2503_v35 = vmax.f32 %v1009_v33, %v2107_v0  ;;  %v825_v54 = vadd.f32 %v10704_v59, %v11123_v15  ;;  %v1923_v8 = vadd.f32 %v10704_v59, %v11125_v47  ;;  %v9109_v40 = vpop.f32.mrf.mxu1 }
 0x190   :  { %v2840_v11 = vpop.permute.xlu1 %2839  ;;  %v2791_v45 = vpop.permute.xlu0 %2790  ;;  %2597 = vst [vmem:[#allocation3 + $0x208] sm:$0xff] %v2498_v22  ;;  %v1007_v61 = vmax.f32 %v814_v19, 0.0  ;;  %v2105_v25 = vmax.f32 %v1912_v5, 0.0  ;;  %v3341_v53 = vrot.slane %v11187_v34, 2  ;;  %v2782_v15 = vadd.f32 %v2780_v9, %v10466_v28  ;;  %v11221_v5 = vld [vmem:[%s13143_s2] ss:$0 sm:$0xff] }
 0x191   :  { %2602 = vst [vmem:[#allocation3 + $0x230] sm:$0xff] %v2503_v35  ;;  %v1010_v43 = vmax.f32 %v825_v54, 0.0  ;;  %v2108_v2 = vmax.f32 %v1923_v8, 0.0  ;;  %v2843_v59 = vadd.f32 %v2840_v11, %v10517_v24  ;;  %v3342_v47 = vrot.slane %v11189_v51, 2  ;;  %v3262_v35 = vld [vmem:[#allocation3 + $0x136] sm:$0x3] }
 0x192   :  { %3249 = vrot.lane.b32.xlu1 %v3244_v16, %s9985_s20  ;;  %3251 = vrot.lane.b32.xlu0 %v3246_v12, %s9985_s20  ;;  %v3330_v16 = vrot.slane %v11187_v34, 1  ;;  %v3331_v12 = vrot.slane %v11189_v51, 1  ;;  %v2501_v33 = vmax.f32 %v1007_v61, %v2105_v25  ;;  %v817_v28 = vadd.f32 %v11221_v5, %v11150_v38  ;;  %v1930_v61 = vpop.f32.mrf.mxu1 }
 0x193   :  { %v2504_v19 = vmax.f32 %v1010_v43, %v2108_v2  ;;  %v1915_v24 = vadd.f32 %v11221_v5, %v11152_v41  ;;  %v2793_v9 = vadd.f32 %v2791_v45, %v2782_v15  ;;  %v1936_v54 = vadd.f32 %v11221_v5, %v11173_v14 }
 0x194   :  { %v2851_v31 = vpop.permute.xlu1 %2850  ;;  %v2803_v18 = vpop.permute.xlu0 %2802  ;;  %2600 = vst [vmem:[#allocation3 + $0x220] sm:$0xff] %v2501_v33  ;;  %v3270_v8 = vsel %vm2642_vm0, %v3268_v44, %v3269_v58  ;;  %v3292_v38 = vrot.slane %v11141_v29, 3  ;;  %v1008_v41 = vmax.f32 %v817_v28, 0.0  ;;  %v1928_v44 = vadd.f32 %v11221_v5, %v1927_v48 }
 0x195   :  { %v2806_v22 = vadd.f32 %v2803_v18, %v2792_v21  ;;  %v2854_v11 = vadd.f32 %v2851_v31, %v2843_v59  ;;  %v3259_v18 = vld [vmem:[#allocation3 + $0x128] sm:$0x3]  ;;  %2603 = vst [vmem:[#allocation3 + $0x238] sm:$0xff] %v2504_v19  ;;  %v2106_v45 = vmax.f32 %v1915_v24, 0.0  ;;  %v832_v31 = vpop.f32.mrf.mxu0  ;;  %v2111_v14 = vmax.f32 %v1936_v54, 0.0  ;;  %v9112_v59 = vpop.f32.mrf.mxu1 }
 0x196   :  { %3284 = vrot.lane.b32.xlu1 %v3281_v4, %s9983_s23  ;;  %3275 = vrot.lane.b32.xlu0 %v3269_v58, %s9982_s21  ;;  %v830_v58 = vadd.f32 %v11221_v5, %v829_v39  ;;  %v841_v2 = vadd.f32 %v11221_v5, %v8993_v3  ;;  %v11244_v19 = vmax.f32 %v3259_v18, %v3262_v35  ;;  %v2109_v48 = vmax.f32 %v1928_v44, 0.0  ;;  %v3385_v44 = vld [vmem:[#allocation3 + $0x166] sm:$0xff] }
 0x197   :  { %v2819_v0 = vadd.f32 %v11165_v62, %v2806_v22  ;;  %v838_v62 = vadd.f32 %v11221_v5, %v11171_v60  ;;  %v2502_v43 = vmax.f32 %v1008_v41, %v2106_v45  ;;  %v8996_v15 = vpop.f32.mrf.mxu0  ;;  %v1939_v28 = vadd.f32 %v11221_v5, %v9109_v40  ;;  %v3384_v40 = vld [vmem:[#allocation3 + $0x15e] sm:$0xff] }
 0x198   :  { %v2865_v4 = vpop.permute.xlu1 %2864  ;;  %v2805_v21 = vpop.permute.xlu0 %2804  ;;  %v1011_v39 = vmax.f32 %v830_v58, 0.0  ;;  %v3343_v3 = vsel %vm2654_vm1, %v3341_v53, %v3342_v47  ;;  %v1931_v53 = vadd.f32 %v11221_v5, %v1930_v61  ;;  %v3294_v58 = vrot.slane %v11244_v19, 3 }
 0x199   :  { %2821 = vst.msk [vmem:[#allocation4 + $0x1c] sm:$0xff] %vm2695_vm5, %v2819_v0  ;;  %v2868_v25 = vadd.f32 %v2865_v4, %v2854_v11  ;;  %v2807_v22 = vadd.f32 %v2805_v21, %v2793_v9  ;;  %v1013_v60 = vmax.f32 %v838_v62, 0.0  ;;  %2601 = vst [vmem:[#allocation3 + $0x228] sm:$0xff] %v2502_v43  ;;  %v1014_v11 = vmax.f32 %v841_v2, 0.0  ;;  %v845_v54 = vpop.f32.mrf.mxu0 }
 0x19a   :  { %3311 = vrot.lane.b32.xlu1 %v3306_v13, %s9985_s20  ;;  %3286 = vrot.lane.b32.xlu0 %v3280_v27, %s9983_s23  ;;  %v3332_v13 = vsel %vm2642_vm0, %v3330_v16, %v3331_v12  ;;  %v3293_v16 = vsel %vm2667_vm2, %v3291_v1, %v3292_v38  ;;  %v2112_v4 = vmax.f32 %v1939_v28, 0.0  ;;  %v3353_v21 = vrot.slane %v11187_v34, 3  ;;  %v4442_v1 = vld [vmem:[#allocation4 + $0xe] sm:$0xff] }
 0x19b   :  { %v2507_v27 = vmax.f32 %v1013_v60, %v2111_v14  ;;  %v2505_v35 = vmax.f32 %v1011_v39, %v2109_v48  ;;  %v833_v62 = vadd.f32 %v11221_v5, %v832_v31  ;;  %v3367_v60 = vrot.slane %v11189_v51, 4  ;;  %v9954_v31 = vld [vmem:[#allocation3 + $0x150] sm:$0xff]  ;;  %v8997_v28 = vpop.f32.mrf.mxu0 }
 0x19c   :  { %v2878_v33 = vpop.permute.xlu1 %2877  ;;  %v2818_v0 = vpop.permute.xlu0 %2817  ;;  %v2508_v14 = vmax.f32 %v1014_v11, %v2112_v4  ;;  %v11266_v2 = vmax.f32 %v9954_v31, %v3384_v40 }
 0x19d   :  { %v2881_v24 = vadd.f32 %v2878_v33, %v2868_v25  ;;  %v2820_v9 = vadd.f32 %v2818_v0, %v2807_v22  ;;  %2606 = vst [vmem:[#allocation3 + $0x250] sm:$0xff] %v2507_v27  ;;  %v3354_v25 = vrot.slane %v11189_v51, 3  ;;  %v3366_v22 = vrot.slane %v11187_v34, 4  ;;  %2604 = vst [vmem:[#allocation3 + $0x240] sm:$0xff] %v2505_v35 }
 0x19e   :  { %3335 = vrot.lane.b32.xlu1 %v3332_v13, %s9982_s21  ;;  %3273 = vrot.lane.b32.xlu0 %v3270_v8, %s9982_s21  ;;  %v1943_v8 = vpop.f32.mrf.mxu1  ;;  %v1012_v61 = vmax.f32 %v833_v62, 0.0  ;;  %v3307_v33 = vrot.slane %v11244_v19, 4  ;;  %2607 = vst [vmem:[#allocation3 + $0x258] sm:$0xff] %v2508_v14  ;;  %v2110_v0 = vmax.f32 %v1931_v53, 0.0  ;;  %v854_v13 = vadd.f32 %v11221_v5, %v8996_v15  ;;  %v9955_v19 = vld [vmem:[#allocation3 + $0x158] sm:$0xff]  ;;  %v848_v14 = vpop.f32.mrf.mxu0 }
 0x19f   :  { %2883 = vst.msk [vmem:[#allocation4 + $0x2a] sm:$0xff] %vm2695_vm5, %v2881_v24  ;;  %v1952_v27 = vadd.f32 %v11221_v5, %v9112_v59  ;;  %v3355_v48 = vsel %vm2667_vm2, %v3353_v21, %v3354_v25  ;;  %v3295_v15 = vsel %vm2667_vm2, %v3292_v38, %v3294_v58  ;;  %v3368_v59 = vsel %vm2681_vm3, %v3366_v22, %v3367_v60 }
 0x1a0   :  { %2822 = vst.msk [vmem:[#allocation4 + $0x24] sm:$0x3f] %vm2697_vm6, %v2820_v9  ;;  %v2902_v18 = vpop.permute.xlu1 %2901  ;;  %v2842_v41 = vpop.permute.xlu0 %2841  ;;  %v4443_v45 = vld [vmem:[#allocation4 + $0x16] sm:$0xff]  ;;  %v2506_v40 = vmax.f32 %v1012_v61, %v2110_v0  ;;  %v3392_v11 = vrot.slane %v11266_v2, 1  ;;  %v1017_v4 = vmax.f32 %v854_v13, 0.0  ;;  %v3308_v35 = vsel %vm2681_vm3, %v3305_v52, %v3307_v33 }
 0x1a1   :  { %v4484_v43 = vpack.c.bf16 %v4443_v45, %v4442_v1  ;;  %v9113_v24 = vpop.f32.mrf.mxu1  ;;  %v2905_v21 = vadd.f32 %v2902_v18, %v10594_v50  ;;  %v2115_v38 = vmax.f32 %v1952_v27, 0.0  ;;  %v846_v1 = vadd.f32 %v11221_v5, %v845_v54  ;;  %v3321_v54 = vld [vmem:[#allocation3 + $0x144] sm:$0x3]  ;;  %v3324_v27 = vld [vmem:[#allocation3 + $0x152] sm:$0x3] }
 0x1a2   :  { %3346 = vrot.lane.b32.xlu1 %v3343_v3, %s9983_s23  ;;  %3298 = vrot.lane.b32.xlu0 %v3293_v16, %s9984_s30  ;;  %v13156_v3 = vmov 0.0   ;;  %v11279_v16 = vmax.f32 %v9955_v19, %v3385_v44  ;;  %2605 = vst [vmem:[#allocation3 + $0x248] sm:$0xff] %v2506_v40  ;;  %v2844_v45 = vadd.f32 %v2842_v41, %v10525_v30  ;;  %v9000_v40 = vpop.f32.mrf.mxu0 }
 0x1a3   :  { %9141 = vmatmul.mubr.msk.bf16.vlgmr.msra.gmra.mxu0 %vm2695_vm5, %v4484_v43  ;;  %v1944_v22 = vadd.f32 %v11221_v5, %v1943_v8  ;;  %v857_v50 = vadd.f32 %v11221_v5, %v8997_v28  ;;  %v1955_v18 = vadd.f32 %v11221_v5, %v9113_v24  ;;  %v1946_v43 = vpop.f32.mrf.mxu1  ;;  %v2511_v61 = vmax.f32 %v1017_v4, %v2115_v38 }
 0x1a4   :  { %v2913_v9 = vpop.permute.xlu1 %2912  ;;  %v2853_v39 = vpop.permute.xlu0 %2852  ;;  %9144 = vmatprep.mubr.msk.bf16.mxu0 %vm9987_vm4, %v13156_v3  ;;  %v3393_v52 = vrot.slane %v11279_v16, 1  ;;  %v1015_v33 = vmax.f32 %v846_v1, 0.0  ;;  %v3403_v8 = vrot.slane %v11266_v2, 2  ;;  %v849_v24 = vadd.f32 %v11221_v5, %v848_v14  ;;  %6517 = vst.msk [vmem:[#allocation7] sm:$0xff] %vm6516_vm7, %v13156_v3  ;;  %6520 = vst.msk [vmem:[#allocation7 + $0x18] sm:$0xff] %vm6516_vm7, %v13156_v3 }
 0x1a5   :  { %v2916_v58 = vadd.f32 %v2913_v9, %v2905_v21  ;;  %v2855_v0 = vadd.f32 %v2853_v39, %v2844_v45  ;;  %v2113_v30 = vmax.f32 %v1944_v22, 0.0  ;;  %v1018_v41 = vmax.f32 %v857_v50, 0.0  ;;  %2610 = vst [vmem:[#allocation3 + $0x270] sm:$0xff] %v2511_v61  ;;  %6523 = vst.msk [vmem:[#allocation7 + $0x30] sm:$0xff] %vm6516_vm7, %v13156_v3 }
 0x1a6   :  { %3360 = vrot.lane.b32.xlu1 %v3355_v48, %s9984_s30  ;;  %3300 = vrot.lane.b32.xlu0 %v3295_v15, %s9984_s30  ;;  %v2116_v28 = vmax.f32 %v1955_v18, 0.0  ;;  %v1947_v19 = vadd.f32 %v11221_v5, %v1946_v43  ;;  %v9116_v15 = vpop.f32.mrf.mxu1  ;;  %v3394_v45 = vsel %vm2642_vm0, %v3392_v11, %v3393_v52  ;;  %v861_v18 = vpop.f32.mrf.mxu0  ;;  %v870_v61 = vadd.f32 %v11221_v5, %v9000_v40 }
 0x1a7   :  { %v4444_v62 = vld [vmem:[#allocation4 + $0x1e] sm:$0xff]  ;;  %v4445_v53 = vld [vmem:[#allocation4 + $0x26] sm:$0xff]  ;;  %v2509_v39 = vmax.f32 %v1015_v33, %v2113_v30  ;;  %v1968_v33 = vadd.f32 %v11221_v5, %v9116_v15  ;;  %v3428_v30 = vrot.slane %v11266_v2, 4  ;;  %6526 = vst.msk [vmem:[#allocation7 + $0x48] sm:$0xff] %vm6516_vm7, %v13156_v3  ;;  %6529 = vst.msk [vmem:[#allocation7 + $0x60] sm:$0xff] %vm6516_vm7, %v13156_v3 }
 0x1a8   :  { %v2927_v44 = vpop.permute.xlu1 %2926  ;;  %v2867_v31 = vpop.permute.xlu0 %2866  ;;  %v4485_v13 = vpack.c.bf16 %v4445_v53, %v4444_v62  ;;  %v2512_v62 = vmax.f32 %v1018_v41, %v2116_v28  ;;  %v1016_v53 = vmax.f32 %v849_v24, 0.0  ;;  %v2114_v22 = vmax.f32 %v1947_v19, 0.0  ;;  %6532 = vst.msk [vmem:[#allocation7 + $0x78] sm:$0xff] %vm6516_vm7, %v13156_v3  ;;  %6535 = vst.msk [vmem:[#allocation7 + $0x90] sm:$0xff] %vm6516_vm7, %v13156_v3 }
 0x1a9   :  { %v2930_v9 = vadd.f32 %v2927_v44, %v2916_v58  ;;  %v2869_v48 = vadd.f32 %v2867_v31, %v2855_v0  ;;  %2608 = vst [vmem:[#allocation3 + $0x260] sm:$0xff] %v2509_v39  ;;  %v1959_v14 = vpop.f32.mrf.mxu1  ;;  %v3415_v44 = vrot.slane %v11266_v2, 3  ;;  %v3416_v31 = vrot.slane %v11279_v16, 3  ;;  %v3443_v39 = vld [vmem:[#allocation3 + $0x16c] sm:$0xff]  ;;  %6539 = vst.msk [vmem:[#allocation7 + $0xb0] sm:$0xff] %vm6516_vm7, %v13156_v3 }
 0x1aa   :  { %3373 = vrot.lane.b32.xlu1 %v3368_v59, %s9985_s20  ;;  %3313 = vrot.lane.b32.xlu0 %v3308_v35, %s9985_s20  ;;  %v3404_v59 = vrot.slane %v11279_v16, 2  ;;  %v3327_v35 = vmax.f32 %v3321_v54, %v3324_v27  ;;  %2611 = vst [vmem:[#allocation3 + $0x278] sm:$0xff] %v2512_v62  ;;  %v2510_v50 = vmax.f32 %v1016_v53, %v2114_v22  ;;  %v3429_v41 = vrot.slane %v11279_v16, 4 }
 0x1ab   :  { %9145 = vmatmul.mubr.msk.bf16.gmra.mxu0 %vm2695_vm5, %v4485_v13  ;;  %v862_v0 = vadd.f32 %v11221_v5, %v861_v18  ;;  %v1960_v13 = vadd.f32 %v11221_v5, %v1959_v14  ;;  %v1021_v28 = vmax.f32 %v870_v61, 0.0  ;;  %v2119_v19 = vmax.f32 %v1968_v33, 0.0  ;;  %v9001_v61 = vpop.f32.mrf.mxu0  ;;  %v9117_v33 = vpop.f32.mrf.mxu1  ;;  %6518 = vst.msk [vmem:[#allocation7 + $0x8] sm:$0xff] %vm6516_vm7, %v13156_v3  ;;  %6519 = vst.msk [vmem:[#allocation7 + $0x10] sm:$0xff] %vm6516_vm7, %v13156_v3 }
 0x1ac   :  { %v2940_v4 = vpop.permute.xlu1 %2939  ;;  %v2880_v21 = vpop.permute.xlu0 %2879  ;;  %9148 = vmatprep.mubr.msk.bf16.mxu0 %vm9987_vm4, %v13156_v3  ;;  %v3405_v11 = vsel %vm2654_vm1, %v3403_v8, %v3404_v59  ;;  %2609 = vst [vmem:[#allocation3 + $0x268] sm:$0xff] %v2510_v50  ;;  %v3369_v8 = vrot.slane %v3327_v35, 4  ;;  %v3430_v18 = vsel %vm2681_vm3, %v3428_v30, %v3429_v41  ;;  %v873_v30 = vadd.f32 %v11221_v5, %v9001_v61 }
 0x1ad   :  { %v2943_v38 = vadd.f32 %v2940_v4, %v2930_v9  ;;  %v2882_v1 = vadd.f32 %v2880_v21, %v2869_v48  ;;  %v3444_v9 = vld [vmem:[#allocation3 + $0x174] sm:$0xff]  ;;  %v3447_v48 = vld [vmem:[#allocation3 + $0x182] sm:$0xff]  ;;  %v1019_v40 = vmax.f32 %v862_v0, 0.0  ;;  %6521 = vst.msk [vmem:[#allocation7 + $0x20] sm:$0xff] %vm6516_vm7, %v13156_v3  ;;  %6522 = vst.msk [vmem:[#allocation7 + $0x28] sm:$0xff] %vm6516_vm7, %v13156_v3 }
 0x1ae   :  { %3397 = vrot.lane.b32.xlu1 %v3394_v45, %s9982_s21  ;;  %3337 = vrot.lane.b32.xlu0 %v3331_v12, %s9982_s21  ;;  %v3356_v12 = vrot.slane %v3327_v35, 3  ;;  %v3446_v21 = vld [vmem:[#allocation3 + $0x17a] sm:$0xff]  ;;  %v2117_v35 = vmax.f32 %v1960_v13, 0.0  ;;  %v3370_v14 = vsel %vm2681_vm3, %v3367_v60, %v3369_v8  ;;  %6524 = vst.msk [vmem:[#allocation7 + $0x38] sm:$0xff] %vm6516_vm7, %v13156_v3  ;;  %6525 = vst.msk [vmem:[#allocation7 + $0x40] sm:$0xff] %vm6516_vm7, %v13156_v3 }
 0x1af   :  { %2945 = vst.msk [vmem:[#allocation4 + $0x38] sm:$0xff] %vm2695_vm5, %v2943_v38  ;;  %v2515_v38 = vmax.f32 %v1021_v28, %v2119_v19  ;;  %v1962_v19 = vpop.f32.mrf.mxu1 }
 0x1b0   :  { %2884 = vst.msk [vmem:[#allocation4 + $0x32] sm:$0x3f] %vm2697_vm6, %v2882_v1  ;;  %v11318_v43 = vpop.permute.xlu1 %2976  ;;  %v2904_v58 = vpop.permute.xlu0 %2903  ;;  %v3357_v24 = vsel %vm2667_vm2, %v3354_v25, %v3356_v12  ;;  %v11344_v25 = vmax.f32 %v3444_v9, %v3447_v48  ;;  %v2513_v22 = vmax.f32 %v1019_v40, %v2117_v35  ;;  %v1022_v9 = vmax.f32 %v873_v30, 0.0 }
 0x1b1   :  { %v2906_v62 = vadd.f32 %v2904_v58, %v10582_v32  ;;  %v3383_v32 = vld [vmem:[#allocation3 + $0x160] sm:$0x3]  ;;  %v3386_v58 = vld [vmem:[#allocation3 + $0x16e] sm:$0x3]  ;;  %2614 = vst [vmem:[#allocation3 + $0x290] sm:$0xff] %v2515_v38  ;;  %v1971_v48 = vadd.f32 %v11221_v5, %v9117_v33  ;;  %v1963_v35 = vadd.f32 %v11221_v5, %v1962_v19  ;;  %6527 = vst.msk [vmem:[#allocation7 + $0x50] sm:$0xff] %vm6516_vm7, %v13156_v3 }
 0x1b2   :  { %3408 = vrot.lane.b32.xlu1 %v3405_v11, %s9983_s23  ;;  %3348 = vrot.lane.b32.xlu0 %v3342_v47, %s9983_s23  ;;  %v3417_v47 = vsel %vm2667_vm2, %v3415_v44, %v3416_v31  ;;  %v11353_v11 = vmax.f32 %v3443_v39, %v3446_v21  ;;  %2612 = vst [vmem:[#allocation3 + $0x280] sm:$0xff] %v2513_v22  ;;  %v3466_v13 = vrot.slane %v11344_v25, 2  ;;  %v864_v39 = vpop.f32.mrf.mxu0  ;;  %6528 = vst.msk [vmem:[#allocation7 + $0x58] sm:$0xff] %vm6516_vm7, %v13156_v3 }
 0x1b3   :  { %v865_v21 = vadd.f32 %v11221_v5, %v864_v39  ;;  %v2120_v38 = vmax.f32 %v1971_v48, 0.0  ;;  %6530 = vst.msk [vmem:[#allocation7 + $0x68] sm:$0xff] %vm6516_vm7, %v13156_v3  ;;  %6531 = vst.msk [vmem:[#allocation7 + $0x70] sm:$0xff] %vm6516_vm7, %v13156_v3 }
 0x1b4   :  { %v2964_v54 = vpop.permute.xlu1 %2963  ;;  %v2915_v27 = vpop.permute.xlu0 %2914  ;;  %v3490_v19 = vrot.slane %v11353_v11, 4  ;;  %6533 = vst.msk [vmem:[#allocation7 + $0x80] sm:$0xff] %vm6516_vm7, %v13156_v3  ;;  %6534 = vst.msk [vmem:[#allocation7 + $0x88] sm:$0xff] %vm6516_vm7, %v13156_v3 }
 0x1b5   :  { %v2917_v50 = vadd.f32 %v2915_v27, %v2906_v62  ;;  %v2967_v44 = vadd.f32 %v2964_v54, %v10687_v36  ;;  %v11361_v27 = vmax.f32 %v3383_v32, %v3386_v58  ;;  %v3455_v36 = vrot.slane %v11344_v25, 1  ;;  %6536 = vst.msk [vmem:[#allocation7 + $0x98] sm:$0xff] %vm6516_vm7, %v13156_v3  ;;  %6537 = vst.msk [vmem:[#allocation7 + $0xa0] sm:$0xff] %vm6516_vm7, %v13156_v3 }
 0x1b6   :  { %3422 = vrot.lane.b32.xlu1 %v3417_v47, %s9984_s30  ;;  %3362 = vrot.lane.b32.xlu0 %v3357_v24, %s9984_s30  ;;  %v3454_v47 = vrot.slane %v11353_v11, 1  ;;  %v3465_v54 = vrot.slane %v11353_v11, 2  ;;  %v1020_v22 = vmax.f32 %v865_v21, 0.0  ;;  %v3477_v32 = vrot.slane %v11353_v11, 3  ;;  %6538 = vst.msk [vmem:[#allocation7 + $0xa8] sm:$0xff] %vm6516_vm7, %v13156_v3  ;;  %6540 = vst.msk [vmem:[#allocation7 + $0xb8] sm:$0xff] %vm6516_vm7, %v13156_v3 }
 0x1b7   :  { %v4446_v15 = vld [vmem:[#allocation4 + $0x2e] sm:$0xff]  ;;  %v4447_v4 = vld [vmem:[#allocation4 + $0x36] sm:$0xff]  ;;  %v2516_v58 = vmax.f32 %v1022_v9, %v2120_v38  ;;  %6541 = vst.msk [vmem:[#allocation7 + $0xc0] sm:$0xff] %vm6516_vm7, %v13156_v3 }
 0x1b8   :  { %v4486_v53 = vpack.c.bf16 %v4447_v4, %v4446_v15  ;;  %v2975_v1 = vpop.permute.xlu1 %2974  ;;  %v2929_v45 = vpop.permute.xlu0 %2928  ;;  %v3418_v4 = vrot.slane %v11361_v27, 3  ;;  %v3448_v9 = vld [vmem:[#allocation3 + $0x18a] sm:$0x3] }
 0x1b9   :  { %v2931_v12 = vadd.f32 %v2929_v45, %v2917_v50  ;;  %v2978_v8 = vadd.f32 %v2975_v1, %v2967_v44  ;;  %v9004_v1 = vpop.f32.mrf.mxu0  ;;  %v3467_v45 = vsel %vm2654_vm1, %v3465_v54, %v3466_v13  ;;  %v2118_v50 = vmax.f32 %v1963_v35, 0.0  ;;  %2615 = vst [vmem:[#allocation3 + $0x298] sm:$0xff] %v2516_v58 }
 0x1ba   :  { %9149 = vmatmul.mubr.msk.bf16.gmra.mxu0 %vm2695_vm5, %v4486_v53  ;;  %3435 = vrot.lane.b32.xlu1 %v3430_v18, %s9985_s20  ;;  %v3456_v53 = vsel %vm2642_vm0, %v3454_v47, %v3455_v36  ;;  %v886_v18 = vadd.f32 %v11221_v5, %v9004_v1 }
 0x1bb   :  { %3375 = vrot.lane.b32.xlu0 %v3370_v14, %s9985_s20  ;;  %9152 = vmatprep.mubr.msk.bf16.mxu0 %vm9987_vm4, %v13156_v3  ;;  %v9120_v14 = vpop.f32.mrf.mxu1 }
 0x1bc   :  { %v2989_v0 = vpop.permute.xlu1 %2988  ;;  %v2942_v60 = vpop.permute.xlu0 %2941  ;;  %v1984_v44 = vadd.f32 %v11221_v5, %v9120_v14 }
 0x1bd   :  { %v2944_v28 = vadd.f32 %v2942_v60, %v2931_v12  ;;  %v2992_v24 = vadd.f32 %v2989_v0, %v2978_v8  ;;  %v877_v12 = vpop.f32.mrf.mxu0  ;;  %v3419_v0 = vsel %vm2667_vm2, %v3416_v31, %v3418_v4  ;;  %v2514_v60 = vmax.f32 %v1020_v22, %v2118_v50  ;;  %v1975_v54 = vpop.f32.mrf.mxu1 }
 0x1be   :  { %3472 = vrot.lane.b32.xlu1 %v3466_v13, %s9983_s23  ;;  %v1025_v13 = vmax.f32 %v886_v18, 0.0  ;;  %v3478_v8 = vrot.slane %v11344_v25, 3  ;;  %v2123_v47 = vmax.f32 %v1984_v44, 0.0  ;;  %v1976_v48 = vadd.f32 %v11221_v5, %v1975_v54 }
 0x1bf   :  { %3399 = vrot.lane.b32.xlu0 %v3393_v52, %s9982_s21  ;;  %2946 = vst.msk [vmem:[#allocation4 + $0x40] sm:$0x3f] %vm2697_vm6, %v2944_v28  ;;  %v3431_v28 = vrot.slane %v11361_v27, 4  ;;  %2613 = vst [vmem:[#allocation3 + $0x288] sm:$0xff] %v2514_v60  ;;  %v9121_v38 = vpop.f32.mrf.mxu1 }
 0x1c0   :  { %v3002_v40 = vpop.permute.xlu1 %3001  ;;  %v2966_v15 = vpop.permute.xlu0 %2965  ;;  %v2519_v27 = vmax.f32 %v1025_v13, %v2123_v47  ;;  %v2121_v21 = vmax.f32 %v1976_v48, 0.0  ;;  %v3479_v35 = vsel %vm2667_vm2, %v3477_v32, %v3478_v8  ;;  %v1987_v18 = vadd.f32 %v11221_v5, %v9121_v38  ;;  %v3509_v32 = vld [vmem:[#allocation3 + $0x19e] sm:$0xff]  ;;  %v9956_v47 = vld [vmem:[#allocation3 + $0x190] sm:$0xff] }
 0x1c1   :  { %v3005_v62 = vadd.f32 %v3002_v40, %v2992_v24  ;;  %v2968_v52 = vadd.f32 %v2966_v15, %v10680_v26  ;;  %v3445_v24 = vld [vmem:[#allocation3 + $0x17c] sm:$0x3]  ;;  %v3491_v40 = vrot.slane %v11344_v25, 4  ;;  %v1978_v58 = vpop.f32.mrf.mxu1  ;;  %v11426_v54 = vmax.f32 %v9956_v47, %v3509_v32 }
 0x1c2   :  { %3459 = vrot.lane.b32.xlu1 %v3456_v53, %s9982_s21  ;;  %2618 = vst [vmem:[#allocation3 + $0x2b0] sm:$0xff] %v2519_v27  ;;  %v9005_v53 = vpop.f32.mrf.mxu0  ;;  %v1979_v60 = vadd.f32 %v11221_v5, %v1978_v58 }
 0x1c3   :  { %3410 = vrot.lane.b32.xlu0 %v3404_v59, %s9983_s23  ;;  %3007 = vst.msk [vmem:[#allocation4 + $0x46] sm:$0xff] %vm2695_vm5, %v3005_v62  ;;  %v2979_v26 = vadd.f32 %v11318_v43, %v2968_v52  ;;  %v9899_v59 = vld [vmem:[%s13144_s3 + $0x10] sm:$0xff]   ;;  %v878_v43 = vadd.f32 %v11221_v5, %v877_v12  ;;  %v3432_v62 = vsel %vm2681_vm3, %v3429_v41, %v3431_v28  ;;  %v3528_v38 = vrot.slane %v11426_v54, 2 }
 0x1c4   :  { %v3004_v61 = vpop.permute.xlu1 %3003  ;;  %v2991_v33 = vpop.permute.xlu0 %2990  ;;  %9225 = vmatpush3.bf16.msra.mxu1 %v9899_v59  ;;  %v3451_v52 = vmax.f32 %v3445_v24, %v3448_v9  ;;  %v889_v50 = vadd.f32 %v11221_v5, %v9005_v53  ;;  %v3508_v59 = vld [vmem:[#allocation3 + $0x196] sm:$0xff] }
 0x1c5   :  { %v2993_v30 = vadd.f32 %v2991_v33, %v2979_v26  ;;  %v1023_v31 = vmax.f32 %v878_v43, 0.0  ;;  %9226 = vmatprep.subr.bf16.mxu1 %v13156_v3  ;;  %v3492_v26 = vsel %vm2681_vm3, %v3490_v19, %v3491_v40  ;;  %v880_v41 = vpop.f32.mrf.mxu0  ;;  %v2124_v33 = vmax.f32 %v1987_v18, 0.0 }
 0x1c6   :  { %3470 = vrot.lane.b32.xlu1 %v3467_v45, %s9983_s23  ;;  %v4448_v1 = vld [vmem:[#allocation4 + $0x3e] sm:$0xff]  ;;  %v3480_v28 = vrot.slane %v3451_v52, 3 }
 0x1c7   :  { %3424 = vrot.lane.b32.xlu0 %v3419_v0, %s9984_s30  ;;  %v3006_v39 = vadd.f32 %v3004_v61, %v2993_v30  ;;  %v2517_v22 = vmax.f32 %v1023_v31, %v2121_v21  ;;  %v1026_v61 = vmax.f32 %v889_v50, 0.0  ;;  %v881_v0 = vadd.f32 %v11221_v5, %v880_v41 }
 0x1c8   :  { %v3039_v15 = vpop.permute.xlu1 %3038  ;;  %v3028_v4 = vpop.permute.xlu0 %3027  ;;  %v3493_v30 = vrot.slane %v3451_v52, 4  ;;  %v2122_v31 = vmax.f32 %v1979_v60, 0.0 }
 0x1c9   :  { %3008 = vst.msk [vmem:[#allocation4 + $0x4e] sm:$0x3f] %vm2697_vm6, %v3006_v39  ;;  %2616 = vst [vmem:[#allocation3 + $0x2a0] sm:$0xff] %v2517_v22  ;;  %v3030_v13 = vadd.f32 %v3028_v4, %v10843_v7  ;;  %v2520_v24 = vmax.f32 %v1026_v61, %v2124_v33  ;;  %v1024_v9 = vmax.f32 %v881_v0, 0.0  ;;  %v9957_v7 = vld [vmem:[#allocation3 + $0x188] sm:$0xff]  ;;  %v9124_v52 = vpop.f32.mrf.mxu1 }
 0x1ca   :  { %3484 = vrot.lane.b32.xlu1 %v3479_v35, %s9984_s30  ;;  %v4449_v45 = vld [vmem:[#allocation4 + $0x46] sm:$0xff]  ;;  %v11428_v39 = vmax.f32 %v9957_v7, %v3508_v59  ;;  %v3494_v35 = vsel %vm2681_vm3, %v3491_v40, %v3493_v30 }
 0x1cb   :  { %3437 = vrot.lane.b32.xlu0 %v3432_v62, %s9985_s20  ;;  %v4487_v14 = vpack.c.bf16 %v4449_v45, %v4448_v1  ;;  %2619 = vst [vmem:[#allocation3 + $0x2b8] sm:$0xff] %v2520_v24  ;;  %v2518_v4 = vmax.f32 %v1024_v9, %v2122_v31  ;;  %v3041_v21 = vadd.f32 %v3039_v15, %v3030_v13  ;;  %v3507_v1 = vld [vmem:[#allocation3 + $0x198] sm:$0x3]  ;;  %v3510_v45 = vld [vmem:[#allocation3 + $0x1a6] sm:$0x3]  ;;  %v3540_v31 = vrot.slane %v11426_v54, 3 }
 0x1cc   :  { %v3026_v44 = vpop.permute.xlu1 %3025  ;;  %v3037_v12 = vpop.permute.xlu0 %3036  ;;  %v3481_v62 = vsel %vm2667_vm2, %v3478_v8, %v3480_v28  ;;  %v2000_v15 = vadd.f32 %v11221_v5, %v9124_v52  ;;  %v3517_v8 = vrot.slane %v11426_v54, 1  ;;  %v3527_v60 = vrot.slane %v11428_v39, 2 }
 0x1cd   :  { %v3029_v43 = vadd.f32 %v3026_v44, %v10852_v17  ;;  %9153 = vmatmul.mubr.msk.bf16.gmra.mxu0 %vm2695_vm5, %v4487_v14  ;;  %v9008_v17 = vpop.f32.mrf.mxu0  ;;  %2617 = vst [vmem:[#allocation3 + $0x2a8] sm:$0xff] %v2518_v4  ;;  %v3516_v14 = vrot.slane %v11428_v39, 1  ;;  %v11447_v13 = vmax.f32 %v3507_v1, %v3510_v45  ;;  %v3539_v4 = vrot.slane %v11428_v39, 3  ;;  %v3568_v1 = vld [vmem:[#allocation3 + $0x1ac] sm:$0xff]  ;;  %v3571_v45 = vld [vmem:[#allocation3 + $0x1ba] sm:$0xff] }
 0x1ce   :  { %3497 = vrot.lane.b32.xlu1 %v3492_v26, %s9985_s20  ;;  %9156 = vmatprep.mubr.msk.bf16.mxu0 %vm9987_vm4, %v13156_v3  ;;  %v1991_v26 = vpop.f32.mrf.mxu1  ;;  %v2127_v44 = vmax.f32 %v2000_v15, 0.0  ;;  %v3529_v52 = vsel %vm2654_vm1, %v3527_v60, %v3528_v38 }
 0x1cf   :  { %3461 = vrot.lane.b32.xlu0 %v3455_v36, %s9982_s21  ;;  %v3040_v48 = vadd.f32 %v3037_v12, %v3029_v43  ;;  %v902_v36 = vadd.f32 %v11221_v5, %v9008_v17  ;;  %v893_v53 = vpop.f32.mrf.mxu0  ;;  %v1992_v59 = vadd.f32 %v11221_v5, %v1991_v26 }
 0x1d0   :  { %v3051_v19 = vpop.permute.xlu1 %3050  ;;  %v3053_v27 = vpop.permute.xlu0 %3052  ;;  %v894_v40 = vadd.f32 %v11221_v5, %v893_v53  ;;  %v3542_v53 = vrot.slane %v11447_v13, 3 }
 0x1d1   :  { %v1029_v22 = vmax.f32 %v902_v36, 0.0  ;;  %v3054_v50 = vadd.f32 %v3051_v19, %v3040_v48  ;;  %v3055_v18 = vadd.f32 %v3053_v27, %v3041_v21  ;;  %v9009_v32 = vpop.f32.mrf.mxu0  ;;  %v9125_v43 = vpop.f32.mrf.mxu1  ;;  %v2125_v47 = vmax.f32 %v1992_v59, 0.0 }
 0x1d2   :  { %3499 = vrot.lane.b32.xlu1 %v3494_v35, %s9985_s20  ;;  %v1027_v12 = vmax.f32 %v894_v40, 0.0  ;;  %v905_v61 = vadd.f32 %v11221_v5, %v9009_v32  ;;  %v2003_v9 = vadd.f32 %v11221_v5, %v9125_v43  ;;  %v3567_v40 = vld [vmem:[#allocation3 + $0x1a4] sm:$0xff]  ;;  %v3552_v32 = vrot.slane %v11428_v39, 4 }
 0x1d3   :  { %3486 = vrot.lane.b32.xlu0 %v3481_v62, %s9984_s30  ;;  %v896_v30 = vpop.f32.mrf.mxu0  ;;  %v2523_v28 = vmax.f32 %v1029_v22, %v2127_v44  ;;  %v1994_v7 = vpop.f32.mrf.mxu1  ;;  %v3518_v62 = vsel %vm2642_vm0, %v3516_v14, %v3517_v8  ;;  %v3553_v14 = vrot.slane %v11426_v54, 4  ;;  %v3541_v44 = vsel %vm2667_vm2, %v3539_v4, %v3540_v31 }
 0x1d4   :  { %v3066_v41 = vpop.permute.xlu1 %3065  ;;  %v3064_v58 = vpop.permute.xlu0 %3063  ;;  %v1030_v24 = vmax.f32 %v905_v61, 0.0  ;;  %v897_v48 = vadd.f32 %v11221_v5, %v896_v30  ;;  %v2521_v36 = vmax.f32 %v1027_v12, %v2125_v47  ;;  %v2128_v21 = vmax.f32 %v2003_v9, 0.0 }
 0x1d5   :  { %v3068_v33 = vadd.f32 %v3066_v41, %v3055_v18  ;;  %v3067_v0 = vadd.f32 %v3064_v58, %v3054_v50  ;;  %v11456_v17 = vpop.f32.mrf.mxu0  ;;  %2622 = vst [vmem:[#allocation3 + $0x2d0] sm:$0xff] %v2523_v28  ;;  %v1995_v35 = vadd.f32 %v11221_v5, %v1994_v7  ;;  %v3570_v50 = vld [vmem:[#allocation3 + $0x1b2] sm:$0xff]  ;;  %v11471_v41 = vmax.f32 %v3568_v1, %v3571_v45 }
 0x1d6   :  { %3534 = vrot.lane.b32.xlu1 %v3528_v38, %s9983_s23  ;;  %v1028_v22 = vmax.f32 %v897_v48, 0.0  ;;  %2620 = vst [vmem:[#allocation3 + $0x2c0] sm:$0xff] %v2521_v36  ;;  %v2524_v18 = vmax.f32 %v1030_v24, %v2128_v21  ;;  %v3543_v12 = vsel %vm2667_vm2, %v3540_v31, %v3542_v53  ;;  %v3555_v59 = vrot.slane %v11447_v13, 4 }
 0x1d7   :  { %3523 = vrot.lane.b32.xlu0 %v3517_v8, %s9982_s21  ;;  %3070 = vst.msk [vmem:[#allocation4 + $0x5c] sm:$0x3f] %vm2697_vm6, %v3068_v33  ;;  %v11463_v15 = vpop.f32.mrf.mxu0  ;;  %v2126_v5 = vmax.f32 %v1995_v35, 0.0  ;;  %v11476_v61 = vmax.f32 %v3567_v40, %v3570_v50  ;;  %v3554_v9 = vsel %vm2681_vm3, %v3552_v32, %v3553_v14  ;;  %v3579_v31 = vrot.slane %v11471_v41, 1 }
 0x1d8   :  { %3069 = vst.msk [vmem:[#allocation4 + $0x54] sm:$0xff] %vm2695_vm5, %v3067_v0  ;;  %v3090_v19 = vpop.permute.xlu1 %3089  ;;  %v3088_v27 = vpop.permute.xlu0 %3087  ;;  %2623 = vst [vmem:[#allocation3 + $0x2d8] sm:$0xff] %v2524_v18  ;;  %v3556_v4 = vsel %vm2681_vm3, %v3553_v14, %v3555_v59  ;;  %v3590_v1 = vrot.slane %v11471_v41, 2  ;;  %v3602_v14 = vrot.slane %v11471_v41, 3 }
 0x1d9   :  { %v11467_v26 = vpop.f32.mrf.mxu0  ;;  %v2522_v58 = vmax.f32 %v1028_v22, %v2126_v5  ;;  %v3092_v43 = vadd.f32 %v3090_v19, %v10917_v23  ;;  %v3091_v30 = vadd.f32 %v3088_v27, %v10919_v37  ;;  %v3578_v36 = vrot.slane %v11476_v61, 1  ;;  %v3569_v37 = vld [vmem:[#allocation3 + $0x1b4] sm:$0x3]  ;;  %v3572_v19 = vld [vmem:[#allocation3 + $0x1c2] sm:$0x3] }
 0x1da   :  { %3521 = vrot.lane.b32.xlu1 %v3518_v62, %s9982_s21  ;;  %v9900_v62 = vld [vmem:[%s13144_s3 + $0x40] sm:$0xff]   ;;  %v3589_v45 = vrot.slane %v11476_v61, 2  ;;  %v3575_v18 = vmax.f32 %v3569_v37, %v3572_v19 }
 0x1db   :  { %3532 = vrot.lane.b32.xlu0 %v3529_v52, %s9983_s23  ;;  %v11478_v33 = vpop.f32.mrf.mxu0  ;;  %2621 = vst [vmem:[#allocation3 + $0x2c8] sm:$0xff] %v2522_v58  ;;  %v3580_v50 = vsel %vm2642_vm0, %v3578_v36, %v3579_v31  ;;  %9315 = vmatpush3.bf16.msra.mxu0 %v9900_v62  ;;  %v3601_v58 = vrot.slane %v11476_v61, 3 }
 0x1dc   :  { %v3101_v8 = vpop.permute.xlu1 %3100  ;;  %v3099_v38 = vpop.permute.xlu0 %3098  ;;  %9316 = vmatprep.subr.bf16.mxu0 %v13156_v3  ;;  %v3604_v32 = vrot.slane %v3575_v18, 3 }
 0x1dd   :  { %v11484_v47 = vpop.f32.mrf.mxu0  ;;  %v3103_v48 = vadd.f32 %v3101_v8, %v3092_v43  ;;  %v3102_v7 = vadd.f32 %v3099_v38, %v3091_v30  ;;  %v3591_v38 = vsel %vm2654_vm1, %v3589_v45, %v3590_v1  ;;  %v3617_v43 = vrot.slane %v3575_v18, 4 }
 0x1de   :  { %3546 = vrot.lane.b32.xlu1 %v3541_v44, %s9984_s30  ;;  %v3633_v44 = vld [vmem:[#allocation3 + $0x1d6] sm:$0xff]  ;;  %v3614_v30 = vrot.slane %v11476_v61, 4 }
 0x1df   :  { %3548 = vrot.lane.b32.xlu0 %v3543_v12, %s9984_s30  ;;  %v4450_v0 = vld [vmem:[#allocation4 + $0x4e] sm:$0xff]  ;;  %v4451_v60 = vld [vmem:[#allocation4 + $0x56] sm:$0xff]  ;;  %v11491_v23 = vpop.f32.mrf.mxu0 }
 0x1e0   :  { %v4488_v28 = vpack.c.bf16 %v4451_v60, %v4450_v0  ;;  %v3115_v24 = vpop.permute.xlu1 %3114  ;;  %v3113_v13 = vpop.permute.xlu0 %3112  ;;  %v3632_v12 = vld [vmem:[#allocation3 + $0x1ce] sm:$0xff]  ;;  %v3615_v60 = vrot.slane %v11471_v41, 4 }
 0x1e1   :  { %v3117_v27 = vadd.f32 %v3115_v24, %v3103_v48  ;;  %v3116_v21 = vadd.f32 %v3113_v13, %v3102_v7  ;;  %v9017_v35 = vpop.f32.mrf.mxu0  ;;  %v3603_v24 = vsel %vm2667_vm2, %v3601_v58, %v3602_v14  ;;  %v9958_v13 = vld [vmem:[#allocation3 + $0x1c8] sm:$0xff] }
 0x1e2   :  { %9157 = vmatmul.mubr.msk.bf16.gmra.mxu0 %vm2695_vm5, %v4488_v28  ;;  %3561 = vrot.lane.b32.xlu1 %v3556_v4, %s9985_s20  ;;  %v3605_v28 = vsel %vm2667_vm2, %v3602_v14, %v3604_v32  ;;  %v3618_v35 = vsel %vm2681_vm3, %v3615_v60, %v3617_v43  ;;  %v3616_v62 = vsel %vm2681_vm3, %v3614_v30, %v3615_v60 }
 0x1e3   :  { %3559 = vrot.lane.b32.xlu0 %v3554_v9, %s9985_s20  ;;  %9160 = vmatprep.mubr.msk.bf16.mxu0 %vm9987_vm4, %v13156_v3  ;;  %v11517_v9 = vmax.f32 %v9958_v13, %v3633_v44 }
 0x1e4   :  { %v3128_v52 = vpop.permute.xlu1 %3127  ;;  %v3126_v53 = vpop.permute.xlu0 %3125 }
 0x1e5   :  { %v3130_v22 = vadd.f32 %v3128_v52, %v3117_v27  ;;  %v3129_v40 = vadd.f32 %v3126_v53, %v3116_v21 }
 0x1e6   :  { %3585 = vrot.lane.b32.xlu1 %v3579_v31, %s9982_s21  ;;  %v9959_v31 = vld [vmem:[#allocation3 + $0x1c0] sm:$0xff] }
 0x1e7   :  { %3583 = vrot.lane.b32.xlu0 %v3580_v50, %s9982_s21  ;;  %3132 = vst.msk [vmem:[#allocation4 + $0x6a] sm:$0x3f] %vm2697_vm6, %v3130_v22  ;;  %v11519_v48 = vmax.f32 %v9959_v31, %v3632_v12  ;;  %v3631_v22 = vld [vmem:[#allocation3 + $0x1d0] sm:$0x3]  ;;  %v3677_v31 = vrot.slane %v11517_v9, 4 }
 0x1e8   :  { %3131 = vst.msk [vmem:[#allocation4 + $0x62] sm:$0xff] %vm2695_vm5, %v3129_v40  ;;  %v3152_v5 = vpop.permute.xlu1 %3151  ;;  %v3150_v8 = vpop.permute.xlu0 %3149  ;;  %v3634_v40 = vld [vmem:[#allocation3 + $0x1de] sm:$0x3] }
 0x1e9   :  { %v3154_v36 = vadd.f32 %v3152_v5, %v10976_v20  ;;  %v3153_v37 = vadd.f32 %v3150_v8, %v10988_v63  ;;  %v3640_v45 = vrot.slane %v11519_v48, 1  ;;  %v3652_v5 = vrot.slane %v11517_v9, 2 }
 0x1ea   :  { %3596 = vrot.lane.b32.xlu1 %v3590_v1, %s9983_s23  ;;  %v3641_v1 = vrot.slane %v11517_v9, 1  ;;  %v3637_v8 = vmax.f32 %v3631_v22, %v3634_v40  ;;  %v3651_v58 = vrot.slane %v11519_v48, 2  ;;  %v3663_v60 = vrot.slane %v11519_v48, 3 }
 0x1eb   :  { %3594 = vrot.lane.b32.xlu0 %v3591_v38, %s9983_s23 }
 0x1ec   :  { %v3163_v59 = vpop.permute.xlu1 %3162  ;;  %v3161_v0 = vpop.permute.xlu0 %3160  ;;  %v3642_v32 = vsel %vm2642_vm0, %v3640_v45, %v3641_v1  ;;  %v3653_v43 = vsel %vm2654_vm1, %v3651_v58, %v3652_v5 }
 0x1ed   :  { %v3165_v52 = vadd.f32 %v3163_v59, %v3154_v36  ;;  %v3164_v53 = vadd.f32 %v3161_v0, %v3153_v37  ;;  %v3664_v59 = vrot.slane %v11517_v9, 3  ;;  %v3666_v0 = vrot.slane %v3637_v8, 3 }
 0x1ee   :  { %3610 = vrot.lane.b32.xlu1 %v3605_v28, %s9984_s30  ;;  %v3679_v37 = vrot.slane %v3637_v8, 4 }
 0x1ef   :  { %3608 = vrot.lane.b32.xlu0 %v3603_v24, %s9984_s30  ;;  %v4452_v7 = vld [vmem:[#allocation4 + $0x5e] sm:$0xff]  ;;  %v4453_v4 = vld [vmem:[#allocation4 + $0x66] sm:$0xff]  ;;  %v3667_v24 = vsel %vm2667_vm2, %v3664_v59, %v3666_v0  ;;  %v3665_v13 = vsel %vm2667_vm2, %v3663_v60, %v3664_v59 }
 0x1f0   :  { %v4489_v19 = vpack.c.bf16 %v4453_v4, %v4452_v7  ;;  %v3177_v27 = vpop.permute.xlu1 %3176  ;;  %v3175_v21 = vpop.permute.xlu0 %3174  ;;  %v3691_v7 = vld [vmem:[#allocation3 + $0x1dc] sm:$0xff] }
 0x1f1   :  { %v3179_v20 = vadd.f32 %v3177_v27, %v3165_v52  ;;  %v3178_v63 = vadd.f32 %v3175_v21, %v3164_v53  ;;  %v3692_v27 = vld [vmem:[#allocation3 + $0x1e4] sm:$0xff]  ;;  %v3695_v21 = vld [vmem:[#allocation3 + $0x1f2] sm:$0xff]  ;;  %v11574_v59 = vld [vmem:[%s13143_s2] ss:$0 sm:$0xff] }
 0x1f2   :  { %9161 = vmatmul.mubr.msk.bf16.gmra.mxu0 %vm2695_vm5, %v4489_v19  ;;  %3623 = vrot.lane.b32.xlu1 %v3618_v35, %s9985_s20  ;;  %v3676_v19 = vrot.slane %v11519_v48, 4  ;;  %v3694_v35 = vld [vmem:[#allocation3 + $0x1ea] sm:$0xff]  ;;  %v11554_v40 = vmax.f32 %v3692_v27, %v3695_v21  ;;  %v918_v0 = vadd.f32 %v11574_v59, %v11456_v17 }
 0x1f3   :  { %3621 = vrot.lane.b32.xlu0 %v3616_v62, %s9985_s20  ;;  %9164 = vmatprep.mubr.msk.bf16.mxu0 %vm9987_vm4, %v13156_v3 }
 0x1f4   :  { %v3190_v50 = vpop.permute.xlu1 %3189  ;;  %v3188_v18 = vpop.permute.xlu0 %3187  ;;  %v3703_v58 = vrot.slane %v11554_v40, 1  ;;  %v3726_v17 = vrot.slane %v11554_v40, 3 }
 0x1f5   :  { %v3192_v38 = vadd.f32 %v3190_v50, %v3179_v20  ;;  %v3191_v14 = vadd.f32 %v3188_v18, %v3178_v63  ;;  %v3680_v20 = vsel %vm2681_vm3, %v3677_v31, %v3679_v37  ;;  %v3678_v63 = vsel %vm2681_vm3, %v3676_v19, %v3677_v31  ;;  %v3693_v50 = vld [vmem:[#allocation3 + $0x1ec] sm:$0x3]  ;;  %v3696_v18 = vld [vmem:[#allocation3 + $0x1fa] sm:$0x3] }
 0x1f6   :  { %3647 = vrot.lane.b32.xlu1 %v3641_v1, %s9982_s21  ;;  %v921_v37 = vadd.f32 %v11574_v59, %v11467_v26 }
 0x1f7   :  { %3645 = vrot.lane.b32.xlu0 %v3642_v32, %s9982_s21  ;;  %3194 = vst.msk [vmem:[#allocation4 + $0x78] sm:$0x3f] %vm2697_vm6, %v3192_v38  ;;  %v9128_v31 = vpop.f32.mrf.mxu1 }
 0x1f8   :  { %3193 = vst.msk [vmem:[#allocation4 + $0x70] sm:$0xff] %vm2695_vm5, %v3191_v14  ;;  %v3214_v44 = vpop.permute.xlu1 %3213  ;;  %v3225_v12 = vpop.permute.xlu0 %3224  ;;  %v2016_v19 = vadd.f32 %v11574_v59, %v9128_v31 }
 0x1f9   :  { %v3216_v4 = vadd.f32 %v3214_v44, %v11088_v10  ;;  %v11556_v10 = vmax.f32 %v3691_v7, %v3694_v35  ;;  %v3714_v44 = vrot.slane %v11554_v40, 2  ;;  %v2007_v35 = vpop.f32.mrf.mxu1 }
 0x1fa   :  { %3658 = vrot.lane.b32.xlu1 %v3652_v5, %s9983_s23  ;;  %v9901_v5 = vld [vmem:[%s13144_s3 + $0x8] sm:$0xff]   ;;  %v2008_v26 = vadd.f32 %v11574_v59, %v2007_v35  ;;  %v3815_v35 = vld [vmem:[#allocation3 + $0x214] sm:$0xff] }
 0x1fb   :  { %3656 = vrot.lane.b32.xlu0 %v3653_v43, %s9983_s23  ;;  %9227 = vmatpush3.bf16.msra.mxu1 %v9901_v5  ;;  %v1034_v5 = vmax.f32 %v921_v37, 0.0 }
 0x1fc   :  { %v3223_v30 = vpop.permute.xlu1 %3222  ;;  %v3212_v28 = vpop.permute.xlu0 %3211  ;;  %9228 = vmatprep.subr.bf16.mxu1 %v13156_v3 }
 0x1fd   :  { %v3215_v36 = vadd.f32 %v3212_v28, %v11090_v46  ;;  %v3227_v46 = vadd.f32 %v3225_v12, %v3216_v4  ;;  %v3713_v12 = vrot.slane %v11556_v10, 2  ;;  %v3699_v28 = vmax.f32 %v3693_v50, %v3696_v18 }
 0x1fe   :  { %3672 = vrot.lane.b32.xlu1 %v3667_v24, %s9984_s30  ;;  %v910_v24 = vadd.f32 %v11574_v59, %v11463_v15 }
 0x1ff   :  { %3670 = vrot.lane.b32.xlu0 %v3665_v13, %s9984_s30  ;;  %v4454_v62 = vld [vmem:[#allocation4 + $0x6e] sm:$0xff]  ;;  %v4455_v52 = vld [vmem:[#allocation4 + $0x76] sm:$0xff]  ;;  %v3226_v53 = vadd.f32 %v3223_v30, %v3215_v36  ;;  %v3702_v30 = vrot.slane %v11556_v10, 1  ;;  %v3725_v13 = vrot.slane %v11556_v10, 3  ;;  %v1033_v36 = vmax.f32 %v918_v0, 0.0 }
 0x200   :  { %v4490_v1 = vpack.c.bf16 %v4455_v52, %v4454_v62  ;;  %v3239_v45 = vpop.permute.xlu1 %3238  ;;  %v3237_v22 = vpop.permute.xlu0 %3236  ;;  %v3715_v15 = vsel %vm2654_vm1, %v3713_v12, %v3714_v44  ;;  %v3728_v21 = vrot.slane %v3699_v28, 3  ;;  %v3756_v62 = vld [vmem:[#allocation3 + $0x206] sm:$0xff]  ;;  %v3757_v52 = vld [vmem:[#allocation3 + $0x20e] sm:$0xff] }
 0x201   :  { %v3241_v8 = vadd.f32 %v3239_v45, %v3227_v46  ;;  %v3240_v38 = vadd.f32 %v3237_v22, %v3226_v53  ;;  %v3704_v27 = vsel %vm2642_vm0, %v3702_v30, %v3703_v58  ;;  %v1031_v53 = vmax.f32 %v910_v24, 0.0  ;;  %v9962_v12 = vld [vmem:[#allocation3 + $0x200] sm:$0xff] }
 0x202   :  { %9165 = vmatmul.mubr.msk.bf16.gmra.mxu0 %vm2695_vm5, %v4490_v1  ;;  %3685 = vrot.lane.b32.xlu1 %v3680_v20, %s9985_s20  ;;  %v913_v1 = vadd.f32 %v11574_v59, %v11478_v33  ;;  %v2131_v45 = vmax.f32 %v2016_v19, 0.0  ;;  %v3727_v22 = vsel %vm2667_vm2, %v3725_v13, %v3726_v17  ;;  %v3738_v46 = vrot.slane %v11556_v10, 4 }
 0x203   :  { %3683 = vrot.lane.b32.xlu0 %v3678_v63, %s9985_s20  ;;  %9168 = vmatprep.mubr.msk.bf16.mxu0 %vm9987_vm4, %v13156_v3  ;;  %v3739_v20 = vrot.slane %v11554_v40, 4  ;;  %v9129_v63 = vpop.f32.mrf.mxu1  ;;  %v3729_v33 = vsel %vm2667_vm2, %v3726_v17, %v3728_v21  ;;  %v11609_v0 = vmax.f32 %v9962_v12, %v3757_v52  ;;  %v3818_v52 = vld [vmem:[#allocation3 + $0x222] sm:$0xff] }
 0x204   :  { %v3250_v14 = vpop.permute.xlu1 %3249  ;;  %v3252_v32 = vpop.permute.xlu0 %3251 }
 0x205   :  { %v3253_v60 = vadd.f32 %v3250_v14, %v3240_v38  ;;  %v3254_v43 = vadd.f32 %v3252_v32, %v3241_v8  ;;  %v2527_v8 = vmax.f32 %v1033_v36, %v2131_v45  ;;  %v2129_v38 = vmax.f32 %v2008_v26, 0.0 }
 0x206   :  { %3709 = vrot.lane.b32.xlu1 %v3703_v58, %s9982_s21  ;;  %v2019_v14 = vadd.f32 %v11574_v59, %v9129_v63  ;;  %v3741_v32 = vrot.slane %v3699_v28, 4  ;;  %v9961_v58 = vld [vmem:[#allocation3 + $0x1f8] sm:$0xff]  ;;  %v3740_v28 = vsel %vm2681_vm3, %v3738_v46, %v3739_v20  ;;  %v3776_v21 = vrot.slane %v11609_v0, 2 }
 0x207   :  { %3720 = vrot.lane.b32.xlu0 %v3714_v44, %s9983_s23  ;;  %3255 = vst.msk [vmem:[#allocation4 + $0x7e] sm:$0xff] %vm2695_vm5, %v3253_v60  ;;  %v11607_v44 = vmax.f32 %v9961_v58, %v3756_v62  ;;  %v2010_v60 = vpop.f32.mrf.mxu1  ;;  %2626 = vst [vmem:[#allocation3 + $0x2f0] sm:$0xff] %v2527_v8  ;;  %v2525_v30 = vmax.f32 %v1031_v53, %v2129_v38  ;;  %v3816_v62 = vld [vmem:[#allocation3 + $0x21c] sm:$0xff]  ;;  %v3819_v53 = vld [vmem:[#allocation3 + $0x22a] sm:$0xff]  ;;  %v3765_v46 = vrot.slane %v11609_v0, 1  ;;  %v3801_v63 = vrot.slane %v11609_v0, 4 }
 0x208   :  { %3256 = vst.msk [vmem:[#allocation4 + $0x86] sm:$0x3f] %vm2697_vm6, %v3254_v43  ;;  %v3285_v7 = vpop.permute.xlu1 %3284  ;;  %v11588_v4 = vpop.permute.xlu0 %3275  ;;  %v1032_v43 = vmax.f32 %v913_v1, 0.0  ;;  %v2132_v24 = vmax.f32 %v2019_v14, 0.0  ;;  %v2011_v13 = vadd.f32 %v11574_v59, %v2010_v60  ;;  %v934_v1 = vadd.f32 %v11574_v59, %v11484_v47 }
 0x209   :  { %2624 = vst [vmem:[#allocation3 + $0x2e0] sm:$0xff] %v2525_v30  ;;  %v11627_v38 = vmax.f32 %v3815_v35, %v3818_v52  ;;  %v11629_v14 = vmax.f32 %v3816_v62, %v3819_v53  ;;  %v3278_v58 = vadd.f32 %v11588_v4, %v11141_v29  ;;  %v3787_v52 = vrot.slane %v11607_v44, 3 }
 0x20a   :  { %3718 = vrot.lane.b32.xlu1 %v3715_v15, %s9983_s23  ;;  %v2528_v36 = vmax.f32 %v1034_v5, %v2132_v24  ;;  %v2130_v37 = vmax.f32 %v2011_v13, 0.0  ;;  %v3742_v15 = vsel %vm2681_vm3, %v3739_v20, %v3741_v32  ;;  %v3800_v20 = vrot.slane %v11607_v44, 4 }
 0x20b   :  { %3707 = vrot.lane.b32.xlu0 %v3704_v27, %s9982_s21  ;;  %v3775_v27 = vrot.slane %v11607_v44, 2  ;;  %v3764_v13 = vrot.slane %v11607_v44, 1  ;;  %v3827_v29 = vrot.slane %v11629_v14, 1  ;;  %v3788_v53 = vrot.slane %v11609_v0, 3 }
 0x20c   :  { %v3312_v50 = vpop.permute.xlu1 %3311  ;;  %v11603_v18 = vpop.permute.xlu0 %3286  ;;  %2627 = vst [vmem:[#allocation3 + $0x2f8] sm:$0xff] %v2528_v36  ;;  %v2526_v45 = vmax.f32 %v1032_v43, %v2130_v37  ;;  %v3802_v24 = vsel %vm2681_vm3, %v3800_v20, %v3801_v63  ;;  %v3826_v36 = vrot.slane %v11627_v38, 1 }
 0x20d   :  { %v3777_v8 = vsel %vm2654_vm1, %v3775_v27, %v3776_v21  ;;  %v9132_v47 = vpop.f32.mrf.mxu1  ;;  %v9902_v27 = vld [vmem:[%s13144_s3 + $0x38] sm:$0xff]  }
 0x20e   :  { %3734 = vrot.lane.b32.xlu1 %v3729_v33, %s9984_s30  ;;  %2625 = vst [vmem:[#allocation3 + $0x2e8] sm:$0xff] %v2526_v45  ;;  %v926_v33 = vadd.f32 %v11574_v59, %v11491_v23  ;;  %v2032_v32 = vadd.f32 %v11574_v59, %v9132_v47  ;;  %9317 = vmatpush3.bf16.msra.mxu0 %v9902_v27  ;;  %v9963_v27 = vld [vmem:[#allocation3 + $0x230] sm:$0xff] }
 0x20f   :  { %3732 = vrot.lane.b32.xlu0 %v3727_v22, %s9984_s30  ;;  %v2023_v4 = vpop.f32.mrf.mxu1  ;;  %v3828_v47 = vsel %vm2642_vm0, %v3826_v36, %v3827_v29  ;;  %9318 = vmatprep.subr.bf16.mxu0 %v13156_v3 }
 0x210   :  { %v3336_v31 = vpop.permute.xlu1 %3335  ;;  %v3274_v17 = vpop.permute.xlu0 %3273  ;;  %v1035_v37 = vmax.f32 %v926_v33, 0.0 }
 0x211   :  { %v3277_v19 = vadd.f32 %v3274_v17, %v11132_v56  ;;  %v3339_v12 = vadd.f32 %v3336_v31, %v11187_v34  ;;  %v2135_v17 = vmax.f32 %v2032_v32, 0.0  ;;  %v928_v34 = vpop.f32.mrf.mxu0  ;;  %v3758_v31 = vld [vmem:[#allocation3 + $0x216] sm:$0x3] }
 0x212   :  { %3745 = vrot.lane.b32.xlu1 %v3740_v28, %s9985_s20  ;;  %v3289_v28 = vadd.f32 %v11603_v18, %v3278_v58  ;;  %v2024_v18 = vadd.f32 %v11574_v59, %v2023_v4  ;;  %v3881_v4 = vld [vmem:[#allocation3 + $0x246] sm:$0xff] }
 0x213   :  { %3747 = vrot.lane.b32.xlu0 %v3742_v15, %s9985_s20  ;;  %v3288_v56 = vadd.f32 %v3285_v7, %v3277_v19  ;;  %v1037_v7 = vmax.f32 %v934_v1, 0.0  ;;  %v929_v19 = vadd.f32 %v11574_v59, %v928_v34  ;;  %v9133_v1 = vpop.f32.mrf.mxu1  ;;  %v3880_v34 = vld [vmem:[#allocation3 + $0x23e] sm:$0xff] }
 0x214   :  { %v3347_v26 = vpop.permute.xlu1 %3346  ;;  %v3299_v22 = vpop.permute.xlu0 %3298  ;;  %v2133_v20 = vmax.f32 %v2024_v18, 0.0  ;;  %v9964_v1 = vld [vmem:[#allocation3 + $0x238] sm:$0xff] }
 0x215   :  { %v3302_v5 = vadd.f32 %v3299_v22, %v3288_v56  ;;  %v3350_v23 = vadd.f32 %v3347_v26, %v3339_v12  ;;  %v2531_v15 = vmax.f32 %v1037_v7, %v2135_v17  ;;  %v3766_v56 = vsel %vm2642_vm0, %v3764_v13, %v3765_v46  ;;  %v2026_v33 = vpop.f32.mrf.mxu1 }
 0x216   :  { %3780 = vrot.lane.b32.xlu1 %v3777_v8, %s9983_s23  ;;  %v3837_v26 = vrot.slane %v11627_v38, 2  ;;  %v3838_v22 = vrot.slane %v11629_v14, 2  ;;  %v2529_v32 = vmax.f32 %v1035_v37, %v2133_v20  ;;  %v2027_v58 = vadd.f32 %v11574_v59, %v2026_v33 }
 0x217   :  { %3771 = vrot.lane.b32.xlu0 %v3765_v46, %s9982_s21  ;;  %v3315_v60 = vadd.f32 %v3312_v50, %v3302_v5  ;;  %v3755_v50 = vld [vmem:[#allocation3 + $0x208] sm:$0x3]  ;;  %2630 = vst [vmem:[#allocation3 + $0x310] sm:$0xff] %v2531_v15  ;;  %v1036_v46 = vmax.f32 %v929_v19, 0.0  ;;  %v3850_v59 = vrot.slane %v11629_v14, 3  ;;  %v3862_v19 = vrot.slane %v11627_v38, 4 }
 0x218   :  { %v3361_v43 = vpop.permute.xlu1 %3360  ;;  %v3301_v30 = vpop.permute.xlu0 %3300  ;;  %v3761_v7 = vmax.f32 %v3755_v50, %v3758_v31  ;;  %2628 = vst [vmem:[#allocation3 + $0x300] sm:$0xff] %v2529_v32  ;;  %v2134_v17 = vmax.f32 %v2027_v58, 0.0  ;;  %v3863_v15 = vrot.slane %v11629_v14, 4 }
 0x219   :  { %3317 = vst.msk [vmem:[#allocation4 + $0x8c] sm:$0xff] %vm2695_vm5, %v3315_v60  ;;  %v3364_v35 = vadd.f32 %v3361_v43, %v3350_v23  ;;  %v3303_v62 = vadd.f32 %v3301_v30, %v3289_v28  ;;  %v3839_v43 = vsel %vm2654_vm1, %v3837_v26, %v3838_v22  ;;  %v3789_v30 = vsel %vm2667_vm2, %v3787_v52, %v3788_v53 }
 0x21a   :  { %3807 = vrot.lane.b32.xlu1 %v3802_v24, %s9985_s20  ;;  %v4456_v24 = vld [vmem:[#allocation4 + $0x7e] sm:$0xff]  ;;  %v3849_v23 = vrot.slane %v11627_v38, 3  ;;  %v3790_v36 = vrot.slane %v3761_v7, 3  ;;  %v2530_v50 = vmax.f32 %v1036_v46, %v2134_v17  ;;  %v3803_v18 = vrot.slane %v3761_v7, 4 }
 0x21b   :  { %3782 = vrot.lane.b32.xlu0 %v3776_v21, %s9983_s23 }
 0x21c   :  { %v3374_v21 = vpop.permute.xlu1 %3373  ;;  %v3314_v45 = vpop.permute.xlu0 %3313  ;;  %2629 = vst [vmem:[#allocation3 + $0x308] sm:$0xff] %v2530_v50  ;;  %v3791_v52 = vsel %vm2667_vm2, %v3788_v53, %v3790_v36  ;;  %v3804_v53 = vsel %vm2681_vm3, %v3801_v63, %v3803_v18 }
 0x21d   :  { %v3377_v5 = vadd.f32 %v3374_v21, %v3364_v35  ;;  %v3316_v8 = vadd.f32 %v3314_v45, %v3303_v62  ;;  %v11681_v35 = vmax.f32 %v9963_v27, %v3880_v34  ;;  %v3851_v62 = vsel %vm2667_vm2, %v3849_v23, %v3850_v59 }
 0x21e   :  { %3831 = vrot.lane.b32.xlu1 %v3828_v47, %s9982_s21  ;;  %v11687_v21 = vmax.f32 %v9964_v1, %v3881_v4  ;;  %v3864_v47 = vsel %vm2681_vm3, %v3862_v19, %v3863_v15 }
 0x21f   :  { %3769 = vrot.lane.b32.xlu0 %v3766_v56, %s9982_s21  ;;  %3379 = vst.msk [vmem:[#allocation4 + $0x9a] sm:$0xff] %vm2695_vm5, %v3377_v5  ;;  %v3888_v7 = vrot.slane %v11681_v35, 1  ;;  %v3899_v17 = vrot.slane %v11681_v35, 2  ;;  %v3911_v19 = vrot.slane %v11681_v35, 3 }
 0x220   :  { %3318 = vst.msk [vmem:[#allocation4 + $0x94] sm:$0x3f] %vm2697_vm6, %v3316_v8  ;;  %v3398_v12 = vpop.permute.xlu1 %3397  ;;  %v3338_v60 = vpop.permute.xlu0 %3337  ;;  %v4457_v13 = vld [vmem:[#allocation4 + $0x86] sm:$0xff]  ;;  %v3889_v58 = vrot.slane %v11687_v21, 1  ;;  %v3912_v18 = vrot.slane %v11687_v21, 3 }
 0x221   :  { %v4491_v28 = vpack.c.bf16 %v4457_v13, %v4456_v24  ;;  %v3401_v26 = vadd.f32 %v3398_v12, %v11266_v2  ;;  %v3340_v20 = vadd.f32 %v3338_v60, %v11189_v51  ;;  %v3820_v2 = vld [vmem:[#allocation3 + $0x232] sm:$0x3]  ;;  %v3817_v51 = vld [vmem:[#allocation3 + $0x224] sm:$0x3]  ;;  %v11705_v60 = vld [vmem:[#allocation4 + $0x40] sm:$0xff] }
 0x222   :  { %3842 = vrot.lane.b32.xlu1 %v3839_v43, %s9983_s23  ;;  %v11703_v12 = vld [vmem:[#allocation4 + $0x38] sm:$0xff]  ;;  %v3890_v34 = vsel %vm2642_vm0, %v3888_v7, %v3889_v58  ;;  %v3823_v4 = vmax.f32 %v3817_v51, %v3820_v2  ;;  %v3913_v1 = vsel %vm2667_vm2, %v3911_v19, %v3912_v18 }
 0x223   :  { %3794 = vrot.lane.b32.xlu0 %v3789_v30, %s9984_s30  ;;  %9169 = vmatmul.mubr.msk.bf16.gmra.mxu0 %vm2695_vm5, %v4491_v28  ;;  %v3900_v28 = vrot.slane %v11687_v21, 2 }
 0x224   :  { %v3409_v31 = vpop.permute.xlu1 %3408  ;;  %v3349_v37 = vpop.permute.xlu0 %3348  ;;  %9172 = vmatprep.mubr.msk.bf16.mxu0 %vm9987_vm4, %v13156_v3  ;;  %v3852_v27 = vrot.slane %v3823_v4, 3 }
 0x225   :  { %v3412_v33 = vadd.f32 %v3409_v31, %v3401_v26  ;;  %v3351_v46 = vadd.f32 %v3349_v37, %v3340_v20  ;;  %v3901_v37 = vsel %vm2654_vm1, %v3899_v17, %v3900_v28  ;;  %v3865_v26 = vrot.slane %v3823_v4, 4  ;;  %v3940_v20 = vld [vmem:[#allocation3 + $0x254] sm:$0xff] }
 0x226   :  { %3856 = vrot.lane.b32.xlu1 %v3851_v62, %s9984_s30 }
 0x227   :  { %3796 = vrot.lane.b32.xlu0 %v3791_v52, %s9984_s30  ;;  %v4458_v45 = vld [vmem:[#allocation4 + $0x8e] sm:$0xff]  ;;  %v4459_v56 = vld [vmem:[#allocation4 + $0x96] sm:$0xff]  ;;  %v3924_v52 = vrot.slane %v11681_v35, 4 }
 0x228   :  { %v3423_v5 = vpop.permute.xlu1 %3422  ;;  %v3363_v8 = vpop.permute.xlu0 %3362  ;;  %v4492_v32 = vpack.c.bf16 %v4459_v56, %v4458_v45  ;;  %v3853_v45 = vsel %vm2667_vm2, %v3850_v59, %v3852_v27  ;;  %v3925_v56 = vrot.slane %v11687_v21, 4  ;;  %v11770_v27 = vld [vmem:[#allocation4 + $0x50] sm:$0xff] }
 0x229   :  { %v3426_v43 = vadd.f32 %v3423_v5, %v3412_v33  ;;  %v3365_v30 = vadd.f32 %v3363_v8, %v3351_v46  ;;  %v3943_v5 = vld [vmem:[#allocation3 + $0x262] sm:$0xff]  ;;  %v3939_v8 = vld [vmem:[#allocation3 + $0x24c] sm:$0xff] }
 0x22a   :  { %3869 = vrot.lane.b32.xlu1 %v3864_v47, %s9985_s20  ;;  %v11745_v2 = vmax.f32 %v3940_v20, %v3943_v5  ;;  %v3926_v51 = vsel %vm2681_vm3, %v3924_v52, %v3925_v56 }
 0x22b   :  { %3809 = vrot.lane.b32.xlu0 %v3804_v53, %s9985_s20  ;;  %9173 = vmatmul.mubr.msk.bf16.gmra.mxu0 %vm2695_vm5, %v4492_v32  ;;  %v3942_v53 = vld [vmem:[#allocation3 + $0x25a] sm:$0xff] }
 0x22c   :  { %v3436_v24 = vpop.permute.xlu1 %3435  ;;  %9176 = vmatprep.mubr.msk.bf16.mxu0 %vm9987_vm4, %v13156_v3  ;;  %v3951_v19 = vrot.slane %v11745_v2, 1 }
 0x22d   :  { %v3376_v13 = vpop.permute.xlu0 %3375  ;;  %v3439_v23 = vadd.f32 %v3436_v24, %v3426_v43  ;;  %v3866_v43 = vsel %vm2681_vm3, %v3863_v15, %v3865_v26  ;;  %v3879_v24 = vld [vmem:[#allocation3 + $0x240] sm:$0x3] }
 0x22e   :  { %v3378_v36 = vadd.f32 %v3376_v13, %v3365_v30  ;;  %3893 = vrot.lane.b32.xlu1 %v3890_v34, %s9982_s21  ;;  %v11754_v30 = vmax.f32 %v3939_v8, %v3942_v53  ;;  %v3962_v34 = vrot.slane %v11745_v2, 2 }
 0x22f   :  { %3833 = vrot.lane.b32.xlu0 %v3827_v29, %s9982_s21  ;;  %3441 = vst.msk [vmem:[#allocation4 + $0xa8] sm:$0xff] %vm2695_vm5, %v3439_v23 }
 0x230   :  { %3380 = vst.msk [vmem:[#allocation4 + $0xa2] sm:$0x3f] %vm2697_vm6, %v3378_v36  ;;  %v11723_v50 = vpop.permute.xlu1 %3472 }
 0x231   :  { %v3400_v31 = vpop.permute.xlu0 %3399 }
 0x232   :  { %3904 = vrot.lane.b32.xlu1 %v3901_v37, %s9983_s23  ;;  %v3402_v7 = vadd.f32 %v3400_v31, %v11279_v16  ;;  %v3882_v16 = vld [vmem:[#allocation3 + $0x24e] sm:$0x3]  ;;  %v3950_v37 = vrot.slane %v11754_v30, 1 }
 0x233   :  { %3844 = vrot.lane.b32.xlu0 %v3838_v22, %s9983_s23  ;;  %v3885_v4 = vmax.f32 %v3879_v24, %v3882_v16  ;;  %v3986_v24 = vrot.slane %v11754_v30, 4  ;;  %v3987_v16 = vrot.slane %v11745_v2, 4 }
 0x234   :  { %v3460_v29 = vpop.permute.xlu1 %3459  ;;  %v3952_v5 = vsel %vm2642_vm0, %v3950_v37, %v3951_v19 }
 0x235   :  { %v3411_v62 = vpop.permute.xlu0 %3410  ;;  %v3463_v13 = vadd.f32 %v3460_v29, %v11353_v11  ;;  %v11768_v11 = vld [vmem:[#allocation4 + $0x48] sm:$0xff]  ;;  %v3988_v37 = vsel %vm2681_vm3, %v3986_v24, %v3987_v16 }
 0x236   :  { %3918 = vrot.lane.b32.xlu1 %v3913_v1, %s9984_s30  ;;  %v3413_v59 = vadd.f32 %v3411_v62, %v3402_v7  ;;  %v3973_v7 = vrot.slane %v11754_v30, 3 }
 0x237   :  { %3858 = vrot.lane.b32.xlu0 %v3853_v45, %s9984_s30  ;;  %v4460_v22 = vld [vmem:[#allocation4 + $0x9e] sm:$0xff]  ;;  %v4461_v47 = vld [vmem:[#allocation4 + $0xa6] sm:$0xff]  ;;  %v3961_v45 = vrot.slane %v11754_v30, 2 }
 0x238   :  { %v4493_v33 = vpack.c.bf16 %v4461_v47, %v4460_v22  ;;  %v3471_v46 = vpop.permute.xlu1 %3470 }
 0x239   :  { %v3425_v32 = vpop.permute.xlu0 %3424  ;;  %v3474_v15 = vadd.f32 %v3471_v46, %v3463_v13  ;;  %v3963_v53 = vsel %vm2654_vm1, %v3961_v45, %v3962_v34  ;;  %v3974_v46 = vrot.slane %v11745_v2, 3  ;;  %v4005_v45 = vld [vmem:[#allocation3 + $0x27e] sm:$0xff] }
 0x23a   :  { %9177 = vmatmul.mubr.msk.bf16.gmra.mxu0 %vm2695_vm5, %v4493_v33  ;;  %3931 = vrot.lane.b32.xlu1 %v3926_v51, %s9985_s20  ;;  %v3427_v17 = vadd.f32 %v3425_v32, %v3413_v59  ;;  %v3927_v32 = vrot.slane %v3885_v4, 4 }
 0x23b   :  { %3871 = vrot.lane.b32.xlu0 %v3866_v43, %s9985_s20  ;;  %9180 = vmatprep.mubr.msk.bf16.mxu0 %vm9987_vm4, %v13156_v3 }
 0x23c   :  { %v3485_v23 = vpop.permute.xlu1 %3484  ;;  %v3928_v13 = vsel %vm2681_vm3, %v3925_v56, %v3927_v32  ;;  %v4003_v32 = vld [vmem:[#allocation3 + $0x278] sm:$0x3] }
 0x23d   :  { %v3438_v36 = vpop.permute.xlu0 %3437  ;;  %v3488_v29 = vadd.f32 %v3485_v23, %v3474_v15  ;;  %v9903_v23 = vld [vmem:[%s13144_s3] sm:$0xff]  }
 0x23e   :  { %v3440_v31 = vadd.f32 %v3438_v36, %v3427_v17  ;;  %3968 = vrot.lane.b32.xlu1 %v3962_v34, %s9983_s23  ;;  %9229 = vmatpush3.bf16.msra.mxu1 %v9903_v23 }
 0x23f   :  { %3895 = vrot.lane.b32.xlu0 %v3889_v58, %s9982_s21  ;;  %v3914_v58 = vrot.slane %v3885_v4, 3  ;;  %9404 = vmatprep.subr.bf16.mxu1 %v13156_v3 }
 0x240   :  { %3442 = vst.msk [vmem:[#allocation4 + $0xb0] sm:$0x3f] %vm2697_vm6, %v3440_v31  ;;  %v3498_v52 = vpop.permute.xlu1 %3497 }
 0x241   :  { %v3462_v1 = vpop.permute.xlu0 %3461  ;;  %v3501_v26 = vadd.f32 %v3498_v52, %v3488_v29  ;;  %v3915_v33 = vsel %vm2667_vm2, %v3912_v18, %v3914_v58  ;;  %v3975_v18 = vsel %vm2667_vm2, %v3973_v7, %v3974_v46 }
 0x242   :  { %v3464_v20 = vadd.f32 %v3462_v1, %v11344_v25  ;;  %3955 = vrot.lane.b32.xlu1 %v3952_v5, %s9982_s21  ;;  %v11813_v5 = vld [vmem:[#allocation4 + $0x60] sm:$0xff] }
 0x243   :  { %3906 = vrot.lane.b32.xlu0 %v3900_v28, %s9983_s23  ;;  %3503 = vst.msk [vmem:[#allocation4 + $0xb6] sm:$0xff] %vm2695_vm5, %v3501_v26  ;;  %v3941_v28 = vld [vmem:[#allocation3 + $0x25c] sm:$0x3] }
 0x244   :  { %v3475_v8 = vadd.f32 %v11723_v50, %v3464_v20  ;;  %v3500_v22 = vpop.permute.xlu1 %3499  ;;  %v3944_v50 = vld [vmem:[#allocation3 + $0x26a] sm:$0x3]  ;;  %v4004_v26 = vld [vmem:[#allocation3 + $0x276] sm:$0xff] }
 0x245   :  { %v3487_v47 = vpop.permute.xlu0 %3486  ;;  %v3947_v17 = vmax.f32 %v3941_v28, %v3944_v50  ;;  %v11811_v20 = vld [vmem:[#allocation4 + $0x58] sm:$0xff]  ;;  %v4006_v28 = vld [vmem:[#allocation3 + $0x286] sm:$0x3] }
 0x246   :  { %v3489_v25 = vadd.f32 %v3487_v47, %v3475_v8  ;;  %3966 = vrot.lane.b32.xlu1 %v3963_v53, %s9983_s23  ;;  %v9904_v50 = vld [vmem:[%s13144_s3 + $0x30] sm:$0xff]  }
 0x247   :  { %3920 = vrot.lane.b32.xlu0 %v3915_v33, %s9984_s30  ;;  %v4462_v36 = vld [vmem:[#allocation4 + $0xae] sm:$0xff]  ;;  %v3989_v52 = vrot.slane %v3947_v17, 4  ;;  %v3976_v1 = vrot.slane %v3947_v17, 3  ;;  %9319 = vmatpush3.bf16.msra.mxu0 %v9904_v50 }
 0x248   :  { %v3502_v59 = vadd.f32 %v3500_v22, %v3489_v25  ;;  %v3535_v51 = vpop.permute.xlu1 %3534  ;;  %v9965_v22 = vld [vmem:[#allocation3 + $0x270] sm:$0xff]  ;;  %v9966_v25 = vld [vmem:[#allocation3 + $0x268] sm:$0xff]  ;;  %9494 = vmatprep.subr.bf16.mxu0 %v13156_v3 }
 0x249   :  { %v3524_v43 = vpop.permute.xlu0 %3523  ;;  %v11819_v47 = vmax.f32 %v9965_v22, %v4005_v45  ;;  %v3977_v7 = vsel %vm2667_vm2, %v3974_v46, %v3976_v1  ;;  %v11823_v33 = vmax.f32 %v9966_v25, %v4004_v26  ;;  %v4067_v1 = vld [vmem:[#allocation3 + $0x29a] sm:$0xff]  ;;  %v4063_v45 = vld [vmem:[#allocation3 + $0x284] sm:$0xff]  ;;  %v4066_v26 = vld [vmem:[#allocation3 + $0x292] sm:$0xff] }
 0x24a   :  { %3504 = vst.msk [vmem:[#allocation4 + $0xbe] sm:$0x3f] %vm2697_vm6, %v3502_v59  ;;  %3980 = vrot.lane.b32.xlu1 %v3975_v18, %s9984_s30  ;;  %v4463_v34 = vld [vmem:[#allocation4 + $0xb6] sm:$0xff]  ;;  %v3526_v56 = vadd.f32 %v3524_v43, %v11426_v54  ;;  %v4009_v18 = vmax.f32 %v4003_v32, %v4006_v28  ;;  %v11851_v32 = vmax.f32 %v4063_v45, %v4066_v26  ;;  %v9970_v54 = vld [vmem:[#allocation3 + $0x2d8] sm:$0xff] }
 0x24b   :  { %3933 = vrot.lane.b32.xlu0 %v3928_v13, %s9985_s20  ;;  %v4494_v4 = vpack.c.bf16 %v4463_v34, %v4462_v36  ;;  %v4024_v46 = vrot.slane %v11819_v47, 2  ;;  %v4012_v23 = vrot.slane %v11823_v33, 1  ;;  %v4023_v36 = vrot.slane %v11823_v33, 2 }
 0x24c   :  { %v3522_v15 = vpop.permute.xlu1 %3521  ;;  %v3537_v53 = vadd.f32 %v3535_v51, %v3526_v56  ;;  %v4035_v56 = vrot.slane %v11823_v33, 3  ;;  %v4051_v22 = vrot.slane %v4009_v18, 4 }
 0x24d   :  { %v3533_v31 = vpop.permute.xlu0 %3532  ;;  %v3525_v29 = vadd.f32 %v3522_v15, %v11428_v39  ;;  %9181 = vmatmul.mubr.msk.bf16.gmra.mxu0 %vm2695_vm5, %v4494_v4  ;;  %v4036_v15 = vrot.slane %v11819_v47, 3 }
 0x24e   :  { %3993 = vrot.lane.b32.xlu1 %v3988_v37, %s9985_s20  ;;  %9184 = vmatprep.mubr.msk.bf16.mxu0 %vm9987_vm4, %v13156_v3  ;;  %v4025_v37 = vsel %vm2654_vm1, %v4023_v36, %v4024_v46 }
 0x24f   :  { %3957 = vrot.lane.b32.xlu0 %v3951_v19, %s9982_s21  ;;  %v3536_v58 = vadd.f32 %v3533_v31, %v3525_v29  ;;  %v3990_v19 = vsel %vm2681_vm3, %v3987_v16, %v3989_v52  ;;  %v4013_v16 = vrot.slane %v11819_v47, 1  ;;  %v4038_v29 = vrot.slane %v4009_v18, 3  ;;  %v4064_v52 = vld [vmem:[#allocation3 + $0x28c] sm:$0xff] }
 0x250   :  { %v3547_v39 = vpop.permute.xlu1 %3546  ;;  %v11849_v25 = vmax.f32 %v4064_v52, %v4067_v1 }
 0x251   :  { %v3549_v8 = vpop.permute.xlu0 %3548  ;;  %v3550_v59 = vadd.f32 %v3547_v39, %v3536_v58  ;;  %v4014_v31 = vsel %vm2642_vm0, %v4012_v23, %v4013_v16 }
 0x252   :  { %3995 = vrot.lane.b32.xlu1 %v3990_v19, %s9985_s20  ;;  %v3551_v43 = vadd.f32 %v3549_v8, %v3537_v53  ;;  %v4049_v8 = vrot.slane %v11819_v47, 4  ;;  %v4048_v53 = vrot.slane %v11823_v33, 4  ;;  %v4037_v19 = vsel %vm2667_vm2, %v4035_v56, %v4036_v15 }
 0x253   :  { %3982 = vrot.lane.b32.xlu0 %v3977_v7, %s9984_s30  ;;  %v4039_v7 = vsel %vm2667_vm2, %v4036_v15, %v4038_v29  ;;  %v4086_v1 = vrot.slane %v11849_v25, 2 }
 0x254   :  { %v3562_v51 = vpop.permute.xlu1 %3561 }
 0x255   :  { %v3560_v24 = vpop.permute.xlu0 %3559  ;;  %v3564_v13 = vadd.f32 %v3562_v51, %v3551_v43 }
 0x256   :  { %v3563_v17 = vadd.f32 %v3560_v24, %v3550_v59  ;;  %4030 = vrot.lane.b32.xlu1 %v4024_v46, %s9983_s23  ;;  %v11857_v24 = vld [vmem:[#allocation4 + $0x68] sm:$0xff]  ;;  %v11859_v46 = vld [vmem:[#allocation4 + $0x70] sm:$0xff] }
 0x257   :  { %4019 = vrot.lane.b32.xlu0 %v4013_v16, %s9982_s21  ;;  %3566 = vst.msk [vmem:[#allocation4 + $0xcc] sm:$0x3f] %vm2697_vm6, %v3564_v13  ;;  %v4052_v13 = vsel %vm2681_vm3, %v4049_v8, %v4051_v22  ;;  %v4085_v22 = vrot.slane %v11851_v32, 2 }
 0x258   :  { %3565 = vst.msk [vmem:[#allocation4 + $0xc4] sm:$0xff] %vm2695_vm5, %v3563_v17  ;;  %v3586_v34 = vpop.permute.xlu1 %3585  ;;  %v4050_v17 = vsel %vm2681_vm3, %v4048_v53, %v4049_v8 }
 0x259   :  { %v3584_v4 = vpop.permute.xlu0 %3583  ;;  %v3588_v59 = vadd.f32 %v3586_v34, %v11471_v41  ;;  %v4075_v41 = vrot.slane %v11849_v25, 1  ;;  %v4065_v34 = vld [vmem:[#allocation3 + $0x294] sm:$0x3] }
 0x25a   :  { %4017 = vrot.lane.b32.xlu1 %v4014_v31, %s9982_s21  ;;  %v3587_v43 = vadd.f32 %v3584_v4, %v11476_v61  ;;  %v4074_v61 = vrot.slane %v11851_v32, 1  ;;  %v4068_v4 = vld [vmem:[#allocation3 + $0x2a2] sm:$0x3] }
 0x25b   :  { %4028 = vrot.lane.b32.xlu0 %v4025_v37, %s9983_s23  ;;  %v4071_v45 = vmax.f32 %v4065_v34, %v4068_v4 }
 0x25c   :  { %v3597_v58 = vpop.permute.xlu1 %3596  ;;  %v4076_v8 = vsel %vm2642_vm0, %v4074_v61, %v4075_v41  ;;  %v4110_v61 = vrot.slane %v11851_v32, 4 }
 0x25d   :  { %v3595_v39 = vpop.permute.xlu0 %3594  ;;  %v3599_v36 = vadd.f32 %v3597_v58, %v3588_v59  ;;  %v4098_v59 = vrot.slane %v11849_v25, 3 }
 0x25e   :  { %4042 = vrot.lane.b32.xlu1 %v4037_v19, %s9984_s30  ;;  %v3598_v15 = vadd.f32 %v3595_v39, %v3587_v43  ;;  %v4100_v43 = vrot.slane %v4071_v45, 3 }
 0x25f   :  { %4044 = vrot.lane.b32.xlu0 %v4039_v7, %s9984_s30  ;;  %v4464_v28 = vld [vmem:[#allocation4 + $0xbe] sm:$0xff]  ;;  %v4465_v50 = vld [vmem:[#allocation4 + $0xc6] sm:$0xff] }
 0x260   :  { %v4495_v51 = vpack.c.bf16 %v4465_v50, %v4464_v28  ;;  %v3611_v16 = vpop.permute.xlu1 %3610  ;;  %v4087_v50 = vsel %vm2654_vm1, %v4085_v22, %v4086_v1  ;;  %v4101_v4 = vsel %vm2667_vm2, %v4098_v59, %v4100_v43 }
 0x261   :  { %v3609_v18 = vpop.permute.xlu0 %3608  ;;  %v3613_v31 = vadd.f32 %v3611_v16, %v3599_v36  ;;  %v4129_v16 = vld [vmem:[#allocation3 + $0x2b6] sm:$0xff] }
 0x262   :  { %9185 = vmatmul.mubr.msk.bf16.gmra.mxu0 %vm2695_vm5, %v4495_v51  ;;  %4057 = vrot.lane.b32.xlu1 %v4052_v13, %s9985_s20  ;;  %v3612_v37 = vadd.f32 %v3609_v18, %v3598_v15  ;;  %v4097_v51 = vrot.slane %v11851_v32, 3  ;;  %v4128_v18 = vld [vmem:[#allocation3 + $0x2ae] sm:$0xff]  ;;  %v4111_v15 = vrot.slane %v11849_v25, 4 }
 0x263   :  { %4055 = vrot.lane.b32.xlu0 %v4050_v17, %s9985_s20  ;;  %v11870_v56 = vpop.f32.mrf.mxu0  ;;  %9188 = vmatprep.mubr.msk.bf16.mxu0 %vm9987_vm4, %v13156_v3 }
 0x264   :  { %v3624_v29 = vpop.permute.xlu1 %3623 }
 0x265   :  { %v3622_v52 = vpop.permute.xlu0 %3621  ;;  %v3626_v26 = vadd.f32 %v3624_v29, %v3613_v31  ;;  %v9142_v39 = vpop.f32.mrf.mxu0  ;;  %v4099_v31 = vsel %vm2667_vm2, %v4097_v51, %v4098_v59 }
 0x266   :  { %v3625_v58 = vadd.f32 %v3622_v52, %v3612_v37  ;;  %4081 = vrot.lane.b32.xlu1 %v4075_v41, %s9982_s21  ;;  %v4113_v41 = vrot.slane %v4071_v45, 4  ;;  %v9967_v37 = vld [vmem:[#allocation3 + $0x2a8] sm:$0xff]  ;;  %v9968_v52 = vld [vmem:[#allocation3 + $0x2a0] sm:$0xff] }
 0x267   :  { %4079 = vrot.lane.b32.xlu0 %v4076_v8, %s9982_s21  ;;  %3628 = vst.msk [vmem:[#allocation4 + $0xda] sm:$0x3f] %vm2697_vm6, %v3626_v26  ;;  %v11881_v53 = vpop.f32.mrf.mxu0  ;;  %v11894_v29 = vmax.f32 %v9967_v37, %v4129_v16  ;;  %v4112_v16 = vsel %vm2681_vm3, %v4110_v61, %v4111_v15 }
 0x268   :  { %3627 = vst.msk [vmem:[#allocation4 + $0xd2] sm:$0xff] %vm2695_vm5, %v3625_v58  ;;  %v3648_v19 = vpop.permute.xlu1 %3647  ;;  %v4114_v51 = vsel %vm2681_vm3, %v4111_v15, %v4113_v41 }
 0x269   :  { %v3646_v7 = vpop.permute.xlu0 %3645  ;;  %v9143_v28 = vpop.f32.mrf.mxu0  ;;  %v3650_v45 = vadd.f32 %v3648_v19, %v11517_v9  ;;  %v4148_v61 = vrot.slane %v11894_v29, 2 }
 0x26a   :  { %4092 = vrot.lane.b32.xlu1 %v4086_v1, %s9983_s23  ;;  %v11896_v1 = vmax.f32 %v9968_v52, %v4128_v18  ;;  %v3649_v39 = vadd.f32 %v3646_v7, %v11519_v48  ;;  %v11904_v28 = vld [vmem:[#allocation4 + $0x78] sm:$0xff]  ;;  %v4137_v48 = vrot.slane %v11894_v29, 1 }
 0x26b   :  { %4090 = vrot.lane.b32.xlu0 %v4087_v50, %s9983_s23  ;;  %v11888_v13 = vpop.f32.mrf.mxu0  ;;  %v11906_v50 = vld [vmem:[#allocation4 + $0x80] sm:$0xff] }
 0x26c   :  { %v3659_v17 = vpop.permute.xlu1 %3658  ;;  %v4136_v7 = vrot.slane %v11896_v1, 1 }
 0x26d   :  { %v3657_v36 = vpop.permute.xlu0 %3656  ;;  %v9146_v34 = vpop.f32.mrf.mxu0 }
 0x26e   :  { %4106 = vrot.lane.b32.xlu1 %v4101_v4, %s9984_s30  ;;  %v3661_v34 = vadd.f32 %v3659_v17, %v3650_v45  ;;  %v3660_v9 = vadd.f32 %v3657_v36, %v3649_v39  ;;  %v4127_v4 = vld [vmem:[#allocation3 + $0x2b0] sm:$0x3]  ;;  %v4147_v45 = vrot.slane %v11896_v1, 2 }
 0x26f   :  { %4104 = vrot.lane.b32.xlu0 %v4099_v31, %s9984_s30  ;;  %v4466_v26 = vld [vmem:[#allocation4 + $0xce] sm:$0xff]  ;;  %v4467_v58 = vld [vmem:[#allocation4 + $0xd6] sm:$0xff]  ;;  %v11902_v8 = vpop.f32.mrf.mxu0  ;;  %v4130_v31 = vld [vmem:[#allocation3 + $0x2be] sm:$0x3] }
 0x270   :  { %v4496_v22 = vpack.c.bf16 %v4467_v58, %v4466_v26  ;;  %v3673_v59 = vpop.permute.xlu1 %3672  ;;  %v4133_v37 = vmax.f32 %v4127_v4, %v4130_v31  ;;  %v4138_v58 = vsel %vm2642_vm0, %v4136_v7, %v4137_v48 }
 0x271   :  { %v3671_v43 = vpop.permute.xlu0 %3670  ;;  %v9147_v19 = vpop.f32.mrf.mxu0  ;;  %v3675_v41 = vadd.f32 %v3673_v59, %v3661_v34  ;;  %v2636_v59 = vld [vmem:[#allocation3 + $0x1e] sm:$0x3] }
 0x272   :  { %9189 = vmatmul.mubr.msk.bf16.gmra.mxu0 %vm2695_vm5, %v4496_v22  ;;  %4119 = vrot.lane.b32.xlu1 %v4114_v51, %s9985_s20  ;;  %v3674_v15 = vadd.f32 %v3671_v43, %v3660_v9  ;;  %v4149_v51 = vsel %vm2654_vm1, %v4147_v45, %v4148_v61  ;;  %v4162_v34 = vrot.slane %v4133_v37, 3  ;;  %v4159_v9 = vrot.slane %v11896_v1, 3  ;;  %v2633_v19 = vld [vmem:[#allocation3 + $0x10] sm:$0x3] }
 0x273   :  { %4117 = vrot.lane.b32.xlu0 %v4112_v16, %s9985_s20  ;;  %9192 = vmatprep.mubr.msk.bf16.mxu0 %vm9987_vm4, %v13156_v3  ;;  %v4160_v16 = vrot.slane %v11894_v29, 3  ;;  %v2639_v7 = vmax.f32 %v2633_v19, %v2636_v59 }
 0x274   :  { %v3686_v17 = vpop.permute.xlu1 %3685 }
 0x275   :  { %v3684_v36 = vpop.permute.xlu0 %3683  ;;  %v3688_v52 = vadd.f32 %v3686_v17, %v3675_v41  ;;  %v4173_v41 = vrot.slane %v11894_v29, 4  ;;  %v4172_v17 = vrot.slane %v11896_v1, 4 }
 0x276   :  { %v3687_v26 = vadd.f32 %v3684_v36, %v3674_v15  ;;  %4143 = vrot.lane.b32.xlu1 %v4137_v48, %s9982_s21  ;;  %v4175_v15 = vrot.slane %v4133_v37, 4 }
 0x277   :  { %4141 = vrot.lane.b32.xlu0 %v4138_v58, %s9982_s21  ;;  %3690 = vst.msk [vmem:[#allocation4 + $0xe8] sm:$0x3f] %vm2697_vm6, %v3688_v52  ;;  %v4161_v58 = vsel %vm2667_vm2, %v4159_v9, %v4160_v16  ;;  %v4188_v9 = vld [vmem:[#allocation3 + $0x2c4] sm:$0xff] }
 0x278   :  { %3689 = vst.msk [vmem:[#allocation4 + $0xe0] sm:$0xff] %vm2695_vm5, %v3687_v26  ;;  %v3710_v39 = vpop.permute.xlu1 %3709 }
 0x279   :  { %v3721_v22 = vpop.permute.xlu0 %3720  ;;  %v3712_v36 = vadd.f32 %v3710_v39, %v11554_v40  ;;  %v2671_v40 = vrot.slane %v2639_v7, 3 }
 0x27a   :  { %v11926_v43 = vpop.f32.mrf.mxu0  ;;  %4154 = vrot.lane.b32.xlu1 %v4148_v61, %s9983_s23  ;;  %v4163_v61 = vsel %vm2667_vm2, %v4160_v16, %v4162_v34  ;;  %v4176_v16 = vsel %vm2681_vm3, %v4173_v41, %v4175_v15  ;;  %v4174_v34 = vsel %vm2681_vm3, %v4172_v17, %v4173_v41  ;;  %v2683_v41 = vrot.slane %v10378_v42, 4 }
 0x27b   :  { %13157 = vst [vmem:[#allocation9_spill] sm:$0xff] %v11926_v43  ;;  %4152 = vrot.lane.b32.xlu0 %v4149_v51, %s9983_s23  ;;  %v3723_v18 = vadd.f32 %v3721_v22, %v3712_v36  ;;  %v2685_v17 = vrot.slane %v2639_v7, 4 }
 0x27c   :  { %v9150_v48 = vpop.f32.mrf.mxu0  ;;  %v3719_v4 = vpop.permute.xlu1 %3718 }
 0x27d   :  { %v3708_v31 = vpop.permute.xlu0 %3707  ;;  %v2669_v48 = vrot.slane %v10378_v42, 3 }
 0x27e   :  { %v3711_v52 = vadd.f32 %v3708_v31, %v11556_v10  ;;  %v11937_v26 = vpop.f32.mrf.mxu0  ;;  %4168 = vrot.lane.b32.xlu1 %v4163_v61, %s9984_s30  ;;  %v2668_v31 = vrot.slane %v10385_v55, 3  ;;  %v4190_v61 = vld [vmem:[#allocation3 + $0x2ca] sm:$0xff] }
 0x27f   :  { %13158 = vst [vmem:[#allocation10_spill] sm:$0xff] %v11937_v26  ;;  %4166 = vrot.lane.b32.xlu0 %v4161_v58, %s9984_s30  ;;  %v4468_v45 = vld [vmem:[#allocation4 + $0xde] sm:$0xff]  ;;  %v4469_v59 = vld [vmem:[#allocation4 + $0xe6] sm:$0xff] }
 0x280   :  { %v9151_v51 = vpop.f32.mrf.mxu0  ;;  %v3722_v37 = vadd.f32 %v3719_v4, %v3711_v52  ;;  %v4497_v19 = vpack.c.bf16 %v4469_v59, %v4468_v45  ;;  %v3735_v39 = vpop.permute.xlu1 %3734  ;;  %v4191_v4 = vld [vmem:[#allocation3 + $0x2d2] sm:$0xff]  ;;  %v4187_v52 = vld [vmem:[#allocation3 + $0x2bc] sm:$0xff]  ;;  %v2672_v59 = vsel %vm2667_vm2, %v2669_v48, %v2671_v40  ;;  %v2670_v15 = vsel %vm2667_vm2, %v2668_v31, %v2669_v48  ;;  %v11964_v40 = vld [vmem:[#allocation4 + $0x90] sm:$0xff] }
 0x281   :  { %v3733_v10 = vpop.permute.xlu0 %3732  ;;  %v3737_v58 = vadd.f32 %v3735_v39, %v3723_v18  ;;  %v2682_v51 = vrot.slane %v10385_v55, 4  ;;  %v11958_v18 = vmax.f32 %v4187_v52, %v4190_v61  ;;  %v4192_v31 = vld [vmem:[#allocation3 + $0x2da] sm:$0x3] }
 0x282   :  { %9193 = vmatmul.mubr.msk.bf16.gmra.mxu0 %vm2695_vm5, %v4497_v19  ;;  %4181 = vrot.lane.b32.xlu1 %v4176_v16, %s9985_s20  ;;  %v3736_v45 = vadd.f32 %v3733_v10, %v3722_v37  ;;  %v11962_v37 = vld [vmem:[#allocation4 + $0x88] sm:$0xff]  ;;  %v4189_v10 = vld [vmem:[#allocation3 + $0x2cc] sm:$0x3] }
 0x283   :  { %4179 = vrot.lane.b32.xlu0 %v4174_v34, %s9985_s20  ;;  %9196 = vmatprep.mubr.msk.bf16.mxu0 %vm9987_vm4, %v13156_v3  ;;  %v11956_v34 = vmax.f32 %v4188_v9, %v4191_v4  ;;  %v2686_v9 = vsel %vm2681_vm3, %v2683_v41, %v2685_v17  ;;  %v2684_v4 = vsel %vm2681_vm3, %v2682_v51, %v2683_v41  ;;  %v4198_v61 = vrot.slane %v11958_v18, 1 }
 0x284   :  { %v3746_v22 = vpop.permute.xlu1 %3745  ;;  %v4209_v17 = vrot.slane %v11958_v18, 2  ;;  %v4221_v23 = vrot.slane %v11958_v18, 3 }
 0x285   :  { %v3748_v36 = vpop.permute.xlu0 %3747  ;;  %v3749_v19 = vadd.f32 %v3746_v22, %v3736_v45  ;;  %v4199_v52 = vrot.slane %v11956_v34, 1  ;;  %v4222_v7 = vrot.slane %v11956_v34, 3 }
 0x286   :  { %v3750_v16 = vadd.f32 %v3748_v36, %v3737_v58  ;;  %2677 = vrot.lane.b32.xlu1 %v2672_v59, %s9984_s30  ;;  %v4195_v58 = vmax.f32 %v4189_v10, %v4192_v31 }
 0x287   :  { %2675 = vrot.lane.b32.xlu0 %v2670_v15, %s9984_s30  ;;  %3751 = vst.msk [vmem:[#allocation4 + $0xee] sm:$0xff] %vm2695_vm5, %v3749_v19  ;;  %v4200_v36 = vsel %vm2642_vm0, %v4198_v61, %v4199_v52  ;;  %v4210_v15 = vrot.slane %v11956_v34, 2  ;;  %v4253_v19 = vld [vmem:[#allocation3 + $0x2ee] sm:$0xff] }
 0x288   :  { %3752 = vst.msk [vmem:[#allocation4 + $0xf6] sm:$0x3f] %vm2697_vm6, %v3750_v16  ;;  %v3781_v48 = vpop.permute.xlu1 %3780  ;;  %v4224_v51 = vrot.slane %v4195_v58, 3  ;;  %v4252_v16 = vld [vmem:[#allocation3 + $0x2e6] sm:$0xff] }
 0x289   :  { %v3772_v39 = vpop.permute.xlu0 %3771  ;;  %v4211_v61 = vsel %vm2654_vm1, %v4209_v17, %v4210_v15  ;;  %v11993_v62 = vmax.f32 %v9970_v54, %v4252_v16 }
 0x28a   :  { %2691 = vrot.lane.b32.xlu1 %v2686_v9, %s9985_s20  ;;  %v4225_v63 = vsel %vm2667_vm2, %v4222_v7, %v4224_v51  ;;  %v12004_v51 = vld [vmem:[#allocation4 + $0x98] sm:$0xff]  ;;  %v3774_v16 = vadd.f32 %v3772_v39, %v11609_v0 }
 0x28b   :  { %2689 = vrot.lane.b32.xlu0 %v2684_v4, %s9985_s20 }
 0x28c   :  { %v3808_v45 = vpop.permute.xlu1 %3807 }
 0x28d   :  { %v3783_v59 = vpop.permute.xlu0 %3782  ;;  %v11976_v22 = vpop.f32.mrf.mxu0 }
 0x28e   :  { %13159 = vst [vmem:[#allocation11_spill] sm:$0xff] %v11976_v22  ;;  %4205 = vrot.lane.b32.xlu1 %v4199_v52, %s9982_s21  ;;  %v4237_v52 = vrot.slane %v4195_v58, 4  ;;  %v4235_v22 = vrot.slane %v11956_v34, 4 }
 0x28f   :  { %4203 = vrot.lane.b32.xlu0 %v4200_v36, %s9982_s21  ;;  %v9154_v41 = vpop.f32.mrf.mxu0  ;;  %v9969_v36 = vld [vmem:[#allocation3 + $0x2e0] sm:$0xff] }
 0x290   :  { %v3832_v9 = vpop.permute.xlu1 %3831  ;;  %v11991_v41 = vmax.f32 %v9969_v36, %v4253_v19  ;;  %v4238_v54 = vsel %vm2681_vm3, %v4235_v22, %v4237_v52  ;;  %v12006_v19 = vld [vmem:[#allocation4 + $0xa0] sm:$0xff]  ;;  %v4251_v36 = vld [vmem:[#allocation3 + $0x2e8] sm:$0x3]  ;;  %v4254_v52 = vld [vmem:[#allocation3 + $0x2f6] sm:$0x3] }
 0x291   :  { %v3770_v10 = vpop.permute.xlu0 %3769  ;;  %v11984_v4 = vpop.f32.mrf.mxu0 }
 0x292   :  { %v3773_v31 = vadd.f32 %v3770_v10, %v11607_v44  ;;  %13160 = vst [vmem:[#allocation12_spill] sm:$0xff] %v11984_v4  ;;  %4216 = vrot.lane.b32.xlu1 %v4210_v15, %s9983_s23  ;;  %v4223_v15 = vsel %vm2667_vm2, %v4221_v23, %v4222_v7  ;;  %v4261_v58 = vrot.slane %v11991_v41, 1  ;;  %v3835_v23 = vadd.f32 %v3832_v9, %v11627_v38 }
 0x293   :  { %4214 = vrot.lane.b32.xlu0 %v4211_v61, %s9983_s23  ;;  %v9155_v44 = vpop.f32.mrf.mxu0  ;;  %v4234_v61 = vrot.slane %v11958_v18, 4  ;;  %v4272_v0 = vrot.slane %v11991_v41, 2  ;;  %v4271_v38 = vrot.slane %v11993_v62, 2  ;;  %v4257_v9 = vmax.f32 %v4251_v36, %v4254_v52 }
 0x294   :  { %v3784_v10 = vadd.f32 %v3781_v48, %v3773_v31  ;;  %v3843_v17 = vpop.permute.xlu1 %3842  ;;  %v4260_v48 = vrot.slane %v11993_v62, 1  ;;  %v3785_v44 = vadd.f32 %v3783_v59, %v3774_v16 }
 0x295   :  { %v3795_v4 = vpop.permute.xlu0 %3794 }
 0x296   :  { %v3798_v26 = vadd.f32 %v3795_v4, %v3784_v10  ;;  %4230 = vrot.lane.b32.xlu1 %v4225_v63, %s9984_s30  ;;  %v3846_v10 = vadd.f32 %v3843_v17, %v3835_v23  ;;  %v4286_v23 = vrot.slane %v4257_v9, 3 }
 0x297   :  { %4228 = vrot.lane.b32.xlu0 %v4223_v15, %s9984_s30  ;;  %v4236_v15 = vsel %vm2681_vm3, %v4234_v61, %v4235_v22  ;;  %v4284_v22 = vrot.slane %v11991_v41, 3  ;;  %v4283_v61 = vrot.slane %v11993_v62, 3 }
 0x298   :  { %v3811_v7 = vadd.f32 %v3808_v45, %v3798_v26  ;;  %v3857_v31 = vpop.permute.xlu1 %3856  ;;  %v4262_v45 = vsel %vm2642_vm0, %v4260_v48, %v4261_v58  ;;  %v4273_v48 = vsel %vm2654_vm1, %v4271_v38, %v4272_v0 }
 0x299   :  { %v3797_v4 = vpop.permute.xlu0 %3796  ;;  %v3860_v26 = vadd.f32 %v3857_v31, %v3846_v10  ;;  %v4311_v31 = vld [vmem:[#allocation3 + $0x2f4] sm:$0xff] }
 0x29a   :  { %3813 = vst.msk [vmem:[#allocation4 + $0xfc] sm:$0xff] %vm2695_vm5, %v3811_v7  ;;  %4243 = vrot.lane.b32.xlu1 %v4238_v54, %s9985_s20  ;;  %v3799_v39 = vadd.f32 %v3797_v4, %v3785_v44  ;;  %v4312_v54 = vld [vmem:[#allocation3 + $0x2fc] sm:$0xff]  ;;  %v4315_v7 = vld [vmem:[#allocation3 + $0x30a] sm:$0xff] }
 0x29b   :  { %4241 = vrot.lane.b32.xlu0 %v4236_v15, %s9985_s20  ;;  %v4285_v15 = vsel %vm2667_vm2, %v4283_v61, %v4284_v22 }
 0x29c   :  { %v3870_v63 = vpop.permute.xlu1 %3869 }
 0x29d   :  { %v3810_v59 = vpop.permute.xlu0 %3809  ;;  %v3873_v17 = vadd.f32 %v3870_v63, %v3860_v26  ;;  %v4314_v63 = vld [vmem:[#allocation3 + $0x302] sm:$0xff]  ;;  %v12031_v26 = vmax.f32 %v4312_v54, %v4315_v7 }
 0x29e   :  { %v3812_v16 = vadd.f32 %v3810_v59, %v3799_v39  ;;  %4267 = vrot.lane.b32.xlu1 %v4261_v58, %s9982_s21  ;;  %v4470_v58 = vld [vmem:[#allocation4 + $0xee] sm:$0xff]  ;;  %v12033_v38 = vmax.f32 %v4311_v31, %v4314_v63  ;;  %v4297_v59 = vrot.slane %v11991_v41, 4 }
 0x29f   :  { %4265 = vrot.lane.b32.xlu0 %v4262_v45, %s9982_s21  ;;  %3875 = vst.msk [vmem:[#allocation4 + $0x10a] sm:$0xff] %vm2695_vm5, %v3873_v17  ;;  %v4287_v45 = vsel %vm2667_vm2, %v4284_v22, %v4286_v23  ;;  %v4299_v17 = vrot.slane %v4257_v9, 4  ;;  %v4323_v22 = vrot.slane %v12031_v26, 1 }
 0x2a0   :  { %3814 = vst.msk [vmem:[#allocation4 + $0x104] sm:$0x3f] %vm2697_vm6, %v3812_v16  ;;  %v3894_v4 = vpop.permute.xlu1 %3893  ;;  %v4296_v16 = vrot.slane %v11993_v62, 4  ;;  %v4322_v23 = vrot.slane %v12033_v38, 1 }
 0x2a1   :  { %v3834_v36 = vpop.permute.xlu0 %3833  ;;  %v4471_v52 = vld [vmem:[#allocation4 + $0xf6] sm:$0xff]  ;;  %v3897_v9 = vadd.f32 %v3894_v4, %v11681_v35  ;;  %v4300_v63 = vsel %vm2681_vm3, %v4297_v59, %v4299_v17  ;;  %v4333_v4 = vrot.slane %v12033_v38, 2 }
 0x2a2   :  { %v12026_v44 = vpop.f32.mrf.mxu0  ;;  %v4498_v10 = vpack.c.bf16 %v4471_v52, %v4470_v58  ;;  %4278 = vrot.lane.b32.xlu1 %v4272_v0, %s9983_s23  ;;  %v3836_v7 = vadd.f32 %v3834_v36, %v11629_v14  ;;  %v4298_v52 = vsel %vm2681_vm3, %v4296_v16, %v4297_v59  ;;  %v4324_v35 = vsel %vm2642_vm0, %v4322_v23, %v4323_v22  ;;  %v12056_v36 = vld [vmem:[#allocation4 + $0xa8] sm:$0xff]  ;;  %v12058_v59 = vld [vmem:[#allocation4 + $0xb0] sm:$0xff] }
 0x2a3   :  { %13161 = vst [vmem:[#allocation13_spill] sm:$0xff] %v12026_v44  ;;  %4276 = vrot.lane.b32.xlu0 %v4273_v48, %s9983_s23  ;;  %v4334_v14 = vrot.slane %v12031_v26, 2 }
 0x2a4   :  { %v9158_v39 = vpop.f32.mrf.mxu0  ;;  %9197 = vmatmul.mubr.msk.bf16.gmra.mxu0 %vm2695_vm5, %v4498_v10  ;;  %v3905_v58 = vpop.permute.xlu1 %3904 }
 0x2a5   :  { %v3845_v0 = vpop.permute.xlu0 %3844  ;;  %9200 = vmatprep.mubr.msk.bf16.mxu0 %vm9987_vm4, %v13156_v3 }
 0x2a6   :  { %v12041_v61 = vpop.f32.mrf.mxu0  ;;  %4292 = vrot.lane.b32.xlu1 %v4287_v45, %s9984_s30  ;;  %v4313_v45 = vld [vmem:[#allocation3 + $0x304] sm:$0x3]  ;;  %v3847_v44 = vadd.f32 %v3845_v0, %v3836_v7  ;;  %v4346_v7 = vrot.slane %v12031_v26, 3 }
 0x2a7   :  { %13162 = vst [vmem:[#allocation14_spill] sm:$0xff] %v12041_v61  ;;  %4290 = vrot.lane.b32.xlu0 %v4285_v15, %s9984_s30  ;;  %v4472_v54 = vld [vmem:[#allocation4 + $0xfe] sm:$0xff]  ;;  %v4473_v48 = vld [vmem:[#allocation4 + $0x106] sm:$0xff]  ;;  %v4316_v61 = vld [vmem:[#allocation3 + $0x312] sm:$0x3]  ;;  %v3908_v15 = vadd.f32 %v3905_v58, %v3897_v9 }
 0x2a8   :  { %v9159_v31 = vpop.f32.mrf.mxu0  ;;  %v3919_v10 = vpop.permute.xlu1 %3918  ;;  %v4499_v43 = vpack.c.bf16 %v4473_v48, %v4472_v54  ;;  %v4319_v58 = vmax.f32 %v4313_v45, %v4316_v61  ;;  %v4359_v45 = vrot.slane %v12031_v26, 4 }
 0x2a9   :  { %v3859_v39 = vpop.permute.xlu0 %3858  ;;  %v3922_v17 = vadd.f32 %v3919_v10, %v3908_v15 }
 0x2aa   :  { %4305 = vrot.lane.b32.xlu1 %v4300_v63, %s9985_s20  ;;  %v3861_v16 = vadd.f32 %v3859_v39, %v3847_v44  ;;  %v4345_v44 = vrot.slane %v12033_v38, 3  ;;  %v4348_v61 = vrot.slane %v4319_v58, 3  ;;  %v4361_v15 = vrot.slane %v4319_v58, 4 }
 0x2ab   :  { %4303 = vrot.lane.b32.xlu0 %v4298_v52, %s9985_s20 }
 0x2ac   :  { %9201 = vmatmul.mubr.msk.bf16.gmra.mxu0 %vm2695_vm5, %v4499_v43  ;;  %v3932_v54 = vpop.permute.xlu1 %3931  ;;  %v4335_v43 = vsel %vm2654_vm1, %v4333_v4, %v4334_v14  ;;  %v4349_v39 = vsel %vm2667_vm2, %v4346_v7, %v4348_v61 }
 0x2ad   :  { %v3872_v48 = vpop.permute.xlu0 %3871  ;;  %9204 = vmatprep.mubr.msk.bf16.mxu0 %vm9987_vm4, %v13156_v3  ;;  %v3935_v23 = vadd.f32 %v3932_v54, %v3922_v17 }
 0x2ae   :  { %v3874_v9 = vadd.f32 %v3872_v48, %v3861_v16  ;;  %4329 = vrot.lane.b32.xlu1 %v4323_v22, %s9982_s21  ;;  %v4347_v22 = vsel %vm2667_vm2, %v4345_v44, %v4346_v7  ;;  %v4362_v7 = vsel %vm2681_vm3, %v4359_v45, %v4361_v15 }
 0x2af   :  { %4327 = vrot.lane.b32.xlu0 %v4324_v35, %s9982_s21  ;;  %3937 = vst.msk [vmem:[#allocation4 + $0x118] sm:$0xff] %vm2695_vm5, %v3935_v23  ;;  %v4358_v35 = vrot.slane %v12033_v38, 4 }
 0x2b0   :  { %3876 = vst.msk [vmem:[#allocation4 + $0x112] sm:$0x3f] %vm2697_vm6, %v3874_v9  ;;  %v3969_v31 = vpop.permute.xlu1 %3968 }
 0x2b1   :  { %v3896_v63 = vpop.permute.xlu0 %3895  ;;  %v4360_v58 = vsel %vm2681_vm3, %v4358_v35, %v4359_v45  ;;  %v12093_v45 = vld [vmem:[#allocation4 + $0xb8] sm:$0xff]  ;;  %v12095_v35 = vld [vmem:[#allocation4 + $0xc0] sm:$0xff] }
 0x2b2   :  { %v12072_v52 = vpop.f32.mrf.mxu0  ;;  %4340 = vrot.lane.b32.xlu1 %v4334_v14, %s9983_s23  ;;  %v3898_v48 = vadd.f32 %v3896_v63, %v11687_v21 }
 0x2b3   :  { %4338 = vrot.lane.b32.xlu0 %v4335_v43, %s9983_s23 }
 0x2b4   :  { %v9162_v10 = vpop.f32.mrf.mxu0  ;;  %v3956_v4 = vpop.permute.xlu1 %3955 }
 0x2b5   :  { %v3907_v17 = vpop.permute.xlu0 %3906 }
 0x2b6   :  { %v12080_v16 = vpop.f32.mrf.mxu0  ;;  %4354 = vrot.lane.b32.xlu1 %v4349_v39, %s9984_s30  ;;  %v3909_v61 = vadd.f32 %v3907_v17, %v3898_v48 }
 0x2b7   :  { %4352 = vrot.lane.b32.xlu0 %v4347_v22, %s9984_s30  ;;  %v4474_v14 = vld [vmem:[#allocation4 + $0x10e] sm:$0xff]  ;;  %v4475_v54 = vld [vmem:[#allocation4 + $0x116] sm:$0xff]  ;;  %v3959_v22 = vadd.f32 %v3956_v4, %v11754_v30 }
 0x2b8   :  { %v9163_v23 = vpop.f32.mrf.mxu0  ;;  %v4500_v9 = vpack.c.bf16 %v4475_v54, %v4474_v14  ;;  %v3967_v44 = vpop.permute.xlu1 %3966 }
 0x2b9   :  { %v3921_v43 = vpop.permute.xlu0 %3920  ;;  %v3970_v39 = vadd.f32 %v3967_v44, %v3959_v22 }
 0x2ba   :  { %9205 = vmatmul.mubr.msk.bf16.gmra.mxu0 %vm2695_vm5, %v4500_v9  ;;  %4367 = vrot.lane.b32.xlu1 %v4362_v7, %s9985_s20  ;;  %v3923_v10 = vadd.f32 %v3921_v43, %v3909_v61 }
 0x2bb   :  { %4365 = vrot.lane.b32.xlu0 %v4360_v58, %s9985_s20  ;;  %9208 = vmatprep.mubr.msk.bf16.mxu0 %vm9987_vm4, %v13156_v3 }
 0x2bc   :  { %v3981_v21 = vpop.permute.xlu1 %3980 }
 0x2bd   :  { %v3934_v63 = vpop.permute.xlu0 %3933  ;;  %v3984_v17 = vadd.f32 %v3981_v21, %v3970_v39 }
 0x2be   :  { %v3936_v15 = vadd.f32 %v3934_v63, %v3923_v10 }
 0x2c0   :  { %3938 = vst.msk [vmem:[#allocation4 + $0x120] sm:$0x3f] %vm2697_vm6, %v3936_v15  ;;  %v3994_v54 = vpop.permute.xlu1 %3993 }
 0x2c1   :  { %v3958_v30 = vpop.permute.xlu0 %3957  ;;  %v3997_v4 = vadd.f32 %v3994_v54, %v3984_v17 }
 0x2c2   :  { %v3960_v48 = vadd.f32 %v3958_v30, %v11745_v2  ;;  %v12101_v23 = vpop.f32.mrf.mxu0 }
 0x2c3   :  { %3999 = vst.msk [vmem:[#allocation4 + $0x126] sm:$0xff] %vm2695_vm5, %v3997_v4  ;;  %v12112_v4 = vld [vmem:[#allocation4 + $0xc8] sm:$0xff] }
 0x2c4   :  { %v9166_v9 = vpop.f32.mrf.mxu0  ;;  %v3971_v7 = vadd.f32 %v3969_v31, %v3960_v48  ;;  %v3996_v58 = vpop.permute.xlu1 %3995  ;;  %v12114_v48 = vld [vmem:[#allocation4 + $0xd0] sm:$0xff] }
 0x2c5   :  { %v3983_v44 = vpop.permute.xlu0 %3982 }
 0x2c6   :  { %v3985_v43 = vadd.f32 %v3983_v44, %v3971_v7  ;;  %v12104_v61 = vpop.f32.mrf.mxu0 }
 0x2c7   :  { %v4476_v39 = vld [vmem:[#allocation4 + $0x11e] sm:$0xff] }
 0x2c8   :  { %v3998_v22 = vadd.f32 %v3996_v58, %v3985_v43  ;;  %v9167_v10 = vpop.f32.mrf.mxu0  ;;  %v4031_v21 = vpop.permute.xlu1 %4030 }
 0x2c9   :  { %v4020_v63 = vpop.permute.xlu0 %4019 }
 0x2ca   :  { %4000 = vst.msk [vmem:[#allocation4 + $0x12e] sm:$0x3f] %vm2697_vm6, %v3998_v22  ;;  %v4477_v15 = vld [vmem:[#allocation4 + $0x126] sm:$0xff]  ;;  %v4022_v30 = vadd.f32 %v4020_v63, %v11819_v47 }
 0x2cb   :  { %v4501_v2 = vpack.c.bf16 %v4477_v15, %v4476_v39 }
 0x2cc   :  { %v4018_v17 = vpop.permute.xlu1 %4017  ;;  %v4033_v43 = vadd.f32 %v4031_v21, %v4022_v30 }
 0x2cd   :  { %v4029_v54 = vpop.permute.xlu0 %4028  ;;  %v4021_v31 = vadd.f32 %v4018_v17, %v11823_v33  ;;  %9209 = vmatmul.mubr.msk.bf16.gmra.mxu0 %vm2695_vm5, %v4501_v2 }
 0x2ce   :  { %9212 = vmatprep.mubr.msk.bf16.mxu0 %vm9987_vm4, %v13156_v3 }
 0x2cf   :  { %v4032_v9 = vadd.f32 %v4029_v54, %v4021_v31 }
 0x2d0   :  { %v4043_v58 = vpop.permute.xlu1 %4042 }
 0x2d1   :  { %v4045_v44 = vpop.permute.xlu0 %4044  ;;  %v4046_v22 = vadd.f32 %v4043_v58, %v4032_v9  ;;  %v12122_v9 = vld [vmem:[#allocation4 + $0xd8] sm:$0xff]  ;;  %v12124_v58 = vld [vmem:[#allocation4 + $0xe0] sm:$0xff] }
 0x2d2   :  { %v4047_v47 = vadd.f32 %v4045_v44, %v4033_v43 }
 0x2d4   :  { %v4058_v10 = vpop.permute.xlu1 %4057 }
 0x2d5   :  { %v4056_v33 = vpop.permute.xlu0 %4055  ;;  %v4060_v63 = vadd.f32 %v4058_v10, %v4047_v47 }
 0x2d6   :  { %v4059_v39 = vadd.f32 %v4056_v33, %v4046_v22  ;;  %v2652_v22 = vadd.f32 %v11022_v6, %v10385_v55 }
 0x2d7   :  { %4062 = vst.msk [vmem:[#allocation4 + $0x13c] sm:$0x3f] %vm2697_vm6, %v4060_v63 }
 0x2d8   :  { %4061 = vst.msk [vmem:[#allocation4 + $0x134] sm:$0xff] %vm2695_vm5, %v4059_v39  ;;  %v4082_v15 = vpop.permute.xlu1 %4081 }
 0x2d9   :  { %v4080_v2 = vpop.permute.xlu0 %4079  ;;  %v4084_v7 = vadd.f32 %v4082_v15, %v11849_v25 }
 0x2da   :  { %v4083_v21 = vadd.f32 %v4080_v2, %v11851_v32 }
 0x2dc   :  { %v4093_v17 = vpop.permute.xlu1 %4092 }
 0x2dd   :  { %v4091_v54 = vpop.permute.xlu0 %4090  ;;  %v4095_v47 = vadd.f32 %v4093_v17, %v4084_v7 }
 0x2de   :  { %v4094_v10 = vadd.f32 %v4091_v54, %v4083_v21 }
 0x2df   :  { %v4478_v31 = vld [vmem:[#allocation4 + $0x12e] sm:$0xff]  ;;  %v4479_v14 = vld [vmem:[#allocation4 + $0x136] sm:$0xff] }
 0x2e0   :  { %v4502_v30 = vpack.c.bf16 %v4479_v14, %v4478_v31  ;;  %v4107_v44 = vpop.permute.xlu1 %4106 }
 0x2e1   :  { %v4105_v43 = vpop.permute.xlu0 %4104  ;;  %v4109_v25 = vadd.f32 %v4107_v44, %v4095_v47 }
 0x2e2   :  { %9213 = vmatmul.mubr.msk.bf16.gmra.mxu0 %vm2695_vm5, %v4502_v30  ;;  %v4108_v33 = vadd.f32 %v4105_v43, %v4094_v10 }
 0x2e3   :  { %9216 = vmatprep.mubr.msk.bf16.mxu0 %vm9987_vm4, %v13156_v3  ;;  %v12131_v32 = vpop.f32.mrf.mxu0 }
 0x2e4   :  { %v4120_v14 = vpop.permute.xlu1 %4119 }
 0x2e5   :  { %v4118_v63 = vpop.permute.xlu0 %4117  ;;  %v4122_v39 = vadd.f32 %v4120_v14, %v4109_v25  ;;  %v9170_v2 = vpop.f32.mrf.mxu0 }
 0x2e6   :  { %v4121_v15 = vadd.f32 %v4118_v63, %v4108_v33 }
 0x2e7   :  { %4124 = vst.msk [vmem:[#allocation4 + $0x14a] sm:$0x3f] %vm2697_vm6, %v4122_v39  ;;  %v12135_v7 = vpop.f32.mrf.mxu0  ;;  %v12143_v39 = vld [vmem:[#allocation4 + $0xe8] sm:$0xff] }
 0x2e8   :  { %4123 = vst.msk [vmem:[#allocation4 + $0x142] sm:$0xff] %vm2695_vm5, %v4121_v15  ;;  %v4144_v17 = vpop.permute.xlu1 %4143  ;;  %v12145_v15 = vld [vmem:[#allocation4 + $0xf0] sm:$0xff] }
 0x2e9   :  { %v4142_v54 = vpop.permute.xlu0 %4141  ;;  %v9171_v31 = vpop.f32.mrf.mxu0  ;;  %v4146_v25 = vadd.f32 %v4144_v17, %v11894_v29 }
 0x2ea   :  { %v4145_v33 = vadd.f32 %v4142_v54, %v11896_v1 }
 0x2eb   :  { %v12137_v21 = vpop.f32.mrf.mxu0 }
 0x2ec   :  { %13163 = vst [vmem:[#allocation15_spill] sm:$0xff] %v12137_v21  ;;  %v4155_v30 = vpop.permute.xlu1 %4154 }
 0x2ed   :  { %v4153_v44 = vpop.permute.xlu0 %4152  ;;  %v9174_v43 = vpop.f32.mrf.mxu0  ;;  %v4157_v0 = vadd.f32 %v4155_v30, %v4146_v25 }
 0x2ee   :  { %v4156_v43 = vadd.f32 %v4153_v44, %v4145_v33 }
 0x2ef   :  { %v4480_v47 = vld [vmem:[#allocation4 + $0x13e] sm:$0xff]  ;;  %v4481_v10 = vld [vmem:[#allocation4 + $0x146] sm:$0xff]  ;;  %v12141_v14 = vpop.f32.mrf.mxu0 }
 0x2f0   :  { %13164 = vst [vmem:[#allocation16_spill] sm:$0xff] %v12141_v14  ;;  %v4503_v63 = vpack.c.bf16 %v4481_v10, %v4480_v47  ;;  %v4169_v2 = vpop.permute.xlu1 %4168  ;;  %v2653_v14 = vadd.f32 %v11013_v49, %v10378_v42 }
 0x2f1   :  { %v4167_v31 = vpop.permute.xlu0 %4166  ;;  %v9175_v21 = vpop.f32.mrf.mxu0  ;;  %v4171_v29 = vadd.f32 %v4169_v2, %v4157_v0  ;;  %v13165_v0 = vld [vmem:[#allocation8_spill] sm:$0xff] }
 0x2f2   :  { %9217 = vmatmul.mubr.msk.bf16.gmra.mxu0 %vm2695_vm5, %v4503_v63  ;;  %v4170_v1 = vadd.f32 %v4167_v31, %v4156_v43  ;;  %v2665_v44 = vadd.f32 %v11042_v57, %v2653_v14  ;;  %v2664_v25 = vadd.f32 %v13165_v0, %v2652_v22  ;;  %v5076_v0 = vld [vmem:[#allocation4 + $0x1c] sm:$0xff] }
 0x2f3   :  { %9220 = vmatprep.mubr.msk.bf16.mxu0 %vm9987_vm4, %v13156_v3 }
 0x2f4   :  { %v4182_v17 = vpop.permute.xlu1 %4181 }
 0x2f5   :  { %v4180_v54 = vpop.permute.xlu0 %4179  ;;  %v4184_v47 = vadd.f32 %v4182_v17, %v4171_v29 }
 0x2f6   :  { %v4183_v10 = vadd.f32 %v4180_v54, %v4170_v1 }
 0x2f7   :  { %4186 = vst.msk [vmem:[#allocation4 + $0x158] sm:$0x3f] %vm2697_vm6, %v4184_v47 }
 0x2f8   :  { %4185 = vst.msk [vmem:[#allocation4 + $0x150] sm:$0xff] %vm2695_vm5, %v4183_v10  ;;  %v2678_v21 = vpop.permute.xlu1 %2677 }
 0x2f9   :  { %v2676_v30 = vpop.permute.xlu0 %2675  ;;  %v2680_v63 = vadd.f32 %v2678_v21, %v2665_v44  ;;  %v5077_v21 = vld [vmem:[#allocation4 + $0x24] sm:$0xff] }
 0x2fa   :  { %v12160_v33 = vpop.f32.mrf.mxu0  ;;  %v2679_v2 = vadd.f32 %v2676_v30, %v2664_v25  ;;  %v12170_v30 = vld [vmem:[#allocation4 + $0x100] sm:$0xff] }
 0x2fb   :  { %v9905_v25 = vld [vmem:[%s13144_s3 + $0x58] sm:$0xff]  }
 0x2fc   :  { %v9178_v31 = vpop.f32.mrf.mxu0  ;;  %v2692_v43 = vpop.permute.xlu1 %2691 }
 0x2fd   :  { %v2690_v42 = vpop.permute.xlu0 %2689  ;;  %v2694_v49 = vadd.f32 %v2692_v43, %v2680_v63  ;;  %v12178_v31 = vld [vmem:[#allocation4 + $0xf8] sm:$0xff] }
 0x2fe   :  { %v2693_v29 = vadd.f32 %v2690_v42, %v2679_v2  ;;  %v12162_v55 = vpop.f32.mrf.mxu0 }
 0x2ff   :  { %v4482_v6 = vld [vmem:[#allocation4 + $0x14e] sm:$0xff]  ;;  %v4483_v1 = vld [vmem:[#allocation4 + $0x156] sm:$0xff]  ;;  %2698 = vst.msk [vmem:[#allocation4 + $0x8] sm:$0x3f] %vm2697_vm6, %v2694_v49  ;;  %v5118_v49 = vpack.c.bf16 %v5077_v21, %v5076_v0 }
 0x300   :  { %2696 = vst.msk [vmem:[#allocation4] sm:$0xff] %vm2695_vm5, %v2693_v29  ;;  %v9179_v57 = vpop.f32.mrf.mxu0  ;;  %v4504_v14 = vpack.c.bf16 %v4483_v1, %v4482_v6  ;;  %v4206_v22 = vpop.permute.xlu1 %4205  ;;  %v5078_v21 = vld [vmem:[#allocation4 + $0x2c] sm:$0xff] }
 0x301   :  { %v4204_v17 = vpop.permute.xlu0 %4203  ;;  %v4208_v54 = vadd.f32 %v4206_v22, %v11956_v34  ;;  %v9906_v34 = vld [vmem:[%s13144_s3 + $0x70] sm:$0xff]  }
 0x302   :  { %9221 = vmatmul.mubr.msk.bf16.gmra.mxu0 %vm2695_vm5, %v4504_v14  ;;  %v4207_v43 = vadd.f32 %v4204_v17, %v11958_v18  ;;  %v9907_v22 = vld [vmem:[%s13144_s3 + $0x50] sm:$0xff]   ;;  %v9908_v18 = vld [vmem:[%s13144_s3 + $0x68] sm:$0xff]  }
 0x303   :  { %9320 = vmatprep.mubr.msk.bf16.mxu0 %vm9987_vm4, %v13156_v3 }
 0x304   :  { %v4217_v47 = vpop.permute.xlu1 %4216 }
 0x305   :  { %v4215_v10 = vpop.permute.xlu0 %4214  ;;  %v4219_v44 = vadd.f32 %v4217_v47, %v4208_v54 }
 0x306   :  { %v4374_v2 = vld [vmem:[#allocation4 + $0x8] sm:$0xff]  ;;  %v4218_v57 = vadd.f32 %v4215_v10, %v4207_v43  ;;  %v4376_v10 = vld [vmem:[#allocation4 + $0x18] sm:$0xff] }
 0x307   :  { %v4373_v63 = vld [vmem:[#allocation4] sm:$0xff] }
 0x308   :  { %v4415_v42 = vpack.c.bf16 %v4374_v2, %v4373_v63  ;;  %v4231_v6 = vpop.permute.xlu1 %4230  ;;  %v4375_v63 = vld [vmem:[#allocation4 + $0x10] sm:$0xff] }
 0x309   :  { %v4229_v1 = vpop.permute.xlu0 %4228  ;;  %v4233_v14 = vadd.f32 %v4231_v6, %v4219_v44  ;;  %v5079_v44 = vld [vmem:[#allocation4 + $0x34] sm:$0xff]  ;;  %v4416_v43 = vpack.c.bf16 %v4376_v10, %v4375_v63  ;;  %v9910_v6 = vld [vmem:[%s13144_s3 + $0x60] sm:$0xff]  }
 0x30a   :  { %9231 = vmatmul.mubr.msk.bf16.vlgmr.msra.gmra.mxu1 %vm2695_vm5, %v4415_v42  ;;  %9321 = vmatmul.mubr.msk.bf16.vlgmr.msra.gmra.mxu0 %vm2695_vm5, %v5118_v49  ;;  %v4232_v17 = vadd.f32 %v4229_v1, %v4218_v57  ;;  %v5119_v42 = vpack.c.bf16 %v5079_v44, %v5078_v21  ;;  %v9909_v49 = vld [vmem:[%s13144_s3 + $0x48] sm:$0xff]   ;;  %v4378_v10 = vld [vmem:[#allocation4 + $0x28] sm:$0xff] }
 0x30b   :  { %9405 = vmatpush3.bf16.msra.mxu1 %v9905_v25  ;;  %9495 = vmatpush3.bf16.msra.mxu0 %v9906_v34  ;;  %v12218_v21 = vld [vmem:[#allocation4 + $0x110] sm:$0xff] }
 0x30c   :  { %9234 = vmatprep.mubr.msk.bf16.mxu1 %vm9987_vm4, %v13156_v3  ;;  %9324 = vmatprep.mubr.msk.bf16.mxu0 %vm9987_vm4, %v13156_v3  ;;  %v4244_v54 = vpop.permute.xlu1 %4243 }
 0x30d   :  { %v4242_v47 = vpop.permute.xlu0 %4241  ;;  %9406 = vmatprep.subr.bf16.mxu1 %v13156_v3  ;;  %9496 = vmatprep.subr.bf16.mxu0 %v13156_v3  ;;  %v4246_v0 = vadd.f32 %v4244_v54, %v4233_v14  ;;  %v12197_v34 = vpop.f32.mrf.mxu0 }
 0x30e   :  { %v4245_v25 = vadd.f32 %v4242_v47, %v4232_v17  ;;  %v4377_v17 = vld [vmem:[#allocation4 + $0x20] sm:$0xff] }
 0x30f   :  { %9407 = vmatpush3.bf16.msra.mxu1 %v9907_v22  ;;  %9497 = vmatpush3.bf16.msra.mxu0 %v9908_v18  ;;  %4248 = vst.msk [vmem:[#allocation4 + $0x166] sm:$0x3f] %vm2697_vm6, %v4246_v0  ;;  %v9182_v2 = vpop.f32.mrf.mxu0  ;;  %v5080_v0 = vld [vmem:[#allocation4 + $0x3c] sm:$0xff] }
 0x310   :  { %4247 = vst.msk [vmem:[#allocation4 + $0x15e] sm:$0xff] %vm2695_vm5, %v4245_v25  ;;  %9408 = vmatprep.subr.bf16.mxu1 %v13156_v3  ;;  %9498 = vmatprep.subr.bf16.mxu0 %v13156_v3  ;;  %v4268_v1 = vpop.permute.xlu1 %4267  ;;  %v12222_v25 = vld [vmem:[#allocation4 + $0x108] sm:$0xff]  ;;  %v4417_v2 = vpack.c.bf16 %v4378_v10, %v4377_v17  ;;  %v4379_v17 = vld [vmem:[#allocation4 + $0x30] sm:$0xff] }
 0x311   :  { %v4266_v57 = vpop.permute.xlu0 %4265  ;;  %v4270_v14 = vadd.f32 %v4268_v1, %v11991_v41  ;;  %v12210_v22 = vpop.f32.mrf.mxu0  ;;  %v5081_v41 = vld [vmem:[#allocation4 + $0x44] sm:$0xff] }
 0x312   :  { %13166 = vst [vmem:[#allocation8_spill] sm:$0xff] %v12210_v22  ;;  %9235 = vmatmul.mubr.msk.bf16.gmra.mxu1 %vm2695_vm5, %v4416_v43  ;;  %9325 = vmatmul.mubr.msk.bf16.gmra.mxu0 %vm2695_vm5, %v5119_v42  ;;  %v4269_v63 = vadd.f32 %v4266_v57, %v11993_v62  ;;  %v5120_v43 = vpack.c.bf16 %v5081_v41, %v5080_v0  ;;  %v5082_v0 = vld [vmem:[#allocation4 + $0x4c] sm:$0xff]  ;;  %v12247_v22 = vld [vmem:[#allocation4 + $0x120] sm:$0xff] }
 0x313   :  { %9238 = vmatprep.mubr.msk.bf16.mxu1 %vm9987_vm4, %v13156_v3  ;;  %9328 = vmatprep.mubr.msk.bf16.mxu0 %vm9987_vm4, %v13156_v3  ;;  %v9183_v18 = vpop.f32.mrf.mxu0 }
 0x314   :  { %9409 = vmatpush3.bf16.msra.mxu1 %v9909_v49  ;;  %9499 = vmatpush3.bf16.msra.mxu0 %v9910_v6  ;;  %v4279_v54 = vpop.permute.xlu1 %4278 }
 0x315   :  { %v4277_v47 = vpop.permute.xlu0 %4276  ;;  %9584 = vmatprep.subr.bf16.mxu1 %v13156_v3  ;;  %9710 = vmatprep.subr.bf16.mxu0 %v13156_v3  ;;  %v4281_v44 = vadd.f32 %v4279_v54, %v4270_v14  ;;  %v5083_v54 = vld [vmem:[#allocation4 + $0x54] sm:$0xff] }
 0x316   :  { %v4280_v1 = vadd.f32 %v4277_v47, %v4269_v63  ;;  %v9971_v47 = vld [vmem:[#allocation4 + $0x38] sm:$0xff]  ;;  %v5121_v63 = vpack.c.bf16 %v5083_v54, %v5082_v0 }
 0x318   :  { %v4293_v49 = vpop.permute.xlu1 %4292 }
 0x319   :  { %v4291_v6 = vpop.permute.xlu0 %4290  ;;  %v4295_v18 = vadd.f32 %v4293_v49, %v4281_v44  ;;  %v4418_v44 = vpack.c.bf16 %v9971_v47, %v4379_v17  ;;  %v5085_v17 = vld [vmem:[#allocation4 + $0x64] sm:$0xff] }
 0x31a   :  { %9239 = vmatmul.mubr.msk.bf16.gmra.mxu1 %vm2695_vm5, %v4417_v2  ;;  %9329 = vmatmul.mubr.msk.bf16.gmra.mxu0 %vm2695_vm5, %v5120_v43  ;;  %v4294_v62 = vadd.f32 %v4291_v6, %v4280_v1  ;;  %v9972_v47 = vld [vmem:[#allocation4 + $0x40] sm:$0xff] }
 0x31b   :  { %9242 = vmatprep.mubr.msk.bf16.mxu1 %vm9987_vm4, %v13156_v3  ;;  %9332 = vmatprep.mubr.msk.bf16.mxu0 %vm9987_vm4, %v13156_v3 }
 0x31c   :  { %v4306_v57 = vpop.permute.xlu1 %4305 }
 0x31d   :  { %v4304_v14 = vpop.permute.xlu0 %4303  ;;  %v4308_v10 = vadd.f32 %v4306_v57, %v4295_v18 }
 0x31e   :  { %v4307_v41 = vadd.f32 %v4304_v14, %v4294_v62  ;;  %v5084_v14 = vld [vmem:[#allocation4 + $0x5c] sm:$0xff] }
 0x31f   :  { %4310 = vst.msk [vmem:[#allocation4 + $0x174] sm:$0x3f] %vm2697_vm6, %v4308_v10  ;;  %v5122_v42 = vpack.c.bf16 %v5085_v17, %v5084_v14  ;;  %v9975_v17 = vld [vmem:[#allocation4 + $0x58] sm:$0xff] }
 0x320   :  { %4309 = vst.msk [vmem:[#allocation4 + $0x16c] sm:$0xff] %vm2695_vm5, %v4307_v41  ;;  %v4330_v2 = vpop.permute.xlu1 %4329 }
 0x321   :  { %v4328_v43 = vpop.permute.xlu0 %4327  ;;  %v4332_v6 = vadd.f32 %v4330_v2, %v12031_v26  ;;  %v12255_v26 = vld [vmem:[#allocation4 + $0x118] sm:$0xff] }
 0x322   :  { %v12235_v49 = vpop.f32.mrf.mxu0  ;;  %9243 = vmatmul.mubr.msk.bf16.gmra.mxu1 %vm2695_vm5, %v4418_v44  ;;  %9333 = vmatmul.mubr.msk.bf16.gmra.mxu0 %vm2695_vm5, %v5121_v63  ;;  %v4331_v1 = vadd.f32 %v4328_v43, %v12033_v38  ;;  %v9973_v44 = vld [vmem:[#allocation4 + $0x48] sm:$0xff] }
 0x323   :  { %13167 = vst [vmem:[#allocation17_spill] sm:$0xff] %v12235_v49  ;;  %9246 = vmatprep.mubr.msk.bf16.mxu1 %vm9987_vm4, %v13156_v3  ;;  %9336 = vmatprep.mubr.msk.bf16.mxu0 %vm9987_vm4, %v13156_v3  ;;  %v4419_v63 = vpack.c.bf16 %v9973_v44, %v9972_v47 }
 0x324   :  { %v9186_v18 = vpop.f32.mrf.mxu0  ;;  %v4341_v62 = vpop.permute.xlu1 %4340 }
 0x325   :  { %v4339_v57 = vpop.permute.xlu0 %4338  ;;  %v4343_v10 = vadd.f32 %v4341_v62, %v4332_v6  ;;  %v5086_v18 = vld [vmem:[#allocation4 + $0x6c] sm:$0xff]  ;;  %v5087_v62 = vld [vmem:[#allocation4 + $0x74] sm:$0xff] }
 0x326   :  { %v12245_v54 = vpop.f32.mrf.mxu0  ;;  %v4342_v41 = vadd.f32 %v4339_v57, %v4331_v1  ;;  %v5123_v47 = vpack.c.bf16 %v5087_v62, %v5086_v18  ;;  %v5091_v18 = vld [vmem:[#allocation4 + $0x94] sm:$0xff] }
 0x327   :  { %v12277_v62 = vld [vmem:[#allocation4 + $0x130] sm:$0xff] }
 0x328   :  { %v9187_v0 = vpop.f32.mrf.mxu0  ;;  %v4355_v29 = vpop.permute.xlu1 %4354 }
 0x329   :  { %v4353_v49 = vpop.permute.xlu0 %4352  ;;  %v4357_v38 = vadd.f32 %v4355_v29, %v4343_v10  ;;  %v5089_v10 = vld [vmem:[#allocation4 + $0x84] sm:$0xff] }
 0x32a   :  { %9247 = vmatmul.mubr.msk.bf16.gmra.mxu1 %vm2695_vm5, %v4419_v63  ;;  %9337 = vmatmul.mubr.msk.bf16.gmra.mxu0 %vm2695_vm5, %v5122_v42  ;;  %v4356_v2 = vadd.f32 %v4353_v49, %v4342_v41  ;;  %v9974_v42 = vld [vmem:[#allocation4 + $0x50] sm:$0xff]  ;;  %v5088_v49 = vld [vmem:[#allocation4 + $0x7c] sm:$0xff] }
 0x32b   :  { %9250 = vmatprep.mubr.msk.bf16.mxu1 %vm9987_vm4, %v13156_v3  ;;  %9340 = vmatprep.mubr.msk.bf16.mxu0 %vm9987_vm4, %v13156_v3  ;;  %v4420_v0 = vpack.c.bf16 %v9975_v17, %v9974_v42  ;;  %v9978_v42 = vld [vmem:[#allocation4 + $0x70] sm:$0xff]  ;;  %v9979_v17 = vld [vmem:[#allocation4 + $0x78] sm:$0xff] }
 0x32c   :  { %v4368_v6 = vpop.permute.xlu1 %4367 }
 0x32d   :  { %v4366_v1 = vpop.permute.xlu0 %4365  ;;  %v4370_v57 = vadd.f32 %v4368_v6, %v4357_v38  ;;  %v9976_v38 = vld [vmem:[#allocation4 + $0x60] sm:$0xff] }
 0x32e   :  { %v4369_v14 = vadd.f32 %v4366_v1, %v4356_v2  ;;  %v9977_v2 = vld [vmem:[#allocation4 + $0x68] sm:$0xff]  ;;  %v5124_v1 = vpack.c.bf16 %v5089_v10, %v5088_v49 }
 0x32f   :  { %4372 = vst.msk [vmem:[#allocation4 + $0x182] sm:$0x3f] %vm2697_vm6, %v4370_v57  ;;  %v4421_v6 = vpack.c.bf16 %v9977_v2, %v9976_v38  ;;  %v5090_v57 = vld [vmem:[#allocation4 + $0x8c] sm:$0xff]  ;;  %v5093_v38 = vld [vmem:[#allocation4 + $0xa4] sm:$0xff] }
 0x330   :  { %4371 = vst.msk [vmem:[#allocation4 + $0x17a] sm:$0xff] %vm2695_vm5, %v4369_v14  ;;  %v12279_v14 = vld [vmem:[#allocation4 + $0x128] sm:$0xff] }
 0x332   :  { %v12261_v44 = vpop.f32.mrf.mxu0  ;;  %9251 = vmatmul.mubr.msk.bf16.gmra.mxu1 %vm2695_vm5, %v4420_v0  ;;  %9341 = vmatmul.mubr.msk.bf16.gmra.mxu0 %vm2695_vm5, %v5123_v47  ;;  %v4422_v0 = vpack.c.bf16 %v9979_v17, %v9978_v42  ;;  %v5125_v47 = vpack.c.bf16 %v5091_v18, %v5090_v57  ;;  %v5095_v42 = vld [vmem:[#allocation4 + $0xb4] sm:$0xff]  ;;  %v12300_v17 = vld [vmem:[#allocation4 + $0x140] sm:$0xff] }
 0x333   :  { %9254 = vmatprep.mubr.msk.bf16.mxu1 %vm9987_vm4, %v13156_v3  ;;  %9344 = vmatprep.mubr.msk.bf16.mxu0 %vm9987_vm4, %v13156_v3 }
 0x334   :  { %v9190_v29 = vpop.f32.mrf.mxu0 }
 0x335   :  { %v5103_v29 = vld [vmem:[#allocation4 + $0xf4] sm:$0xff] }
 0x336   :  { %v12269_v41 = vpop.f32.mrf.mxu0 }
 0x338   :  { %v9191_v63 = vpop.f32.mrf.mxu0 }
 0x339   :  { %v5092_v63 = vld [vmem:[#allocation4 + $0x9c] sm:$0xff] }
 0x33a   :  { %9255 = vmatmul.mubr.msk.bf16.gmra.mxu1 %vm2695_vm5, %v4421_v6  ;;  %9345 = vmatmul.mubr.msk.bf16.gmra.mxu0 %vm2695_vm5, %v5124_v1  ;;  %v9980_v1 = vld [vmem:[#allocation4 + $0x80] sm:$0xff]  ;;  %v5126_v57 = vpack.c.bf16 %v5093_v38, %v5092_v63 }
 0x33b   :  { %9258 = vmatprep.mubr.msk.bf16.mxu1 %vm9987_vm4, %v13156_v3  ;;  %9348 = vmatprep.mubr.msk.bf16.mxu0 %vm9987_vm4, %v13156_v3  ;;  %v4423_v18 = vpack.c.bf16 %v11962_v37, %v9980_v1  ;;  %v5096_v1 = vld [vmem:[#allocation4 + $0xbc] sm:$0xff] }
 0x342   :  { %v12283_v49 = vpop.f32.mrf.mxu0  ;;  %9259 = vmatmul.mubr.msk.bf16.gmra.mxu1 %vm2695_vm5, %v4422_v0  ;;  %9349 = vmatmul.mubr.msk.bf16.gmra.mxu0 %vm2695_vm5, %v5125_v47  ;;  %v5094_v0 = vld [vmem:[#allocation4 + $0xac] sm:$0xff]  ;;  %v12302_v47 = vld [vmem:[#allocation4 + $0x138] sm:$0xff] }
 0x343   :  { %9262 = vmatprep.mubr.msk.bf16.mxu1 %vm9987_vm4, %v13156_v3  ;;  %9352 = vmatprep.mubr.msk.bf16.mxu0 %vm9987_vm4, %v13156_v3  ;;  %v5127_v63 = vpack.c.bf16 %v5095_v42, %v5094_v0  ;;  %v5098_v42 = vld [vmem:[#allocation4 + $0xcc] sm:$0xff]  ;;  %v5099_v0 = vld [vmem:[#allocation4 + $0xd4] sm:$0xff] }
 0x344   :  { %v9194_v10 = vpop.f32.mrf.mxu0 }
 0x345   :  { %v4424_v10 = vpack.c.bf16 %v12004_v51, %v11964_v40 }
 0x346   :  { %v12291_v2 = vpop.f32.mrf.mxu0 }
 0x348   :  { %v9195_v6 = vpop.f32.mrf.mxu0 }
 0x349   :  { %v5097_v6 = vld [vmem:[#allocation4 + $0xc4] sm:$0xff] }
 0x34a   :  { %9263 = vmatmul.mubr.msk.bf16.gmra.mxu1 %vm2695_vm5, %v4423_v18  ;;  %9353 = vmatmul.mubr.msk.bf16.gmra.mxu0 %vm2695_vm5, %v5126_v57  ;;  %v4425_v18 = vpack.c.bf16 %v12056_v36, %v12006_v19  ;;  %v5128_v57 = vpack.c.bf16 %v5097_v6, %v5096_v1  ;;  %v5100_v1 = vld [vmem:[#allocation4 + $0xdc] sm:$0xff] }
 0x34b   :  { %9266 = vmatprep.mubr.msk.bf16.mxu1 %vm9987_vm4, %v13156_v3  ;;  %9356 = vmatprep.mubr.msk.bf16.mxu0 %vm9987_vm4, %v13156_v3 }
 0x352   :  { %9267 = vmatmul.mubr.msk.bf16.gmra.mxu1 %vm2695_vm5, %v4424_v10  ;;  %9357 = vmatmul.mubr.msk.bf16.gmra.mxu0 %vm2695_vm5, %v5127_v63  ;;  %v4426_v10 = vpack.c.bf16 %v12093_v45, %v12058_v59  ;;  %v5129_v63 = vpack.c.bf16 %v5099_v0, %v5098_v42  ;;  %v4427_v42 = vpack.c.bf16 %v12112_v4, %v12095_v35 }
 0x353   :  { %9270 = vmatprep.mubr.msk.bf16.mxu1 %vm9987_vm4, %v13156_v3  ;;  %9360 = vmatprep.mubr.msk.bf16.mxu0 %vm9987_vm4, %v13156_v3 }
 0x35a   :  { %9271 = vmatmul.mubr.msk.bf16.gmra.mxu1 %vm2695_vm5, %v4425_v18  ;;  %9361 = vmatmul.mubr.msk.bf16.gmra.mxu0 %vm2695_vm5, %v5128_v57  ;;  %v5101_v18 = vld [vmem:[#allocation4 + $0xe4] sm:$0xff] }
 0x35b   :  { %9274 = vmatprep.mubr.msk.bf16.mxu1 %vm9987_vm4, %v13156_v3  ;;  %9364 = vmatprep.mubr.msk.bf16.mxu0 %vm9987_vm4, %v13156_v3  ;;  %v5130_v0 = vpack.c.bf16 %v5101_v18, %v5100_v1  ;;  %v4428_v1 = vpack.c.bf16 %v12122_v9, %v12114_v48 }
 0x362   :  { %9275 = vmatmul.mubr.msk.bf16.gmra.mxu1 %vm2695_vm5, %v4426_v10  ;;  %9365 = vmatmul.mubr.msk.bf16.gmra.mxu0 %vm2695_vm5, %v5129_v63 }
 0x363   :  { %9278 = vmatprep.mubr.msk.bf16.mxu1 %vm9987_vm4, %v13156_v3  ;;  %9368 = vmatprep.mubr.msk.bf16.mxu0 %vm9987_vm4, %v13156_v3 }
 0x364   :  { %v12330_v6 = vpop.f32.mrf.mxu0 }
 0x365   :  { %13168 = vst [vmem:[#allocation18_spill] sm:$0xff] %v12330_v6 }
 0x366   :  { %v9198_v57 = vpop.f32.mrf.mxu0 }
 0x367   :  { %v5102_v57 = vld [vmem:[#allocation4 + $0xec] sm:$0xff] }
 0x368   :  { %v12332_v38 = vpop.f32.mrf.mxu0  ;;  %v5131_v18 = vpack.c.bf16 %v5103_v29, %v5102_v57  ;;  %v5106_v57 = vld [vmem:[#allocation4 + $0x10c] sm:$0xff] }
 0x369   :  { %13169 = vst [vmem:[#allocation19_spill] sm:$0xff] %v12332_v38 }
 0x36a   :  { %v9199_v10 = vpop.f32.mrf.mxu0  ;;  %9279 = vmatmul.mubr.msk.bf16.gmra.mxu1 %vm2695_vm5, %v4427_v42  ;;  %9369 = vmatmul.mubr.msk.bf16.gmra.mxu0 %vm2695_vm5, %v5130_v0  ;;  %v5105_v0 = vld [vmem:[#allocation4 + $0x104] sm:$0xff] }
 0x36b   :  { %9282 = vmatprep.mubr.msk.bf16.mxu1 %vm9987_vm4, %v13156_v3  ;;  %9372 = vmatprep.mubr.msk.bf16.mxu0 %vm9987_vm4, %v13156_v3  ;;  %v5104_v10 = vld [vmem:[#allocation4 + $0xfc] sm:$0xff] }
 0x36c   :  { %v12342_v63 = vpop.f32.mrf.mxu0 }
 0x36d   :  { %13170 = vst [vmem:[#allocation20_spill] sm:$0xff] %v12342_v63 }
 0x36e   :  { %v9202_v43 = vpop.f32.mrf.mxu0 }
 0x36f   :  { %v4429_v43 = vpack.c.bf16 %v12143_v39, %v12124_v58 }
 0x370   :  { %v12344_v38 = vpop.f32.mrf.mxu0 }
 0x371   :  { %13171 = vst [vmem:[#allocation21_spill] sm:$0xff] %v12344_v38  ;;  %v5132_v38 = vpack.c.bf16 %v5105_v0, %v5104_v10  ;;  %v4430_v0 = vpack.c.bf16 %v12178_v31, %v12145_v15 }
 0x372   :  { %v9203_v42 = vpop.f32.mrf.mxu0  ;;  %9283 = vmatmul.mubr.msk.bf16.gmra.mxu1 %vm2695_vm5, %v4428_v1  ;;  %9373 = vmatmul.mubr.msk.bf16.gmra.mxu0 %vm2695_vm5, %v5131_v18  ;;  %v5107_v1 = vld [vmem:[#allocation4 + $0x114] sm:$0xff] }
 0x373   :  { %9286 = vmatprep.mubr.msk.bf16.mxu1 %vm9987_vm4, %v13156_v3  ;;  %9376 = vmatprep.mubr.msk.bf16.mxu0 %vm9987_vm4, %v13156_v3  ;;  %v5133_v10 = vpack.c.bf16 %v5107_v1, %v5106_v57  ;;  %v5111_v57 = vld [vmem:[#allocation4 + $0x134] sm:$0xff] }
 0x37a   :  { %v12356_v63 = vpop.f32.mrf.mxu0  ;;  %9287 = vmatmul.mubr.msk.bf16.gmra.mxu1 %vm2695_vm5, %v4429_v43  ;;  %9377 = vmatmul.mubr.msk.bf16.gmra.mxu0 %vm2695_vm5, %v5132_v38  ;;  %v5109_v38 = vld [vmem:[#allocation4 + $0x124] sm:$0xff]  ;;  %v5108_v43 = vld [vmem:[#allocation4 + $0x11c] sm:$0xff] }
 0x37b   :  { %13172 = vst [vmem:[#allocation22_spill] sm:$0xff] %v12356_v63  ;;  %9290 = vmatprep.mubr.msk.bf16.mxu1 %vm9987_vm4, %v13156_v3  ;;  %9380 = vmatprep.mubr.msk.bf16.mxu0 %vm9987_vm4, %v13156_v3 }
 0x37c   :  { %v9206_v29 = vpop.f32.mrf.mxu0 }
 0x37d   :  { %v4431_v29 = vpack.c.bf16 %v12222_v25, %v12170_v30 }
 0x37e   :  { %v12364_v18 = vpop.f32.mrf.mxu0 }
 0x37f   :  { %13173 = vst [vmem:[#allocation23_spill] sm:$0xff] %v12364_v18  ;;  %v4432_v18 = vpack.c.bf16 %v12255_v26, %v12218_v21 }
 0x380   :  { %v9207_v42 = vpop.f32.mrf.mxu0 }
 0x381   :  { %v5134_v42 = vpack.c.bf16 %v5109_v38, %v5108_v43 }
 0x382   :  { %9291 = vmatmul.mubr.msk.bf16.gmra.mxu1 %vm2695_vm5, %v4430_v0  ;;  %9381 = vmatmul.mubr.msk.bf16.gmra.mxu0 %vm2695_vm5, %v5133_v10  ;;  %v5110_v0 = vld [vmem:[#allocation4 + $0x12c] sm:$0xff] }
 0x383   :  { %9294 = vmatprep.mubr.msk.bf16.mxu1 %vm9987_vm4, %v13156_v3  ;;  %9384 = vmatprep.mubr.msk.bf16.mxu0 %vm9987_vm4, %v13156_v3  ;;  %v5135_v63 = vpack.c.bf16 %v5111_v57, %v5110_v0  ;;  %v4434_v57 = vpack.c.bf16 %v12302_v47, %v12277_v62 }
 0x38a   :  { %9295 = vmatmul.mubr.msk.bf16.gmra.mxu1 %vm2695_vm5, %v4431_v29  ;;  %9385 = vmatmul.mubr.msk.bf16.gmra.mxu0 %vm2695_vm5, %v5134_v42  ;;  %v5112_v29 = vld [vmem:[#allocation4 + $0x13c] sm:$0xff]  ;;  %v5113_v42 = vld [vmem:[#allocation4 + $0x144] sm:$0xff] }
 0x38b   :  { %9298 = vmatprep.mubr.msk.bf16.mxu1 %vm9987_vm4, %v13156_v3  ;;  %9388 = vmatprep.mubr.msk.bf16.mxu0 %vm9987_vm4, %v13156_v3 }
 0x38d   :  { %v12382_v1 = vpop.f32.mrf.mxu0 }
 0x38e   :  { %13174 = vst [vmem:[#allocation24_spill] sm:$0xff] %v12382_v1  ;;  %v5136_v1 = vpack.c.bf16 %v5113_v42, %v5112_v29  ;;  %v12412_v29 = vld [vmem:[#allocation4 + $0x148] sm:$0xff]  ;;  %v5116_v42 = vld [vmem:[#allocation4 + $0x15c] sm:$0xff] }
 0x38f   :  { %v9210_v10 = vpop.f32.mrf.mxu0 }
 0x390   :  { %v4433_v10 = vpack.c.bf16 %v12279_v14, %v12247_v22 }
 0x391   :  { %v12386_v38 = vpop.f32.mrf.mxu0 }
 0x392   :  { %13175 = vst [vmem:[#allocation25_spill] sm:$0xff] %v12386_v38  ;;  %9299 = vmatmul.mubr.msk.bf16.gmra.mxu1 %vm2695_vm5, %v4432_v18  ;;  %9389 = vmatmul.mubr.msk.bf16.gmra.mxu0 %vm2695_vm5, %v5135_v63  ;;  %v5114_v63 = vld [vmem:[#allocation4 + $0x14c] sm:$0xff]  ;;  %v5115_v18 = vld [vmem:[#allocation4 + $0x154] sm:$0xff] }
 0x393   :  { %9302 = vmatprep.mubr.msk.bf16.mxu1 %vm9987_vm4, %v13156_v3  ;;  %9392 = vmatprep.mubr.msk.bf16.mxu0 %vm9987_vm4, %v13156_v3  ;;  %v9211_v43 = vpop.f32.mrf.mxu0  ;;  %v5137_v0 = vpack.c.bf16 %v5115_v18, %v5114_v63  ;;  %v4435_v18 = vpack.c.bf16 %v12412_v29, %v12300_v17 }
 0x39a   :  { %9303 = vmatmul.mubr.msk.bf16.gmra.mxu1 %vm2695_vm5, %v4433_v10  ;;  %9393 = vmatmul.mubr.msk.bf16.gmra.mxu0 %vm2695_vm5, %v5136_v1  ;;  %v5117_v10 = vld [vmem:[#allocation4 + $0x164] sm:$0xff] }
 0x39b   :  { %9306 = vmatprep.mubr.msk.bf16.mxu1 %vm9987_vm4, %v13156_v3  ;;  %9396 = vmatprep.mubr.msk.bf16.mxu0 %vm9987_vm4, %v13156_v3 }
 0x3a2   :  { %v12404_v43 = vpop.f32.mrf.mxu0  ;;  %9307 = vmatmul.mubr.msk.bf16.gmra.mxu1 %vm2695_vm5, %v4434_v57  ;;  %9397 = vmatmul.mubr.msk.bf16.gmra.mxu0 %vm2695_vm5, %v5137_v0  ;;  %v5138_v57 = vpack.c.bf16 %v5117_v10, %v5116_v42  ;;  %v5471_v0 = vld [vmem:[#allocation4 + $0x32] sm:$0xff]  ;;  %v13177_v42 = vpack.c.bf16 %v11705_v60, %v11703_v12  ;;  %v13178_v12 = vpack.c.bf16 %v11770_v27, %v11768_v11  ;;  %v5477_v27 = vld [vmem:[#allocation4 + $0x62] sm:$0xff] }
 0x3a3   :  { %13176 = vst [vmem:[#allocation26_spill] sm:$0xff] %v12404_v43  ;;  %9310 = vmatprep.mubr.msk.bf16.mxu1 %vm9987_vm4, %v13156_v3  ;;  %9400 = vmatprep.mubr.msk.bf16.mxu0 %vm9987_vm4, %v13156_v3  ;;  %v5475_v60 = vld [vmem:[#allocation4 + $0x52] sm:$0xff] }
 0x3a4   :  { %v9214_v1 = vpop.f32.mrf.mxu0 }
 0x3a5   :  { %v5470_v1 = vld [vmem:[#allocation4 + $0x2a] sm:$0xff] }
 0x3a6   :  { %v12414_v38 = vpop.f32.mrf.mxu0  ;;  %v5512_v43 = vpack.c.bf16 %v5471_v0, %v5470_v1 }
 0x3a8   :  { %v9215_v63 = vpop.f32.mrf.mxu0 }
 0x3a9   :  { %v5473_v63 = vld [vmem:[#allocation4 + $0x42] sm:$0xff] }
 0x3aa   :  { %9311 = vmatmul.mubr.msk.bf16.gmra.mxu1 %vm2695_vm5, %v4435_v18  ;;  %9401 = vmatmul.mubr.msk.bf16.gmra.mxu0 %vm2695_vm5, %v5138_v57  ;;  %v5472_v57 = vld [vmem:[#allocation4 + $0x3a] sm:$0xff] }
 0x3ab   :  { %9410 = vmatprep.mubr.msk.bf16.mxu1 %vm9987_vm4, %v13156_v3  ;;  %9500 = vmatprep.mubr.msk.bf16.mxu0 %vm9987_vm4, %v13156_v3  ;;  %v5513_v1 = vpack.c.bf16 %v5473_v63, %v5472_v57  ;;  %v13180_v63 = vpack.c.bf16 %v11813_v5, %v11811_v20  ;;  %v13182_v20 = vpack.c.bf16 %v11859_v46, %v11857_v24 }
 0x3b2   :  { %v12424_v6 = vpop.f32.mrf.mxu0  ;;  %9411 = vmatmul.mubr.msk.bf16.vlgmr.msra.gmra.mxu1 %vm2695_vm5, %v5512_v43  ;;  %9501 = vmatmul.mubr.msk.bf16.vlgmr.msra.gmra.mxu0 %vm2695_vm5, %v13177_v42  ;;  %v5474_v43 = vld [vmem:[#allocation4 + $0x4a] sm:$0xff] }
 0x3b3   :  { %9414 = vmatprep.mubr.msk.bf16.mxu1 %vm9987_vm4, %v13156_v3  ;;  %9504 = vmatprep.mubr.msk.bf16.mxu0 %vm9987_vm4, %v13156_v3  ;;  %v5514_v42 = vpack.c.bf16 %v5475_v60, %v5474_v43 }
 0x3b4   :  { %v9218_v10 = vpop.f32.mrf.mxu0 }
 0x3b6   :  { %v12435_v18 = vpop.f32.mrf.mxu0 }
 0x3b8   :  { %v9219_v0 = vpop.f32.mrf.mxu0 }
 0x3b9   :  { %v5476_v0 = vld [vmem:[#allocation4 + $0x5a] sm:$0xff] }
 0x3ba   :  { %9415 = vmatmul.mubr.msk.bf16.gmra.mxu1 %vm2695_vm5, %v5513_v1  ;;  %9505 = vmatmul.mubr.msk.bf16.gmra.mxu0 %vm2695_vm5, %v13178_v12  ;;  %v5515_v12 = vpack.c.bf16 %v5477_v27, %v5476_v0  ;;  %v5478_v27 = vld [vmem:[#allocation4 + $0x6a] sm:$0xff]  ;;  %v5479_v0 = vld [vmem:[#allocation4 + $0x72] sm:$0xff] }
 0x3bb   :  { %9418 = vmatprep.mubr.msk.bf16.mxu1 %vm9987_vm4, %v13156_v3  ;;  %9508 = vmatprep.mubr.msk.bf16.mxu0 %vm9987_vm4, %v13156_v3 }
 0x3c2   :  { %v12446_v10 = vpop.f32.mrf.mxu0  ;;  %9419 = vmatmul.mubr.msk.bf16.gmra.mxu1 %vm2695_vm5, %v5514_v42  ;;  %9509 = vmatmul.mubr.msk.bf16.gmra.mxu0 %vm2695_vm5, %v13180_v63 }
 0x3c3   :  { %13179 = vst [vmem:[#allocation27_spill] sm:$0xff] %v12446_v10  ;;  %9422 = vmatprep.mubr.msk.bf16.mxu1 %vm9987_vm4, %v13156_v3  ;;  %9512 = vmatprep.mubr.msk.bf16.mxu0 %vm9987_vm4, %v13156_v3 }
 0x3c4   :  { %v9222_v11 = vpop.f32.mrf.mxu0 }
 0x3c6   :  { %v12457_v57 = vpop.f32.mrf.mxu0 }
 0x3c7   :  { %13181 = vst [vmem:[#allocation28_spill] sm:$0xff] %v12457_v57  ;;  %v5516_v57 = vpack.c.bf16 %v5479_v0, %v5478_v27  ;;  %v5480_v27 = vld [vmem:[#allocation4 + $0x7a] sm:$0xff]  ;;  %v5481_v0 = vld [vmem:[#allocation4 + $0x82] sm:$0xff] }
 0x3c8   :  { %v9223_v1 = vpop.f32.mrf.mxu0 }
 0x3ca   :  { %v4909_v60 = vpop.f32.mrf.mxu1  ;;  %v5261_v43 = vpop.f32.mrf.mxu0  ;;  %9423 = vmatmul.mubr.msk.bf16.gmra.mxu1 %vm2695_vm5, %v5515_v12  ;;  %9513 = vmatmul.mubr.msk.bf16.gmra.mxu0 %vm2695_vm5, %v13182_v20 }
 0x3cb   :  { %v4910_v5 = vadd.f32 %v4909_v60, %v11870_v56  ;;  %9426 = vmatprep.mubr.msk.bf16.mxu1 %vm9987_vm4, %v13156_v3  ;;  %9516 = vmatprep.mubr.msk.bf16.mxu0 %vm9987_vm4, %v13156_v3 }
 0x3cc   :  { %v9232_v42 = vpop.f32.mrf.mxu1  ;;  %v9322_v63 = vpop.f32.mrf.mxu0 }
 0x3cd   :  { %v12469_v11 = vadd.f32 %v5261_v43, %v4910_v5  ;;  %v13183_v42 = vpack.c.bf16 %v11906_v50, %v11904_v28 }
 0x3ce   :  { %v4912_v1 = vpop.f32.mrf.mxu1  ;;  %v5264_v12 = vpop.f32.mrf.mxu0 }
 0x3cf   :  { %v4913_v24 = vadd.f32 %v4912_v1, %v11881_v53 }
 0x3d0   :  { %v9233_v46 = vpop.f32.mrf.mxu1  ;;  %v9323_v20 = vpop.f32.mrf.mxu0 }
 0x3d1   :  { %v12472_v56 = vadd.f32 %v5264_v12, %v4913_v24  ;;  %v5517_v24 = vpack.c.bf16 %v5481_v0, %v5480_v27  ;;  %v5483_v27 = vld [vmem:[#allocation4 + $0x92] sm:$0xff] }
 0x3d2   :  { %v4917_v60 = vpop.f32.mrf.mxu1  ;;  %v5269_v10 = vpop.f32.mrf.mxu0  ;;  %9427 = vmatmul.mubr.msk.bf16.gmra.mxu1 %vm2695_vm5, %v5516_v57  ;;  %9517 = vmatmul.mubr.msk.bf16.gmra.mxu0 %vm2695_vm5, %v13183_v42 }
 0x3d3   :  { %v4918_v43 = vadd.f32 %v4917_v60, %v11888_v13  ;;  %9430 = vmatprep.mubr.msk.bf16.mxu1 %vm9987_vm4, %v13156_v3  ;;  %9520 = vmatprep.mubr.msk.bf16.mxu0 %vm9987_vm4, %v13156_v3  ;;  %v13184_v60 = vpack.c.bf16 %v11964_v40, %v11962_v37  ;;  %v9911_v37 = vld [vmem:[%s13145_s5 + $0x8] sm:$0xff]   ;;  %v13186_v40 = vld [vmem:[#allocation10_spill] sm:$0xff] }
 0x3d4   :  { %v9236_v53 = vpop.f32.mrf.mxu1  ;;  %v9326_v5 = vpop.f32.mrf.mxu0  ;;  %9585 = vmatpush3.bf16.msra.mxu1 %v9911_v37 }
 0x3d5   :  { %v12484_v63 = vadd.f32 %v5269_v10, %v4918_v43  ;;  %v13185_v10 = vld [vmem:[#allocation9_spill] sm:$0xff]  ;;  %9590 = vmatprep.subr.bf16.mxu1 %v13156_v3 }
 0x3d6   :  { %v4920_v57 = vpop.f32.mrf.mxu1  ;;  %v5272_v1 = vpop.f32.mrf.mxu0  ;;  %v5482_v5 = vld [vmem:[#allocation4 + $0x8a] sm:$0xff] }
 0x3d7   :  { %v4921_v28 = vadd.f32 %v4920_v57, %v11902_v8 }
 0x3d8   :  { %v9237_v50 = vpop.f32.mrf.mxu1  ;;  %v9327_v12 = vpop.f32.mrf.mxu0 }
 0x3d9   :  { %v12487_v13 = vadd.f32 %v5272_v1, %v4921_v28  ;;  %v5518_v12 = vpack.c.bf16 %v5483_v27, %v5482_v5 }
 0x3da   :  { %v4925_v46 = vpop.f32.mrf.mxu1  ;;  %v5277_v20 = vpop.f32.mrf.mxu0  ;;  %9431 = vmatmul.mubr.msk.bf16.gmra.mxu1 %vm2695_vm5, %v5517_v24  ;;  %9521 = vmatmul.mubr.msk.bf16.gmra.mxu0 %vm2695_vm5, %v13184_v60  ;;  %v13187_v60 = vpack.c.bf16 %v12006_v19, %v12004_v51 }
 0x3db   :  { %v4926_v42 = vadd.f32 %v4925_v46, %v13185_v10  ;;  %9434 = vmatprep.mubr.msk.bf16.mxu1 %vm9987_vm4, %v13156_v3  ;;  %9524 = vmatprep.mubr.msk.bf16.mxu0 %vm9987_vm4, %v13156_v3  ;;  %v13188_v10 = vld [vmem:[#allocation11_spill] sm:$0xff] }
 0x3dc   :  { %v9240_v8 = vpop.f32.mrf.mxu1  ;;  %v9330_v43 = vpop.f32.mrf.mxu0 }
 0x3dd   :  { %v12499_v53 = vadd.f32 %v5277_v20, %v4926_v42  ;;  %v5485_v8 = vld [vmem:[#allocation4 + $0xa2] sm:$0xff] }
 0x3de   :  { %v4928_v0 = vpop.f32.mrf.mxu1  ;;  %v5280_v57 = vpop.f32.mrf.mxu0 }
 0x3df   :  { %v4929_v1 = vadd.f32 %v4928_v0, %v13186_v40  ;;  %v5484_v0 = vld [vmem:[#allocation4 + $0x9a] sm:$0xff]  ;;  %v13189_v40 = vld [vmem:[#allocation12_spill] sm:$0xff] }
 0x3e0   :  { %v9241_v28 = vpop.f32.mrf.mxu1  ;;  %v9331_v50 = vpop.f32.mrf.mxu0 }
 0x3e1   :  { %v12505_v24 = vadd.f32 %v5280_v57, %v4929_v1  ;;  %v5519_v28 = vpack.c.bf16 %v5485_v8, %v5484_v0 }
 0x3e2   :  { %v4933_v46 = vpop.f32.mrf.mxu1  ;;  %v5285_v20 = vpop.f32.mrf.mxu0  ;;  %9435 = vmatmul.mubr.msk.bf16.gmra.mxu1 %vm2695_vm5, %v5518_v12  ;;  %9525 = vmatmul.mubr.msk.bf16.gmra.mxu0 %vm2695_vm5, %v13187_v60  ;;  %v13190_v60 = vpack.c.bf16 %v12058_v59, %v12056_v36  ;;  %v5486_v36 = vld [vmem:[#allocation4 + $0xaa] sm:$0xff] }
 0x3e3   :  { %v4934_v42 = vadd.f32 %v4933_v46, %v13188_v10  ;;  %9438 = vmatprep.mubr.msk.bf16.mxu1 %vm9987_vm4, %v13156_v3  ;;  %9528 = vmatprep.mubr.msk.bf16.mxu0 %vm9987_vm4, %v13156_v3 }
 0x3e4   :  { %v9244_v43 = vpop.f32.mrf.mxu1  ;;  %v9334_v5 = vpop.f32.mrf.mxu0 }
 0x3e5   :  { %v12518_v27 = vadd.f32 %v5285_v20, %v4934_v42  ;;  %v13191_v20 = vld [vmem:[#allocation13_spill] sm:$0xff] }
 0x3e6   :  { %v4936_v57 = vpop.f32.mrf.mxu1  ;;  %v5288_v37 = vpop.f32.mrf.mxu0  ;;  %v5487_v42 = vld [vmem:[#allocation4 + $0xb2] sm:$0xff] }
 0x3e7   :  { %v4937_v51 = vadd.f32 %v4936_v57, %v13189_v40 }
 0x3e8   :  { %v9245_v19 = vpop.f32.mrf.mxu1  ;;  %v9335_v1 = vpop.f32.mrf.mxu0 }
 0x3e9   :  { %v12521_v50 = vadd.f32 %v5288_v37, %v4937_v51  ;;  %v13192_v37 = vld [vmem:[#allocation14_spill] sm:$0xff]  ;;  %v5520_v19 = vpack.c.bf16 %v5487_v42, %v5486_v36 }
 0x3ea   :  { %v4941_v12 = vpop.f32.mrf.mxu1  ;;  %v5293_v46 = vpop.f32.mrf.mxu0  ;;  %9439 = vmatmul.mubr.msk.bf16.gmra.mxu1 %vm2695_vm5, %v5519_v28  ;;  %9529 = vmatmul.mubr.msk.bf16.gmra.mxu0 %vm2695_vm5, %v13190_v60  ;;  %v13193_v60 = vpack.c.bf16 %v12095_v35, %v12093_v45  ;;  %v5488_v45 = vld [vmem:[#allocation4 + $0xba] sm:$0xff] }
 0x3eb   :  { %v4942_v10 = vadd.f32 %v4941_v12, %v13191_v20  ;;  %9442 = vmatprep.mubr.msk.bf16.mxu1 %vm9987_vm4, %v13156_v3  ;;  %9532 = vmatprep.mubr.msk.bf16.mxu0 %vm9987_vm4, %v13156_v3 }
 0x3ec   :  { %v9248_v8 = vpop.f32.mrf.mxu1  ;;  %v9338_v43 = vpop.f32.mrf.mxu0 }
 0x3ed   :  { %v12533_v5 = vadd.f32 %v5293_v46, %v4942_v10  ;;  %v5489_v8 = vld [vmem:[#allocation4 + $0xc2] sm:$0xff] }
 0x3ee   :  { %v4944_v0 = vpop.f32.mrf.mxu1  ;;  %v5296_v57 = vpop.f32.mrf.mxu0 }
 0x3ef   :  { %v4945_v40 = vadd.f32 %v4944_v0, %v13192_v37 }
 0x3f0   :  { %v9249_v59 = vpop.f32.mrf.mxu1  ;;  %v9339_v51 = vpop.f32.mrf.mxu0 }
 0x3f1   :  { %v12536_v1 = vadd.f32 %v5296_v57, %v4945_v40  ;;  %v5521_v40 = vpack.c.bf16 %v5489_v8, %v5488_v45  ;;  %v13194_v51 = vpack.c.bf16 %v12114_v48, %v12112_v4  ;;  %v5490_v4 = vld [vmem:[#allocation4 + $0xca] sm:$0xff]  ;;  %v13195_v45 = vpack.c.bf16 %v12124_v58, %v12122_v9 }
 0x3f2   :  { %v4949_v28 = vpop.f32.mrf.mxu1  ;;  %v5301_v12 = vpop.f32.mrf.mxu0  ;;  %9443 = vmatmul.mubr.msk.bf16.gmra.mxu1 %vm2695_vm5, %v5520_v19  ;;  %9533 = vmatmul.mubr.msk.bf16.gmra.mxu0 %vm2695_vm5, %v13193_v60  ;;  %v5491_v60 = vld [vmem:[#allocation4 + $0xd2] sm:$0xff] }
 0x3f3   :  { %v4950_v46 = vadd.f32 %v4949_v28, %v12072_v52  ;;  %9446 = vmatprep.mubr.msk.bf16.mxu1 %vm9987_vm4, %v13156_v3  ;;  %9536 = vmatprep.mubr.msk.bf16.mxu0 %vm9987_vm4, %v13156_v3 }
 0x3f4   :  { %v9252_v20 = vpop.f32.mrf.mxu1  ;;  %v9342_v10 = vpop.f32.mrf.mxu0 }
 0x3f5   :  { %v12548_v42 = vadd.f32 %v5301_v12, %v4950_v46 }
 0x3f6   :  { %v4952_v43 = vpop.f32.mrf.mxu1  ;;  %v5304_v0 = vpop.f32.mrf.mxu0 }
 0x3f7   :  { %v4953_v57 = vadd.f32 %v4952_v43, %v12080_v16  ;;  %v5522_v43 = vpack.c.bf16 %v5491_v60, %v5490_v4 }
 0x3f8   :  { %v9253_v35 = vpop.f32.mrf.mxu1  ;;  %v9343_v37 = vpop.f32.mrf.mxu0 }
 0x3f9   :  { %v12551_v52 = vadd.f32 %v5304_v0, %v4953_v57 }
 0x3fa   :  { %v4957_v36 = vpop.f32.mrf.mxu1  ;;  %v5309_v59 = vpop.f32.mrf.mxu0  ;;  %9447 = vmatmul.mubr.msk.bf16.gmra.mxu1 %vm2695_vm5, %v5521_v40  ;;  %9537 = vmatmul.mubr.msk.bf16.gmra.mxu0 %vm2695_vm5, %v13194_v51 }
 0x3fb   :  { %v4958_v19 = vadd.f32 %v4957_v36, %v12101_v23  ;;  %9450 = vmatprep.mubr.msk.bf16.mxu1 %vm9987_vm4, %v13156_v3  ;;  %9540 = vmatprep.mubr.msk.bf16.mxu0 %vm9987_vm4, %v13156_v3  ;;  %v5492_v36 = vld [vmem:[#allocation4 + $0xda] sm:$0xff] }
 0x3fc   :  { %v9256_v16 = vpop.f32.mrf.mxu1  ;;  %v9346_v28 = vpop.f32.mrf.mxu0 }
 0x3fd   :  { %v12563_v12 = vadd.f32 %v5309_v59, %v4958_v19  ;;  %v5493_v59 = vld [vmem:[#allocation4 + $0xe2] sm:$0xff] }
 0x3fe   :  { %v4960_v46 = vpop.f32.mrf.mxu1  ;;  %v5312_v20 = vpop.f32.mrf.mxu0  ;;  %v5523_v28 = vpack.c.bf16 %v5493_v59, %v5492_v36 }
 0x3ff   :  { %v4961_v10 = vadd.f32 %v4960_v46, %v12104_v61 }
 0x400   :  { %v9257_v48 = vpop.f32.mrf.mxu1  ;;  %v9347_v8 = vpop.f32.mrf.mxu0 }
 0x401   :  { %v12566_v23 = vadd.f32 %v5312_v20, %v4961_v10  ;;  %v13196_v20 = vpack.c.bf16 %v12145_v15, %v12143_v39  ;;  %v13197_v10 = vld [vmem:[#allocation15_spill] sm:$0xff] }
 0x402   :  { %v4965_v0 = vpop.f32.mrf.mxu1  ;;  %v5317_v57 = vpop.f32.mrf.mxu0  ;;  %9451 = vmatmul.mubr.msk.bf16.gmra.mxu1 %vm2695_vm5, %v5522_v43  ;;  %9541 = vmatmul.mubr.msk.bf16.gmra.mxu0 %vm2695_vm5, %v13195_v45  ;;  %v5494_v43 = vld [vmem:[#allocation4 + $0xea] sm:$0xff] }
 0x403   :  { %v4966_v35 = vadd.f32 %v4965_v0, %v12131_v32  ;;  %9454 = vmatprep.mubr.msk.bf16.mxu1 %vm9987_vm4, %v13156_v3  ;;  %9544 = vmatprep.mubr.msk.bf16.mxu0 %vm9987_vm4, %v13156_v3  ;;  %v5495_v0 = vld [vmem:[#allocation4 + $0xf2] sm:$0xff] }
 0x404   :  { %v9260_v61 = vpop.f32.mrf.mxu1  ;;  %v9350_v37 = vpop.f32.mrf.mxu0 }
 0x405   :  { %v12578_v40 = vadd.f32 %v5317_v57, %v4966_v35  ;;  %v13198_v35 = vld [vmem:[#allocation16_spill] sm:$0xff]  ;;  %v5524_v37 = vpack.c.bf16 %v5495_v0, %v5494_v43  ;;  %v13200_v0 = vpack.c.bf16 %v12218_v21, %v12222_v25 }
 0x406   :  { %v4968_v51 = vpop.f32.mrf.mxu1  ;;  %v5320_v19 = vpop.f32.mrf.mxu0  ;;  %v5498_v21 = vld [vmem:[#allocation4 + $0x10a] sm:$0xff] }
 0x407   :  { %v4969_v9 = vadd.f32 %v4968_v51, %v12135_v7 }
 0x408   :  { %v9261_v58 = vpop.f32.mrf.mxu1  ;;  %v9351_v16 = vpop.f32.mrf.mxu0 }
 0x409   :  { %v12581_v32 = vadd.f32 %v5320_v19, %v4969_v9  ;;  %v13199_v19 = vpack.c.bf16 %v12170_v30, %v12178_v31  ;;  %v5496_v30 = vld [vmem:[#allocation4 + $0xfa] sm:$0xff] }
 0x40a   :  { %v4973_v60 = vpop.f32.mrf.mxu1  ;;  %v5325_v46 = vpop.f32.mrf.mxu0  ;;  %9455 = vmatmul.mubr.msk.bf16.gmra.mxu1 %vm2695_vm5, %v5523_v28  ;;  %9545 = vmatmul.mubr.msk.bf16.gmra.mxu0 %vm2695_vm5, %v13196_v20 }
 0x40b   :  { %v4974_v4 = vadd.f32 %v4973_v60, %v13197_v10  ;;  %9458 = vmatprep.mubr.msk.bf16.mxu1 %vm9987_vm4, %v13156_v3  ;;  %9548 = vmatprep.mubr.msk.bf16.mxu0 %vm9987_vm4, %v13156_v3  ;;  %v5497_v60 = vld [vmem:[#allocation4 + $0x102] sm:$0xff] }
 0x40c   :  { %v9264_v7 = vpop.f32.mrf.mxu1  ;;  %v9354_v48 = vpop.f32.mrf.mxu0 }
 0x40d   :  { %v12593_v8 = vadd.f32 %v5325_v46, %v4974_v4  ;;  %v5525_v7 = vpack.c.bf16 %v5497_v60, %v5496_v30  ;;  %v13203_v60 = vld [vmem:[#allocation17_spill] sm:$0xff] }
 0x40e   :  { %v4976_v57 = vpop.f32.mrf.mxu1  ;;  %v5328_v45 = vpop.f32.mrf.mxu0 }
 0x40f   :  { %v4977_v39 = vadd.f32 %v4976_v57, %v13198_v35 }
 0x410   :  { %v9265_v15 = vpop.f32.mrf.mxu1  ;;  %v9355_v61 = vpop.f32.mrf.mxu0 }
 0x411   :  { %v12596_v36 = vadd.f32 %v5328_v45, %v4977_v39  ;;  %v5499_v39 = vld [vmem:[#allocation4 + $0x112] sm:$0xff] }
 0x412   :  { %v4981_v59 = vpop.f32.mrf.mxu1  ;;  %v5333_v51 = vpop.f32.mrf.mxu0  ;;  %9459 = vmatmul.mubr.msk.bf16.gmra.mxu1 %vm2695_vm5, %v5524_v37  ;;  %9549 = vmatmul.mubr.msk.bf16.gmra.mxu0 %vm2695_vm5, %v13199_v19  ;;  %v13201_v37 = vld [vmem:[#allocation8_spill] sm:$0xff]  ;;  %v5526_v19 = vpack.c.bf16 %v5499_v39, %v5498_v21  ;;  %v13204_v39 = vpack.c.bf16 %v12277_v62, %v12279_v14 }
 0x413   :  { %v4982_v9 = vadd.f32 %v4981_v59, %v12160_v33  ;;  %9462 = vmatprep.mubr.msk.bf16.mxu1 %vm9987_vm4, %v13156_v3  ;;  %9552 = vmatprep.mubr.msk.bf16.mxu0 %vm9987_vm4, %v13156_v3  ;;  %v5502_v62 = vld [vmem:[#allocation4 + $0x12a] sm:$0xff] }
 0x414   :  { %v9268_v58 = vpop.f32.mrf.mxu1  ;;  %v9358_v16 = vpop.f32.mrf.mxu0 }
 0x415   :  { %v12608_v28 = vadd.f32 %v5333_v51, %v4982_v9  ;;  %v13202_v16 = vpack.c.bf16 %v12247_v22, %v12255_v26  ;;  %v5500_v22 = vld [vmem:[#allocation4 + $0x11a] sm:$0xff] }
 0x416   :  { %v4984_v46 = vpop.f32.mrf.mxu1  ;;  %v5336_v20 = vpop.f32.mrf.mxu0 }
 0x417   :  { %v4985_v10 = vadd.f32 %v4984_v46, %v12162_v55 }
 0x418   :  { %v9269_v31 = vpop.f32.mrf.mxu1  ;;  %v9359_v4 = vpop.f32.mrf.mxu0 }
 0x419   :  { %v12611_v33 = vadd.f32 %v5336_v20, %v4985_v10  ;;  %v5501_v31 = vld [vmem:[#allocation4 + $0x122] sm:$0xff] }
 0x41a   :  { %v4989_v48 = vpop.f32.mrf.mxu1  ;;  %v5341_v43 = vpop.f32.mrf.mxu0  ;;  %9463 = vmatmul.mubr.msk.bf16.gmra.mxu1 %vm2695_vm5, %v5525_v7  ;;  %9553 = vmatmul.mubr.msk.bf16.gmra.mxu0 %vm2695_vm5, %v13200_v0  ;;  %v5527_v0 = vpack.c.bf16 %v5501_v31, %v5500_v22  ;;  %v5505_v31 = vld [vmem:[#allocation4 + $0x142] sm:$0xff] }
 0x41b   :  { %v4990_v57 = vadd.f32 %v4989_v48, %v12197_v34  ;;  %9466 = vmatprep.mubr.msk.bf16.mxu1 %vm9987_vm4, %v13156_v3  ;;  %9556 = vmatprep.mubr.msk.bf16.mxu0 %vm9987_vm4, %v13156_v3 }
 0x41c   :  { %v9272_v55 = vpop.f32.mrf.mxu1  ;;  %v9362_v45 = vpop.f32.mrf.mxu0 }
 0x41d   :  { %v12623_v35 = vadd.f32 %v5341_v43, %v4990_v57 }
 0x41e   :  { %v4992_v15 = vpop.f32.mrf.mxu1  ;;  %v5344_v61 = vpop.f32.mrf.mxu0 }
 0x41f   :  { %v4993_v59 = vadd.f32 %v4992_v15, %v13201_v37 }
 0x420   :  { %v9273_v25 = vpop.f32.mrf.mxu1  ;;  %v9363_v51 = vpop.f32.mrf.mxu0 }
 0x421   :  { %v12626_v34 = vadd.f32 %v5344_v61, %v4993_v59  ;;  %v5503_v59 = vld [vmem:[#allocation4 + $0x132] sm:$0xff] }
 0x422   :  { %v4997_v9 = vpop.f32.mrf.mxu1  ;;  %v5349_v58 = vpop.f32.mrf.mxu0  ;;  %9467 = vmatmul.mubr.msk.bf16.gmra.mxu1 %vm2695_vm5, %v5526_v19  ;;  %9557 = vmatmul.mubr.msk.bf16.gmra.mxu0 %vm2695_vm5, %v13202_v16 }
 0x423   :  { %v4998_v46 = vadd.f32 %v4997_v9, %v13203_v60  ;;  %9470 = vmatprep.mubr.msk.bf16.mxu1 %vm9987_vm4, %v13156_v3  ;;  %9560 = vmatprep.mubr.msk.bf16.mxu0 %vm9987_vm4, %v13156_v3  ;;  %v5528_v9 = vpack.c.bf16 %v5503_v59, %v5502_v62  ;;  %v13205_v60 = vpack.c.bf16 %v12300_v17, %v12302_v47  ;;  %v5504_v47 = vld [vmem:[#allocation4 + $0x13a] sm:$0xff]  ;;  %v5507_v59 = vld [vmem:[#allocation4 + $0x152] sm:$0xff] }
 0x424   :  { %v9276_v20 = vpop.f32.mrf.mxu1  ;;  %v9366_v10 = vpop.f32.mrf.mxu0 }
 0x425   :  { %v12638_v30 = vadd.f32 %v5349_v58, %v4998_v46 }
 0x426   :  { %v5000_v4 = vpop.f32.mrf.mxu1  ;;  %v5352_v7 = vpop.f32.mrf.mxu0 }
 0x427   :  { %v5001_v48 = vadd.f32 %v5000_v4, %v12245_v54  ;;  %v5899_v4 = vld [vmem:[#allocation4 + $0x150] sm:$0xff] }
 0x428   :  { %v9277_v26 = vpop.f32.mrf.mxu1  ;;  %v9367_v43 = vpop.f32.mrf.mxu0 }
 0x429   :  { %v12641_v57 = vadd.f32 %v5352_v7, %v5001_v48  ;;  %v5923_v43 = vpack.c.bf16 %v5899_v4, %v12412_v29 }
 0x42a   :  { %v5005_v55 = vpop.f32.mrf.mxu1  ;;  %v5357_v45 = vpop.f32.mrf.mxu0  ;;  %9471 = vmatmul.mubr.msk.bf16.gmra.mxu1 %vm2695_vm5, %v5527_v0  ;;  %9561 = vmatmul.mubr.msk.bf16.gmra.mxu0 %vm2695_vm5, %v13204_v39  ;;  %v13206_v39 = vld [vmem:[#allocation18_spill] sm:$0xff] }
 0x42b   :  { %v5006_v15 = vadd.f32 %v5005_v55, %v12261_v44  ;;  %9474 = vmatprep.mubr.msk.bf16.mxu1 %vm9987_vm4, %v13156_v3  ;;  %9564 = vmatprep.mubr.msk.bf16.mxu0 %vm9987_vm4, %v13156_v3 }
 0x42c   :  { %v9280_v54 = vpop.f32.mrf.mxu1  ;;  %v9370_v61 = vpop.f32.mrf.mxu0 }
 0x42d   :  { %v12653_v37 = vadd.f32 %v5357_v45, %v5006_v15  ;;  %v5506_v61 = vld [vmem:[#allocation4 + $0x14a] sm:$0xff] }
 0x42e   :  { %v5008_v21 = vpop.f32.mrf.mxu1  ;;  %v5360_v25 = vpop.f32.mrf.mxu0 }
 0x42f   :  { %v5009_v51 = vadd.f32 %v5008_v21, %v12269_v41  ;;  %v5900_v21 = vld [vmem:[#allocation4 + $0x158] sm:$0xff] }
 0x430   :  { %v9281_v14 = vpop.f32.mrf.mxu1  ;;  %v9371_v19 = vpop.f32.mrf.mxu0 }
 0x431   :  { %v12656_v44 = vadd.f32 %v5360_v25, %v5009_v51  ;;  %v5901_v25 = vld [vmem:[#allocation4 + $0x160] sm:$0xff] }
 0x432   :  { %v5013_v58 = vpop.f32.mrf.mxu1  ;;  %v5365_v16 = vpop.f32.mrf.mxu0  ;;  %9475 = vmatmul.mubr.msk.bf16.gmra.mxu1 %vm2695_vm5, %v5528_v9  ;;  %9565 = vmatmul.mubr.msk.bf16.gmra.mxu0 %vm2695_vm5, %v13205_v60  ;;  %v13207_v14 = vld [vmem:[#allocation19_spill] sm:$0xff]  ;;  %v5924_v60 = vpack.c.bf16 %v5901_v25, %v5900_v21 }
 0x433   :  { %v5014_v46 = vadd.f32 %v5013_v58, %v12283_v49  ;;  %9478 = vmatprep.mubr.msk.bf16.mxu1 %vm9987_vm4, %v13156_v3  ;;  %9568 = vmatprep.mubr.msk.bf16.mxu0 %vm9987_vm4, %v13156_v3  ;;  %v5529_v49 = vpack.c.bf16 %v5505_v31, %v5504_v47  ;;  %v13208_v31 = vld [vmem:[#allocation20_spill] sm:$0xff] }
 0x434   :  { %v9284_v41 = vpop.f32.mrf.mxu1  ;;  %v9374_v20 = vpop.f32.mrf.mxu0 }
 0x435   :  { %v12668_v10 = vadd.f32 %v5365_v16, %v5014_v46  ;;  %v5530_v16 = vpack.c.bf16 %v5507_v59, %v5506_v61 }
 0x436   :  { %v5016_v7 = vpop.f32.mrf.mxu1  ;;  %v5368_v48 = vpop.f32.mrf.mxu0 }
 0x437   :  { %v5017_v17 = vadd.f32 %v5016_v7, %v12291_v2 }
 0x438   :  { %v9285_v22 = vpop.f32.mrf.mxu1  ;;  %v9375_v26 = vpop.f32.mrf.mxu0 }
 0x439   :  { %v12672_v0 = vadd.f32 %v5368_v48, %v5017_v17  ;;  %v5508_v17 = vld [vmem:[#allocation4 + $0x15a] sm:$0xff]  ;;  %v5509_v22 = vld [vmem:[#allocation4 + $0x162] sm:$0xff] }
 0x43a   :  { %v5021_v55 = vpop.f32.mrf.mxu1  ;;  %v5373_v45 = vpop.f32.mrf.mxu0  ;;  %9479 = vmatmul.mubr.msk.bf16.gmra.mxu1 %vm2695_vm5, %v5529_v49  ;;  %9569 = vmatmul.mubr.msk.bf16.gmra.mxu0 %vm2695_vm5, %v5923_v43  ;;  %v5902_v26 = vld [vmem:[#allocation4 + $0x168] sm:$0xff]  ;;  %v5903_v49 = vld [vmem:[#allocation4 + $0x170] sm:$0xff] }
 0x43b   :  { %v5022_v15 = vadd.f32 %v5021_v55, %v13206_v39  ;;  %9482 = vmatprep.mubr.msk.bf16.mxu1 %vm9987_vm4, %v13156_v3  ;;  %9572 = vmatprep.mubr.msk.bf16.mxu0 %vm9987_vm4, %v13156_v3  ;;  %v5925_v61 = vpack.c.bf16 %v5903_v49, %v5902_v26 }
 0x43c   :  { %v9288_v2 = vpop.f32.mrf.mxu1  ;;  %v9378_v54 = vpop.f32.mrf.mxu0 }
 0x43d   :  { %v12681_v29 = vadd.f32 %v5373_v45, %v5022_v15  ;;  %v13209_v45 = vld [vmem:[#allocation21_spill] sm:$0xff]  ;;  %v5531_v54 = vpack.c.bf16 %v5509_v22, %v5508_v17 }
 0x43e   :  { %v5024_v51 = vpop.f32.mrf.mxu1  ;;  %v5376_v62 = vpop.f32.mrf.mxu0 }
 0x43f   :  { %v5025_v19 = vadd.f32 %v5024_v51, %v13207_v14  ;;  %v13210_v51 = vld [vmem:[#allocation22_spill] sm:$0xff] }
 0x440   :  { %v9289_v9 = vpop.f32.mrf.mxu1  ;;  %v9379_v58 = vpop.f32.mrf.mxu0 }
 0x441   :  { %v12684_v46 = vadd.f32 %v5376_v62, %v5025_v19  ;;  %v5510_v9 = vld [vmem:[#allocation4 + $0x16a] sm:$0xff] }
 0x442   :  { %v5029_v41 = vpop.f32.mrf.mxu1  ;;  %v5381_v20 = vpop.f32.mrf.mxu0  ;;  %9483 = vmatmul.mubr.msk.bf16.gmra.mxu1 %vm2695_vm5, %v5530_v16  ;;  %9573 = vmatmul.mubr.msk.bf16.gmra.mxu0 %vm2695_vm5, %v5924_v60  ;;  %v5511_v16 = vld [vmem:[#allocation4 + $0x172] sm:$0xff] }
 0x443   :  { %v5030_v4 = vadd.f32 %v5029_v41, %v13208_v31  ;;  %9486 = vmatprep.mubr.msk.bf16.mxu1 %vm9987_vm4, %v13156_v3  ;;  %9576 = vmatprep.mubr.msk.bf16.mxu0 %vm9987_vm4, %v13156_v3  ;;  %v5904_v60 = vld [vmem:[#allocation4 + $0x178] sm:$0xff]  ;;  %v5905_v41 = vld [vmem:[#allocation4 + $0x180] sm:$0xff]  ;;  %v5532_v22 = vpack.c.bf16 %v5511_v16, %v5510_v9 }
 0x444   :  { %v9292_v7 = vpop.f32.mrf.mxu1  ;;  %v9382_v48 = vpop.f32.mrf.mxu0  ;;  %v5926_v26 = vpack.c.bf16 %v5905_v41, %v5904_v60  ;;  %v13214_v60 = vld [vmem:[#allocation26_spill] sm:$0xff] }
 0x445   :  { %v12693_v47 = vadd.f32 %v5381_v20, %v5030_v4  ;;  %v13211_v4 = vld [vmem:[#allocation23_spill] sm:$0xff] }
 0x446   :  { %v5032_v43 = vpop.f32.mrf.mxu1  ;;  %v5384_v55 = vpop.f32.mrf.mxu0 }
 0x447   :  { %v5033_v39 = vadd.f32 %v5032_v43, %v13209_v45  ;;  %v13212_v45 = vld [vmem:[#allocation24_spill] sm:$0xff] }
 0x448   :  { %v9293_v15 = vpop.f32.mrf.mxu1  ;;  %v9383_v2 = vpop.f32.mrf.mxu0 }
 0x449   :  { %v12696_v59 = vadd.f32 %v5384_v55, %v5033_v39 }
 0x44a   :  { %v5037_v21 = vpop.f32.mrf.mxu1  ;;  %v5389_v25 = vpop.f32.mrf.mxu0  ;;  %9487 = vmatmul.mubr.msk.bf16.gmra.mxu1 %vm2695_vm5, %v5531_v54  ;;  %9577 = vmatmul.mubr.msk.bf16.gmra.mxu0 %vm2695_vm5, %v5925_v61 }
 0x44b   :  { %v5038_v62 = vadd.f32 %v5037_v21, %v13210_v51  ;;  %9490 = vmatprep.mubr.msk.bf16.mxu1 %vm9987_vm4, %v13156_v3  ;;  %9580 = vmatprep.mubr.msk.bf16.mxu0 %vm9987_vm4, %v13156_v3 }
 0x44c   :  { %v9296_v14 = vpop.f32.mrf.mxu1  ;;  %v9386_v19 = vpop.f32.mrf.mxu0 }
 0x44d   :  { %v12705_v58 = vadd.f32 %v5389_v25, %v5038_v62  ;;  %v13213_v25 = vld [vmem:[#allocation25_spill] sm:$0xff] }
 0x44e   :  { %v5040_v20 = vpop.f32.mrf.mxu1  ;;  %v5392_v31 = vpop.f32.mrf.mxu0 }
 0x44f   :  { %v5041_v7 = vadd.f32 %v5040_v20, %v13211_v4 }
 0x450   :  { %v9297_v48 = vpop.f32.mrf.mxu1  ;;  %v9387_v17 = vpop.f32.mrf.mxu0 }
 0x451   :  { %v12708_v49 = vadd.f32 %v5392_v31, %v5041_v7 }
 0x452   :  { %v5045_v43 = vpop.f32.mrf.mxu1  ;;  %v5397_v55 = vpop.f32.mrf.mxu0  ;;  %9491 = vmatmul.mubr.msk.bf16.gmra.mxu1 %vm2695_vm5, %v5532_v22  ;;  %9581 = vmatmul.mubr.msk.bf16.gmra.mxu0 %vm2695_vm5, %v5926_v26 }
 0x453   :  { %v5046_v39 = vadd.f32 %v5045_v43, %v13212_v45  ;;  %9586 = vmatprep.mubr.msk.bf16.mxu1 %vm9987_vm4, %v13156_v3  ;;  %9712 = vmatprep.mubr.msk.bf16.mxu0 %vm9987_vm4, %v13156_v3 }
 0x454   :  { %v9300_v15 = vpop.f32.mrf.mxu1  ;;  %v9390_v2 = vpop.f32.mrf.mxu0 }
 0x455   :  { %v12717_v54 = vadd.f32 %v5397_v55, %v5046_v39 }
 0x456   :  { %v5048_v61 = vpop.f32.mrf.mxu1  ;;  %v5400_v21 = vpop.f32.mrf.mxu0 }
 0x457   :  { %v5049_v51 = vadd.f32 %v5048_v61, %v13213_v25 }
 0x458   :  { %v9301_v62 = vpop.f32.mrf.mxu1  ;;  %v9391_v14 = vpop.f32.mrf.mxu0 }
 0x459   :  { %v12720_v19 = vadd.f32 %v5400_v21, %v5049_v51 }
 0x45a   :  { %v5053_v9 = vpop.f32.mrf.mxu1  ;;  %v5405_v16 = vpop.f32.mrf.mxu0 }
 0x45b   :  { %v5054_v41 = vadd.f32 %v5053_v9, %v13214_v60  ;;  %v13215_v60 = vld [vmem:[#allocation27_spill] sm:$0xff] }
 0x45c   :  { %v9304_v20 = vpop.f32.mrf.mxu1  ;;  %v9394_v31 = vpop.f32.mrf.mxu0 }
 0x45d   :  { %v12723_v4 = vadd.f32 %v5405_v16, %v5054_v41 }
 0x45e   :  { %v5056_v7 = vpop.f32.mrf.mxu1  ;;  %v5408_v48 = vpop.f32.mrf.mxu0 }
 0x45f   :  { %v5057_v17 = vadd.f32 %v5056_v7, %v12414_v38 }
 0x460   :  { %v9305_v22 = vpop.f32.mrf.mxu1  ;;  %v9395_v26 = vpop.f32.mrf.mxu0 }
 0x461   :  { %v12726_v43 = vadd.f32 %v5408_v48, %v5057_v17  ;;  %v13216_v17 = vld [vmem:[#allocation28_spill] sm:$0xff] }
 0x462   :  { %v5061_v55 = vpop.f32.mrf.mxu1  ;;  %v5413_v45 = vpop.f32.mrf.mxu0 }
 0x463   :  { %v5062_v39 = vadd.f32 %v5061_v55, %v12424_v6 }
 0x464   :  { %v9308_v15 = vpop.f32.mrf.mxu1  ;;  %v9398_v2 = vpop.f32.mrf.mxu0 }
 0x465   :  { %v12729_v61 = vadd.f32 %v5413_v45, %v5062_v39  ;;  %v12744_v2 = vld [vmem:[%s13146_s4] ss:$0 sm:$0xff] }
 0x466   :  { %v5064_v21 = vpop.f32.mrf.mxu1  ;;  %v5416_v25 = vpop.f32.mrf.mxu0 }
 0x467   :  { %v5065_v51 = vadd.f32 %v5064_v21, %v12435_v18 }
 0x468   :  { %v9309_v62 = vpop.f32.mrf.mxu1  ;;  %v9399_v14 = vpop.f32.mrf.mxu0 }
 0x469   :  { %v12732_v9 = vadd.f32 %v5416_v25, %v5065_v51 }
 0x46a   :  { %v5069_v38 = vpop.f32.mrf.mxu1  ;;  %v5421_v16 = vpop.f32.mrf.mxu0 }
 0x46b   :  { %v5070_v41 = vadd.f32 %v5069_v38, %v13215_v60 }
 0x46c   :  { %v9312_v20 = vpop.f32.mrf.mxu1  ;;  %v9402_v31 = vpop.f32.mrf.mxu0 }
 0x46d   :  { %v12735_v7 = vadd.f32 %v5421_v16, %v5070_v41 }
 0x46e   :  { %v5072_v6 = vpop.f32.mrf.mxu1  ;;  %v5424_v48 = vpop.f32.mrf.mxu0 }
 0x46f   :  { %v5073_v22 = vadd.f32 %v5072_v6, %v13216_v17 }
 0x470   :  { %v9313_v26 = vpop.f32.mrf.mxu1  ;;  %v9403_v55 = vpop.f32.mrf.mxu0 }
 0x471   :  { %v12738_v45 = vadd.f32 %v5424_v48, %v5073_v22 }
 0x472   :  { %v5655_v18 = vpop.f32.mrf.mxu1  ;;  %v6049_v39 = vpop.f32.mrf.mxu0 }
 0x473   :  { %v5822_v15 = vadd.f32 %v5655_v18, %v12469_v11 }
 0x474   :  { %v9412_v21 = vpop.f32.mrf.mxu1  ;;  %v9502_v25 = vpop.f32.mrf.mxu0 }
 0x475   :  { %v6216_v51 = vadd.f32 %v6049_v39, %v5822_v15 }
 0x476   :  { %v5658_v62 = vpop.f32.mrf.mxu1  ;;  %v6052_v14 = vpop.f32.mrf.mxu0 }
 0x477   :  { %v6265_v38 = vadd.f32 %v12744_v2, %v6216_v51  ;;  %v5823_v16 = vadd.f32 %v5658_v62, %v12472_v56 }
 0x478   :  { %v9413_v60 = vpop.f32.mrf.mxu1  ;;  %v9503_v41 = vpop.f32.mrf.mxu0 }
 0x479   :  { %v6307_v20 = vmax.f32 %v6265_v38, 0.0  ;;  %v6217_v31 = vadd.f32 %v6052_v14, %v5823_v16 }
 0x47a   :  { %v5663_v6 = vpop.f32.mrf.mxu1  ;;  %v6057_v11 = vpop.f32.mrf.mxu0 }
 0x47b   :  { %6349 = vst [vmem:[#allocation5] sm:$0xff] %v6307_v20  ;;  %v6266_v48 = vadd.f32 %v12744_v2, %v6217_v31  ;;  %v5824_v17 = vadd.f32 %v5663_v6, %v12484_v63 }
 0x47c   :  { %v9416_v22 = vpop.f32.mrf.mxu1  ;;  %v9506_v26 = vpop.f32.mrf.mxu0 }
 0x47d   :  { %v6308_v55 = vmax.f32 %v6266_v48, 0.0  ;;  %v6218_v18 = vadd.f32 %v6057_v11, %v5824_v17 }
 0x47e   :  { %v5666_v39 = vpop.f32.mrf.mxu1  ;;  %v6060_v15 = vpop.f32.mrf.mxu0 }
 0x47f   :  { %6350 = vst [vmem:[#allocation5 + $0x8] sm:$0xff] %v6308_v55  ;;  %v6267_v56 = vadd.f32 %v12744_v2, %v6218_v18  ;;  %v5825_v21 = vadd.f32 %v5666_v39, %v12487_v13 }
 0x480   :  { %v9417_v25 = vpop.f32.mrf.mxu1  ;;  %v9507_v51 = vpop.f32.mrf.mxu0 }
 0x481   :  { %v6309_v62 = vmax.f32 %v6267_v56, 0.0  ;;  %v6219_v14 = vadd.f32 %v6060_v15, %v5825_v21 }
 0x482   :  { %v5671_v38 = vpop.f32.mrf.mxu1  ;;  %v6065_v16 = vpop.f32.mrf.mxu0 }
 0x483   :  { %6351 = vst [vmem:[#allocation5 + $0x10] sm:$0xff] %v6309_v62  ;;  %v6268_v63 = vadd.f32 %v12744_v2, %v6219_v14  ;;  %v5826_v60 = vadd.f32 %v5671_v38, %v12499_v53 }
 0x484   :  { %v9420_v41 = vpop.f32.mrf.mxu1  ;;  %v9510_v20 = vpop.f32.mrf.mxu0 }
 0x485   :  { %v6310_v31 = vmax.f32 %v6268_v63, 0.0  ;;  %v6220_v6 = vadd.f32 %v6065_v16, %v5826_v60 }
 0x486   :  { %v6391_v11 = vld [vmem:[#allocation5] ss:$2 sm:$0xff]  ;;  %v6433_v48 = vld [vmem:[#allocation5 + $0x1] ss:$2 sm:$0xff]  ;;  %v5674_v17 = vpop.f32.mrf.mxu1  ;;  %v6068_v22 = vpop.f32.mrf.mxu0 }
 0x487   :  { %v6474_v13 = vmax.f32 %v6391_v11, %v6433_v48  ;;  %6352 = vst [vmem:[#allocation5 + $0x18] sm:$0xff] %v6310_v31  ;;  %v6269_v26 = vadd.f32 %v12744_v2, %v6220_v6  ;;  %v5827_v55 = vadd.f32 %v5674_v17, %v12505_v24 }
 0x488   :  { %v9421_v18 = vpop.f32.mrf.mxu1  ;;  %v9511_v39 = vpop.f32.mrf.mxu0 }
 0x489   :  { %6495 = vst [vmem:[#allocation6] sm:$0xff] %v6474_v13  ;;  %v6311_v15 = vmax.f32 %v6269_v26, 0.0  ;;  %v6221_v56 = vadd.f32 %v6068_v22, %v5827_v55 }
 0x48a   :  { %v5679_v53 = vpop.f32.mrf.mxu1  ;;  %v6073_v21 = vpop.f32.mrf.mxu0 }
 0x48b   :  { %6353 = vst [vmem:[#allocation5 + $0x20] sm:$0xff] %v6311_v15  ;;  %v6270_v25 = vadd.f32 %v12744_v2, %v6221_v56  ;;  %v5828_v51 = vadd.f32 %v5679_v53, %v12518_v27  ;;  %v9912_v27 = vld [vmem:[%s13145_s5 + $0xa8] sm:$0xff]  }
 0x48c   :  { %v9424_v62 = vpop.f32.mrf.mxu1  ;;  %v9514_v14 = vpop.f32.mrf.mxu0  ;;  %9711 = vmatpush3.bf16.msra.mxu0 %v9912_v27 }
 0x48d   :  { %v6312_v38 = vmax.f32 %v6270_v25, 0.0  ;;  %v6222_v16 = vadd.f32 %v6073_v21, %v5828_v51  ;;  %9722 = vmatprep.subr.bf16.mxu0 %v13156_v3 }
 0x48e   :  { %v6393_v63 = vld [vmem:[#allocation5 + $0x10] ss:$2 sm:$0xff]  ;;  %v6435_v60 = vld [vmem:[#allocation5 + $0x11] ss:$2 sm:$0xff]  ;;  %v5682_v41 = vpop.f32.mrf.mxu1  ;;  %v6076_v24 = vpop.f32.mrf.mxu0 }
 0x48f   :  { %v6475_v20 = vmax.f32 %v6393_v63, %v6435_v60  ;;  %6354 = vst [vmem:[#allocation5 + $0x28] sm:$0xff] %v6312_v38  ;;  %v6271_v31 = vadd.f32 %v12744_v2, %v6222_v16  ;;  %v5829_v6 = vadd.f32 %v5682_v41, %v12521_v50 }
 0x490   :  { %v9425_v11 = vpop.f32.mrf.mxu1  ;;  %v9515_v48 = vpop.f32.mrf.mxu0 }
 0x491   :  { %6496 = vst [vmem:[#allocation6 + $0x8] sm:$0xff] %v6475_v20  ;;  %v6313_v17 = vmax.f32 %v6271_v31, 0.0  ;;  %v6223_v22 = vadd.f32 %v6076_v24, %v5829_v6 }
 0x492   :  { %v5687_v13 = vpop.f32.mrf.mxu1  ;;  %v6081_v26 = vpop.f32.mrf.mxu0 }
 0x493   :  { %6355 = vst [vmem:[#allocation5 + $0x30] sm:$0xff] %v6313_v17  ;;  %v6272_v50 = vadd.f32 %v12744_v2, %v6223_v22  ;;  %v5830_v55 = vadd.f32 %v5687_v13, %v12533_v5  ;;  %v6542_v5 = vld [vmem:[#allocation6] sm:$0x1f] }
 0x494   :  { %v9428_v18 = vpop.f32.mrf.mxu1  ;;  %v9518_v39 = vpop.f32.mrf.mxu0 }
 0x495   :  { %v6314_v15 = vmax.f32 %v6272_v50, 0.0  ;;  %v6224_v56 = vadd.f32 %v6081_v26, %v5830_v55 }
 0x496   :  { %v6395_v53 = vld [vmem:[#allocation5 + $0x20] ss:$2 sm:$0xff]  ;;  %v6437_v21 = vld [vmem:[#allocation5 + $0x21] ss:$2 sm:$0xff]  ;;  %v5690_v25 = vpop.f32.mrf.mxu1  ;;  %v6084_v51 = vpop.f32.mrf.mxu0 }
 0x497   :  { %v6476_v62 = vmax.f32 %v6395_v53, %v6437_v21  ;;  %6356 = vst [vmem:[#allocation5 + $0x38] sm:$0xff] %v6314_v15  ;;  %v6273_v14 = vadd.f32 %v12744_v2, %v6224_v56  ;;  %v5831_v38 = vadd.f32 %v5690_v25, %v12536_v1 }
 0x498   :  { %v9429_v16 = vpop.f32.mrf.mxu1  ;;  %v9519_v63 = vpop.f32.mrf.mxu0  ;;  %v6543_v60 = vld [vmem:[#allocation6 + $0x7] sm:$0x1f] }
 0x499   :  { %6497 = vst [vmem:[#allocation6 + $0x10] sm:$0xff] %v6476_v62  ;;  %v6315_v41 = vmax.f32 %v6273_v14, 0.0  ;;  %v6225_v24 = vadd.f32 %v6084_v51, %v5831_v38  ;;  %v6544_v20 = vmax.f32 %v6542_v5, %v6543_v60 }
 0x49a   :  { %v5695_v31 = vpop.f32.mrf.mxu1  ;;  %v6089_v6 = vpop.f32.mrf.mxu0 }
 0x49b   :  { %6357 = vst [vmem:[#allocation5 + $0x40] sm:$0xff] %v6315_v41  ;;  %v6274_v11 = vadd.f32 %v12744_v2, %v6225_v24  ;;  %v5832_v48 = vadd.f32 %v5695_v31, %v12548_v42  ;;  %6546 = vst.msk [vmem:[#allocation7] sm:$0x1f] %vm6545_vm8, %v6544_v20 }
 0x49c   :  { %v9432_v17 = vpop.f32.mrf.mxu1  ;;  %v9522_v1 = vpop.f32.mrf.mxu0 }
 0x49d   :  { %v6316_v22 = vmax.f32 %v6274_v11, 0.0  ;;  %v6226_v27 = vadd.f32 %v6089_v6, %v5832_v48 }
 0x49e   :  { %v6397_v13 = vld [vmem:[#allocation5 + $0x30] ss:$2 sm:$0xff]  ;;  %v6439_v26 = vld [vmem:[#allocation5 + $0x31] ss:$2 sm:$0xff]  ;;  %v5698_v50 = vpop.f32.mrf.mxu1  ;;  %v6092_v55 = vpop.f32.mrf.mxu0 }
 0x49f   :  { %v6477_v18 = vmax.f32 %v6397_v13, %v6439_v26  ;;  %6358 = vst [vmem:[#allocation5 + $0x48] sm:$0xff] %v6316_v22  ;;  %v6275_v39 = vadd.f32 %v12744_v2, %v6226_v27  ;;  %v5833_v15 = vadd.f32 %v5698_v50, %v12551_v52 }
 0x4a0   :  { %v9433_v56 = vpop.f32.mrf.mxu1  ;;  %v9523_v53 = vpop.f32.mrf.mxu0  ;;  %v6547_v27 = vld [vmem:[#allocation6 + $0xe] sm:$0x1f] }
 0x4a1   :  { %6498 = vst [vmem:[#allocation6 + $0x18] sm:$0xff] %v6477_v18  ;;  %v6317_v42 = vmax.f32 %v6275_v39, 0.0  ;;  %v6227_v21 = vadd.f32 %v6092_v55, %v5833_v15 }
 0x4a2   :  { %v5703_v25 = vpop.f32.mrf.mxu1  ;;  %v6097_v51 = vpop.f32.mrf.mxu0 }
 0x4a3   :  { %6359 = vst [vmem:[#allocation5 + $0x50] sm:$0xff] %v6317_v42  ;;  %v6276_v62 = vadd.f32 %v12744_v2, %v6227_v21  ;;  %v5834_v14 = vadd.f32 %v5703_v25, %v12563_v12 }
 0x4a4   :  { %v9436_v38 = vpop.f32.mrf.mxu1  ;;  %v9526_v16 = vpop.f32.mrf.mxu0 }
 0x4a5   :  { %v6318_v63 = vmax.f32 %v6276_v62, 0.0  ;;  %v6228_v5 = vadd.f32 %v6097_v51, %v5834_v14 }
 0x4a6   :  { %v6399_v60 = vld [vmem:[#allocation5 + $0x40] ss:$2 sm:$0xff]  ;;  %v6441_v41 = vld [vmem:[#allocation5 + $0x41] ss:$2 sm:$0xff]  ;;  %v5706_v24 = vpop.f32.mrf.mxu1  ;;  %v6100_v52 = vpop.f32.mrf.mxu0 }
 0x4a7   :  { %v6478_v20 = vmax.f32 %v6399_v60, %v6441_v41  ;;  %6360 = vst [vmem:[#allocation5 + $0x58] sm:$0xff] %v6318_v63  ;;  %v6277_v31 = vadd.f32 %v12744_v2, %v6228_v5  ;;  %v5835_v6 = vadd.f32 %v5706_v24, %v12566_v23 }
 0x4a8   :  { %v9437_v11 = vpop.f32.mrf.mxu1  ;;  %v9527_v48 = vpop.f32.mrf.mxu0  ;;  %v6548_v13 = vld [vmem:[#allocation6 + $0x15] sm:$0x1f] }
 0x4a9   :  { %6499 = vst [vmem:[#allocation6 + $0x20] sm:$0xff] %v6478_v20  ;;  %v6319_v17 = vmax.f32 %v6277_v31, 0.0  ;;  %v6229_v1 = vadd.f32 %v6100_v52, %v5835_v6  ;;  %v6549_v55 = vmax.f32 %v6547_v27, %v6548_v13 }
 0x4aa   :  { %v5711_v12 = vpop.f32.mrf.mxu1  ;;  %v6105_v22 = vpop.f32.mrf.mxu0 }
 0x4ab   :  { %6361 = vst [vmem:[#allocation5 + $0x60] sm:$0xff] %v6319_v17  ;;  %v6278_v26 = vadd.f32 %v12744_v2, %v6229_v1  ;;  %v5836_v50 = vadd.f32 %v5711_v12, %v12578_v40  ;;  %6550 = vst.msk [vmem:[#allocation7 + $0x5] sm:$0x1f] %vm6545_vm8, %v6549_v55 }
 0x4ac   :  { %v9440_v18 = vpop.f32.mrf.mxu1  ;;  %v9530_v39 = vpop.f32.mrf.mxu0 }
 0x4ad   :  { %v6320_v15 = vmax.f32 %v6278_v26, 0.0  ;;  %v6230_v56 = vadd.f32 %v6105_v22, %v5836_v50 }
 0x4ae   :  { %v6401_v23 = vld [vmem:[#allocation5 + $0x50] ss:$2 sm:$0xff]  ;;  %v6443_v53 = vld [vmem:[#allocation5 + $0x51] ss:$2 sm:$0xff]  ;;  %v5714_v42 = vpop.f32.mrf.mxu1  ;;  %v6108_v21 = vpop.f32.mrf.mxu0 }
 0x4af   :  { %v6479_v25 = vmax.f32 %v6401_v23, %v6443_v53  ;;  %6362 = vst [vmem:[#allocation5 + $0x68] sm:$0xff] %v6320_v15  ;;  %v6279_v51 = vadd.f32 %v12744_v2, %v6230_v56  ;;  %v5837_v62 = vadd.f32 %v5714_v42, %v12581_v32 }
 0x4b0   :  { %v9441_v14 = vpop.f32.mrf.mxu1  ;;  %v9531_v38 = vpop.f32.mrf.mxu0 }
 0x4b1   :  { %6500 = vst [vmem:[#allocation6 + $0x28] sm:$0xff] %v6479_v25  ;;  %v6321_v40 = vmax.f32 %v6279_v51, 0.0  ;;  %v6231_v16 = vadd.f32 %v6108_v21, %v5837_v62 }
 0x4b2   :  { %v5719_v63 = vpop.f32.mrf.mxu1  ;;  %v6113_v5 = vpop.f32.mrf.mxu0 }
 0x4b3   :  { %6363 = vst [vmem:[#allocation5 + $0x70] sm:$0xff] %v6321_v40  ;;  %v6280_v60 = vadd.f32 %v12744_v2, %v6231_v16  ;;  %v5838_v41 = vadd.f32 %v5719_v63, %v12593_v8 }
 0x4b4   :  { %v9444_v24 = vpop.f32.mrf.mxu1  ;;  %v9534_v52 = vpop.f32.mrf.mxu0 }
 0x4b5   :  { %v6322_v20 = vmax.f32 %v6280_v60, 0.0  ;;  %v6232_v31 = vadd.f32 %v6113_v5, %v5838_v41 }
 0x4b6   :  { %v6403_v6 = vld [vmem:[#allocation5 + $0x60] ss:$2 sm:$0xff]  ;;  %v6445_v11 = vld [vmem:[#allocation5 + $0x61] ss:$2 sm:$0xff]  ;;  %v5722_v48 = vpop.f32.mrf.mxu1  ;;  %v6116_v32 = vpop.f32.mrf.mxu0 }
 0x4b7   :  { %v6480_v17 = vmax.f32 %v6403_v6, %v6445_v11  ;;  %6364 = vst [vmem:[#allocation5 + $0x78] sm:$0xff] %v6322_v20  ;;  %v6281_v1 = vadd.f32 %v12744_v2, %v6232_v31  ;;  %v5839_v12 = vadd.f32 %v5722_v48, %v12596_v36 }
 0x4b8   :  { %v9445_v22 = vpop.f32.mrf.mxu1  ;;  %v9535_v27 = vpop.f32.mrf.mxu0 }
 0x4b9   :  { %6501 = vst [vmem:[#allocation6 + $0x30] sm:$0xff] %v6480_v17  ;;  %v6323_v13 = vmax.f32 %v6281_v1, 0.0  ;;  %v6233_v26 = vadd.f32 %v6116_v32, %v5839_v12 }
 0x4ba   :  { %v5727_v8 = vpop.f32.mrf.mxu1  ;;  %v6121_v50 = vpop.f32.mrf.mxu0 }
 0x4bb   :  { %6365 = vst [vmem:[#allocation5 + $0x80] sm:$0xff] %v6323_v13  ;;  %v6282_v55 = vadd.f32 %v12744_v2, %v6233_v26  ;;  %v5840_v18 = vadd.f32 %v5727_v8, %v12608_v28 }
 0x4bc   :  { %v9448_v39 = vpop.f32.mrf.mxu1  ;;  %v9538_v15 = vpop.f32.mrf.mxu0 }
 0x4bd   :  { %v6324_v56 = vmax.f32 %v6282_v55, 0.0  ;;  %v6234_v23 = vadd.f32 %v6121_v50, %v5840_v18 }
 0x4be   :  { %v6405_v53 = vld [vmem:[#allocation5 + $0x70] ss:$2 sm:$0xff]  ;;  %v6447_v42 = vld [vmem:[#allocation5 + $0x71] ss:$2 sm:$0xff]  ;;  %v5730_v21 = vpop.f32.mrf.mxu1  ;;  %v6124_v36 = vpop.f32.mrf.mxu0 }
 0x4bf   :  { %v6481_v25 = vmax.f32 %v6405_v53, %v6447_v42  ;;  %6366 = vst [vmem:[#allocation5 + $0x88] sm:$0xff] %v6324_v56  ;;  %v6283_v51 = vadd.f32 %v12744_v2, %v6234_v23  ;;  %v5841_v62 = vadd.f32 %v5730_v21, %v12611_v33  ;;  %v6551_v53 = vld [vmem:[#allocation6 + $0x1c] sm:$0x1f]  ;;  %v6552_v42 = vld [vmem:[#allocation6 + $0x23] sm:$0x1f] }
 0x4c0   :  { %v9449_v14 = vpop.f32.mrf.mxu1  ;;  %v9539_v38 = vpop.f32.mrf.mxu0 }
 0x4c1   :  { %6502 = vst [vmem:[#allocation6 + $0x38] sm:$0xff] %v6481_v25  ;;  %v6325_v40 = vmax.f32 %v6283_v51, 0.0  ;;  %v6235_v16 = vadd.f32 %v6124_v36, %v5841_v62  ;;  %v6553_v62 = vmax.f32 %v6551_v53, %v6552_v42 }
 0x4c2   :  { %v5735_v28 = vpop.f32.mrf.mxu1  ;;  %v6129_v63 = vpop.f32.mrf.mxu0 }
 0x4c3   :  { %6367 = vst [vmem:[#allocation5 + $0x90] sm:$0xff] %v6325_v40  ;;  %v6284_v5 = vadd.f32 %v12744_v2, %v6235_v16  ;;  %v5842_v60 = vadd.f32 %v5735_v28, %v12623_v35  ;;  %6554 = vst.msk [vmem:[#allocation7 + $0xa] sm:$0x1f] %vm6545_vm8, %v6553_v62 }
 0x4c4   :  { %v9452_v41 = vpop.f32.mrf.mxu1  ;;  %v9542_v24 = vpop.f32.mrf.mxu0 }
 0x4c5   :  { %v6326_v52 = vmax.f32 %v6284_v5, 0.0  ;;  %v6236_v20 = vadd.f32 %v6129_v63, %v5842_v60 }
 0x4c6   :  { %v6407_v31 = vld [vmem:[#allocation5 + $0x80] ss:$2 sm:$0xff]  ;;  %v6449_v6 = vld [vmem:[#allocation5 + $0x81] ss:$2 sm:$0xff]  ;;  %v5738_v11 = vpop.f32.mrf.mxu1  ;;  %v6132_v33 = vpop.f32.mrf.mxu0 }
 0x4c7   :  { %v6482_v48 = vmax.f32 %v6407_v31, %v6449_v6  ;;  %6368 = vst [vmem:[#allocation5 + $0x98] sm:$0xff] %v6326_v52  ;;  %v6285_v32 = vadd.f32 %v12744_v2, %v6236_v20  ;;  %v5843_v17 = vadd.f32 %v5738_v11, %v12626_v34 }
 0x4c8   :  { %v9453_v1 = vpop.f32.mrf.mxu1  ;;  %v9543_v12 = vpop.f32.mrf.mxu0  ;;  %v6559_v25 = vld [vmem:[#allocation6 + $0x38] sm:$0x1f] }
 0x4c9   :  { %6503 = vst [vmem:[#allocation6 + $0x40] sm:$0xff] %v6482_v48  ;;  %v6327_v22 = vmax.f32 %v6285_v32, 0.0  ;;  %v6237_v27 = vadd.f32 %v6132_v33, %v5843_v17 }
 0x4ca   :  { %v5743_v35 = vpop.f32.mrf.mxu1  ;;  %v6137_v13 = vpop.f32.mrf.mxu0 }
 0x4cb   :  { %6369 = vst [vmem:[#allocation5 + $0xa0] sm:$0xff] %v6327_v22  ;;  %v6286_v26 = vadd.f32 %v12744_v2, %v6237_v27  ;;  %v5844_v8 = vadd.f32 %v5743_v35, %v12638_v30 }
 0x4cc   :  { %v9456_v50 = vpop.f32.mrf.mxu1  ;;  %v9546_v55 = vpop.f32.mrf.mxu0 }
 0x4cd   :  { %v6328_v18 = vmax.f32 %v6286_v26, 0.0  ;;  %v6238_v39 = vadd.f32 %v6137_v13, %v5844_v8 }
 0x4ce   :  { %v5746_v15 = vpop.f32.mrf.mxu1  ;;  %v6140_v56 = vpop.f32.mrf.mxu0 }
 0x4cf   :  { %6370 = vst [vmem:[#allocation5 + $0xa8] sm:$0xff] %v6328_v18  ;;  %v6287_v34 = vadd.f32 %v12744_v2, %v6238_v39  ;;  %v5845_v23 = vadd.f32 %v5746_v15, %v12641_v57 }
 0x4d0   :  { %v9457_v21 = vpop.f32.mrf.mxu1  ;;  %v9547_v36 = vpop.f32.mrf.mxu0  ;;  %v6560_v51 = vld [vmem:[#allocation6 + $0x3f] sm:$0x1f] }
 0x4d1   :  { %v6329_v14 = vmax.f32 %v6287_v34, 0.0  ;;  %v6239_v30 = vadd.f32 %v6140_v56, %v5845_v23  ;;  %v6561_v38 = vmax.f32 %v6559_v25, %v6560_v51 }
 0x4d2   :  { %v5751_v40 = vpop.f32.mrf.mxu1  ;;  %v6145_v16 = vpop.f32.mrf.mxu0 }
 0x4d3   :  { %6371 = vst [vmem:[#allocation5 + $0xb0] sm:$0xff] %v6329_v14  ;;  %v6288_v28 = vadd.f32 %v12744_v2, %v6239_v30  ;;  %v5846_v63 = vadd.f32 %v5751_v40, %v12653_v37  ;;  %6562 = vst.msk [vmem:[#allocation7 + $0x14] sm:$0x1f] %vm6545_vm8, %v6561_v38 }
 0x4d4   :  { %v9460_v57 = vpop.f32.mrf.mxu1  ;;  %v9550_v5 = vpop.f32.mrf.mxu0 }
 0x4d5   :  { %v6330_v60 = vmax.f32 %v6288_v28, 0.0  ;;  %v6240_v41 = vadd.f32 %v6145_v16, %v5846_v63 }
 0x4d6   :  { %v5754_v24 = vpop.f32.mrf.mxu1  ;;  %v6148_v52 = vpop.f32.mrf.mxu0 }
 0x4d7   :  { %6372 = vst [vmem:[#allocation5 + $0xb8] sm:$0xff] %v6330_v60  ;;  %v6289_v20 = vadd.f32 %v12744_v2, %v6240_v41  ;;  %v5847_v31 = vadd.f32 %v5754_v24, %v12656_v44 }
 0x4d8   :  { %v9461_v6 = vpop.f32.mrf.mxu1  ;;  %v9551_v11 = vpop.f32.mrf.mxu0 }
 0x4d9   :  { %v6331_v33 = vmax.f32 %v6289_v20, 0.0  ;;  %v6241_v48 = vadd.f32 %v6148_v52, %v5847_v31 }
 0x4da   :  { %v5759_v32 = vpop.f32.mrf.mxu1  ;;  %v6153_v17 = vpop.f32.mrf.mxu0 }
 0x4db   :  { %6373 = vst [vmem:[#allocation5 + $0xc0] sm:$0xff] %v6331_v33  ;;  %v6290_v37 = vadd.f32 %v12744_v2, %v6241_v48  ;;  %v5848_v1 = vadd.f32 %v5759_v32, %v12668_v10 }
 0x4dc   :  { %v9464_v12 = vpop.f32.mrf.mxu1  ;;  %v9554_v22 = vpop.f32.mrf.mxu0 }
 0x4dd   :  { %v6332_v27 = vmax.f32 %v6290_v37, 0.0  ;;  %v6242_v35 = vadd.f32 %v6153_v17, %v5848_v1 }
 0x4de   :  { %v5762_v13 = vpop.f32.mrf.mxu1  ;;  %v6156_v26 = vpop.f32.mrf.mxu0 }
 0x4df   :  { %6374 = vst [vmem:[#allocation5 + $0xc8] sm:$0xff] %v6332_v27  ;;  %v6291_v44 = vadd.f32 %v12744_v2, %v6242_v35  ;;  %v5849_v8 = vadd.f32 %v5762_v13, %v12672_v0 }
 0x4e0   :  { %v9465_v50 = vpop.f32.mrf.mxu1  ;;  %v9555_v55 = vpop.f32.mrf.mxu0 }
 0x4e1   :  { %v6333_v18 = vmax.f32 %v6291_v44, 0.0  ;;  %v6243_v39 = vadd.f32 %v6156_v26, %v5849_v8 }
 0x4e2   :  { %v5767_v15 = vpop.f32.mrf.mxu1  ;;  %v6161_v56 = vpop.f32.mrf.mxu0 }
 0x4e3   :  { %6375 = vst [vmem:[#allocation5 + $0xd0] sm:$0xff] %v6333_v18  ;;  %v6292_v10 = vadd.f32 %v12744_v2, %v6243_v39  ;;  %v5850_v34 = vadd.f32 %v5767_v15, %v12681_v29 }
 0x4e4   :  { %v9468_v23 = vpop.f32.mrf.mxu1  ;;  %v9558_v53 = vpop.f32.mrf.mxu0 }
 0x4e5   :  { %v6334_v42 = vmax.f32 %v6292_v10, 0.0  ;;  %v6244_v21 = vadd.f32 %v6161_v56, %v5850_v34  ;;  %v6555_v56 = vld [vmem:[#allocation6 + $0x2a] sm:$0x1f]  ;;  %v6556_v10 = vld [vmem:[#allocation6 + $0x31] sm:$0x1f] }
 0x4e6   :  { %v6415_v36 = vld [vmem:[#allocation5 + $0xc0] ss:$2 sm:$0xff]  ;;  %v6457_v25 = vld [vmem:[#allocation5 + $0xc1] ss:$2 sm:$0xff]  ;;  %v5770_v51 = vpop.f32.mrf.mxu1  ;;  %v6164_v62 = vpop.f32.mrf.mxu0 }
 0x4e7   :  { %v6486_v0 = vmax.f32 %v6415_v36, %v6457_v25  ;;  %6376 = vst [vmem:[#allocation5 + $0xd8] sm:$0xff] %v6334_v42  ;;  %v6293_v14 = vadd.f32 %v12744_v2, %v6244_v21  ;;  %v5851_v30 = vadd.f32 %v5770_v51, %v12684_v46  ;;  %v6557_v42 = vmax.f32 %v6555_v56, %v6556_v10  ;;  %v9914_v56 = vld [vmem:[%s13145_s5 + $0x10] sm:$0xff]  }
 0x4e8   :  { %v9469_v38 = vpop.f32.mrf.mxu1  ;;  %v9559_v40 = vpop.f32.mrf.mxu0 }
 0x4e9   :  { %6507 = vst [vmem:[#allocation6 + $0x60] sm:$0xff] %v6486_v0  ;;  %v6335_v16 = vmax.f32 %v6293_v14, 0.0  ;;  %v6245_v28 = vadd.f32 %v6164_v62, %v5851_v30  ;;  %6558 = vst.msk [vmem:[#allocation7 + $0xf] sm:$0x1f] %vm6545_vm8, %v6557_v42 }
 0x4ea   :  { %v5775_v29 = vpop.f32.mrf.mxu1  ;;  %v6169_v63 = vpop.f32.mrf.mxu0 }
 0x4eb   :  { %6377 = vst [vmem:[#allocation5 + $0xe0] sm:$0xff] %v6335_v16  ;;  %v6294_v57 = vadd.f32 %v12744_v2, %v6245_v28  ;;  %v5852_v5 = vadd.f32 %v5775_v29, %v12693_v47 }
 0x4ec   :  { %v9472_v60 = vpop.f32.mrf.mxu1  ;;  %v9562_v41 = vpop.f32.mrf.mxu0 }
 0x4ed   :  { %v6336_v24 = vmax.f32 %v6294_v57, 0.0  ;;  %v6246_v52 = vadd.f32 %v6169_v63, %v5852_v5 }
 0x4ee   :  { %v6417_v20 = vld [vmem:[#allocation5 + $0xd0] ss:$2 sm:$0xff]  ;;  %v6459_v31 = vld [vmem:[#allocation5 + $0xd1] ss:$2 sm:$0xff]  ;;  %v5778_v6 = vpop.f32.mrf.mxu1  ;;  %v6172_v46 = vpop.f32.mrf.mxu0 }
 0x4ef   :  { %v6487_v11 = vmax.f32 %v6417_v20, %v6459_v31  ;;  %6378 = vst [vmem:[#allocation5 + $0xe8] sm:$0xff] %v6336_v24  ;;  %v6295_v33 = vadd.f32 %v12744_v2, %v6246_v52  ;;  %v5853_v48 = vadd.f32 %v5778_v6, %v12696_v59 }
 0x4f0   :  { %v9473_v32 = vpop.f32.mrf.mxu1  ;;  %v9563_v17 = vpop.f32.mrf.mxu0  ;;  %v6563_v53 = vld [vmem:[#allocation6 + $0x62] sm:$0x1f] }
 0x4f1   :  { %6508 = vst [vmem:[#allocation6 + $0x68] sm:$0xff] %v6487_v11  ;;  %v6337_v37 = vmax.f32 %v6295_v33, 0.0  ;;  %v6247_v1 = vadd.f32 %v6172_v46, %v5853_v48  ;;  %v9913_v46 = vld [vmem:[%s13145_s5] sm:$0xff]  }
 0x4f2   :  { %v5783_v47 = vpop.f32.mrf.mxu1  ;;  %v6177_v12 = vpop.f32.mrf.mxu0 }
 0x4f3   :  { %6379 = vst [vmem:[#allocation5 + $0xf0] sm:$0xff] %v6337_v37  ;;  %v6296_v22 = vadd.f32 %v12744_v2, %v6247_v1  ;;  %v5854_v27 = vadd.f32 %v5783_v47, %v12705_v58 }
 0x4f4   :  { %v9476_v35 = vpop.f32.mrf.mxu1  ;;  %v9566_v13 = vpop.f32.mrf.mxu0 }
 0x4f5   :  { %v6338_v26 = vmax.f32 %v6296_v22, 0.0  ;;  %v6248_v44 = vadd.f32 %v6177_v12, %v5854_v27 }
 0x4f6   :  { %v6419_v8 = vld [vmem:[#allocation5 + $0xe0] ss:$2 sm:$0xff]  ;;  %v6461_v50 = vld [vmem:[#allocation5 + $0xe1] ss:$2 sm:$0xff]  ;;  %v5786_v55 = vpop.f32.mrf.mxu1  ;;  %v6180_v59 = vpop.f32.mrf.mxu0 }
 0x4f7   :  { %v6488_v18 = vmax.f32 %v6419_v8, %v6461_v50  ;;  %6380 = vst [vmem:[#allocation5 + $0xf8] sm:$0xff] %v6338_v26  ;;  %v6297_v39 = vadd.f32 %v12744_v2, %v6248_v44  ;;  %v5855_v15 = vadd.f32 %v5786_v55, %v12708_v49 }
 0x4f8   :  { %v9477_v34 = vpop.f32.mrf.mxu1  ;;  %v9567_v23 = vpop.f32.mrf.mxu0  ;;  %v6564_v58 = vld [vmem:[#allocation6 + $0x69] sm:$0x1f] }
 0x4f9   :  { %6509 = vst [vmem:[#allocation6 + $0x70] sm:$0xff] %v6488_v18  ;;  %v6339_v21 = vmax.f32 %v6297_v39, 0.0  ;;  %v6249_v36 = vadd.f32 %v6180_v59, %v5855_v15  ;;  %v6565_v25 = vmax.f32 %v6563_v53, %v6564_v58 }
 0x4fa   :  { %v5791_v51 = vpop.f32.mrf.mxu1  ;;  %v6185_v62 = vpop.f32.mrf.mxu0 }
 0x4fb   :  { %6381 = vst [vmem:[#allocation5 + $0x100] sm:$0xff] %v6339_v21  ;;  %v6298_v0 = vadd.f32 %v12744_v2, %v6249_v36  ;;  %v5856_v49 = vadd.f32 %v5791_v51, %v12717_v54  ;;  %6566 = vst.msk [vmem:[#allocation7 + $0x19] sm:$0x1f] %vm6545_vm8, %v6565_v25 }
 0x4fc   :  { %v9480_v14 = vpop.f32.mrf.mxu1  ;;  %v9570_v30 = vpop.f32.mrf.mxu0 }
 0x4fd   :  { %v6340_v38 = vmax.f32 %v6298_v0, 0.0  ;;  %v6250_v40 = vadd.f32 %v6185_v62, %v5856_v49 }
 0x4fe   :  { %v6421_v16 = vld [vmem:[#allocation5 + $0xf0] ss:$2 sm:$0xff]  ;;  %v6463_v28 = vld [vmem:[#allocation5 + $0xf1] ss:$2 sm:$0xff]  ;;  %v5794_v29 = vpop.f32.mrf.mxu1  ;;  %v6188_v63 = vpop.f32.mrf.mxu0 }
 0x4ff   :  { %v6489_v57 = vmax.f32 %v6421_v16, %v6463_v28  ;;  %6382 = vst [vmem:[#allocation5 + $0x108] sm:$0xff] %v6340_v38  ;;  %v6299_v5 = vadd.f32 %v12744_v2, %v6250_v40  ;;  %v5857_v60 = vadd.f32 %v5794_v29, %v12720_v19  ;;  %v9915_v29 = vld [vmem:[%s13145_s5 + $0x18] sm:$0xff]  }
 0x500   :  { %v9481_v41 = vpop.f32.mrf.mxu1  ;;  %v9571_v24 = vpop.f32.mrf.mxu0  ;;  %v6567_v8 = vld [vmem:[#allocation6 + $0x70] sm:$0x1f] }
 0x501   :  { %6510 = vst [vmem:[#allocation6 + $0x78] sm:$0xff] %v6489_v57  ;;  %v6341_v54 = vmax.f32 %v6299_v5, 0.0  ;;  %v6251_v52 = vadd.f32 %v6188_v63, %v5857_v60 }
 0x502   :  { %v5799_v20 = vpop.f32.mrf.mxu1  ;;  %v6193_v31 = vpop.f32.mrf.mxu0  ;;  %v6588_v6 = vld [vmem:[#allocation7 + $0x1] ss:$25 sm:$0xff]  ;;  %v6583_v44 = vld [vmem:[#allocation7] ss:$25 sm:$0xff]  ;;  %v6692_v30 = vld [vmem:[#allocation7 + $0x2] ss:$25 sm:$0xff] }
 0x503   :  { %6383 = vst [vmem:[#allocation5 + $0x110] sm:$0xff] %v6341_v54  ;;  %v6300_v11 = vadd.f32 %v12744_v2, %v6251_v52  ;;  %v5858_v33 = vadd.f32 %v5799_v20, %v12723_v4  ;;  %v6589_v48 = vpack.c.bf16 %v6588_v6, %v6588_v6  ;;  %v6584_v34 = vpack.c.bf16 %v6583_v44, %v6583_v44 }
 0x504   :  { %v9484_v32 = vpop.f32.mrf.mxu1  ;;  %v9574_v19 = vpop.f32.mrf.mxu0 }
 0x505   :  { %v6342_v17 = vmax.f32 %v6300_v11, 0.0  ;;  %v6252_v37 = vadd.f32 %v6193_v31, %v5858_v33  ;;  %9587 = vmatmul.mubr.msk.bf16.vlgmr.msra.gmra.mxu1 %vm6516_vm7, %v6589_v48  ;;  %v6748_v48 = vld [vmem:[#allocation7 + $0x3] ss:$25 sm:$0xff] }
 0x506   :  { %v6423_v1 = vld [vmem:[#allocation5 + $0x100] ss:$2 sm:$0xff]  ;;  %v6465_v47 = vld [vmem:[#allocation5 + $0x101] ss:$2 sm:$0xff]  ;;  %9591 = vmatpush3.bf16.msra.mxu1 %v9913_v46  ;;  %v5802_v12 = vpop.f32.mrf.mxu1  ;;  %v6196_v22 = vpop.f32.mrf.mxu0  ;;  %9592 = vmatprep.mubr.msk.bf16.mxu1 %vm9987_vm4, %v13156_v3 }
 0x507   :  { %v6490_v27 = vmax.f32 %v6423_v1, %v6465_v47  ;;  %6384 = vst [vmem:[#allocation5 + $0x118] sm:$0xff] %v6342_v17  ;;  %v6301_v35 = vadd.f32 %v12744_v2, %v6252_v37  ;;  %v5859_v4 = vadd.f32 %v5802_v12, %v12726_v43  ;;  %9596 = vmatprep.subr.bf16.mxu1 %v13156_v3  ;;  %v9916_v47 = vld [vmem:[%s13145_s5 + $0x20] sm:$0xff]  }
 0x508   :  { %v9485_v13 = vpop.f32.mrf.mxu1  ;;  %v9575_v26 = vpop.f32.mrf.mxu0  ;;  %v6568_v50 = vld [vmem:[#allocation6 + $0x77] sm:$0x1f] }
 0x509   :  { %6511 = vst [vmem:[#allocation6 + $0x80] sm:$0xff] %v6490_v27  ;;  %v6343_v55 = vmax.f32 %v6301_v35, 0.0  ;;  %v6253_v59 = vadd.f32 %v6196_v22, %v5859_v4  ;;  %v6569_v18 = vmax.f32 %v6567_v8, %v6568_v50  ;;  %v6749_v22 = vpack.c.bf16 %v6748_v48, %v6748_v48  ;;  %v6804_v13 = vld [vmem:[#allocation7 + $0x4] ss:$25 sm:$0xff] }
 0x50a   :  { %v5807_v39 = vpop.f32.mrf.mxu1  ;;  %v6201_v15 = vpop.f32.mrf.mxu0  ;;  %v9917_v50 = vld [vmem:[%s13145_s5 + $0x28] sm:$0xff]  }
 0x50b   :  { %6385 = vst [vmem:[#allocation5 + $0x120] sm:$0xff] %v6343_v55  ;;  %v6302_v43 = vadd.f32 %v12744_v2, %v6253_v59  ;;  %v5860_v10 = vadd.f32 %v5807_v39, %v12729_v61  ;;  %6570 = vst.msk [vmem:[#allocation7 + $0x1e] sm:$0x1f] %vm6545_vm8, %v6569_v18  ;;  %v6805_v55 = vpack.c.bf16 %v6804_v13, %v6804_v13  ;;  %v9934_v13 = vld [vmem:[%s13145_s5 + $0xb0] sm:$0xff]  }
 0x50c   :  { %v9488_v23 = vpop.f32.mrf.mxu1  ;;  %v9578_v53 = vpop.f32.mrf.mxu0 }
 0x50d   :  { %v6344_v58 = vmax.f32 %v6302_v43, 0.0  ;;  %v6254_v42 = vadd.f32 %v6201_v15, %v5860_v10  ;;  %9593 = vmatmul.mubr.msk.bf16.vlgmr.msra.gmra.mxu1 %vm6516_vm7, %v6584_v34 }
 0x50e   :  { %v6425_v21 = vld [vmem:[#allocation5 + $0x110] ss:$2 sm:$0xff]  ;;  %v6467_v36 = vld [vmem:[#allocation5 + $0x111] ss:$2 sm:$0xff]  ;;  %9597 = vmatpush3.bf16.msra.mxu1 %v9914_v56  ;;  %v5810_v25 = vpop.f32.mrf.mxu1  ;;  %v6204_v51 = vpop.f32.mrf.mxu0  ;;  %9598 = vmatprep.mubr.msk.bf16.mxu1 %vm9987_vm4, %v13156_v3 }
 0x50f   :  { %v6491_v62 = vmax.f32 %v6425_v21, %v6467_v36  ;;  %6386 = vst [vmem:[#allocation5 + $0x128] sm:$0xff] %v6344_v58  ;;  %v6303_v61 = vadd.f32 %v12744_v2, %v6254_v42  ;;  %v5861_v0 = vadd.f32 %v5810_v25, %v12732_v9  ;;  %9602 = vmatprep.subr.bf16.mxu1 %v13156_v3  ;;  %v9918_v56 = vld [vmem:[%s13145_s5 + $0x30] sm:$0xff]   ;;  %v9919_v58 = vld [vmem:[%s13145_s5 + $0x38] sm:$0xff]   ;;  %v9920_v36 = vld [vmem:[%s13145_s5 + $0x40] sm:$0xff]  }
 0x510   :  { %v9489_v49 = vpop.f32.mrf.mxu1  ;;  %v9579_v14 = vpop.f32.mrf.mxu0  ;;  %v6693_v9 = vpack.c.bf16 %v6692_v30, %v6692_v30  ;;  %v6571_v32 = vld [vmem:[#allocation6 + $0x7e] sm:$0x1f] }
 0x511   :  { %6512 = vst [vmem:[#allocation6 + $0x88] sm:$0xff] %v6491_v62  ;;  %v6345_v38 = vmax.f32 %v6303_v61, 0.0  ;;  %v6255_v40 = vadd.f32 %v6204_v51, %v5861_v0  ;;  %v9921_v51 = vld [vmem:[%s13145_s5 + $0xb8] sm:$0xff]   ;;  %v9922_v14 = vld [vmem:[%s13145_s5 + $0x48] sm:$0xff]  }
 0x512   :  { %v5815_v16 = vpop.f32.mrf.mxu1  ;;  %v6209_v28 = vpop.f32.mrf.mxu0  ;;  %v6860_v15 = vld [vmem:[#allocation7 + $0x5] ss:$25 sm:$0xff]  ;;  %v6916_v10 = vld [vmem:[#allocation7 + $0x6] ss:$25 sm:$0xff]  ;;  %v6972_v21 = vld [vmem:[#allocation7 + $0x7] ss:$25 sm:$0xff] }
 0x513   :  { %6387 = vst [vmem:[#allocation5 + $0x130] sm:$0xff] %v6345_v38  ;;  %v6304_v63 = vadd.f32 %v12744_v2, %v6255_v40  ;;  %v5862_v57 = vadd.f32 %v5815_v16, %v12735_v7  ;;  %v9981_v7 = vld [vmem:[%s13146_s4] ss:$0 sm:$0xff]  ;;  %v6861_v43 = vpack.c.bf16 %v6860_v15, %v6860_v15  ;;  %v6917_v42 = vpack.c.bf16 %v6916_v10, %v6916_v10  ;;  %v7084_v40 = vld [vmem:[#allocation7 + $0x9] ss:$25 sm:$0xff] }
 0x514   :  { %v9492_v5 = vpop.f32.mrf.mxu1  ;;  %v9582_v60 = vpop.f32.mrf.mxu0  ;;  %v6973_v62 = vpack.c.bf16 %v6972_v21, %v6972_v21  ;;  %v7028_v0 = vld [vmem:[#allocation7 + $0x8] ss:$25 sm:$0xff] }
 0x515   :  { %v6346_v41 = vmax.f32 %v6304_v63, 0.0  ;;  %v6256_v24 = vadd.f32 %v6209_v28, %v5862_v57  ;;  %9599 = vmatmul.mubr.msk.bf16.vlgmr.msra.gmra.mxu1 %vm6516_vm7, %v6693_v9  ;;  %v7029_v30 = vpack.c.bf16 %v7028_v0, %v7028_v0  ;;  %v9923_v16 = vld [vmem:[%s13145_s5 + $0x50] sm:$0xff]   ;;  %v7085_v28 = vpack.c.bf16 %v7084_v40, %v7084_v40  ;;  %v9924_v63 = vld [vmem:[%s13145_s5 + $0x58] sm:$0xff]   ;;  %v9925_v5 = vld [vmem:[%s13145_s5 + $0x60] sm:$0xff]  }
 0x516   :  { %v6427_v54 = vld [vmem:[#allocation5 + $0x120] ss:$2 sm:$0xff]  ;;  %v6469_v52 = vld [vmem:[#allocation5 + $0x121] ss:$2 sm:$0xff]  ;;  %9603 = vmatpush3.bf16.msra.mxu1 %v9915_v29  ;;  %v5818_v20 = vpop.f32.mrf.mxu1  ;;  %v6212_v31 = vpop.f32.mrf.mxu0  ;;  %9604 = vmatprep.mubr.msk.bf16.mxu1 %vm9987_vm4, %v13156_v3  ;;  %v9936_v0 = vld [vmem:[%s13147_s7 + $0x38] sm:$0xff]  }
 0x517   :  { %v6492_v6 = vmax.f32 %v6427_v54, %v6469_v52  ;;  %6388 = vst [vmem:[#allocation5 + $0x138] sm:$0xff] %v6346_v41  ;;  %v6305_v2 = vadd.f32 %v9981_v7, %v6256_v24  ;;  %v5863_v46 = vadd.f32 %v5818_v20, %v12738_v45  ;;  %9608 = vmatprep.subr.bf16.mxu1 %v13156_v3  ;;  %v9926_v24 = vld [vmem:[%s13145_s5 + $0x68] sm:$0xff]   ;;  %v9927_v20 = vld [vmem:[%s13145_s5 + $0x70] sm:$0xff]  }
 0x518   :  { %v9493_v11 = vpop.f32.mrf.mxu1  ;;  %v9583_v33 = vpop.f32.mrf.mxu0  ;;  %v6572_v19 = vld [vmem:[#allocation6 + $0x85] sm:$0x1f] }
 0x519   :  { %6513 = vst [vmem:[#allocation6 + $0x90] sm:$0xff] %v6492_v6  ;;  %v6347_v17 = vmax.f32 %v6305_v2, 0.0  ;;  %v6257_v37 = vadd.f32 %v6212_v31, %v5863_v46  ;;  %v6573_v1 = vmax.f32 %v6571_v32, %v6572_v19  ;;  %v9929_v11 = vld [vmem:[%s13145_s5 + $0x80] sm:$0xff]   ;;  %v9930_v32 = vld [vmem:[%s13145_s5 + $0x88] sm:$0xff]  }
 0x51b   :  { %6389 = vst [vmem:[#allocation5 + $0x140] sm:$0xff] %v6347_v17  ;;  %v6306_v12 = vadd.f32 %v9981_v7, %v6257_v37  ;;  %6574 = vst.msk [vmem:[#allocation7 + $0x23] sm:$0x1f] %vm6545_vm8, %v6573_v1  ;;  %v9928_v7 = vld [vmem:[%s13145_s5 + $0x78] sm:$0xff]   ;;  %v9931_v37 = vld [vmem:[%s13145_s5 + $0x90] sm:$0xff]  }
 0x51d   :  { %v6348_v45 = vmax.f32 %v6306_v12, 0.0  ;;  %9605 = vmatmul.mubr.msk.bf16.vlgmr.msra.gmra.mxu1 %vm6516_vm7, %v6749_v22  ;;  %v9932_v12 = vld [vmem:[%s13145_s5 + $0x98] sm:$0xff]  }
 0x51e   :  { %v6429_v27 = vld [vmem:[#allocation5 + $0x130] ss:$2 sm:$0xff]  ;;  %v6471_v35 = vld [vmem:[#allocation5 + $0x131] ss:$2 sm:$0xff]  ;;  %9609 = vmatpush3.bf16.msra.mxu1 %v9916_v47  ;;  %9610 = vmatprep.mubr.msk.bf16.mxu1 %vm9987_vm4, %v13156_v3 }
 0x51f   :  { %v6493_v4 = vmax.f32 %v6429_v27, %v6471_v35  ;;  %6390 = vst [vmem:[#allocation5 + $0x148] sm:$0xff] %v6348_v45  ;;  %9614 = vmatprep.subr.bf16.mxu1 %v13156_v3  ;;  %v9933_v27 = vld [vmem:[%s13145_s5 + $0xa0] sm:$0xff]  }
 0x520   :  { %v6575_v26 = vld [vmem:[#allocation6 + $0x8c] sm:$0x1f]  ;;  %v6576_v44 = vld [vmem:[#allocation6 + $0x93] sm:$0x1f] }
 0x521   :  { %6514 = vst [vmem:[#allocation6 + $0x98] sm:$0xff] %v6493_v4  ;;  %v6577_v8 = vmax.f32 %v6575_v26, %v6576_v44 }
 0x522   :  { %v7140_v29 = vld [vmem:[#allocation7 + $0xa] ss:$25 sm:$0xff]  ;;  %v7196_v9 = vld [vmem:[#allocation7 + $0xb] ss:$25 sm:$0xff]  ;;  %v7252_v41 = vld [vmem:[#allocation7 + $0xc] ss:$25 sm:$0xff] }
 0x523   :  { %6578 = vst.msk [vmem:[#allocation7 + $0x28] sm:$0x1f] %vm6545_vm8, %v6577_v8  ;;  %v7141_v57 = vpack.c.bf16 %v7140_v29, %v7140_v29  ;;  %v7197_v60 = vpack.c.bf16 %v7196_v9, %v7196_v9  ;;  %v7253_v54 = vpack.c.bf16 %v7252_v41, %v7252_v41  ;;  %v7308_v52 = vld [vmem:[#allocation7 + $0xd] ss:$25 sm:$0xff]  ;;  %v7364_v6 = vld [vmem:[#allocation7 + $0xe] ss:$25 sm:$0xff] }
 0x524   :  { %v7309_v31 = vpack.c.bf16 %v7308_v52, %v7308_v52  ;;  %v7365_v2 = vpack.c.bf16 %v7364_v6, %v7364_v6  ;;  %v9935_v8 = vld [vmem:[%s13145_s5 + $0xc0] sm:$0xff]   ;;  %v9940_v41 = vld [vmem:[%s13147_s7 + $0x18] sm:$0xff]   ;;  %v9941_v52 = vld [vmem:[%s13147_s7 + $0x10] sm:$0xff]  }
 0x525   :  { %9611 = vmatmul.mubr.msk.bf16.vlgmr.msra.gmra.mxu1 %vm6516_vm7, %v6805_v55 }
 0x526   :  { %v6431_v59 = vld [vmem:[#allocation5 + $0x140] ss:$2 sm:$0xff]  ;;  %v6473_v18 = vld [vmem:[#allocation5 + $0x141] ss:$2 sm:$0xff]  ;;  %9615 = vmatpush3.bf16.msra.mxu1 %v9917_v50  ;;  %9616 = vmatprep.mubr.msk.bf16.mxu1 %vm9987_vm4, %v13156_v3 }
 0x527   :  { %v6494_v39 = vmax.f32 %v6431_v59, %v6473_v18  ;;  %9620 = vmatprep.subr.bf16.mxu1 %v13156_v3 }
 0x528   :  { %v6579_v34 = vld [vmem:[#allocation6 + $0x9a] sm:$0x1f] }
 0x529   :  { %6515 = vst [vmem:[#allocation6 + $0xa0] sm:$0xff] %v6494_v39 }
 0x52a   :  { %v7420_v46 = vld [vmem:[#allocation7 + $0xf] ss:$25 sm:$0xff]  ;;  %v7476_v48 = vld [vmem:[#allocation7 + $0x10] ss:$25 sm:$0xff]  ;;  %v7532_v17 = vld [vmem:[#allocation7 + $0x11] ss:$25 sm:$0xff] }
 0x52b   :  { %v7421_v33 = vpack.c.bf16 %v7420_v46, %v7420_v46  ;;  %v7477_v19 = vpack.c.bf16 %v7476_v48, %v7476_v48  ;;  %v7533_v1 = vpack.c.bf16 %v7532_v17, %v7532_v17  ;;  %v7588_v47 = vld [vmem:[#allocation7 + $0x12] ss:$25 sm:$0xff]  ;;  %v7644_v45 = vld [vmem:[#allocation7 + $0x13] ss:$25 sm:$0xff] }
 0x52c   :  { %v7589_v22 = vpack.c.bf16 %v7588_v47, %v7588_v47  ;;  %v7645_v35 = vpack.c.bf16 %v7644_v45, %v7644_v45  ;;  %v9942_v46 = vld [vmem:[%s13147_s7 + $0x8] sm:$0xff]  }
 0x52d   :  { %9617 = vmatmul.mubr.msk.bf16.vlgmr.msra.gmra.mxu1 %vm6516_vm7, %v6861_v43 }
 0x52e   :  { %9621 = vmatpush3.bf16.msra.mxu1 %v9918_v56  ;;  %9622 = vmatprep.mubr.msk.bf16.mxu1 %vm9987_vm4, %v13156_v3 }
 0x52f   :  { %9626 = vmatprep.subr.bf16.mxu1 %v13156_v3 }
 0x530   :  { %v6580_v23 = vld [vmem:[#allocation6 + $0xa1] sm:$0x1f] }
 0x531   :  { %v6581_v53 = vmax.f32 %v6579_v34, %v6580_v23 }
 0x533   :  { %6582 = vst.msk [vmem:[#allocation7 + $0x2d] sm:$0x1f] %vm6545_vm8, %v6581_v53 }
 0x535   :  { %9623 = vmatmul.mubr.msk.bf16.vlgmr.msra.gmra.mxu1 %vm6516_vm7, %v6917_v42 }
 0x536   :  { %9627 = vmatpush3.bf16.msra.mxu1 %v9919_v58  ;;  %9628 = vmatprep.mubr.msk.bf16.mxu1 %vm9987_vm4, %v13156_v3 }
 0x537   :  { %9632 = vmatprep.subr.bf16.mxu1 %v13156_v3 }
 0x53a   :  { %v7756_v25 = vld [vmem:[#allocation7 + $0x15] ss:$25 sm:$0xff]  ;;  %v7868_v49 = vld [vmem:[#allocation7 + $0x17] ss:$25 sm:$0xff]  ;;  %v7812_v44 = vld [vmem:[#allocation7 + $0x16] ss:$25 sm:$0xff] }
 0x53b   :  { %v7757_v61 = vpack.c.bf16 %v7756_v25, %v7756_v25  ;;  %v7869_v38 = vpack.c.bf16 %v7868_v49, %v7868_v49  ;;  %v7700_v4 = vld [vmem:[#allocation7 + $0x14] ss:$25 sm:$0xff]  ;;  %v7813_v50 = vpack.c.bf16 %v7812_v44, %v7812_v44 }
 0x53c   :  { %v7701_v26 = vpack.c.bf16 %v7700_v4, %v7700_v4  ;;  %v7924_v55 = vld [vmem:[#allocation7 + $0x18] ss:$25 sm:$0xff] }
 0x53d   :  { %9629 = vmatmul.mubr.msk.bf16.vlgmr.msra.gmra.mxu1 %vm6516_vm7, %v6973_v62  ;;  %9713 = vmatmul.mubr.msk.bf16.vlgmr.msra.gmra.mxu0 %vm6516_vm7, %v7757_v61  ;;  %v7925_v59 = vpack.c.bf16 %v7924_v55, %v7924_v55  ;;  %v9946_v4 = vld [vmem:[%s13148_s9 + $0x28] sm:$0xff]   ;;  %v9947_v55 = vld [vmem:[%s13148_s9 + $0x20] sm:$0xff]  }
 0x53e   :  { %9633 = vmatpush3.bf16.msra.mxu1 %v9920_v36  ;;  %9723 = vmatpush3.bf16.msra.mxu0 %v9921_v51 }
 0x53f   :  { %9634 = vmatprep.mubr.msk.bf16.mxu1 %vm9987_vm4, %v13156_v3  ;;  %9638 = vmatprep.subr.bf16.mxu1 %v13156_v3 }
 0x540   :  { %9724 = vmatprep.mubr.msk.bf16.mxu0 %vm9987_vm4, %v13156_v3  ;;  %9734 = vmatprep.subr.bf16.mxu0 %v13156_v3 }
 0x545   :  { %9635 = vmatmul.mubr.msk.bf16.vlgmr.msra.gmra.mxu1 %vm6516_vm7, %v7029_v30  ;;  %9725 = vmatmul.mubr.msk.bf16.vlgmr.msra.gmra.mxu0 %vm6516_vm7, %v7869_v38  ;;  %v9937_v30 = vld [vmem:[%s13147_s7 + $0x30] sm:$0xff]  }
 0x546   :  { %9639 = vmatpush3.bf16.msra.mxu1 %v9922_v14  ;;  %9640 = vmatprep.mubr.msk.bf16.mxu1 %vm9987_vm4, %v13156_v3 }
 0x547   :  { %9644 = vmatprep.subr.bf16.mxu1 %v13156_v3  ;;  %9750 = vmatprep.mubr.msk.bf16.mxu0 %vm9987_vm4, %v13156_v3 }
 0x548   :  { %9735 = vmatpush3.bf16.msra.mxu0 %v9936_v0 }
 0x549   :  { %9736 = vmatprep.subr.bf16.mxu0 %v13156_v3 }
 0x54c   :  { %9737 = vmatpush3.bf16.msra.mxu0 %v9937_v30 }
 0x54d   :  { %9641 = vmatmul.mubr.msk.bf16.vlgmr.msra.gmra.mxu1 %vm6516_vm7, %v7085_v28  ;;  %9738 = vmatprep.subr.bf16.mxu0 %v13156_v3  ;;  %v9938_v28 = vld [vmem:[%s13147_s7 + $0x28] sm:$0xff]  }
 0x54e   :  { %9645 = vmatpush3.bf16.msra.mxu1 %v9923_v16  ;;  %9646 = vmatprep.mubr.msk.bf16.mxu1 %vm9987_vm4, %v13156_v3 }
 0x54f   :  { %9650 = vmatprep.subr.bf16.mxu1 %v13156_v3 }
 0x550   :  { %9739 = vmatpush3.bf16.msra.mxu0 %v9938_v28 }
 0x551   :  { %9740 = vmatprep.subr.bf16.mxu0 %v13156_v3 }
 0x555   :  { %9647 = vmatmul.mubr.msk.bf16.vlgmr.msra.gmra.mxu1 %vm6516_vm7, %v7141_v57  ;;  %v9939_v57 = vld [vmem:[%s13147_s7 + $0x20] sm:$0xff]  }
 0x556   :  { %9651 = vmatpush3.bf16.msra.mxu1 %v9924_v63  ;;  %9652 = vmatprep.mubr.msk.bf16.mxu1 %vm9987_vm4, %v13156_v3 }
 0x557   :  { %9656 = vmatprep.subr.bf16.mxu1 %v13156_v3  ;;  %9741 = vmatpush3.bf16.msra.mxu0 %v9939_v57 }
 0x558   :  { %9742 = vmatprep.subr.bf16.mxu0 %v13156_v3 }
 0x55b   :  { %9743 = vmatpush3.bf16.msra.mxu0 %v9940_v41 }
 0x55c   :  { %9744 = vmatprep.subr.bf16.mxu0 %v13156_v3 }
 0x55d   :  { %9653 = vmatmul.mubr.msk.bf16.vlgmr.msra.gmra.mxu1 %vm6516_vm7, %v7197_v60 }
 0x55e   :  { %9657 = vmatpush3.bf16.msra.mxu1 %v9925_v5  ;;  %9658 = vmatprep.mubr.msk.bf16.mxu1 %vm9987_vm4, %v13156_v3 }
 0x55f   :  { %9662 = vmatprep.subr.bf16.mxu1 %v13156_v3  ;;  %9745 = vmatpush3.bf16.msra.mxu0 %v9941_v52 }
 0x560   :  { %9746 = vmatprep.subr.bf16.mxu0 %v13156_v3 }
 0x563   :  { %9747 = vmatpush3.bf16.msra.mxu0 %v9942_v46 }
 0x564   :  { %9748 = vmatprep.subr.bf16.mxu0 %v13156_v3 }
 0x565   :  { %9659 = vmatmul.mubr.msk.bf16.vlgmr.msra.gmra.mxu1 %vm6516_vm7, %v7253_v54 }
 0x566   :  { %9663 = vmatpush3.bf16.msra.mxu1 %v9926_v24  ;;  %9664 = vmatprep.mubr.msk.bf16.mxu1 %vm9987_vm4, %v13156_v3 }
 0x567   :  { %9668 = vmatprep.subr.bf16.mxu1 %v13156_v3 }
 0x56d   :  { %9665 = vmatmul.mubr.msk.bf16.vlgmr.msra.gmra.mxu1 %vm6516_vm7, %v7309_v31 }
 0x56e   :  { %9669 = vmatpush3.bf16.msra.mxu1 %v9927_v20  ;;  %9670 = vmatprep.mubr.msk.bf16.mxu1 %vm9987_vm4, %v13156_v3 }
 0x56f   :  { %9674 = vmatprep.subr.bf16.mxu1 %v13156_v3 }
 0x575   :  { %9671 = vmatmul.mubr.msk.bf16.vlgmr.msra.gmra.mxu1 %vm6516_vm7, %v7365_v2 }
 0x576   :  { %9675 = vmatpush3.bf16.msra.mxu1 %v9928_v7  ;;  %9676 = vmatprep.mubr.msk.bf16.mxu1 %vm9987_vm4, %v13156_v3 }
 0x577   :  { %9680 = vmatprep.subr.bf16.mxu1 %v13156_v3 }
 0x57d   :  { %9677 = vmatmul.mubr.msk.bf16.vlgmr.msra.gmra.mxu1 %vm6516_vm7, %v7421_v33 }
 0x57e   :  { %9681 = vmatpush3.bf16.msra.mxu1 %v9929_v11  ;;  %9682 = vmatprep.mubr.msk.bf16.mxu1 %vm9987_vm4, %v13156_v3 }
 0x57f   :  { %9686 = vmatprep.subr.bf16.mxu1 %v13156_v3 }
 0x585   :  { %9683 = vmatmul.mubr.msk.bf16.vlgmr.msra.gmra.mxu1 %vm6516_vm7, %v7477_v19 }
 0x586   :  { %9687 = vmatpush3.bf16.msra.mxu1 %v9930_v32  ;;  %9688 = vmatprep.mubr.msk.bf16.mxu1 %vm9987_vm4, %v13156_v3  ;;  %v9943_v32 = vld [vmem:[%s13147_s7] sm:$0xff]  }
 0x587   :  { %9692 = vmatprep.subr.bf16.mxu1 %v13156_v3  ;;  %9749 = vmatpush3.bf16.msra.mxu0 %v9943_v32 }
 0x58d   :  { %9689 = vmatmul.mubr.msk.bf16.vlgmr.msra.gmra.mxu1 %vm6516_vm7, %v7533_v1 }
 0x58e   :  { %9693 = vmatpush3.bf16.msra.mxu1 %v9931_v37  ;;  %9694 = vmatprep.mubr.msk.bf16.mxu1 %vm9987_vm4, %v13156_v3  ;;  %v9944_v37 = vld [vmem:[%s13148_s9 + $0x38] sm:$0xff]  }
 0x58f   :  { %9698 = vmatprep.subr.bf16.mxu1 %v13156_v3 }
 0x595   :  { %9695 = vmatmul.mubr.msk.bf16.vlgmr.msra.gmra.mxu1 %vm6516_vm7, %v7589_v22 }
 0x596   :  { %9699 = vmatpush3.bf16.msra.mxu1 %v9932_v12  ;;  %9700 = vmatprep.mubr.msk.bf16.mxu1 %vm9987_vm4, %v13156_v3  ;;  %v9945_v12 = vld [vmem:[%s13148_s9 + $0x30] sm:$0xff]  }
 0x597   :  { %9704 = vmatprep.subr.bf16.mxu1 %v13156_v3 }
 0x59d   :  { %9701 = vmatmul.mubr.msk.bf16.vlgmr.msra.gmra.mxu1 %vm6516_vm7, %v7645_v35 }
 0x59e   :  { %9705 = vmatpush3.bf16.msra.mxu1 %v9933_v27  ;;  %9706 = vmatprep.mubr.msk.bf16.mxu1 %vm9987_vm4, %v13156_v3 }
 0x59f   :  { %9716 = vmatprep.subr.bf16.mxu1 %v13156_v3 }
 0x5a5   :  { %9707 = vmatmul.mubr.msk.bf16.vlgmr.msra.gmra.mxu1 %vm6516_vm7, %v7701_v26 }
 0x5a6   :  { %9717 = vmatpush3.bf16.msra.mxu1 %v9934_v13  ;;  %9718 = vmatprep.mubr.msk.bf16.mxu1 %vm9987_vm4, %v13156_v3 }
 0x5a7   :  { %9728 = vmatprep.subr.bf16.mxu1 %v13156_v3 }
 0x5ad   :  { %9719 = vmatmul.mubr.msk.bf16.vlgmr.msra.gmra.mxu1 %vm6516_vm7, %v7813_v50 }
 0x5ae   :  { %9729 = vmatpush3.bf16.msra.mxu1 %v9935_v8  ;;  %9730 = vmatprep.mubr.msk.bf16.mxu1 %vm9987_vm4, %v13156_v3 }
 0x5af   :  { %9754 = vmatprep.subr.bf16.mxu1 %v13156_v3 }
 0x5b5   :  { %9731 = vmatmul.mubr.msk.bf16.vlgmr.msra.gmra.mxu1 %vm6516_vm7, %v7925_v59 }
 0x5b6   :  { %9770 = vmatprep.mubr.msk.bf16.mxu1 %vm9987_vm4, %v13156_v3  ;;  %9755 = vmatpush3.bf16.msra.mxu1 %v9944_v37 }
 0x5b7   :  { %9756 = vmatprep.subr.bf16.mxu1 %v13156_v3 }
 0x5ba   :  { %9757 = vmatpush3.bf16.msra.mxu1 %v9945_v12 }
 0x5bb   :  { %9758 = vmatprep.subr.bf16.mxu1 %v13156_v3 }
 0x5be   :  { %9759 = vmatpush3.bf16.msra.mxu1 %v9946_v4 }
 0x5bf   :  { %9760 = vmatprep.subr.bf16.mxu1 %v13156_v3 }
 0x5c2   :  { %9761 = vmatpush3.bf16.msra.mxu1 %v9947_v55 }
 0x5c3   :  { %9762 = vmatprep.subr.bf16.mxu1 %v13156_v3 }
 0x5c5   :  { %v6636_v18 = vpop.f32.mrf.mxu1 }
 0x5c7   :  { %v9588_v39 = vpop.f32.mrf.mxu1 }
 0x5c9   :  { %v6639_v15 = vpop.f32.mrf.mxu1 }
 0x5ca   :  { %v9948_v15 = vld [vmem:[%s13148_s9 + $0x18] sm:$0xff]  }
 0x5cb   :  { %v9589_v56 = vpop.f32.mrf.mxu1  ;;  %9763 = vmatpush3.bf16.msra.mxu1 %v9948_v15 }
 0x5cc   :  { %9764 = vmatprep.subr.bf16.mxu1 %v13156_v3 }
 0x5cd   :  { %v6685_v43 = vpop.f32.mrf.mxu1 }
 0x5ce   :  { %v6686_v10 = vadd.f32 %v6685_v43, %v6636_v18 }
 0x5cf   :  { %v9594_v34 = vpop.f32.mrf.mxu1 }
 0x5d0   :  { %v9949_v34 = vld [vmem:[%s13148_s9 + $0x10] sm:$0xff]  }
 0x5d1   :  { %v6688_v23 = vpop.f32.mrf.mxu1  ;;  %9765 = vmatpush3.bf16.msra.mxu1 %v9949_v34 }
 0x5d2   :  { %9766 = vmatprep.subr.bf16.mxu1 %v13156_v3 }
 0x5d3   :  { %v9595_v53 = vpop.f32.mrf.mxu1 }
 0x5d5   :  { %v6740_v58 = vpop.f32.mrf.mxu1 }
 0x5d6   :  { %v6746_v42 = vadd.f32 %v6740_v58, %v6686_v10 }
 0x5d7   :  { %v9600_v21 = vpop.f32.mrf.mxu1 }
 0x5d9   :  { %v6743_v36 = vpop.f32.mrf.mxu1 }
 0x5db   :  { %v9601_v25 = vpop.f32.mrf.mxu1 }
 0x5dd   :  { %v6796_v51 = vpop.f32.mrf.mxu1 }
 0x5de   :  { %v6802_v62 = vadd.f32 %v6796_v51, %v6746_v42 }
 0x5df   :  { %v9606_v61 = vpop.f32.mrf.mxu1 }
 0x5e1   :  { %v6799_v49 = vpop.f32.mrf.mxu1 }
 0x5e3   :  { %v9607_v14 = vpop.f32.mrf.mxu1 }
 0x5e5   :  { %v6852_v38 = vpop.f32.mrf.mxu1 }
 0x5e6   :  { %v6858_v40 = vadd.f32 %v6852_v38, %v6802_v62 }
 0x5e7   :  { %v9612_v16 = vpop.f32.mrf.mxu1 }
 0x5e9   :  { %v6855_v29 = vpop.f32.mrf.mxu1 }
 0x5eb   :  { %v9613_v63 = vpop.f32.mrf.mxu1 }
 0x5ed   :  { %v6908_v9 = vpop.f32.mrf.mxu1 }
 0x5ee   :  { %v6914_v5 = vadd.f32 %v6908_v9, %v6858_v40 }
 0x5ef   :  { %v9618_v60 = vpop.f32.mrf.mxu1 }
 0x5f1   :  { %v6911_v24 = vpop.f32.mrf.mxu1 }
 0x5f3   :  { %v9619_v54 = vpop.f32.mrf.mxu1 }
 0x5f5   :  { %v6964_v20 = vpop.f32.mrf.mxu1 }
 0x5f6   :  { %v6970_v31 = vadd.f32 %v6964_v20, %v6914_v5 }
 0x5f7   :  { %v9624_v6 = vpop.f32.mrf.mxu1 }
 0x5f9   :  { %v6967_v7 = vpop.f32.mrf.mxu1 }
 0x5fb   :  { %v9625_v2 = vpop.f32.mrf.mxu1 }
 0x5fd   :  { %v7020_v11 = vpop.f32.mrf.mxu1  ;;  %v13088_v33 = vpop.f32.mrf.mxu0 }
 0x5fe   :  { %v7026_v48 = vadd.f32 %v7020_v11, %v6970_v31 }
 0x5ff   :  { %v9630_v19 = vpop.f32.mrf.mxu1  ;;  %v9714_v17 = vpop.f32.mrf.mxu0 }
 0x601   :  { %v7023_v1 = vpop.f32.mrf.mxu1  ;;  %v7807_v47 = vpop.f32.mrf.mxu0 }
 0x603   :  { %v9631_v22 = vpop.f32.mrf.mxu1  ;;  %v9715_v45 = vpop.f32.mrf.mxu0 }
 0x605   :  { %v7076_v27 = vpop.f32.mrf.mxu1  ;;  %v13101_v35 = vpop.f32.mrf.mxu0 }
 0x606   :  { %v7082_v13 = vadd.f32 %v7076_v27, %v7026_v48 }
 0x607   :  { %v9636_v26 = vpop.f32.mrf.mxu1  ;;  %v9726_v44 = vpop.f32.mrf.mxu0 }
 0x609   :  { %v7079_v8 = vpop.f32.mrf.mxu1  ;;  %v7919_v50 = vpop.f32.mrf.mxu0 }
 0x60b   :  { %v9637_v59 = vpop.f32.mrf.mxu1  ;;  %v9727_v18 = vpop.f32.mrf.mxu0 }
 0x60d   :  { %v7132_v39 = vpop.f32.mrf.mxu1 }
 0x60e   :  { %v7138_v56 = vadd.f32 %v7132_v39, %v7082_v13 }
 0x60f   :  { %v9642_v43 = vpop.f32.mrf.mxu1 }
 0x611   :  { %v7135_v10 = vpop.f32.mrf.mxu1 }
 0x613   :  { %v9643_v23 = vpop.f32.mrf.mxu1 }
 0x615   :  { %v7188_v53 = vpop.f32.mrf.mxu1 }
 0x616   :  { %v7194_v58 = vadd.f32 %v7188_v53, %v7138_v56 }
 0x617   :  { %v9648_v42 = vpop.f32.mrf.mxu1 }
 0x618   :  { %v8579_v42 = vld [vmem:[%s13149_s6] ss:$0 sm:$0xff] }
 0x619   :  { %v7191_v21 = vpop.f32.mrf.mxu1 }
 0x61b   :  { %v9649_v36 = vpop.f32.mrf.mxu1 }
 0x61d   :  { %v7244_v25 = vpop.f32.mrf.mxu1 }
 0x61e   :  { %v7250_v32 = vadd.f32 %v7244_v25, %v7194_v58 }
 0x61f   :  { %v9654_v51 = vpop.f32.mrf.mxu1 }
 0x621   :  { %v7247_v62 = vpop.f32.mrf.mxu1 }
 0x623   :  { %v9655_v61 = vpop.f32.mrf.mxu1 }
 0x625   :  { %v7300_v0 = vpop.f32.mrf.mxu1 }
 0x626   :  { %v7306_v17 = vadd.f32 %v7300_v0, %v7250_v32 }
 0x627   :  { %v9660_v49 = vpop.f32.mrf.mxu1 }
 0x628   :  { %v8580_v49 = vld [vmem:[%s13150_s8] ss:$0 sm:$0xff] }
 0x629   :  { %v7303_v14 = vpop.f32.mrf.mxu1 }
 0x62b   :  { %v9661_v30 = vpop.f32.mrf.mxu1 }
 0x62d   :  { %v7356_v38 = vpop.f32.mrf.mxu1 }
 0x62e   :  { %v7362_v1 = vadd.f32 %v7356_v38, %v7306_v17 }
 0x62f   :  { %v9666_v40 = vpop.f32.mrf.mxu1 }
 0x631   :  { %v7359_v16 = vpop.f32.mrf.mxu1 }
 0x633   :  { %v9667_v28 = vpop.f32.mrf.mxu1 }
 0x635   :  { %v7412_v29 = vpop.f32.mrf.mxu1 }
 0x636   :  { %v7418_v12 = vadd.f32 %v7412_v29, %v7362_v1 }
 0x637   :  { %v9672_v63 = vpop.f32.mrf.mxu1 }
 0x638   :  { %v8589_v63 = vld [vmem:[%s13151_s10] ss:$0 sm:$0xff] }
 0x639   :  { %v7415_v57 = vpop.f32.mrf.mxu1 }
 0x63b   :  { %v9673_v9 = vpop.f32.mrf.mxu1 }
 0x63d   :  { %v7468_v5 = vpop.f32.mrf.mxu1 }
 0x63e   :  { %v7474_v45 = vadd.f32 %v7468_v5, %v7418_v12 }
 0x63f   :  { %v9678_v60 = vpop.f32.mrf.mxu1 }
 0x641   :  { %v7471_v41 = vpop.f32.mrf.mxu1 }
 0x643   :  { %v9679_v24 = vpop.f32.mrf.mxu1 }
 0x645   :  { %v7524_v54 = vpop.f32.mrf.mxu1 }
 0x646   :  { %v7530_v4 = vadd.f32 %v7524_v54, %v7474_v45 }
 0x647   :  { %v9684_v52 = vpop.f32.mrf.mxu1 }
 0x649   :  { %v7527_v20 = vpop.f32.mrf.mxu1 }
 0x64b   :  { %v9685_v31 = vpop.f32.mrf.mxu1 }
 0x64d   :  { %v7580_v6 = vpop.f32.mrf.mxu1 }
 0x64e   :  { %v7586_v26 = vadd.f32 %v7580_v6, %v7530_v4 }
 0x64f   :  { %v9690_v7 = vpop.f32.mrf.mxu1 }
 0x651   :  { %v7583_v2 = vpop.f32.mrf.mxu1 }
 0x653   :  { %v9691_v46 = vpop.f32.mrf.mxu1 }
 0x655   :  { %v7636_v11 = vpop.f32.mrf.mxu1 }
 0x656   :  { %v7642_v8 = vadd.f32 %v7636_v11, %v7586_v26 }
 0x657   :  { %v9696_v48 = vpop.f32.mrf.mxu1 }
 0x659   :  { %v7639_v19 = vpop.f32.mrf.mxu1 }
 0x65b   :  { %v9697_v37 = vpop.f32.mrf.mxu1 }
 0x65d   :  { %v7692_v47 = vpop.f32.mrf.mxu1 }
 0x65e   :  { %v7698_v55 = vadd.f32 %v7692_v47, %v7642_v8 }
 0x65f   :  { %v9702_v22 = vpop.f32.mrf.mxu1 }
 0x661   :  { %v7695_v27 = vpop.f32.mrf.mxu1 }
 0x663   :  { %v9703_v13 = vpop.f32.mrf.mxu1 }
 0x665   :  { %v7748_v44 = vpop.f32.mrf.mxu1 }
 0x666   :  { %v7754_v18 = vadd.f32 %v7748_v44, %v7698_v55 }
 0x667   :  { %v9708_v50 = vpop.f32.mrf.mxu1 }
 0x668   :  { %v7810_v56 = vadd.f32 %v13088_v33, %v7754_v18  ;;  %v9950_v33 = vld [vmem:[%s13148_s9 + $0x8] sm:$0xff]  }
 0x669   :  { %v7751_v59 = vpop.f32.mrf.mxu1  ;;  %9767 = vmatpush3.bf16.msra.mxu1 %v9950_v33 }
 0x66a   :  { %9768 = vmatprep.subr.bf16.mxu1 %v13156_v3 }
 0x66b   :  { %v9709_v39 = vpop.f32.mrf.mxu1 }
 0x66d   :  { %v7860_v15 = vpop.f32.mrf.mxu1 }
 0x66e   :  { %v7866_v10 = vadd.f32 %v7860_v15, %v7810_v56 }
 0x66f   :  { %v9720_v43 = vpop.f32.mrf.mxu1 }
 0x670   :  { %v7922_v53 = vadd.f32 %v13101_v35, %v7866_v10  ;;  %v9951_v35 = vld [vmem:[%s13148_s9] sm:$0xff]  }
 0x671   :  { %v7863_v34 = vpop.f32.mrf.mxu1  ;;  %9769 = vmatpush3.bf16.msra.mxu1 %v9951_v35 }
 0x673   :  { %v9721_v23 = vpop.f32.mrf.mxu1 }
 0x675   :  { %v7972_v58 = vpop.f32.mrf.mxu1 }
 0x676   :  { %v7978_v21 = vadd.f32 %v7972_v58, %v7922_v53 }
 0x677   :  { %v9732_v36 = vpop.f32.mrf.mxu1 }
 0x678   :  { %v7986_v25 = vadd.f32 %v8579_v42, %v7978_v21 }
 0x679   :  { %v7975_v51 = vpop.f32.mrf.mxu1 }
 0x67a   :  { %v7987_v62 = vmax.f32 %v7986_v25, 0.0 }
 0x67b   :  { %v9733_v61 = vpop.f32.mrf.mxu1 }
 0x67c   :  { %v7988_v0 = vpack.c.bf16 %v7987_v62, %v7987_v62 }
 0x67e   :  { %9751 = vmatmul.mubr.bf16.vlgmr.msra.gmra.mxu0 %v7988_v0 }
 0x73e   :  { %v8094_v14 = vpop.f32.mrf.mxu0 }
 0x73f   :  { %v8095_v30 = vadd.f32 %v8580_v49, %v8094_v14 }
 0x740   :  { %v9752_v38 = vpop.f32.mrf.mxu0 }
 0x741   :  { %v8100_v40 = vmax.f32 %v8095_v30, 0.0 }
 0x742   :  { %v8097_v16 = vpop.f32.mrf.mxu0 }
 0x743   :  { %v8101_v28 = vpack.c.bf16 %v8100_v40, %v8100_v40 }
 0x744   :  { %v9753_v29 = vpop.f32.mrf.mxu0 }
 0x745   :  { %9771 = vmatmul.mubr.bf16.vlgmr.msra.gmra.mxu1 %v8101_v28 }
 0x805   :  { %v8207_v57 = vpop.f32.mrf.mxu1 }
 0x806   :  { %v8208_v9 = vadd.f32 %v8589_v63, %v8207_v57 }
 0x807   :  { %v9772_v3 = vpop.f32.mrf.mxu1 }
 0x808   :  { %8213 = vst [vmem:[%s13152_s11] sm:$0xff] %v8208_v9 }
 0x809   :  { %v8210_v5 = vpop.f32.mrf.mxu1 }
 0x80b   :  { %v9773_v60 = vpop.f32.mrf.mxu1 }

</bundles_post_ra>
